<compile_context>
chip_gen: v5e
topology: v5e:2x2
jax: 0.10.0
libtpu: 0.0.40
codegen_flags: <defaults>
</compile_context>

<pallas_src>
import math

import jax
import jax.numpy as jnp
import numpy as np
from jax.experimental import pallas as pl
from jax.experimental.pallas import tpu as pltpu


# ----------------------------- static geometry ------------------------------
IN_H, IN_W, IN_C = 20, 20, 6          # forward() implies a 20x20x6 input
ROW = IN_W                            # row stride of the flat 20-grid
C_TAIL = 6                            # channels entering the folded tail

# Tap offsets (flat 20-grid) for the "front" of the network.
CONV1_OFFS = [dh * ROW + dw for dh in range(3) for dw in range(3)]   # 3x3 conv
POOL1_OFFS = [d * ROW + e for d in range(4) for e in range(4)]       # 4x4 pool s1
CONV2_OFFS = [dh * ROW + dw for dh in range(3) for dw in range(3)]   # 3x3 conv
POOL2_OFFS = [d * ROW + e for d in range(3) for e in range(3)]       # 3x3 pool s2

# Every stage keeps only the leading rows for which all of its taps are in range.
L0 = IN_H * IN_W                      # 400
L1 = L0 - max(CONV1_OFFS)             # 358  conv1 output (valid at rows i*20+j, i,j<=17)
L2 = L1 - max(POOL1_OFFS)             # 295  maxpool 4/1  (valid at i,j<=14)
L3 = L2 - max(CONV2_OFFS)             # 253  conv2 output (valid at i,j<=12)
L4 = L3 - max(POOL2_OFFS)             # 211  maxpool 3/2  (valid at rows 40*pi+2*pj)
P2_H = P2_W = 6                       # 6x6 maxpool-2 output grid


# --------------------------------- kernel ------------------------------------
def connet_kernel(x_ref, w1_ref, b1_ref, w2_ref, b2_ref,
                  s4_ref, t_ref, bt_ref, l2w_ref, l2b_ref, out_ref):
    x = x_ref[0]                                                  # (400, 6)

    # conv1 (3x3, 6->8) + ReLU, kept on the 20-grid
    z = None
    for tap, off in enumerate(CONV1_OFFS):
        term = jnp.dot(x[off:off + L1, :], w1_ref[tap],
                       preferred_element_type=jnp.float32)        # (358, 8)
        z = term if z is None else z + term
    z1 = jnp.maximum(z + b1_ref[...], 0.0)

    # max_pool2d k=4 s=1
    m = None
    for off in POOL1_OFFS:
        tap = z1[off:off + L2, :]                                 # (295, 8)
        m = tap if m is None else jnp.maximum(m, tap)
    z2 = m

    # conv2 (3x3, 8->6) + ReLU
    z = None
    for tap, off in enumerate(CONV2_OFFS):
        term = jnp.dot(z2[off:off + L3, :], w2_ref[tap],
                       preferred_element_type=jnp.float32)        # (253, 6)
        z = term if z is None else z + term
    z3 = jnp.maximum(z + b2_ref[...], 0.0)

    # max_pool2d k=3 s=2
    m = None
    for off in POOL2_OFFS:
        tap = z3[off:off + L4, :]                                 # (211, 6)
        m = tap if m is None else jnp.maximum(m, tap)
    z4 = m

    # compact the 6x6 pool output with a single exact one-hot selection matmul
    h4 = jnp.dot(s4_ref[...], z4, preferred_element_type=jnp.float32)   # (36, 6)

    # folded affine tail: conv3 -> avgpool(2,1) -> conv4 -> avgpool(2,2) -> Linear1
    g = None
    for c in range(C_TAIL):
        contrib = h4[:, c:c + 1] * t_ref[c]                       # (36, 10)
        g = contrib if g is None else g + contrib
    pre = jnp.sum(g, axis=0, keepdims=True) + bt_ref[...]         # (1, 10)

    # tanh + Linear2
    a = jnp.tanh(pre)
    y = jnp.dot(a, l2w_ref[...], preferred_element_type=jnp.float32) + l2b_ref[...]
    out_ref[0] = y.astype(out_ref.dtype)                          # (1, 2)


# ------------------------------ host-side glue --------------------------------
def _conv_weight_taps(w):
    """PyTorch (Cout, Cin, Kh, Kw) -> (Kh*Kw, Cin, Cout)."""
    cout, cin, kh, kw = w.shape
    return jnp.transpose(w, (2, 3, 1, 0)).reshape(kh * kw, cin, cout)


def _pool2_selection():
    """(36, L4) one-hot matrix: row pi*6+pj selects 20-grid row 40*pi + 2*pj."""
    sel = np.zeros((P2_H * P2_W, L4), np.float32)
    for pi in range(P2_H):
        for pj in range(P2_W):
            sel[pi * P2_W + pj, 2 * ROW * pi + 2 * pj] = 1.0
    assert (sel.sum(axis=1) == 1.0).all(), "selection rows must be exactly one-hot"
    return jnp.asarray(sel)


def _fold_tail(p):
    """Fold the purely linear tail conv3 -> avgpool(2,1) -> conv4 -> avgpool(2,2)
    -> Linear1 into an affine map (36, 6) -> (10,), returned as T (6, 36, 10)
    with T[c, q, j], plus a (1, 10) bias."""
    def tail(h4):                                  # h4: (36, 6) = (H*W, C)
        t = jnp.transpose(h4.reshape(6, 6, 6), (2, 0, 1))[None]          # NCHW
        t = jax.lax.conv_general_dilated(
            t, p["w3"], (1, 1), "VALID",
            dimension_numbers=("NCHW", "OIHW", "NCHW")) + p["b3"][None, :, None, None]
        t = jax.lax.reduce_window(t, 0.0, jax.lax.add,
                                  (1, 1, 2, 2), (1, 1, 1, 1), "VALID") * 0.25
        t = jax.lax.conv_general_dilated(
            t, p["w4"], (1, 1), "VALID",
            dimension_numbers=("NCHW", "OIHW", "NCHW")) + p["b4"][None, :, None, None]
        t = jax.lax.reduce_window(t, 0.0, jax.lax.add,
                                  (1, 1, 2, 2), (1, 1, 2, 2), "VALID") * 0.25
        t = t.reshape(2)
        return t @ p["l1w"].T + p["l1b"]           # (10,)

    zero = jnp.zeros((P2_H * P2_W, C_TAIL), jnp.float32)
    bias = tail(zero)                              # (10,)
    jac = jax.jacobian(tail)(zero)                 # (10, 36, 6)
    return jnp.transpose(jac, (2, 1, 0)), bias.reshape(1, 10)


def connet_forward(x_nchw, params):
    """x_nchw: (B, 6, 20, 20) -> (B, 1, 2).  B=1 matches the PyTorch forward."""
    B = x_nchw.shape[0]
    x_flat = jnp.transpose(x_nchw, (0, 2, 3, 1)).reshape(B, IN_H * IN_W, IN_C)
    x_flat = x_flat.astype(jnp.float32)

    w1 = _conv_weight_taps(params["w1"]); b1 = params["b1"].reshape(1, -1)
    w2 = _conv_weight_taps(params["w2"]); b2 = params["b2"].reshape(1, -1)
    s4 = _pool2_selection()
    t_fold, bt = _fold_tail(params)
    l2w = params["l2w"].T                          # (10, 2)
    l2b = params["l2b"].reshape(1, -1)             # (1, 2)

    def full(shape):
        return pl.BlockSpec(tuple(shape), lambda b, _n=len(shape): (0,) * _n)

    out = pl.pallas_call(
        connet_kernel,
        out_shape=jax.ShapeDtypeStruct((B, 1, 2), jnp.float32),
        grid=(B,),
        in_specs=[
            pl.BlockSpec((1, IN_H * IN_W, IN_C), lambda b: (b, 0, 0)),
            full(w1.shape), full(b1.shape),
            full(w2.shape), full(b2.shape),
            full(s4.shape), full(t_fold.shape), full(bt.shape),
            full(l2w.shape), full(l2b.shape),
        ],
        out_specs=pl.BlockSpec((1, 1, 2), lambda b: (b, 0, 0)),
        compiler_params=pltpu.CompilerParams(
            dimension_semantics=("parallel",),
            vmem_limit_bytes=32 * 1024 * 1024),
    )(x_flat, w1, b1, w2, b2, s4, t_fold, bt, l2w, l2b)
    return out                                     # (B, 1, 2)


# --------------------------- pure-JAX reference -------------------------------
def reference_forward(x, p):
    """x: (1, 6, 20, 20) -> (1, 1, 2); mirrors the PyTorch forward exactly."""
    def conv(t, w, b):
        y = jax.lax.conv_general_dilated(
            t, w, window_strides=(1, 1), padding="VALID",
            dimension_numbers=("NCHW", "OIHW", "NCHW"))
        return y + b[None, :, None, None]

    def maxpool(t, k, s):
        return jax.lax.reduce_window(t, -jnp.inf, jax.lax.max,
                                     (1, 1, k, k), (1, 1, s, s), "VALID")

    def avgpool(t, k, s):
        return jax.lax.reduce_window(t, 0.0, jax.lax.add,
                                     (1, 1, k, k), (1, 1, s, s), "VALID") / float(k * k)

    t = conv(x, p["w1"], p["b1"]); t = jax.nn.relu(t); t = maxpool(t, 4, 1)
    t = conv(t, p["w2"], p["b2"]); t = jax.nn.relu(t); t = maxpool(t, 3, 2)
    t = conv(t, p["w3"], p["b3"]); t = avgpool(t, 2, 1)
    t = conv(t, p["w4"], p["b4"]); t = avgpool(t, 2, 2)
    t = t.reshape(1, 1, 2)
    t = t @ p["l1w"].T + p["l1b"]
    t = jnp.tanh(t)
    t = t @ p["l2w"].T + p["l2b"]
    return t


# ----------------------------------- main --------------------------------------
def _uniform(key, shape, fan_in):
    bound = 1.0 / math.sqrt(fan_in)
    return jax.random.uniform(key, shape, jnp.float32, -bound, bound)


if __name__ == "__main__":
    key = jax.random.PRNGKey(0)
    ks = jax.random.split(key, 13)

    params = {
        "w1": _uniform(ks[0], (8, 6, 3, 3), 6 * 9),  "b1": _uniform(ks[1], (8,), 6 * 9),
        "w2": _uniform(ks[2], (6, 8, 3, 3), 8 * 9),  "b2": _uniform(ks[3], (6,), 8 * 9),
        "w3": _uniform(ks[4], (4, 6, 3, 3), 6 * 9),  "b3": _uniform(ks[5], (4,), 6 * 9),
        "w4": _uniform(ks[6], (2, 4, 2, 2), 4 * 4),  "b4": _uniform(ks[7], (2,), 4 * 4),
        "l1w": _uniform(ks[8], (10, 2), 2),          "l1b": _uniform(ks[9], (10,), 2),
        "l2w": _uniform(ks[10], (2, 10), 10),        "l2b": _uniform(ks[11], (2,), 10),
    }
    B = 4
    x = jax.random.normal(ks[12], (B, IN_C, IN_H, IN_W), jnp.float32)

    out = jax.block_until_ready(connet_forward(x, params))
    assert out.shape == (B, 1, 2), out.shape

    ref = jnp.concatenate([reference_forward(x[i:i + 1], params) for i in range(B)],
                          axis=0)                                  # (B, 1, 2)
    max_err = float(jnp.max(jnp.abs(out - ref)))
    assert max_err < 1e-3, f"mismatch vs reference: {max_err}"

    # TODO(synk): getloss()/nn.MSELoss is training-only glue and is not part of forward; not implemented.
    print("KERNEL_OK")
</pallas_src>

<mosaic_0001>
module attributes {stable_mosaic.version = 11 : i64} {
  func.func @connet_kernel(%arg0: i32, %arg1: memref<1x400x6xf32, #tpu.memory_space<vmem>>, %arg2: memref<9x6x8xf32, #tpu.memory_space<vmem>>, %arg3: memref<1x8xf32, #tpu.memory_space<vmem>>, %arg4: memref<9x8x6xf32, #tpu.memory_space<vmem>>, %arg5: memref<1x6xf32, #tpu.memory_space<vmem>>, %arg6: memref<36x211xf32, #tpu.memory_space<vmem>>, %arg7: memref<6x36x10xf32, #tpu.memory_space<vmem>>, %arg8: memref<1x10xf32, #tpu.memory_space<vmem>>, %arg9: memref<10x2xf32, #tpu.memory_space<vmem>>, %arg10: memref<1x2xf32, #tpu.memory_space<vmem>>, %arg11: memref<1x1x2xf32, #tpu.memory_space<vmem>>) attributes {dimension_semantics = [#tpu.dimension_semantics<parallel>], iteration_bounds = array<i64: 4>, scalar_prefetch = 0 : i64, scratch_operands = 0 : i64, tpu.core_type = #tpu.core_type<tc>, window_params = [{transform_indices = @transform_0, window_bounds = array<i64: 1, 400, 6>}, {pipeline_mode = #tpu.pipeline_mode<synchronous>, transform_indices = @transform_1, window_bounds = array<i64: 9, 6, 8>}, {pipeline_mode = #tpu.pipeline_mode<synchronous>, transform_indices = @transform_2, window_bounds = array<i64: 1, 8>}, {pipeline_mode = #tpu.pipeline_mode<synchronous>, transform_indices = @transform_3, window_bounds = array<i64: 9, 8, 6>}, {pipeline_mode = #tpu.pipeline_mode<synchronous>, transform_indices = @transform_4, window_bounds = array<i64: 1, 6>}, {pipeline_mode = #tpu.pipeline_mode<synchronous>, transform_indices = @transform_5, window_bounds = array<i64: 36, 211>}, {pipeline_mode = #tpu.pipeline_mode<synchronous>, transform_indices = @transform_6, window_bounds = array<i64: 6, 36, 10>}, {pipeline_mode = #tpu.pipeline_mode<synchronous>, transform_indices = @transform_7, window_bounds = array<i64: 1, 10>}, {pipeline_mode = #tpu.pipeline_mode<synchronous>, transform_indices = @transform_8, window_bounds = array<i64: 10, 2>}, {pipeline_mode = #tpu.pipeline_mode<synchronous>, transform_indices = @transform_9, window_bounds = array<i64: 1, 2>}, {transform_indices = @transform_10, window_bounds = array<i64: 1, 1, 2>}]} {
    %c0 = arith.constant 0 : index
    %c0_0 = arith.constant 0 : index
    %c0_1 = arith.constant 0 : index
    %0 = vector.load %arg1[%c0, %c0_0, %c0_1] : memref<1x400x6xf32, #tpu.memory_space<vmem>>, vector<1x400x6xf32>
    %1 = vector.shape_cast %0 : vector<1x400x6xf32> to vector<400x6xf32>
    %2 = vector.extract_strided_slice %1 {offsets = [0, 0], sizes = [358, 6], strides = [1, 1]} : vector<400x6xf32> to vector<358x6xf32>
    %c0_2 = arith.constant 0 : index
    %c0_3 = arith.constant 0 : index
    %c0_4 = arith.constant 0 : index
    %3 = vector.load %arg2[%c0_2, %c0_3, %c0_4] : memref<9x6x8xf32, #tpu.memory_space<vmem>>, vector<1x6x8xf32>
    %4 = vector.shape_cast %3 : vector<1x6x8xf32> to vector<6x8xf32>
    %cst = arith.constant dense<0.000000e+00> : vector<358x8xf32>
    %5 = tpu.matmul %2, %4, %cst {dimension_numbers = #tpu.dot_dimension_numbers<[1], [0], [0], [1], [0, 0, 1, 1], [], []>} : vector<358x6xf32>, vector<6x8xf32>, vector<358x8xf32> -> vector<358x8xf32>
    %6 = vector.extract_strided_slice %1 {offsets = [1, 0], sizes = [358, 6], strides = [1, 1]} : vector<400x6xf32> to vector<358x6xf32>
    %c1 = arith.constant 1 : index
    %c0_5 = arith.constant 0 : index
    %c0_6 = arith.constant 0 : index
    %7 = vector.load %arg2[%c1, %c0_5, %c0_6] : memref<9x6x8xf32, #tpu.memory_space<vmem>>, vector<1x6x8xf32>
    %8 = vector.shape_cast %7 : vector<1x6x8xf32> to vector<6x8xf32>
    %cst_7 = arith.constant dense<0.000000e+00> : vector<358x8xf32>
    %9 = tpu.matmul %6, %8, %cst_7 {dimension_numbers = #tpu.dot_dimension_numbers<[1], [0], [0], [1], [0, 0, 1, 1], [], []>} : vector<358x6xf32>, vector<6x8xf32>, vector<358x8xf32> -> vector<358x8xf32>
    %10 = arith.addf %5, %9 : vector<358x8xf32>
    %11 = vector.extract_strided_slice %1 {offsets = [2, 0], sizes = [358, 6], strides = [1, 1]} : vector<400x6xf32> to vector<358x6xf32>
    %c2 = arith.constant 2 : index
    %c0_8 = arith.constant 0 : index
    %c0_9 = arith.constant 0 : index
    %12 = vector.load %arg2[%c2, %c0_8, %c0_9] : memref<9x6x8xf32, #tpu.memory_space<vmem>>, vector<1x6x8xf32>
    %13 = vector.shape_cast %12 : vector<1x6x8xf32> to vector<6x8xf32>
    %cst_10 = arith.constant dense<0.000000e+00> : vector<358x8xf32>
    %14 = tpu.matmul %11, %13, %cst_10 {dimension_numbers = #tpu.dot_dimension_numbers<[1], [0], [0], [1], [0, 0, 1, 1], [], []>} : vector<358x6xf32>, vector<6x8xf32>, vector<358x8xf32> -> vector<358x8xf32>
    %15 = arith.addf %10, %14 : vector<358x8xf32>
    %16 = vector.extract_strided_slice %1 {offsets = [20, 0], sizes = [358, 6], strides = [1, 1]} : vector<400x6xf32> to vector<358x6xf32>
    %c3 = arith.constant 3 : index
    %c0_11 = arith.constant 0 : index
    %c0_12 = arith.constant 0 : index
    %17 = vector.load %arg2[%c3, %c0_11, %c0_12] : memref<9x6x8xf32, #tpu.memory_space<vmem>>, vector<1x6x8xf32>
    %18 = vector.shape_cast %17 : vector<1x6x8xf32> to vector<6x8xf32>
    %cst_13 = arith.constant dense<0.000000e+00> : vector<358x8xf32>
    %19 = tpu.matmul %16, %18, %cst_13 {dimension_numbers = #tpu.dot_dimension_numbers<[1], [0], [0], [1], [0, 0, 1, 1], [], []>} : vector<358x6xf32>, vector<6x8xf32>, vector<358x8xf32> -> vector<358x8xf32>
    %20 = arith.addf %15, %19 : vector<358x8xf32>
    %21 = vector.extract_strided_slice %1 {offsets = [21, 0], sizes = [358, 6], strides = [1, 1]} : vector<400x6xf32> to vector<358x6xf32>
    %c4 = arith.constant 4 : index
    %c0_14 = arith.constant 0 : index
    %c0_15 = arith.constant 0 : index
    %22 = vector.load %arg2[%c4, %c0_14, %c0_15] : memref<9x6x8xf32, #tpu.memory_space<vmem>>, vector<1x6x8xf32>
    %23 = vector.shape_cast %22 : vector<1x6x8xf32> to vector<6x8xf32>
    %cst_16 = arith.constant dense<0.000000e+00> : vector<358x8xf32>
    %24 = tpu.matmul %21, %23, %cst_16 {dimension_numbers = #tpu.dot_dimension_numbers<[1], [0], [0], [1], [0, 0, 1, 1], [], []>} : vector<358x6xf32>, vector<6x8xf32>, vector<358x8xf32> -> vector<358x8xf32>
    %25 = arith.addf %20, %24 : vector<358x8xf32>
    %26 = vector.extract_strided_slice %1 {offsets = [22, 0], sizes = [358, 6], strides = [1, 1]} : vector<400x6xf32> to vector<358x6xf32>
    %c5 = arith.constant 5 : index
    %c0_17 = arith.constant 0 : index
    %c0_18 = arith.constant 0 : index
    %27 = vector.load %arg2[%c5, %c0_17, %c0_18] : memref<9x6x8xf32, #tpu.memory_space<vmem>>, vector<1x6x8xf32>
    %28 = vector.shape_cast %27 : vector<1x6x8xf32> to vector<6x8xf32>
    %cst_19 = arith.constant dense<0.000000e+00> : vector<358x8xf32>
    %29 = tpu.matmul %26, %28, %cst_19 {dimension_numbers = #tpu.dot_dimension_numbers<[1], [0], [0], [1], [0, 0, 1, 1], [], []>} : vector<358x6xf32>, vector<6x8xf32>, vector<358x8xf32> -> vector<358x8xf32>
    %30 = arith.addf %25, %29 : vector<358x8xf32>
    %31 = vector.extract_strided_slice %1 {offsets = [40, 0], sizes = [358, 6], strides = [1, 1]} : vector<400x6xf32> to vector<358x6xf32>
    %c6 = arith.constant 6 : index
    %c0_20 = arith.constant 0 : index
    %c0_21 = arith.constant 0 : index
    %32 = vector.load %arg2[%c6, %c0_20, %c0_21] : memref<9x6x8xf32, #tpu.memory_space<vmem>>, vector<1x6x8xf32>
    %33 = vector.shape_cast %32 : vector<1x6x8xf32> to vector<6x8xf32>
    %cst_22 = arith.constant dense<0.000000e+00> : vector<358x8xf32>
    %34 = tpu.matmul %31, %33, %cst_22 {dimension_numbers = #tpu.dot_dimension_numbers<[1], [0], [0], [1], [0, 0, 1, 1], [], []>} : vector<358x6xf32>, vector<6x8xf32>, vector<358x8xf32> -> vector<358x8xf32>
    %35 = arith.addf %30, %34 : vector<358x8xf32>
    %36 = vector.extract_strided_slice %1 {offsets = [41, 0], sizes = [358, 6], strides = [1, 1]} : vector<400x6xf32> to vector<358x6xf32>
    %c7 = arith.constant 7 : index
    %c0_23 = arith.constant 0 : index
    %c0_24 = arith.constant 0 : index
    %37 = vector.load %arg2[%c7, %c0_23, %c0_24] : memref<9x6x8xf32, #tpu.memory_space<vmem>>, vector<1x6x8xf32>
    %38 = vector.shape_cast %37 : vector<1x6x8xf32> to vector<6x8xf32>
    %cst_25 = arith.constant dense<0.000000e+00> : vector<358x8xf32>
    %39 = tpu.matmul %36, %38, %cst_25 {dimension_numbers = #tpu.dot_dimension_numbers<[1], [0], [0], [1], [0, 0, 1, 1], [], []>} : vector<358x6xf32>, vector<6x8xf32>, vector<358x8xf32> -> vector<358x8xf32>
    %40 = arith.addf %35, %39 : vector<358x8xf32>
    %41 = vector.extract_strided_slice %1 {offsets = [42, 0], sizes = [358, 6], strides = [1, 1]} : vector<400x6xf32> to vector<358x6xf32>
    %c8 = arith.constant 8 : index
    %c0_26 = arith.constant 0 : index
    %c0_27 = arith.constant 0 : index
    %42 = vector.load %arg2[%c8, %c0_26, %c0_27] : memref<9x6x8xf32, #tpu.memory_space<vmem>>, vector<1x6x8xf32>
    %43 = vector.shape_cast %42 : vector<1x6x8xf32> to vector<6x8xf32>
    %cst_28 = arith.constant dense<0.000000e+00> : vector<358x8xf32>
    %44 = tpu.matmul %41, %43, %cst_28 {dimension_numbers = #tpu.dot_dimension_numbers<[1], [0], [0], [1], [0, 0, 1, 1], [], []>} : vector<358x6xf32>, vector<6x8xf32>, vector<358x8xf32> -> vector<358x8xf32>
    %45 = arith.addf %40, %44 : vector<358x8xf32>
    %c0_29 = arith.constant 0 : index
    %c0_30 = arith.constant 0 : index
    %46 = vector.load %arg3[%c0_29, %c0_30] : memref<1x8xf32, #tpu.memory_space<vmem>>, vector<1x8xf32>
    %47 = vector.broadcast %46 : vector<1x8xf32> to vector<358x8xf32>
    %48 = arith.addf %45, %47 : vector<358x8xf32>
    %cst_31 = arith.constant 0.000000e+00 : f32
    %49 = vector.broadcast %cst_31 : f32 to vector<358x8xf32>
    %50 = arith.maximumf %48, %49 : vector<358x8xf32>
    %51 = vector.extract_strided_slice %50 {offsets = [0, 0], sizes = [295, 8], strides = [1, 1]} : vector<358x8xf32> to vector<295x8xf32>
    %52 = vector.extract_strided_slice %50 {offsets = [1, 0], sizes = [295, 8], strides = [1, 1]} : vector<358x8xf32> to vector<295x8xf32>
    %53 = arith.maximumf %51, %52 : vector<295x8xf32>
    %54 = vector.extract_strided_slice %50 {offsets = [2, 0], sizes = [295, 8], strides = [1, 1]} : vector<358x8xf32> to vector<295x8xf32>
    %55 = arith.maximumf %53, %54 : vector<295x8xf32>
    %56 = vector.extract_strided_slice %50 {offsets = [3, 0], sizes = [295, 8], strides = [1, 1]} : vector<358x8xf32> to vector<295x8xf32>
    %57 = arith.maximumf %55, %56 : vector<295x8xf32>
    %58 = vector.extract_strided_slice %50 {offsets = [20, 0], sizes = [295, 8], strides = [1, 1]} : vector<358x8xf32> to vector<295x8xf32>
    %59 = arith.maximumf %57, %58 : vector<295x8xf32>
    %60 = vector.extract_strided_slice %50 {offsets = [21, 0], sizes = [295, 8], strides = [1, 1]} : vector<358x8xf32> to vector<295x8xf32>
    %61 = arith.maximumf %59, %60 : vector<295x8xf32>
    %62 = vector.extract_strided_slice %50 {offsets = [22, 0], sizes = [295, 8], strides = [1, 1]} : vector<358x8xf32> to vector<295x8xf32>
    %63 = arith.maximumf %61, %62 : vector<295x8xf32>
    %64 = vector.extract_strided_slice %50 {offsets = [23, 0], sizes = [295, 8], strides = [1, 1]} : vector<358x8xf32> to vector<295x8xf32>
    %65 = arith.maximumf %63, %64 : vector<295x8xf32>
    %66 = vector.extract_strided_slice %50 {offsets = [40, 0], sizes = [295, 8], strides = [1, 1]} : vector<358x8xf32> to vector<295x8xf32>
    %67 = arith.maximumf %65, %66 : vector<295x8xf32>
    %68 = vector.extract_strided_slice %50 {offsets = [41, 0], sizes = [295, 8], strides = [1, 1]} : vector<358x8xf32> to vector<295x8xf32>
    %69 = arith.maximumf %67, %68 : vector<295x8xf32>
    %70 = vector.extract_strided_slice %50 {offsets = [42, 0], sizes = [295, 8], strides = [1, 1]} : vector<358x8xf32> to vector<295x8xf32>
    %71 = arith.maximumf %69, %70 : vector<295x8xf32>
    %72 = vector.extract_strided_slice %50 {offsets = [43, 0], sizes = [295, 8], strides = [1, 1]} : vector<358x8xf32> to vector<295x8xf32>
    %73 = arith.maximumf %71, %72 : vector<295x8xf32>
    %74 = vector.extract_strided_slice %50 {offsets = [60, 0], sizes = [295, 8], strides = [1, 1]} : vector<358x8xf32> to vector<295x8xf32>
    %75 = arith.maximumf %73, %74 : vector<295x8xf32>
    %76 = vector.extract_strided_slice %50 {offsets = [61, 0], sizes = [295, 8], strides = [1, 1]} : vector<358x8xf32> to vector<295x8xf32>
    %77 = arith.maximumf %75, %76 : vector<295x8xf32>
    %78 = vector.extract_strided_slice %50 {offsets = [62, 0], sizes = [295, 8], strides = [1, 1]} : vector<358x8xf32> to vector<295x8xf32>
    %79 = arith.maximumf %77, %78 : vector<295x8xf32>
    %80 = vector.extract_strided_slice %50 {offsets = [63, 0], sizes = [295, 8], strides = [1, 1]} : vector<358x8xf32> to vector<295x8xf32>
    %81 = arith.maximumf %79, %80 : vector<295x8xf32>
    %82 = vector.extract_strided_slice %81 {offsets = [0, 0], sizes = [253, 8], strides = [1, 1]} : vector<295x8xf32> to vector<253x8xf32>
    %c0_32 = arith.constant 0 : index
    %c0_33 = arith.constant 0 : index
    %c0_34 = arith.constant 0 : index
    %83 = vector.load %arg4[%c0_32, %c0_33, %c0_34] : memref<9x8x6xf32, #tpu.memory_space<vmem>>, vector<1x8x6xf32>
    %84 = vector.shape_cast %83 : vector<1x8x6xf32> to vector<8x6xf32>
    %cst_35 = arith.constant dense<0.000000e+00> : vector<253x6xf32>
    %85 = tpu.matmul %82, %84, %cst_35 {dimension_numbers = #tpu.dot_dimension_numbers<[1], [0], [0], [1], [0, 0, 1, 1], [], []>} : vector<253x8xf32>, vector<8x6xf32>, vector<253x6xf32> -> vector<253x6xf32>
    %86 = vector.extract_strided_slice %81 {offsets = [1, 0], sizes = [253, 8], strides = [1, 1]} : vector<295x8xf32> to vector<253x8xf32>
    %c1_36 = arith.constant 1 : index
    %c0_37 = arith.constant 0 : index
    %c0_38 = arith.constant 0 : index
    %87 = vector.load %arg4[%c1_36, %c0_37, %c0_38] : memref<9x8x6xf32, #tpu.memory_space<vmem>>, vector<1x8x6xf32>
    %88 = vector.shape_cast %87 : vector<1x8x6xf32> to vector<8x6xf32>
    %cst_39 = arith.constant dense<0.000000e+00> : vector<253x6xf32>
    %89 = tpu.matmul %86, %88, %cst_39 {dimension_numbers = #tpu.dot_dimension_numbers<[1], [0], [0], [1], [0, 0, 1, 1], [], []>} : vector<253x8xf32>, vector<8x6xf32>, vector<253x6xf32> -> vector<253x6xf32>
    %90 = arith.addf %85, %89 : vector<253x6xf32>
    %91 = vector.extract_strided_slice %81 {offsets = [2, 0], sizes = [253, 8], strides = [1, 1]} : vector<295x8xf32> to vector<253x8xf32>
    %c2_40 = arith.constant 2 : index
    %c0_41 = arith.constant 0 : index
    %c0_42 = arith.constant 0 : index
    %92 = vector.load %arg4[%c2_40, %c0_41, %c0_42] : memref<9x8x6xf32, #tpu.memory_space<vmem>>, vector<1x8x6xf32>
    %93 = vector.shape_cast %92 : vector<1x8x6xf32> to vector<8x6xf32>
    %cst_43 = arith.constant dense<0.000000e+00> : vector<253x6xf32>
    %94 = tpu.matmul %91, %93, %cst_43 {dimension_numbers = #tpu.dot_dimension_numbers<[1], [0], [0], [1], [0, 0, 1, 1], [], []>} : vector<253x8xf32>, vector<8x6xf32>, vector<253x6xf32> -> vector<253x6xf32>
    %95 = arith.addf %90, %94 : vector<253x6xf32>
    %96 = vector.extract_strided_slice %81 {offsets = [20, 0], sizes = [253, 8], strides = [1, 1]} : vector<295x8xf32> to vector<253x8xf32>
    %c3_44 = arith.constant 3 : index
    %c0_45 = arith.constant 0 : index
    %c0_46 = arith.constant 0 : index
    %97 = vector.load %arg4[%c3_44, %c0_45, %c0_46] : memref<9x8x6xf32, #tpu.memory_space<vmem>>, vector<1x8x6xf32>
    %98 = vector.shape_cast %97 : vector<1x8x6xf32> to vector<8x6xf32>
    %cst_47 = arith.constant dense<0.000000e+00> : vector<253x6xf32>
    %99 = tpu.matmul %96, %98, %cst_47 {dimension_numbers = #tpu.dot_dimension_numbers<[1], [0], [0], [1], [0, 0, 1, 1], [], []>} : vector<253x8xf32>, vector<8x6xf32>, vector<253x6xf32> -> vector<253x6xf32>
    %100 = arith.addf %95, %99 : vector<253x6xf32>
    %101 = vector.extract_strided_slice %81 {offsets = [21, 0], sizes = [253, 8], strides = [1, 1]} : vector<295x8xf32> to vector<253x8xf32>
    %c4_48 = arith.constant 4 : index
    %c0_49 = arith.constant 0 : index
    %c0_50 = arith.constant 0 : index
    %102 = vector.load %arg4[%c4_48, %c0_49, %c0_50] : memref<9x8x6xf32, #tpu.memory_space<vmem>>, vector<1x8x6xf32>
    %103 = vector.shape_cast %102 : vector<1x8x6xf32> to vector<8x6xf32>
    %cst_51 = arith.constant dense<0.000000e+00> : vector<253x6xf32>
    %104 = tpu.matmul %101, %103, %cst_51 {dimension_numbers = #tpu.dot_dimension_numbers<[1], [0], [0], [1], [0, 0, 1, 1], [], []>} : vector<253x8xf32>, vector<8x6xf32>, vector<253x6xf32> -> vector<253x6xf32>
    %105 = arith.addf %100, %104 : vector<253x6xf32>
    %106 = vector.extract_strided_slice %81 {offsets = [22, 0], sizes = [253, 8], strides = [1, 1]} : vector<295x8xf32> to vector<253x8xf32>
    %c5_52 = arith.constant 5 : index
    %c0_53 = arith.constant 0 : index
    %c0_54 = arith.constant 0 : index
    %107 = vector.load %arg4[%c5_52, %c0_53, %c0_54] : memref<9x8x6xf32, #tpu.memory_space<vmem>>, vector<1x8x6xf32>
    %108 = vector.shape_cast %107 : vector<1x8x6xf32> to vector<8x6xf32>
    %cst_55 = arith.constant dense<0.000000e+00> : vector<253x6xf32>
    %109 = tpu.matmul %106, %108, %cst_55 {dimension_numbers = #tpu.dot_dimension_numbers<[1], [0], [0], [1], [0, 0, 1, 1], [], []>} : vector<253x8xf32>, vector<8x6xf32>, vector<253x6xf32> -> vector<253x6xf32>
    %110 = arith.addf %105, %109 : vector<253x6xf32>
    %111 = vector.extract_strided_slice %81 {offsets = [40, 0], sizes = [253, 8], strides = [1, 1]} : vector<295x8xf32> to vector<253x8xf32>
    %c6_56 = arith.constant 6 : index
    %c0_57 = arith.constant 0 : index
    %c0_58 = arith.constant 0 : index
    %112 = vector.load %arg4[%c6_56, %c0_57, %c0_58] : memref<9x8x6xf32, #tpu.memory_space<vmem>>, vector<1x8x6xf32>
    %113 = vector.shape_cast %112 : vector<1x8x6xf32> to vector<8x6xf32>
    %cst_59 = arith.constant dense<0.000000e+00> : vector<253x6xf32>
    %114 = tpu.matmul %111, %113, %cst_59 {dimension_numbers = #tpu.dot_dimension_numbers<[1], [0], [0], [1], [0, 0, 1, 1], [], []>} : vector<253x8xf32>, vector<8x6xf32>, vector<253x6xf32> -> vector<253x6xf32>
    %115 = arith.addf %110, %114 : vector<253x6xf32>
    %116 = vector.extract_strided_slice %81 {offsets = [41, 0], sizes = [253, 8], strides = [1, 1]} : vector<295x8xf32> to vector<253x8xf32>
    %c7_60 = arith.constant 7 : index
    %c0_61 = arith.constant 0 : index
    %c0_62 = arith.constant 0 : index
    %117 = vector.load %arg4[%c7_60, %c0_61, %c0_62] : memref<9x8x6xf32, #tpu.memory_space<vmem>>, vector<1x8x6xf32>
    %118 = vector.shape_cast %117 : vector<1x8x6xf32> to vector<8x6xf32>
    %cst_63 = arith.constant dense<0.000000e+00> : vector<253x6xf32>
    %119 = tpu.matmul %116, %118, %cst_63 {dimension_numbers = #tpu.dot_dimension_numbers<[1], [0], [0], [1], [0, 0, 1, 1], [], []>} : vector<253x8xf32>, vector<8x6xf32>, vector<253x6xf32> -> vector<253x6xf32>
    %120 = arith.addf %115, %119 : vector<253x6xf32>
    %121 = vector.extract_strided_slice %81 {offsets = [42, 0], sizes = [253, 8], strides = [1, 1]} : vector<295x8xf32> to vector<253x8xf32>
    %c8_64 = arith.constant 8 : index
    %c0_65 = arith.constant 0 : index
    %c0_66 = arith.constant 0 : index
    %122 = vector.load %arg4[%c8_64, %c0_65, %c0_66] : memref<9x8x6xf32, #tpu.memory_space<vmem>>, vector<1x8x6xf32>
    %123 = vector.shape_cast %122 : vector<1x8x6xf32> to vector<8x6xf32>
    %cst_67 = arith.constant dense<0.000000e+00> : vector<253x6xf32>
    %124 = tpu.matmul %121, %123, %cst_67 {dimension_numbers = #tpu.dot_dimension_numbers<[1], [0], [0], [1], [0, 0, 1, 1], [], []>} : vector<253x8xf32>, vector<8x6xf32>, vector<253x6xf32> -> vector<253x6xf32>
    %125 = arith.addf %120, %124 : vector<253x6xf32>
    %c0_68 = arith.constant 0 : index
    %c0_69 = arith.constant 0 : index
    %126 = vector.load %arg5[%c0_68, %c0_69] : memref<1x6xf32, #tpu.memory_space<vmem>>, vector<1x6xf32>
    %127 = vector.broadcast %126 : vector<1x6xf32> to vector<253x6xf32>
    %128 = arith.addf %125, %127 : vector<253x6xf32>
    %cst_70 = arith.constant 0.000000e+00 : f32
    %129 = vector.broadcast %cst_70 : f32 to vector<253x6xf32>
    %130 = arith.maximumf %128, %129 : vector<253x6xf32>
    %131 = vector.extract_strided_slice %130 {offsets = [0, 0], sizes = [211, 6], strides = [1, 1]} : vector<253x6xf32> to vector<211x6xf32>
    %132 = vector.extract_strided_slice %130 {offsets = [1, 0], sizes = [211, 6], strides = [1, 1]} : vector<253x6xf32> to vector<211x6xf32>
    %133 = arith.maximumf %131, %132 : vector<211x6xf32>
    %134 = vector.extract_strided_slice %130 {offsets = [2, 0], sizes = [211, 6], strides = [1, 1]} : vector<253x6xf32> to vector<211x6xf32>
    %135 = arith.maximumf %133, %134 : vector<211x6xf32>
    %136 = vector.extract_strided_slice %130 {offsets = [20, 0], sizes = [211, 6], strides = [1, 1]} : vector<253x6xf32> to vector<211x6xf32>
    %137 = arith.maximumf %135, %136 : vector<211x6xf32>
    %138 = vector.extract_strided_slice %130 {offsets = [21, 0], sizes = [211, 6], strides = [1, 1]} : vector<253x6xf32> to vector<211x6xf32>
    %139 = arith.maximumf %137, %138 : vector<211x6xf32>
    %140 = vector.extract_strided_slice %130 {offsets = [22, 0], sizes = [211, 6], strides = [1, 1]} : vector<253x6xf32> to vector<211x6xf32>
    %141 = arith.maximumf %139, %140 : vector<211x6xf32>
    %142 = vector.extract_strided_slice %130 {offsets = [40, 0], sizes = [211, 6], strides = [1, 1]} : vector<253x6xf32> to vector<211x6xf32>
    %143 = arith.maximumf %141, %142 : vector<211x6xf32>
    %144 = vector.extract_strided_slice %130 {offsets = [41, 0], sizes = [211, 6], strides = [1, 1]} : vector<253x6xf32> to vector<211x6xf32>
    %145 = arith.maximumf %143, %144 : vector<211x6xf32>
    %146 = vector.extract_strided_slice %130 {offsets = [42, 0], sizes = [211, 6], strides = [1, 1]} : vector<253x6xf32> to vector<211x6xf32>
    %147 = arith.maximumf %145, %146 : vector<211x6xf32>
    %c0_71 = arith.constant 0 : index
    %c0_72 = arith.constant 0 : index
    %148 = vector.load %arg6[%c0_71, %c0_72] : memref<36x211xf32, #tpu.memory_space<vmem>>, vector<36x211xf32>
    %cst_73 = arith.constant dense<0.000000e+00> : vector<36x6xf32>
    %149 = tpu.matmul %148, %147, %cst_73 {dimension_numbers = #tpu.dot_dimension_numbers<[1], [0], [0], [1], [0, 0, 1, 1], [], []>} : vector<36x211xf32>, vector<211x6xf32>, vector<36x6xf32> -> vector<36x6xf32>
    %150 = vector.extract_strided_slice %149 {offsets = [0, 0], sizes = [36, 1], strides = [1, 1]} : vector<36x6xf32> to vector<36x1xf32>
    %c0_74 = arith.constant 0 : index
    %c0_75 = arith.constant 0 : index
    %c0_76 = arith.constant 0 : index
    %151 = vector.load %arg7[%c0_74, %c0_75, %c0_76] : memref<6x36x10xf32, #tpu.memory_space<vmem>>, vector<1x36x10xf32>
    %152 = vector.shape_cast %151 : vector<1x36x10xf32> to vector<36x10xf32>
    %153 = vector.broadcast %150 : vector<36x1xf32> to vector<36x10xf32>
    %154 = arith.mulf %153, %152 : vector<36x10xf32>
    %155 = vector.extract_strided_slice %149 {offsets = [0, 1], sizes = [36, 1], strides = [1, 1]} : vector<36x6xf32> to vector<36x1xf32>
    %c1_77 = arith.constant 1 : index
    %c0_78 = arith.constant 0 : index
    %c0_79 = arith.constant 0 : index
    %156 = vector.load %arg7[%c1_77, %c0_78, %c0_79] : memref<6x36x10xf32, #tpu.memory_space<vmem>>, vector<1x36x10xf32>
    %157 = vector.shape_cast %156 : vector<1x36x10xf32> to vector<36x10xf32>
    %158 = vector.broadcast %155 : vector<36x1xf32> to vector<36x10xf32>
    %159 = arith.mulf %158, %157 : vector<36x10xf32>
    %160 = arith.addf %154, %159 : vector<36x10xf32>
    %161 = vector.extract_strided_slice %149 {offsets = [0, 2], sizes = [36, 1], strides = [1, 1]} : vector<36x6xf32> to vector<36x1xf32>
    %c2_80 = arith.constant 2 : index
    %c0_81 = arith.constant 0 : index
    %c0_82 = arith.constant 0 : index
    %162 = vector.load %arg7[%c2_80, %c0_81, %c0_82] : memref<6x36x10xf32, #tpu.memory_space<vmem>>, vector<1x36x10xf32>
    %163 = vector.shape_cast %162 : vector<1x36x10xf32> to vector<36x10xf32>
    %164 = vector.broadcast %161 : vector<36x1xf32> to vector<36x10xf32>
    %165 = arith.mulf %164, %163 : vector<36x10xf32>
    %166 = arith.addf %160, %165 : vector<36x10xf32>
    %167 = vector.extract_strided_slice %149 {offsets = [0, 3], sizes = [36, 1], strides = [1, 1]} : vector<36x6xf32> to vector<36x1xf32>
    %c3_83 = arith.constant 3 : index
    %c0_84 = arith.constant 0 : index
    %c0_85 = arith.constant 0 : index
    %168 = vector.load %arg7[%c3_83, %c0_84, %c0_85] : memref<6x36x10xf32, #tpu.memory_space<vmem>>, vector<1x36x10xf32>
    %169 = vector.shape_cast %168 : vector<1x36x10xf32> to vector<36x10xf32>
    %170 = vector.broadcast %167 : vector<36x1xf32> to vector<36x10xf32>
    %171 = arith.mulf %170, %169 : vector<36x10xf32>
    %172 = arith.addf %166, %171 : vector<36x10xf32>
    %173 = vector.extract_strided_slice %149 {offsets = [0, 4], sizes = [36, 1], strides = [1, 1]} : vector<36x6xf32> to vector<36x1xf32>
    %c4_86 = arith.constant 4 : index
    %c0_87 = arith.constant 0 : index
    %c0_88 = arith.constant 0 : index
    %174 = vector.load %arg7[%c4_86, %c0_87, %c0_88] : memref<6x36x10xf32, #tpu.memory_space<vmem>>, vector<1x36x10xf32>
    %175 = vector.shape_cast %174 : vector<1x36x10xf32> to vector<36x10xf32>
    %176 = vector.broadcast %173 : vector<36x1xf32> to vector<36x10xf32>
    %177 = arith.mulf %176, %175 : vector<36x10xf32>
    %178 = arith.addf %172, %177 : vector<36x10xf32>
    %179 = vector.extract_strided_slice %149 {offsets = [0, 5], sizes = [36, 1], strides = [1, 1]} : vector<36x6xf32> to vector<36x1xf32>
    %c5_89 = arith.constant 5 : index
    %c0_90 = arith.constant 0 : index
    %c0_91 = arith.constant 0 : index
    %180 = vector.load %arg7[%c5_89, %c0_90, %c0_91] : memref<6x36x10xf32, #tpu.memory_space<vmem>>, vector<1x36x10xf32>
    %181 = vector.shape_cast %180 : vector<1x36x10xf32> to vector<36x10xf32>
    %182 = vector.broadcast %179 : vector<36x1xf32> to vector<36x10xf32>
    %183 = arith.mulf %182, %181 : vector<36x10xf32>
    %184 = arith.addf %178, %183 : vector<36x10xf32>
    %cst_92 = arith.constant dense<0.000000e+00> : vector<10xf32>
    %185 = vector.multi_reduction <add>, %184, %cst_92 [0] : vector<36x10xf32> to vector<10xf32>
    %186 = vector.shape_cast %185 : vector<10xf32> to vector<1x10xf32>
    %c0_93 = arith.constant 0 : index
    %c0_94 = arith.constant 0 : index
    %187 = vector.load %arg8[%c0_93, %c0_94] : memref<1x10xf32, #tpu.memory_space<vmem>>, vector<1x10xf32>
    %188 = arith.addf %186, %187 : vector<1x10xf32>
    %189 = math.tanh %188 : vector<1x10xf32>
    %c0_95 = arith.constant 0 : index
    %c0_96 = arith.constant 0 : index
    %190 = vector.load %arg9[%c0_95, %c0_96] : memref<10x2xf32, #tpu.memory_space<vmem>>, vector<10x2xf32>
    %cst_97 = arith.constant dense<0.000000e+00> : vector<1x2xf32>
    %191 = tpu.matmul %189, %190, %cst_97 {dimension_numbers = #tpu.dot_dimension_numbers<[1], [0], [0], [1], [0, 0, 1, 1], [], []>} : vector<1x10xf32>, vector<10x2xf32>, vector<1x2xf32> -> vector<1x2xf32>
    %c0_98 = arith.constant 0 : index
    %c0_99 = arith.constant 0 : index
    %192 = vector.load %arg10[%c0_98, %c0_99] : memref<1x2xf32, #tpu.memory_space<vmem>>, vector<1x2xf32>
    %193 = arith.addf %191, %192 : vector<1x2xf32>
    %c0_100 = arith.constant 0 : index
    %c0_101 = arith.constant 0 : index
    %c0_102 = arith.constant 0 : index
    %194 = vector.load %arg11[%c0_100, %c0_101, %c0_102] : memref<1x1x2xf32, #tpu.memory_space<vmem>>, vector<1x1x2xf32>
    %195 = vector.shape_cast %194 : vector<1x1x2xf32> to vector<1x2xf32>
    %196 = vector.shape_cast %193 : vector<1x2xf32> to vector<1x1x2xf32>
    tpu.vector_store %arg11[%c0_100, %c0_101, %c0_102], %196 {strides = array<i32>} : memref<1x1x2xf32, #tpu.memory_space<vmem>>, vector<1x1x2xf32>,
    return
  }
  func.func @transform_0(%arg0: i32) -> (i32, i32, i32) {
    %c0_i32 = arith.constant 0 : i32
    %c0_i32_0 = arith.constant 0 : i32
    %c0_i32_1 = arith.constant 0 : i32
    return %arg0, %c0_i32, %c0_i32_0 : i32, i32, i32
  }
  func.func @transform_1(%arg0: i32) -> (i32, i32, i32) {
    %c0_i32 = arith.constant 0 : i32
    %c0_i32_0 = arith.constant 0 : i32
    %c0_i32_1 = arith.constant 0 : i32
    %c0_i32_2 = arith.constant 0 : i32
    return %c0_i32, %c0_i32_0, %c0_i32_1 : i32, i32, i32
  }
  func.func @transform_2(%arg0: i32) -> (i32, i32) {
    %c0_i32 = arith.constant 0 : i32
    %c0_i32_0 = arith.constant 0 : i32
    %c0_i32_1 = arith.constant 0 : i32
    return %c0_i32, %c0_i32_0 : i32, i32
  }
  func.func @transform_3(%arg0: i32) -> (i32, i32, i32) {
    %c0_i32 = arith.constant 0 : i32
    %c0_i32_0 = arith.constant 0 : i32
    %c0_i32_1 = arith.constant 0 : i32
    %c0_i32_2 = arith.constant 0 : i32
    return %c0_i32, %c0_i32_0, %c0_i32_1 : i32, i32, i32
  }
  func.func @transform_4(%arg0: i32) -> (i32, i32) {
    %c0_i32 = arith.constant 0 : i32
    %c0_i32_0 = arith.constant 0 : i32
    %c0_i32_1 = arith.constant 0 : i32
    return %c0_i32, %c0_i32_0 : i32, i32
  }
  func.func @transform_5(%arg0: i32) -> (i32, i32) {
    %c0_i32 = arith.constant 0 : i32
    %c0_i32_0 = arith.constant 0 : i32
    %c0_i32_1 = arith.constant 0 : i32
    return %c0_i32, %c0_i32_0 : i32, i32
  }
  func.func @transform_6(%arg0: i32) -> (i32, i32, i32) {
    %c0_i32 = arith.constant 0 : i32
    %c0_i32_0 = arith.constant 0 : i32
    %c0_i32_1 = arith.constant 0 : i32
    %c0_i32_2 = arith.constant 0 : i32
    return %c0_i32, %c0_i32_0, %c0_i32_1 : i32, i32, i32
  }
  func.func @transform_7(%arg0: i32) -> (i32, i32) {
    %c0_i32 = arith.constant 0 : i32
    %c0_i32_0 = arith.constant 0 : i32
    %c0_i32_1 = arith.constant 0 : i32
    return %c0_i32, %c0_i32_0 : i32, i32
  }
  func.func @transform_8(%arg0: i32) -> (i32, i32) {
    %c0_i32 = arith.constant 0 : i32
    %c0_i32_0 = arith.constant 0 : i32
    %c0_i32_1 = arith.constant 0 : i32
    return %c0_i32, %c0_i32_0 : i32, i32
  }
  func.func @transform_9(%arg0: i32) -> (i32, i32) {
    %c0_i32 = arith.constant 0 : i32
    %c0_i32_0 = arith.constant 0 : i32
    %c0_i32_1 = arith.constant 0 : i32
    return %c0_i32, %c0_i32_0 : i32, i32
  }
  func.func @transform_10(%arg0: i32) -> (i32, i32, i32) {
    %c0_i32 = arith.constant 0 : i32
    %c0_i32_0 = arith.constant 0 : i32
    %c0_i32_1 = arith.constant 0 : i32
    return %arg0, %c0_i32, %c0_i32_0 : i32, i32, i32
  }
}

</mosaic_0001>

<bundles_post_ra>
// kernel: tpu_custom_call.1
= control target key start
LH: loop header
LB: loop body
LE: loop exit
PB: predicated region body
PF: predicated region fallthrough
CT: control target
= control target key end

     0   :  { %s8974_s13 = smov 0   ;;  %s15548_s0 = inlined_call_operand.vmem [shape: f32[4,400,6], index: 0, kind: input, shape index: {}]   ;;  %s15549_s1 = inlined_call_operand.vmem [shape: f32[9,6,8], index: 1, kind: input, shape index: {}]   ;;  %s15550_s2 = inlined_call_operand.vmem [shape: f32[1,8], index: 2, kind: input, shape index: {}]   ;;  %s15551_s3 = inlined_call_operand.vmem [shape: f32[9,8,6], index: 3, kind: input, shape index: {}]   ;;  %s15552_s4 = inlined_call_operand.vmem [shape: f32[1,6], index: 4, kind: input, shape index: {}]   ;;  %s15553_s5 = inlined_call_operand.vmem [shape: f32[36,211], index: 5, kind: input, shape index: {}]   ;;  %s15554_s6 = inlined_call_operand.vmem [shape: f32[6,36,10], index: 6, kind: input, shape index: {}]   ;;  %s15555_s7 = inlined_call_operand.vmem [shape: f32[1,10], index: 7, kind: input, shape index: {}]   ;;  %s15556_s8 = inlined_call_operand.vmem [shape: f32[10,2], index: 8, kind: input, shape index: {}]   ;;  %s15557_s9 = inlined_call_operand.vmem [shape: f32[1,2], index: 9, kind: input, shape index: {}]   ;;  %s15558_s10 = inlined_call_operand.vmem [shape: f32[4,1,2], index: 10, kind: output, shape index: {}]  }
   0x1 LB: > { %s8029_s14 = sadd.s32 4294967295, %s8911_s13   ;;  %p8033_p0 = scmp.ge.s32.totalorder %s8911_s13, 1  ;;  %s8911_s13 = sphi %s8974_s13, %s20_s13  }
   0x2   : > { %p312_p1 = scmp.lt.s32.totalorder %s8911_s13, 5 }
   0x4   : > { %p313_p2 = pnand %p8033_p0, %p312_p1 }
   0x6   : > { %316 = sbr.rel (%p313_p2) target bundleno = 2545 (0x9f1), region = 60 }
   0xb   : > { %v8035_v0 = vld [vmem:[%s15549_s1 + $0x8] sm:$0x3f]  ;;  %vm635_vm0 = vcmask 1045504   ;;  %p348_p3 = scmp.lt.s32.totalorder %s8029_s14, 3  ;;  %v406_v1 = vld [vmem:[%s15549_s1] sm:$0x3f] }
   0xc   : > { %8788 = vmatpush.msk.msra.mxu3 %vm635_vm0, %v8035_v0  ;;  %8036 = vmatpush.msk.msra.mxu0 %vm635_vm0, %v8035_v0  ;;  %vm544_vm1 = vcmask 48128   ;;  %vm454_vm2 = vcmask 1046528   ;;  %v8128_v30 = vld [vmem:[%s15549_s1 + $0x10] sm:$0x3f]  ;;  %v8175_v45 = vld [vmem:[%s15549_s1 + $0x18] sm:$0x3f] }
   0xd   : > { %s16876_s14 = smov (!%p348_p3, %s8029_s14), 3  ;;  %8082 = vmatpush.msk.msra.mxu1 %vm635_vm0, %v406_v1  ;;  %8790 = vmatpush.msk.msra.mxu2 %vm635_vm0, %v8128_v30  ;;  %vm1422_vm3 = vcmask 1043456   ;;  %vm2190_vm4 = vcmask 1041408   ;;  %vm1806_vm5 = vcmask 1042432   ;;  %vm3662_vm6 = vcmask 1044480  }
   0xe   : > { %8789 = vmatpush.msk.msrb.mxu3 %vm635_vm0, %v406_v1  ;;  %s8791_s19 = smul.u32 400, %s16876_s14  ;;  %8129 = vmatpush.msk.msrb.mxu0 %vm635_vm0, %v8128_v30  ;;  %vm4261_vm7 = vcmask 1040384   ;;  %vm4916_vm8 = vcmask 64512   ;;  %vm7633_vm9 = vcmask 678912   ;;  %vm7931_vm10 = vcmask 80896   ;;  %s355_s11 = scalar_lea.vmem %s15558_s10, %s16876_s14 }
   0xf   : > { %vm7939_vm11 = vcmask 76800   ;;  %vm7980_vm12 = vcmask 8192  }
  0x10   : > { %s8998_s22 = scalar_lea.vmem %s15548_s0, %s8791_s19 }
  0x11   : > { %v9001_v2 = vld [vmem:[%s8998_s22 + $0x160] sm:$0xff]  ;;  %v357_v4 = vld [vmem:[%s8998_s22 + $0x8] sm:$0xff]  ;;  %v9010_v8 = vld [vmem:[%s8998_s22 + $0x10] sm:$0xff] }
  0x12   : > { %v356_v3 = vld [vmem:[%s8998_s22] sm:$0xff]  ;;  %v9006_v5 = vrot.slane %v9001_v2, 1  ;;  %v456_v7 = vrot.slane %v357_v4, 1  ;;  %v458_v10 = vrot.slane %v9010_v8, 1  ;;  %v9018_v11 = vld [vmem:[%s8998_s22 + $0x118] sm:$0xff]  ;;  %v9043_v19 = vld [vmem:[%s8998_s22 + $0x128] sm:$0xff] }
  0x13   : > { %v455_v6 = vrot.slane %v356_v3, 1  ;;  %8083 = vmatmul.msk.f32.vlgmr.msra.gmra.mxu1 %vm544_vm1, %v356_v3  ;;  %v9023_v13 = vld [vmem:[%s8998_s22 + $0x18] sm:$0xff]  ;;  %v9030_v15 = vld [vmem:[%s8998_s22 + $0x120] sm:$0xff]  ;;  %v9049_v21 = vld [vmem:[%s8998_s22 + $0x28] sm:$0xff] }
  0x14   : > { %8081 = vmatmul.msk.f32.vlgmr.msra.gmra.mxu3 %vm544_vm1, %v9006_v5  ;;  %v459_v12 = vsel %vm454_vm2, %v456_v7, %v458_v10  ;;  %v460_v14 = vrot.slane %v9023_v13, 1  ;;  %v9036_v17 = vld [vmem:[%s8998_s22 + $0x20] sm:$0xff]  ;;  %v464_v22 = vrot.slane %v9049_v21, 1  ;;  %v9056_v23 = vld [vmem:[%s8998_s22 + $0x130] sm:$0xff]  ;;  %v9068_v27 = vld [vmem:[%s8998_s22 + $0x58] sm:$0xff] }
  0x15   : > { %v457_v9 = vsel %vm454_vm2, %v455_v6, %v456_v7  ;;  %v462_v18 = vrot.slane %v9036_v17, 1  ;;  %v9062_v25 = vld [vmem:[%s8998_s22 + $0x30] sm:$0xff]  ;;  %v1059_v29 = vrot.slane %v9068_v27, 2  ;;  %v9089_v33 = vld [vmem:[%s8998_s22 + $0x138] sm:$0xff]  ;;  %v9100_v36 = vld [vmem:[%s8998_s22 + $0x60] sm:$0xff]  ;;  %8176 = vmatpush.msk.msra.mxu3 %vm635_vm0, %v8175_v45  ;;  %v476_v1 = vrot.slane %v9068_v27, 1 }
  0x16   : > { %8037 = vmatmul.msk.f32.vlgmr.msra.gmra.mxu0 %vm544_vm1, %v457_v9  ;;  %v461_v16 = vsel %vm454_vm2, %v458_v10, %v460_v14  ;;  %v9065_v26 = vld [vmem:[%s8998_s22 + $0x50] sm:$0xff]  ;;  %v466_v31 = vrot.slane %v9062_v25, 1  ;;  %v9097_v35 = vld [vmem:[%s8998_s22 + $0x38] sm:$0xff]  ;;  %v1061_v37 = vrot.slane %v9100_v36, 2  ;;  %v9114_v40 = vld [vmem:[%s8998_s22 + $0x140] sm:$0xff]  ;;  %v1423_v9 = vrot.slane %v9010_v8, 4 }
  0x17   : > { %v463_v20 = vsel %vm454_vm2, %v460_v14, %v462_v18  ;;  %v465_v24 = vsel %vm454_vm2, %v462_v18, %v464_v22  ;;  %v15559_v28 = vrot.slane %v9065_v26, 2  ;;  %v468_v38 = vrot.slane %v9097_v35, 1  ;;  %v9122_v42 = vld [vmem:[%s8998_s22 + $0x40] sm:$0xff]  ;;  %v9125_v43 = vld [vmem:[%s8998_s22 + $0x68] sm:$0xff]  ;;  %v9154_v51 = vld [vmem:[%s8998_s22 + $0x70] sm:$0xff] }
  0x18   : > { %v9092_v34 = vsel %vm454_vm2, %v464_v22, %v466_v31  ;;  %v9109_v39 = vsel %vm635_vm0, %v1059_v29, %v1061_v37  ;;  %v1063_v44 = vrot.slane %v9125_v43, 2  ;;  %v470_v46 = vrot.slane %v9122_v42, 1  ;;  %v9143_v48 = vld [vmem:[%s8998_s22 + $0x148] sm:$0xff]  ;;  %v9168_v55 = vld [vmem:[%s8998_s22 + $0x150] sm:$0xff]  ;;  %v9176_v57 = vld [vmem:[%s8998_s22 + $0x78] sm:$0xff] }
  0x19   : > { %v9083_v32 = vsel %vm635_vm0, %v15559_v28, %v1059_v29  ;;  %15799 = vst [vmem:[#allocation3_spill] sm:$0xff] %v9109_v39  ;;  %v9117_v41 = vsel %vm454_vm2, %v466_v31, %v468_v38  ;;  %v9151_v50 = vld [vmem:[%s8998_s22 + $0x48] sm:$0xff]  ;;  %v1065_v52 = vrot.slane %v9154_v51, 2  ;;  %v1067_v58 = vrot.slane %v9176_v57, 2  ;;  %v9190_v61 = vld [vmem:[%s8998_s22 + $0x158] sm:$0xff]  ;;  %v9198_v63 = vld [vmem:[%s8998_s22 + $0x80] sm:$0xff] }
  0x1a   : > { %15798 = vst [vmem:[#allocation2_spill] sm:$0xff] %v9083_v32  ;;  %8140 = vmatmul.msk.f32.vlgmr.msra.gmra.mxu2 %vm544_vm1, %v9083_v32  ;;  %v9137_v47 = vsel %vm635_vm0, %v1061_v37, %v1063_v44  ;;  %v9146_v49 = vsel %vm454_vm2, %v468_v38, %v470_v46  ;;  %v472_v53 = vrot.slane %v9151_v50, 1  ;;  %v474_v59 = vrot.slane %v9065_v26, 1  ;;  %v9217_v6 = vld [vmem:[%s8998_s22 + $0x88] sm:$0xff]  ;;  %v9259_v31 = vld [vmem:[%s8998_s22 + $0x98] sm:$0xff] }
  0x1b   : > { %8084 = vmatmul.msk.f32.gmra.mxu1 %vm544_vm1, %v357_v4  ;;  %15800 = vst [vmem:[#allocation4_spill] sm:$0xff] %v9137_v47  ;;  %v9163_v54 = vsel %vm635_vm0, %v1063_v44, %v1065_v52  ;;  %v9185_v60 = vsel %vm635_vm0, %v1065_v52, %v1067_v58  ;;  %v1069_v0 = vrot.slane %v9198_v63, 2  ;;  %v1071_v7 = vrot.slane %v9217_v6, 2  ;;  %v9279_v52 = vld [vmem:[%s8998_s22 + $0xa0] sm:$0xff] }
  0x1c   : > { %8118 = vmatmul.msk.f32.vlgmr.msrb.gmra.mxu3 %vm544_vm1, %v9018_v11  ;;  %15801 = vst [vmem:[#allocation5_spill] sm:$0xff] %v9163_v54  ;;  %v9171_v56 = vsel %vm454_vm2, %v470_v46, %v472_v53  ;;  %v9193_v62 = vsel %vm454_vm2, %v472_v53, %v474_v59  ;;  %v9212_v4 = vsel %vm454_vm2, %v474_v59, %v476_v1  ;;  %v1424_v10 = vrot.slane %v9023_v13, 4 }
  0x1d   : > { %15802 = vst [vmem:[#allocation6_spill] sm:$0xff] %v9185_v60  ;;  %v9207_v3 = vsel %vm635_vm0, %v1067_v58, %v1069_v0  ;;  %v9228_v14 = vsel %vm635_vm0, %v1069_v0, %v1071_v7  ;;  %v480_v22 = vrot.slane %v9125_v43, 1  ;;  %v1428_v37 = vrot.slane %v9049_v21, 4 }
  0x1e   : > { %8038 = vmatmul.msk.f32.gmra.mxu0 %vm544_vm1, %v459_v12  ;;  %15803 = vst [vmem:[#allocation7_spill] sm:$0xff] %v9207_v3  ;;  %v478_v12 = vrot.slane %v9100_v36, 1  ;;  %v482_v38 = vrot.slane %v9154_v51, 1  ;;  %v1430_v53 = vrot.slane %v9062_v25, 4  ;;  %v484_v58 = vrot.slane %v9176_v57, 1 }
  0x1f   : > { %15804 = vst [vmem:[#allocation8_spill] sm:$0xff] %v9228_v14 }
  0x20   : > { %v9234_v18 = vsel %vm454_vm2, %v476_v1, %v478_v12  ;;  %v9254_v30 = vsel %vm454_vm2, %v478_v12, %v480_v22  ;;  %v9274_v46 = vsel %vm454_vm2, %v480_v22, %v482_v38  ;;  %v1431_v0 = vsel %vm1422_vm3, %v1428_v37, %v1430_v53 }
  0x21   : > { %v9294_v1 = vsel %vm454_vm2, %v482_v38, %v484_v58  ;;  %v1434_v22 = vrot.slane %v9122_v42, 4 }
  0x22   : > { %8141 = vmatmul.msk.f32.gmra.mxu2 %vm544_vm1, %v9109_v39 }
  0x23   : > { %8085 = vmatmul.msk.f32.gmra.mxu1 %vm544_vm1, %v9010_v8  ;;  %v9239_v8 = vld [vmem:[%s8998_s22 + $0x90] sm:$0xff] }
  0x24   : > { %8119 = vmatmul.msk.f32.gmra.mxu3 %vm544_vm1, %v9030_v15 }
  0x26   : > { %8039 = vmatmul.msk.f32.gmra.mxu0 %vm544_vm1, %v461_v16  ;;  %v1425_v16 = vsel %vm1422_vm3, %v1423_v9, %v1424_v10  ;;  %v1432_v9 = vrot.slane %v9097_v35, 4 }
  0x28   : > { %v1435_v38 = vsel %vm1422_vm3, %v1432_v9, %v1434_v22 }
  0x2a   : > { %8142 = vmatmul.msk.f32.gmra.mxu2 %vm544_vm1, %v9137_v47 }
  0x2b   : > { %8086 = vmatmul.msk.f32.gmra.mxu1 %vm544_vm1, %v9023_v13  ;;  %v1073_v13 = vrot.slane %v9239_v8, 2 }
  0x2c   : > { %8120 = vmatmul.msk.f32.gmra.mxu3 %vm544_vm1, %v9043_v19 }
  0x2e   : > { %8040 = vmatmul.msk.f32.gmra.mxu0 %vm544_vm1, %v463_v20  ;;  %v1426_v20 = vrot.slane %v9036_v17, 4 }
  0x30   : > { %v1427_v29 = vsel %vm1422_vm3, %v1424_v10, %v1426_v20  ;;  %v1429_v45 = vsel %vm1422_vm3, %v1426_v20, %v1428_v37  ;;  %v486_v10 = vrot.slane %v9198_v63, 1  ;;  %v9319_v20 = vld [vmem:[%s8998_s22 + $0xb0] sm:$0xff] }
  0x32   : > { %8143 = vmatmul.msk.f32.gmra.mxu2 %vm544_vm1, %v9163_v54 }
  0x33   : > { %8087 = vmatmul.msk.f32.gmra.mxu1 %vm544_vm1, %v9036_v17  ;;  %v1075_v17 = vrot.slane %v9259_v31, 2 }
  0x34   : > { %8121 = vmatmul.msk.f32.gmra.mxu3 %vm544_vm1, %v9056_v23 }
  0x35   : > { %v9268_v44 = vsel %vm635_vm0, %v1073_v13, %v1075_v17 }
  0x36   : > { %8041 = vmatmul.msk.f32.gmra.mxu0 %vm544_vm1, %v465_v24  ;;  %v9248_v24 = vsel %vm635_vm0, %v1071_v7, %v1073_v13  ;;  %15806 = vst [vmem:[#allocation10_spill] sm:$0xff] %v9268_v44  ;;  %v9299_v7 = vld [vmem:[%s8998_s22 + $0xa8] sm:$0xff]  ;;  %v9314_v13 = vsel %vm454_vm2, %v484_v58, %v486_v10  ;;  %v1436_v58 = vrot.slane %v9151_v50, 4 }
  0x37   : > { %15805 = vst [vmem:[#allocation9_spill] sm:$0xff] %v9248_v24 }
  0x3a   : > { %8144 = vmatmul.msk.f32.gmra.mxu2 %vm544_vm1, %v9185_v60 }
  0x3b   : > { %8088 = vmatmul.msk.f32.gmra.mxu1 %vm544_vm1, %v9049_v21  ;;  %v1077_v21 = vrot.slane %v9279_v52, 2 }
  0x3c   : > { %8122 = vmatmul.msk.f32.gmra.mxu3 %vm544_vm1, %v9089_v33 }
  0x3d   : > { %v9288_v59 = vsel %vm635_vm0, %v1075_v17, %v1077_v21 }
  0x3e   : > { %8042 = vmatmul.msk.f32.gmra.mxu0 %vm544_vm1, %v9092_v34  ;;  %15807 = vst [vmem:[#allocation11_spill] sm:$0xff] %v9288_v59 }
  0x42   : > { %8145 = vmatmul.msk.f32.gmra.mxu2 %vm544_vm1, %v9207_v3 }
  0x43   : > { %8089 = vmatmul.msk.f32.gmra.mxu1 %vm544_vm1, %v9062_v25  ;;  %v1079_v25 = vrot.slane %v9299_v7, 2 }
  0x44   : > { %8123 = vmatmul.msk.f32.gmra.mxu3 %vm544_vm1, %v9114_v40 }
  0x45   : > { %v9308_v12 = vsel %vm635_vm0, %v1077_v21, %v1079_v25 }
  0x46   : > { %8043 = vmatmul.msk.f32.gmra.mxu0 %vm544_vm1, %v9117_v41  ;;  %15808 = vst [vmem:[#allocation12_spill] sm:$0xff] %v9308_v12 }
  0x4a   : > { %8146 = vmatmul.msk.f32.gmra.mxu2 %vm544_vm1, %v9228_v14 }
  0x4b   : > { %8090 = vmatmul.msk.f32.gmra.mxu1 %vm544_vm1, %v9097_v35  ;;  %v1081_v35 = vrot.slane %v9319_v20, 2 }
  0x4c   : > { %8124 = vmatmul.msk.f32.gmra.mxu3 %vm544_vm1, %v9143_v48 }
  0x4d   : > { %v9328_v17 = vsel %vm635_vm0, %v1079_v25, %v1081_v35 }
  0x4e   : > { %8044 = vmatmul.msk.f32.gmra.mxu0 %vm544_vm1, %v9146_v49  ;;  %15809 = vst [vmem:[#allocation13_spill] sm:$0xff] %v9328_v17 }
  0x52   : > { %8147 = vmatmul.msk.f32.gmra.mxu2 %vm544_vm1, %v9248_v24 }
  0x53   : > { %8091 = vmatmul.msk.f32.gmra.mxu1 %vm544_vm1, %v9122_v42  ;;  %v9343_v42 = vld [vmem:[%s8998_s22 + $0xb8] sm:$0xff] }
  0x54   : > { %8125 = vmatmul.msk.f32.gmra.mxu3 %vm544_vm1, %v9168_v55 }
  0x56   : > { %8045 = vmatmul.msk.f32.gmra.mxu0 %vm544_vm1, %v9171_v56 }
  0x5a   : > { %8148 = vmatmul.msk.f32.gmra.mxu2 %vm544_vm1, %v9268_v44 }
  0x5b   : > { %8092 = vmatmul.msk.f32.gmra.mxu1 %vm544_vm1, %v9151_v50  ;;  %v9369_v50 = vld [vmem:[%s8998_s22 + $0xc0] sm:$0xff] }
  0x5c   : > { %8126 = vmatmul.msk.f32.gmra.mxu3 %vm544_vm1, %v9190_v61 }
  0x5e   : > { %8046 = vmatmul.msk.f32.gmra.mxu0 %vm544_vm1, %v9193_v62 }
  0x62   : > { %8149 = vmatmul.msk.f32.gmra.mxu2 %vm544_vm1, %v9288_v59 }
  0x63   : > { %8093 = vmatmul.msk.f32.gmra.mxu1 %vm544_vm1, %v9065_v26 }
  0x64   : > { %8127 = vmatmul.msk.f32.gmra.mxu3 %vm544_vm1, %v9001_v2 }
  0x66   : > { %8047 = vmatmul.msk.f32.gmra.mxu0 %vm544_vm1, %v9212_v4 }
  0x6a   : > { %8150 = vmatmul.msk.f32.gmra.mxu2 %vm544_vm1, %v9308_v12 }
  0x6b   : > { %8094 = vmatmul.msk.f32.gmra.mxu1 %vm544_vm1, %v9068_v27 }
  0x6c   : > { %8177 = vmatmul.msk.f32.vlgmr.msra.gmra.mxu3 %vm544_vm1, %v1425_v16  ;;  %v1433_v16 = vsel %vm1422_vm3, %v1430_v53, %v1432_v9  ;;  %v1083_v53 = vrot.slane %v9343_v42, 2 }
  0x6e   : > { %8048 = vmatmul.msk.f32.gmra.mxu0 %vm544_vm1, %v9234_v18  ;;  %v9352_v25 = vsel %vm635_vm0, %v1081_v35, %v1083_v53  ;;  %v1085_v35 = vrot.slane %v9369_v50, 2 }
  0x6f   : > { %15811 = vst [vmem:[#allocation15_spill] sm:$0xff] %v9352_v25 }
  0x72   : > { %8151 = vmatmul.msk.f32.gmra.mxu2 %vm544_vm1, %v9328_v17 }
  0x73   : > { %8095 = vmatmul.msk.f32.gmra.mxu1 %vm544_vm1, %v9100_v36 }
  0x74   : > { %8178 = vmatmul.msk.f32.gmra.mxu3 %vm544_vm1, %v1427_v29  ;;  %v488_v29 = vrot.slane %v9217_v6, 1 }
  0x76   : > { %8049 = vmatmul.msk.f32.gmra.mxu0 %vm544_vm1, %v9254_v30  ;;  %v9338_v21 = vsel %vm454_vm2, %v486_v10, %v488_v29 }
  0x7a   : > { %8152 = vmatmul.msk.f32.gmra.mxu2 %vm544_vm1, %v9352_v25  ;;  %v492_v25 = vrot.slane %v9259_v31, 1 }
  0x7b   : > { %8096 = vmatmul.msk.f32.gmra.mxu1 %vm544_vm1, %v9125_v43 }
  0x7c   : > { %8179 = vmatmul.msk.f32.gmra.mxu3 %vm544_vm1, %v1429_v45 }
  0x7e   : > { %8050 = vmatmul.msk.f32.gmra.mxu0 %vm544_vm1, %v9274_v46 }
  0x83   : > { %8097 = vmatmul.msk.f32.gmra.mxu1 %vm544_vm1, %v9154_v51 }
  0x84   : > { %8180 = vmatmul.msk.f32.gmra.mxu3 %vm544_vm1, %v1431_v0  ;;  %v490_v0 = vrot.slane %v9239_v8, 1 }
  0x86   : > { %8051 = vmatmul.msk.f32.gmra.mxu0 %vm544_vm1, %v9294_v1  ;;  %v9364_v28 = vsel %vm454_vm2, %v488_v29, %v490_v0  ;;  %v9378_v29 = vsel %vm635_vm0, %v1083_v53, %v1085_v35  ;;  %v9390_v44 = vsel %vm454_vm2, %v490_v0, %v492_v25  ;;  %v9395_v53 = vld [vmem:[%s8998_s22 + $0xc8] sm:$0xff] }
  0x87   : > { %15815 = vst [vmem:[#allocation19_spill] sm:$0xff] %v9378_v29  ;;  %8153 = vmatmul.msk.f32.gmra.mxu2 %vm544_vm1, %v9378_v29  ;;  %v494_v29 = vrot.slane %v9279_v52, 1 }
  0x88   : > { %15819 = vst [vmem:[#allocation23_spill] sm:$0xff] %v9390_v44 }
  0x89   : > { %v9416_v60 = vsel %vm454_vm2, %v492_v25, %v494_v29 }
  0x8a   : > { %15824 = vst [vmem:[#allocation28_spill] sm:$0xff] %v9416_v60 }
  0x8b   : > { %8098 = vmatmul.msk.f32.gmra.mxu1 %vm544_vm1, %v9176_v57 }
  0x8c   : > { %8181 = vmatmul.msk.f32.gmra.mxu3 %vm544_vm1, %v1433_v16  ;;  %v1437_v16 = vsel %vm1422_vm3, %v1434_v22, %v1436_v58  ;;  %v1438_v22 = vrot.slane %v9065_v26, 4 }
  0x8e   : > { %8052 = vmatmul.msk.f32.gmra.mxu0 %vm544_vm1, %v9314_v13 }
  0x90   : > { %v9330_v37 = vpop.f32.mrf.mxu1 }
  0x91   : > { %15810 = vst [vmem:[#allocation14_spill] sm:$0xff] %v9330_v37 }
  0x93   : > { %v9335_v45 = vpop.f32.mrf.mxu0  ;;  %8099 = vmatmul.msk.f32.gmra.mxu1 %vm544_vm1, %v9198_v63 }
  0x94   : > { %8182 = vmatmul.msk.f32.gmra.mxu3 %vm544_vm1, %v1435_v38 }
  0x96   : > { %8053 = vmatmul.msk.f32.gmra.mxu0 %vm544_vm1, %v9338_v21 }
  0x97   : > { %v9354_v9 = vpop.f32.mrf.mxu3 }
  0x98   : > { %15812 = vst [vmem:[#allocation16_spill] sm:$0xff] %v9354_v9  ;;  %v9356_v10 = vpop.f32.mrf.mxu1 }
  0x99   : > { %15813 = vst [vmem:[#allocation17_spill] sm:$0xff] %v9356_v10 }
  0x9b   : > { %v9361_v38 = vpop.f32.mrf.mxu0  ;;  %8100 = vmatmul.msk.f32.gmra.mxu1 %vm544_vm1, %v9217_v6 }
  0x9c   : > { %15814 = vst [vmem:[#allocation18_spill] sm:$0xff] %v9361_v38  ;;  %8183 = vmatmul.msk.f32.gmra.mxu3 %vm544_vm1, %v1437_v16  ;;  %v1439_v16 = vsel %vm1422_vm3, %v1436_v58, %v1438_v22  ;;  %v1440_v58 = vrot.slane %v9068_v27, 4  ;;  %v9421_v27 = vld [vmem:[%s8998_s22 + $0xd0] sm:$0xff] }
  0x9e   : > { %8054 = vmatmul.msk.f32.gmra.mxu0 %vm544_vm1, %v9364_v28 }
  0x9f   : > { %v9380_v17 = vpop.f32.mrf.mxu3 }
  0xa0   : > { %15816 = vst [vmem:[#allocation20_spill] sm:$0xff] %v9380_v17  ;;  %v9382_v12 = vpop.f32.mrf.mxu1  ;;  %v1087_v17 = vrot.slane %v9395_v53, 2 }
  0xa1   : > { %15817 = vst [vmem:[#allocation21_spill] sm:$0xff] %v9382_v12  ;;  %v9603_v12 = vld [vmem:[%s8998_s22 + $0x108] sm:$0xff] }
  0xa2   : > { %v9404_v0 = vsel %vm635_vm0, %v1085_v35, %v1087_v17  ;;  %v1089_v35 = vrot.slane %v9421_v27, 2 }
  0xa3   : > { %v9387_v59 = vpop.f32.mrf.mxu0  ;;  %8101 = vmatmul.msk.f32.gmra.mxu1 %vm544_vm1, %v9239_v8  ;;  %15820 = vst [vmem:[#allocation24_spill] sm:$0xff] %v9404_v0  ;;  %8154 = vmatmul.msk.f32.gmra.mxu2 %vm544_vm1, %v9404_v0  ;;  %v496_v0 = vrot.slane %v9299_v7, 1 }
  0xa4   : > { %15818 = vst [vmem:[#allocation22_spill] sm:$0xff] %v9387_v59  ;;  %8184 = vmatmul.msk.f32.gmra.mxu3 %vm544_vm1, %v1439_v16  ;;  %v1441_v16 = vsel %vm1422_vm3, %v1438_v22, %v1440_v58  ;;  %v1442_v22 = vrot.slane %v9100_v36, 4  ;;  %v9430_v25 = vsel %vm635_vm0, %v1087_v17, %v1089_v35  ;;  %v9447_v36 = vld [vmem:[%s8998_s22 + $0xd8] sm:$0xff] }
  0xa5   : > { %15825 = vst [vmem:[#allocation29_spill] sm:$0xff] %v9430_v25  ;;  %v9442_v39 = vsel %vm454_vm2, %v494_v29, %v496_v0  ;;  %v1091_v17 = vrot.slane %v9447_v36, 2 }
  0xa6   : > { %8055 = vmatmul.msk.f32.gmra.mxu0 %vm544_vm1, %v9390_v44  ;;  %15829 = vst [vmem:[#allocation33_spill] sm:$0xff] %v9442_v39 }
  0xa7   : > { %v9406_v24 = vpop.f32.mrf.mxu3  ;;  %v9456_v29 = vsel %vm635_vm0, %v1089_v35, %v1091_v17 }
  0xa8   : > { %15821 = vst [vmem:[#allocation25_spill] sm:$0xff] %v9406_v24  ;;  %v9408_v14 = vpop.f32.mrf.mxu1 }
  0xa9   : > { %15822 = vst [vmem:[#allocation26_spill] sm:$0xff] %v9408_v14 }
  0xaa   : > { %15830 = vst [vmem:[#allocation34_spill] sm:$0xff] %v9456_v29 }
  0xab   : > { %v9413_v3 = vpop.f32.mrf.mxu0  ;;  %8102 = vmatmul.msk.f32.gmra.mxu1 %vm544_vm1, %v9259_v31  ;;  %8155 = vmatmul.msk.f32.gmra.mxu2 %vm544_vm1, %v9430_v25  ;;  %v498_v25 = vrot.slane %v9319_v20, 1 }
  0xac   : > { %15823 = vst [vmem:[#allocation27_spill] sm:$0xff] %v9413_v3  ;;  %8185 = vmatmul.msk.f32.gmra.mxu3 %vm544_vm1, %v1441_v16  ;;  %v1443_v16 = vsel %vm1422_vm3, %v1440_v58, %v1442_v22  ;;  %v1444_v58 = vrot.slane %v9125_v43, 4  ;;  %v9473_v43 = vld [vmem:[%s8998_s22 + $0xe0] sm:$0xff] }
  0xad   : > { %v1093_v35 = vrot.slane %v9473_v43, 2 }
  0xae   : > { %8056 = vmatmul.msk.f32.gmra.mxu0 %vm544_vm1, %v9416_v60 }
  0xaf   : > { %v9432_v24 = vpop.f32.mrf.mxu3 }
  0xb0   : > { %15826 = vst [vmem:[#allocation30_spill] sm:$0xff] %v9432_v24  ;;  %v9434_v54 = vpop.f32.mrf.mxu1 }
  0xb1   : > { %15827 = vst [vmem:[#allocation31_spill] sm:$0xff] %v9434_v54 }
  0xb3   : > { %v9439_v47 = vpop.f32.mrf.mxu0  ;;  %8103 = vmatmul.msk.f32.gmra.mxu1 %vm544_vm1, %v9279_v52  ;;  %8156 = vmatmul.msk.f32.gmra.mxu2 %vm544_vm1, %v9456_v29  ;;  %v500_v29 = vrot.slane %v9343_v42, 1 }
  0xb4   : > { %15828 = vst [vmem:[#allocation32_spill] sm:$0xff] %v9439_v47  ;;  %8186 = vmatmul.msk.f32.gmra.mxu3 %vm544_vm1, %v1443_v16  ;;  %v1445_v16 = vsel %vm1422_vm3, %v1442_v22, %v1444_v58  ;;  %v9468_v47 = vsel %vm454_vm2, %v496_v0, %v498_v25  ;;  %v1446_v22 = vrot.slane %v9154_v51, 4  ;;  %v9482_v0 = vsel %vm635_vm0, %v1091_v17, %v1093_v35  ;;  %v9499_v51 = vld [vmem:[%s8998_s22 + $0xe8] sm:$0xff] }
  0xb5   : > { %15834 = vst [vmem:[#allocation38_spill] sm:$0xff] %v9468_v47  ;;  %v1095_v17 = vrot.slane %v9499_v51, 2 }
  0xb6   : > { %8057 = vmatmul.msk.f32.gmra.mxu0 %vm544_vm1, %v9442_v39  ;;  %15835 = vst [vmem:[#allocation39_spill] sm:$0xff] %v9482_v0 }
  0xb7   : > { %v9458_v24 = vpop.f32.mrf.mxu3 }
  0xb8   : > { %15831 = vst [vmem:[#allocation35_spill] sm:$0xff] %v9458_v24  ;;  %v9460_v32 = vpop.f32.mrf.mxu1 }
  0xb9   : > { %15832 = vst [vmem:[#allocation36_spill] sm:$0xff] %v9460_v32 }
  0xbb   : > { %v9465_v54 = vpop.f32.mrf.mxu0  ;;  %8104 = vmatmul.msk.f32.gmra.mxu1 %vm544_vm1, %v9299_v7  ;;  %8157 = vmatmul.msk.f32.gmra.mxu2 %vm544_vm1, %v9482_v0  ;;  %v502_v0 = vrot.slane %v9369_v50, 1 }
  0xbc   : > { %15833 = vst [vmem:[#allocation37_spill] sm:$0xff] %v9465_v54  ;;  %8187 = vmatmul.msk.f32.gmra.mxu3 %vm544_vm1, %v1445_v16  ;;  %v1447_v16 = vsel %vm1422_vm3, %v1444_v58, %v1446_v22  ;;  %v1448_v58 = vrot.slane %v9176_v57, 4  ;;  %v1267_v57 = vpop.f32.mrf.mxu2 }
  0xbe   : > { %8058 = vmatmul.msk.f32.gmra.mxu0 %vm544_vm1, %v9468_v47  ;;  %v9494_v47 = vsel %vm454_vm2, %v498_v25, %v500_v29  ;;  %v9508_v25 = vsel %vm635_vm0, %v1093_v35, %v1095_v17  ;;  %v9525_v35 = vld [vmem:[%s8998_s22 + $0xf0] sm:$0xff] }
  0xbf   : > { %v9484_v24 = vpop.f32.mrf.mxu3  ;;  %15839 = vst [vmem:[#allocation43_spill] sm:$0xff] %v9494_v47 }
  0xc0   : > { %15836 = vst [vmem:[#allocation40_spill] sm:$0xff] %v9484_v24  ;;  %v9486_v32 = vpop.f32.mrf.mxu1 }
  0xc1   : > { %15837 = vst [vmem:[#allocation41_spill] sm:$0xff] %v9486_v32 }
  0xc2   : > { %15840 = vst [vmem:[#allocation44_spill] sm:$0xff] %v9508_v25 }
  0xc3   : > { %v9491_v54 = vpop.f32.mrf.mxu0  ;;  %8105 = vmatmul.msk.f32.gmra.mxu1 %vm544_vm1, %v9319_v20  ;;  %8158 = vmatmul.msk.f32.gmra.mxu2 %vm544_vm1, %v9508_v25  ;;  %v504_v25 = vrot.slane %v9395_v53, 1 }
  0xc4   : > { %15838 = vst [vmem:[#allocation42_spill] sm:$0xff] %v9491_v54  ;;  %8188 = vmatmul.msk.f32.gmra.mxu3 %vm544_vm1, %v1447_v16  ;;  %v1449_v16 = vsel %vm1422_vm3, %v1446_v22, %v1448_v58  ;;  %v1450_v22 = vrot.slane %v9198_v63, 4  ;;  %v9551_v63 = vld [vmem:[%s8998_s22 + $0xf8] sm:$0xff] }
  0xc6   : > { %8059 = vmatmul.msk.f32.gmra.mxu0 %vm544_vm1, %v9494_v47  ;;  %v9520_v47 = vsel %vm454_vm2, %v500_v29, %v502_v0 }
  0xc7   : > { %v9510_v24 = vpop.f32.mrf.mxu3  ;;  %15844 = vst [vmem:[#allocation48_spill] sm:$0xff] %v9520_v47 }
  0xc8   : > { %15841 = vst [vmem:[#allocation45_spill] sm:$0xff] %v9510_v24  ;;  %v9512_v32 = vpop.f32.mrf.mxu1  ;;  %v1097_v24 = vrot.slane %v9525_v35, 2 }
  0xc9   : > { %15842 = vst [vmem:[#allocation46_spill] sm:$0xff] %v9512_v32 }
  0xca   : > { %v9534_v29 = vsel %vm635_vm0, %v1095_v17, %v1097_v24  ;;  %v9554_v17 = vpop.f32.mrf.mxu2 }
  0xcb   : > { %v9517_v54 = vpop.f32.mrf.mxu0  ;;  %8106 = vmatmul.msk.f32.gmra.mxu1 %vm544_vm1, %v9343_v42  ;;  %15845 = vst [vmem:[#allocation49_spill] sm:$0xff] %v9534_v29  ;;  %8159 = vmatmul.msk.f32.gmra.mxu2 %vm544_vm1, %v9534_v29 }
  0xcc   : > { %15843 = vst [vmem:[#allocation47_spill] sm:$0xff] %v9517_v54  ;;  %8189 = vmatmul.msk.f32.gmra.mxu3 %vm544_vm1, %v1449_v16  ;;  %v1451_v16 = vsel %vm1422_vm3, %v1448_v58, %v1450_v22  ;;  %v1452_v58 = vrot.slane %v9217_v6, 4  ;;  %v9579_v6 = vld [vmem:[%s8998_s22 + $0x100] sm:$0xff] }
  0xce   : > { %8060 = vmatmul.msk.f32.gmra.mxu0 %vm544_vm1, %v9520_v47  ;;  %v9546_v47 = vsel %vm454_vm2, %v502_v0, %v504_v25  ;;  %v506_v0 = vrot.slane %v9421_v27, 1 }
  0xcf   : > { %v9536_v32 = vpop.f32.mrf.mxu3  ;;  %15849 = vst [vmem:[#allocation53_spill] sm:$0xff] %v9546_v47 }
  0xd0   : > { %15846 = vst [vmem:[#allocation50_spill] sm:$0xff] %v9536_v32  ;;  %v9538_v54 = vpop.f32.mrf.mxu1  ;;  %v1099_v32 = vrot.slane %v9551_v63, 2 }
  0xd1   : > { %15847 = vst [vmem:[#allocation51_spill] sm:$0xff] %v9538_v54 }
  0xd2   : > { %v9562_v29 = vsel %vm635_vm0, %v1097_v24, %v1099_v32  ;;  %v1101_v24 = vrot.slane %v9579_v6, 2 }
  0xd3   : > { %v9543_v14 = vpop.f32.mrf.mxu0  ;;  %8107 = vmatmul.msk.f32.gmra.mxu1 %vm544_vm1, %v9369_v50  ;;  %15850 = vst [vmem:[#allocation54_spill] sm:$0xff] %v9562_v29  ;;  %8160 = vmatmul.msk.f32.gmra.mxu2 %vm544_vm1, %v9562_v29  ;;  %v9587_v29 = vpop.f32.mrf.mxu2 }
  0xd4   : > { %15848 = vst [vmem:[#allocation52_spill] sm:$0xff] %v9543_v14  ;;  %8190 = vmatmul.msk.f32.gmra.mxu3 %vm544_vm1, %v1451_v16  ;;  %v1453_v16 = vsel %vm1422_vm3, %v1450_v22, %v1452_v58  ;;  %v1454_v22 = vrot.slane %v9239_v8, 4 }
  0xd6   : > { %8061 = vmatmul.msk.f32.gmra.mxu0 %vm544_vm1, %v9546_v47  ;;  %v9574_v47 = vsel %vm454_vm2, %v504_v25, %v506_v0  ;;  %v9590_v25 = vsel %vm635_vm0, %v1099_v32, %v1101_v24  ;;  %v1103_v32 = vrot.slane %v9603_v12, 2 }
  0xd7   : > { %v9564_v54 = vpop.f32.mrf.mxu3  ;;  %15854 = vst [vmem:[#allocation58_spill] sm:$0xff] %v9574_v47 }
  0xd8   : > { %15851 = vst [vmem:[#allocation55_spill] sm:$0xff] %v9564_v54  ;;  %v9566_v14 = vpop.f32.mrf.mxu1  ;;  %v508_v54 = vrot.slane %v9447_v36, 1 }
  0xd9   : > { %15852 = vst [vmem:[#allocation56_spill] sm:$0xff] %v9566_v14 }
  0xda   : > { %15855 = vst [vmem:[#allocation59_spill] sm:$0xff] %v9590_v25 }
  0xdb   : > { %v9571_v3 = vpop.f32.mrf.mxu0  ;;  %8108 = vmatmul.msk.f32.gmra.mxu1 %vm544_vm1, %v9395_v53  ;;  %8161 = vmatmul.msk.f32.gmra.mxu2 %vm544_vm1, %v9590_v25  ;;  %v9614_v25 = vsel %vm635_vm0, %v1101_v24, %v1103_v32 }
  0xdc   : > { %15853 = vst [vmem:[#allocation57_spill] sm:$0xff] %v9571_v3  ;;  %8191 = vmatmul.msk.f32.gmra.mxu3 %vm544_vm1, %v1453_v16  ;;  %v1455_v3 = vsel %vm1422_vm3, %v1452_v58, %v1454_v22  ;;  %v1456_v58 = vrot.slane %v9259_v31, 4 }
  0xdd   : > { %15858 = vst [vmem:[#allocation62_spill] sm:$0xff] %v9614_v25 }
  0xde   : > { %8062 = vmatmul.msk.f32.gmra.mxu0 %vm544_vm1, %v9574_v47  ;;  %v9598_v47 = vsel %vm454_vm2, %v506_v0, %v508_v54  ;;  %v510_v0 = vrot.slane %v9473_v43, 1 }
  0xdf   : > { %v9592_v14 = vpop.f32.mrf.mxu3  ;;  %15857 = vst [vmem:[#allocation61_spill] sm:$0xff] %v9598_v47 }
  0xe0   : > { %15856 = vst [vmem:[#allocation60_spill] sm:$0xff] %v9592_v14  ;;  %v931_v16 = vpop.f32.mrf.mxu1  ;;  %v9626_v31 = vsel %vm454_vm2, %v508_v54, %v510_v0 }
  0xe1   : > { %15860 = vst [vmem:[#allocation64_spill] sm:$0xff] %v9626_v31 }
  0xe3   : > { %v686_v39 = vpop.f32.mrf.mxu0  ;;  %8109 = vmatmul.msk.f32.gmra.mxu1 %vm544_vm1, %v9421_v27  ;;  %8162 = vmatmul.msk.f32.gmra.mxu2 %vm544_vm1, %v9614_v25 }
  0xe4   : > { %v932_v8 = vadd.f32 %v931_v16, %v686_v39  ;;  %8192 = vmatmul.msk.f32.gmra.mxu3 %vm544_vm1, %v1455_v3  ;;  %v9620_v3 = vpop.f32.mrf.mxu2  ;;  %v1457_v16 = vsel %vm1422_vm3, %v1454_v22, %v1456_v58  ;;  %v512_v22 = vrot.slane %v9499_v51, 1 }
  0xe6   : > { %8063 = vmatmul.msk.f32.gmra.mxu0 %vm544_vm1, %v9598_v47  ;;  %v9610_v14 = vadd.f32 %v1267_v57, %v932_v8  ;;  %v9631_v57 = vld [vmem:[%s8998_s22 + $0x110] sm:$0xff]  ;;  %v1458_v8 = vrot.slane %v9279_v52, 4 }
  0xe7   : > { %v9616_v39 = vpop.f32.mrf.mxu3  ;;  %v1105_v24 = vrot.slane %v9631_v57, 2 }
  0xe8   : > { %15859 = vst [vmem:[#allocation63_spill] sm:$0xff] %v9616_v39  ;;  %v1459_v47 = vsel %vm1422_vm3, %v1456_v58, %v1458_v8  ;;  %v9650_v39 = vsel %vm454_vm2, %v510_v0, %v512_v22  ;;  %v514_v58 = vrot.slane %v9525_v35, 1 }
  0xe9   : > { %v9640_v25 = vsel %vm635_vm0, %v1103_v32, %v1105_v24  ;;  %15863 = vst [vmem:[#allocation67_spill] sm:$0xff] %v9650_v39  ;;  %v1107_v32 = vrot.slane %v9018_v11, 2 }
  0xea   : > { %15861 = vst [vmem:[#allocation65_spill] sm:$0xff] %v9640_v25  ;;  %v9673_v60 = vsel %vm454_vm2, %v512_v22, %v514_v58 }
  0xeb   : > { %v9623_v59 = vpop.f32.mrf.mxu0  ;;  %8110 = vmatmul.msk.f32.gmra.mxu1 %vm544_vm1, %v9447_v36  ;;  %8163 = vmatmul.msk.f32.gmra.mxu2 %vm544_vm1, %v9640_v25  ;;  %v1460_v25 = vrot.slane %v9299_v7, 4  ;;  %15866 = vst [vmem:[#allocation70_spill] sm:$0xff] %v9673_v60 }
  0xec   : > { %8193 = vmatmul.msk.f32.gmra.mxu3 %vm544_vm1, %v1457_v16  ;;  %v9654_v52 = vpop.f32.mrf.mxu2 }
  0xed   : > { %v1461_v9 = vsel %vm1422_vm3, %v1458_v8, %v1460_v25  ;;  %v516_v8 = vrot.slane %v9551_v63, 1 }
  0xee   : > { %8064 = vmatmul.msk.f32.gmra.mxu0 %vm544_vm1, %v9626_v31  ;;  %v9663_v31 = vsel %vm635_vm0, %v1105_v24, %v1107_v32  ;;  %v1109_v24 = vrot.slane %v9030_v15, 2 }
  0xef   : > { %v9642_v54 = vpop.f32.mrf.mxu3  ;;  %15864 = vst [vmem:[#allocation68_spill] sm:$0xff] %v9663_v31  ;;  %v9696_v10 = vsel %vm454_vm2, %v514_v58, %v516_v8 }
  0xf0   : > { %15862 = vst [vmem:[#allocation66_spill] sm:$0xff] %v9642_v54 }
  0xf1   : > { %15869 = vst [vmem:[#allocation73_spill] sm:$0xff] %v9696_v10 }
  0xf3   : > { %v9647_v16 = vpop.f32.mrf.mxu0  ;;  %8111 = vmatmul.msk.f32.gmra.mxu1 %vm544_vm1, %v9473_v43  ;;  %8164 = vmatmul.msk.f32.gmra.mxu2 %vm544_vm1, %v9663_v31  ;;  %v1462_v31 = vrot.slane %v9319_v20, 4  ;;  %v1111_v20 = vrot.slane %v9043_v19, 2 }
  0xf4   : > { %8194 = vmatmul.msk.f32.gmra.mxu3 %vm544_vm1, %v1459_v47  ;;  %v9678_v7 = vpop.f32.mrf.mxu2 }
  0xf6   : > { %8065 = vmatmul.msk.f32.gmra.mxu0 %vm544_vm1, %v9650_v39  ;;  %v9686_v39 = vsel %vm635_vm0, %v1107_v32, %v1109_v24  ;;  %v1464_v32 = vrot.slane %v9343_v42, 4  ;;  %v1113_v42 = vrot.slane %v9056_v23, 2 }
  0xf7   : > { %v9665_v0 = vpop.f32.mrf.mxu3  ;;  %15867 = vst [vmem:[#allocation71_spill] sm:$0xff] %v9686_v39 }
  0xf8   : > { %15865 = vst [vmem:[#allocation69_spill] sm:$0xff] %v9665_v0 }
  0xfb   : > { %v9670_v47 = vpop.f32.mrf.mxu0  ;;  %8112 = vmatmul.msk.f32.gmra.mxu1 %vm544_vm1, %v9499_v51  ;;  %8165 = vmatmul.msk.f32.gmra.mxu2 %vm544_vm1, %v9686_v39 }
  0xfc   : > { %8195 = vmatmul.msk.f32.gmra.mxu3 %vm544_vm1, %v1461_v9  ;;  %v1463_v9 = vsel %vm1422_vm3, %v1460_v25, %v1462_v31  ;;  %v9705_v39 = vpop.f32.mrf.mxu2  ;;  %v518_v25 = vrot.slane %v9579_v6, 1 }
  0xfe   : > { %8066 = vmatmul.msk.f32.gmra.mxu0 %vm544_vm1, %v9673_v60  ;;  %v9709_v60 = vsel %vm635_vm0, %v1109_v24, %v1111_v20  ;;  %v1466_v24 = vrot.slane %v9369_v50, 4  ;;  %v1115_v50 = vrot.slane %v9089_v33, 2 }
  0xff   : > { %v9688_v22 = vpop.f32.mrf.mxu3  ;;  %15870 = vst [vmem:[#allocation74_spill] sm:$0xff] %v9709_v60 }
 0x100   : > { %15868 = vst [vmem:[#allocation72_spill] sm:$0xff] %v9688_v22 }
 0x103   : > { %v9693_v0 = vpop.f32.mrf.mxu0  ;;  %8113 = vmatmul.msk.f32.gmra.mxu1 %vm544_vm1, %v9525_v35  ;;  %8166 = vmatmul.msk.f32.gmra.mxu2 %vm544_vm1, %v9709_v60  ;;  %v520_v60 = vrot.slane %v9603_v12, 1 }
 0x104   : > { %8196 = vmatmul.msk.f32.gmra.mxu3 %vm544_vm1, %v1463_v9  ;;  %v1465_v9 = vsel %vm1422_vm3, %v1462_v31, %v1464_v32  ;;  %v9730_v31 = vsel %vm635_vm0, %v1111_v20, %v1113_v42  ;;  %v1468_v20 = vrot.slane %v9395_v53, 4  ;;  %v1117_v53 = vrot.slane %v9114_v40, 2 }
 0x105   : > { %15873 = vst [vmem:[#allocation77_spill] sm:$0xff] %v9730_v31 }
 0x106   : > { %8067 = vmatmul.msk.f32.gmra.mxu0 %vm544_vm1, %v9696_v10  ;;  %v9719_v10 = vsel %vm454_vm2, %v516_v8, %v518_v25  ;;  %v9736_v8 = vpop.f32.mrf.mxu2 }
 0x107   : > { %v9711_v58 = vpop.f32.mrf.mxu3  ;;  %15872 = vst [vmem:[#allocation76_spill] sm:$0xff] %v9719_v10 }
 0x108   : > { %15871 = vst [vmem:[#allocation75_spill] sm:$0xff] %v9711_v58 }
 0x10b   : > { %v9716_v22 = vpop.f32.mrf.mxu0  ;;  %8114 = vmatmul.msk.f32.gmra.mxu1 %vm544_vm1, %v9551_v63  ;;  %8167 = vmatmul.msk.f32.gmra.mxu2 %vm544_vm1, %v9730_v31  ;;  %v522_v31 = vrot.slane %v9631_v57, 1 }
 0x10c   : > { %8197 = vmatmul.msk.f32.gmra.mxu3 %vm544_vm1, %v1465_v9  ;;  %v1467_v9 = vsel %vm1422_vm3, %v1464_v32, %v1466_v24  ;;  %v9753_v32 = vsel %vm635_vm0, %v1113_v42, %v1115_v50  ;;  %v1470_v42 = vrot.slane %v9421_v27, 4 }
 0x10d   : > { %15876 = vst [vmem:[#allocation80_spill] sm:$0xff] %v9753_v32 }
 0x10e   : > { %8068 = vmatmul.msk.f32.gmra.mxu0 %vm544_vm1, %v9719_v10  ;;  %v9742_v10 = vsel %vm454_vm2, %v518_v25, %v520_v60  ;;  %v1469_v25 = vsel %vm1422_vm3, %v1466_v24, %v1468_v20  ;;  %v9762_v54 = vpop.f32.mrf.mxu2  ;;  %v524_v24 = vrot.slane %v9018_v11, 1  ;;  %v1119_v11 = vrot.slane %v9143_v48, 2 }
 0x10f   : > { %v9732_v58 = vpop.f32.mrf.mxu3  ;;  %15875 = vst [vmem:[#allocation79_spill] sm:$0xff] %v9742_v10 }
 0x110   : > { %15874 = vst [vmem:[#allocation78_spill] sm:$0xff] %v9732_v58  ;;  %v9786_v44 = vsel %vm454_vm2, %v522_v31, %v524_v24 }
 0x111   : > { %15881 = vst [vmem:[#allocation85_spill] sm:$0xff] %v9786_v44 }
 0x113   : > { %v9739_v38 = vpop.f32.mrf.mxu0  ;;  %8115 = vmatmul.msk.f32.gmra.mxu1 %vm544_vm1, %v9579_v6  ;;  %8168 = vmatmul.msk.f32.gmra.mxu2 %vm544_vm1, %v9753_v32  ;;  %v9776_v32 = vsel %vm635_vm0, %v1115_v50, %v1117_v53  ;;  %v1472_v50 = vrot.slane %v9447_v36, 4  ;;  %v1121_v36 = vrot.slane %v9168_v55, 2 }
 0x114   : > { %8198 = vmatmul.msk.f32.gmra.mxu3 %vm544_vm1, %v1467_v9  ;;  %15879 = vst [vmem:[#allocation83_spill] sm:$0xff] %v9776_v32 }
 0x116   : > { %8069 = vmatmul.msk.f32.gmra.mxu0 %vm544_vm1, %v9742_v10  ;;  %v9765_v10 = vsel %vm454_vm2, %v520_v60, %v522_v31  ;;  %v1471_v60 = vsel %vm1422_vm3, %v1468_v20, %v1470_v42  ;;  %v9790_v27 = vpop.f32.mrf.mxu2  ;;  %v526_v20 = vrot.slane %v9030_v15, 1  ;;  %v934_v15 = vpop.f32.mrf.mxu1 }
 0x117   : > { %v9755_v58 = vpop.f32.mrf.mxu3  ;;  %15878 = vst [vmem:[#allocation82_spill] sm:$0xff] %v9765_v10 }
 0x118   : > { %15877 = vst [vmem:[#allocation81_spill] sm:$0xff] %v9755_v58 }
 0x11b   : > { %v9760_v9 = vpop.f32.mrf.mxu0  ;;  %8116 = vmatmul.msk.f32.gmra.mxu1 %vm544_vm1, %v9603_v12  ;;  %8169 = vmatmul.msk.f32.gmra.mxu2 %vm544_vm1, %v9776_v32  ;;  %v9799_v32 = vsel %vm635_vm0, %v1117_v53, %v1119_v11  ;;  %v1474_v53 = vrot.slane %v9473_v43, 4  ;;  %v1123_v43 = vrot.slane %v9190_v61, 2 }
 0x11c   : > { %8199 = vmatmul.msk.f32.gmra.mxu3 %vm544_vm1, %v1469_v25  ;;  %15882 = vst [vmem:[#allocation86_spill] sm:$0xff] %v9799_v32 }
 0x11e   : > { %8070 = vmatmul.msk.f32.gmra.mxu0 %vm544_vm1, %v9765_v10  ;;  %v1473_v10 = vsel %vm1422_vm3, %v1470_v42, %v1472_v50  ;;  %v9820_v42 = vsel %vm635_vm0, %v1119_v11, %v1121_v36  ;;  %v530_v11 = vrot.slane %v9056_v23, 1  ;;  %v9855_v23 = vrot.slane %v9001_v2, 2 }
 0x11f   : > { %v9778_v58 = vpop.f32.mrf.mxu3  ;;  %15885 = vst [vmem:[#allocation89_spill] sm:$0xff] %v9820_v42 }
 0x120   : > { %15880 = vst [vmem:[#allocation84_spill] sm:$0xff] %v9778_v58  ;;  %v9809_v58 = vsel %vm454_vm2, %v524_v24, %v526_v20 }
 0x121   : > { %15884 = vst [vmem:[#allocation88_spill] sm:$0xff] %v9809_v58 }
 0x122   : > { %15891 = vst [vmem:[#allocation95_spill] sm:$0xff] %v9855_v23 }
 0x123   : > { %v9783_v25 = vpop.f32.mrf.mxu0  ;;  %8117 = vmatmul.msk.f32.gmra.mxu1 %vm544_vm1, %v9631_v57  ;;  %8170 = vmatmul.msk.f32.gmra.mxu2 %vm544_vm1, %v9799_v32  ;;  %v528_v32 = vrot.slane %v9043_v19, 1  ;;  %v1476_v19 = vrot.slane %v9499_v51, 4  ;;  %v1478_v51 = vrot.slane %v9525_v35, 4 }
 0x124   : > { %8200 = vmatmul.msk.f32.gmra.mxu3 %vm544_vm1, %v1471_v60 }
 0x126   : > { %8071 = vmatmul.msk.f32.gmra.mxu0 %vm544_vm1, %v9786_v44  ;;  %v9816_v44 = vpop.f32.mrf.mxu2 }
 0x127   : > { %v9801_v31 = vpop.f32.mrf.mxu3 }
 0x128   : > { %15883 = vst [vmem:[#allocation87_spill] sm:$0xff] %v9801_v31 }
 0x12b   : > { %v9806_v60 = vpop.f32.mrf.mxu0  ;;  %8171 = vmatmul.msk.f32.gmra.mxu2 %vm544_vm1, %v9820_v42  ;;  %v9839_v42 = vsel %vm635_vm0, %v1121_v36, %v1123_v43  ;;  %v532_v36 = vrot.slane %v9089_v33, 1 }
 0x12c   : > { %8201 = vmatmul.msk.f32.gmra.mxu3 %vm544_vm1, %v1473_v10  ;;  %v1475_v10 = vsel %vm1422_vm3, %v1472_v50, %v1474_v53  ;;  %15888 = vst [vmem:[#allocation92_spill] sm:$0xff] %v9839_v42  ;;  %v937_v50 = vpop.f32.mrf.mxu1 }
 0x12d   : > { %v9877_v33 = vsel %vm454_vm2, %v530_v11, %v532_v36 }
 0x12e   : > { %8072 = vmatmul.msk.f32.gmra.mxu0 %vm544_vm1, %v9809_v58  ;;  %v9830_v58 = vsel %vm454_vm2, %v526_v20, %v528_v32  ;;  %v9845_v20 = vpop.f32.mrf.mxu2 }
 0x12f   : > { %v9822_v31 = vpop.f32.mrf.mxu3  ;;  %15887 = vst [vmem:[#allocation91_spill] sm:$0xff] %v9830_v58 }
 0x130   : > { %15886 = vst [vmem:[#allocation90_spill] sm:$0xff] %v9822_v31 }
 0x131   : > { %15889 = vst [vmem:[#allocation93_spill] sm:$0xff] %v9845_v20  ;;  %v935_v20 = vadd.f32 %v934_v15, %v9623_v59 }
 0x133   : > { %v9827_v24 = vpop.f32.mrf.mxu0  ;;  %8172 = vmatmul.msk.f32.gmra.mxu2 %vm544_vm1, %v9839_v42 }
 0x134   : > { %8202 = vmatmul.msk.f32.gmra.mxu3 %vm544_vm1, %v1475_v10  ;;  %v1477_v10 = vsel %vm1422_vm3, %v1474_v53, %v1476_v19  ;;  %v9863_v53 = vsel %vm635_vm0, %v1123_v43, %v9855_v23  ;;  %v940_v2 = vpop.f32.mrf.mxu1  ;;  %v534_v43 = vrot.slane %v9114_v40, 1  ;;  %v1482_v40 = vrot.slane %v9579_v6, 4 }
 0x135   : > { %15892 = vst [vmem:[#allocation96_spill] sm:$0xff] %v9863_v53 }
 0x136   : > { %8073 = vmatmul.msk.f32.gmra.mxu0 %vm544_vm1, %v9830_v58  ;;  %v9851_v58 = vsel %vm454_vm2, %v528_v32, %v530_v11  ;;  %v938_v11 = vadd.f32 %v937_v50, %v9647_v16 }
 0x137   : > { %v9841_v31 = vpop.f32.mrf.mxu3 }
 0x13b   : > { %v9848_v37 = vpop.f32.mrf.mxu0  ;;  %8173 = vmatmul.msk.f32.gmra.mxu2 %vm544_vm1, %v9863_v53  ;;  %v9894_v53 = vsel %vm454_vm2, %v532_v36, %v534_v43  ;;  %v941_v36 = vadd.f32 %v940_v2, %v9670_v47 }
 0x13c   : > { %15890 = vst [vmem:[#allocation94_spill] sm:$0xff] %v9848_v37  ;;  %8203 = vmatmul.msk.f32.gmra.mxu3 %vm544_vm1, %v1477_v10  ;;  %v1479_v10 = vsel %vm1422_vm3, %v1476_v19, %v1478_v51  ;;  %v9872_v37 = vpop.f32.mrf.mxu2 }
 0x13d   : > { %15893 = vst [vmem:[#allocation97_spill] sm:$0xff] %v9872_v37  ;;  %v1385_v6 = vadd.f32 %v9620_v3, %v941_v36  ;;  %v540_v3 = vrot.slane %v9190_v61, 1  ;;  %v8840_v61 = vld [vmem:[%s8998_s22 + $0x118] sm:$0xff] }
 0x13e   : > { %8074 = vmatmul.msk.f32.gmra.mxu0 %vm544_vm1, %v9851_v58 }
 0x13f   : > { %v1654_v42 = vpop.f32.mrf.mxu3 }
 0x140   : > { %v9868_v32 = vadd.f32 %v1654_v42, %v9610_v14  ;;  %v1480_v14 = vrot.slane %v9551_v63, 4  ;;  %v1383_v42 = vadd.f32 %v9554_v17, %v935_v20  ;;  %v943_v63 = vpop.f32.mrf.mxu1  ;;  %v1384_v17 = vadd.f32 %v9587_v29, %v938_v11 }
 0x141   : > { %v536_v20 = vrot.slane %v9143_v48, 1  ;;  %v1484_v48 = vrot.slane %v9603_v12, 4  ;;  %v944_v11 = vadd.f32 %v943_v63, %v9693_v0 }
 0x142   : > { %v1481_v15 = vsel %vm1422_vm3, %v1478_v51, %v1480_v14  ;;  %v1483_v51 = vsel %vm1422_vm3, %v1480_v14, %v1482_v40  ;;  %v538_v14 = vrot.slane %v9168_v55, 1  ;;  %v1486_v55 = vrot.slane %v9631_v57, 4 }
 0x143   : > { %v9874_v35 = vpop.f32.mrf.mxu0  ;;  %8174 = vmatmul.msk.f32.gmra.mxu2 %vm544_vm1, %v9855_v23  ;;  %v1386_v12 = vadd.f32 %v9654_v52, %v944_v11  ;;  %v1488_v57 = vrot.slane %v8840_v61, 4 }
 0x144   : > { %15894 = vst [vmem:[#allocation98_spill] sm:$0xff] %v9874_v35  ;;  %8204 = vmatmul.msk.f32.gmra.mxu3 %vm544_vm1, %v1479_v10  ;;  %v9896_v37 = vpop.f32.mrf.mxu2 }
 0x145   : > { %15896 = vst [vmem:[#allocation100_spill] sm:$0xff] %v9896_v37  ;;  %v10069_v37 = vld [vmem:[%s8998_s22 + $0x38] sm:$0xff] }
 0x146   : > { %8075 = vmatmul.msk.f32.gmra.mxu0 %vm544_vm1, %v9877_v33 }
 0x147   : > { %v1657_v19 = vpop.f32.mrf.mxu3 }
 0x148   : > { %v9887_v59 = vadd.f32 %v1657_v19, %v1383_v42  ;;  %v9911_v19 = vsel %vm454_vm2, %v534_v43, %v536_v20  ;;  %v1485_v43 = vsel %vm1422_vm3, %v1482_v40, %v1484_v48 }
 0x14b   : > { %v9891_v10 = vpop.f32.mrf.mxu0 }
 0x14c   : > { %15895 = vst [vmem:[#allocation99_spill] sm:$0xff] %v9891_v10  ;;  %8205 = vmatmul.msk.f32.gmra.mxu3 %vm544_vm1, %v1481_v15  ;;  %v946_v15 = vpop.f32.mrf.mxu1  ;;  %v9917_v29 = vpop.f32.mrf.mxu2 }
 0x14d   : > { %15898 = vst [vmem:[#allocation102_spill] sm:$0xff] %v9917_v29  ;;  %v947_v36 = vadd.f32 %v946_v15, %v9716_v22  ;;  %v1489_v15 = vsel %vm1422_vm3, %v1486_v55, %v1488_v57 }
 0x14e   : > { %8076 = vmatmul.msk.f32.gmra.mxu0 %vm544_vm1, %v9894_v53 }
 0x14f   : > { %v1660_v16 = vpop.f32.mrf.mxu3  ;;  %v1387_v52 = vadd.f32 %v9678_v7, %v947_v36  ;;  %v8841_v7 = vld [vmem:[%s8998_s22 + $0x120] sm:$0xff] }
 0x150   : > { %v9904_v50 = vadd.f32 %v1660_v16, %v1384_v17  ;;  %v9928_v16 = vsel %vm454_vm2, %v536_v20, %v538_v14  ;;  %v1487_v20 = vsel %vm1422_vm3, %v1484_v48, %v1486_v55  ;;  %v8842_v36 = vld [vmem:[%s8998_s22] sm:$0xff] }
 0x153   : > { %v9908_v42 = vpop.f32.mrf.mxu0 }
 0x154   : > { %15897 = vst [vmem:[#allocation101_spill] sm:$0xff] %v9908_v42  ;;  %8206 = vmatmul.msk.f32.gmra.mxu3 %vm544_vm1, %v1483_v51  ;;  %v949_v40 = vpop.f32.mrf.mxu1  ;;  %v9936_v0 = vpop.f32.mrf.mxu2  ;;  %v401_v42 = vld [vmem:[%s8998_s22 + $0x168] sm:$0xff] }
 0x155   : > { %15900 = vst [vmem:[#allocation104_spill] sm:$0xff] %v9936_v0 }
 0x156   : > { %8077 = vmatmul.msk.f32.gmra.mxu0 %vm544_vm1, %v9911_v19 }
 0x157   : > { %v1663_v47 = vpop.f32.mrf.mxu3 }
 0x158   : > { %v9921_v2 = vadd.f32 %v1663_v47, %v1385_v6  ;;  %v9945_v47 = vsel %vm454_vm2, %v538_v14, %v540_v3  ;;  %v950_v14 = vadd.f32 %v949_v40, %v9739_v38  ;;  %v1038_v38 = vrot.slane %v8842_v36, 2  ;;  %v8843_v40 = vld [vmem:[%s8998_s22 + $0x8] sm:$0xff] }
 0x159   : > { %v1039_v61 = vrot.slane %v8843_v40, 2 }
 0x15a   : > { %v1388_v55 = vadd.f32 %v9705_v39, %v950_v14  ;;  %v8844_v39 = vld [vmem:[%s8998_s22 + $0x128] sm:$0xff] }
 0x15b   : > { %v9925_v17 = vpop.f32.mrf.mxu0  ;;  %v1492_v14 = vrot.slane %v8844_v39, 4 }
 0x15c   : > { %15899 = vst [vmem:[#allocation103_spill] sm:$0xff] %v9925_v17  ;;  %8207 = vmatmul.msk.f32.gmra.mxu3 %vm544_vm1, %v1485_v43  ;;  %v952_v22 = vpop.f32.mrf.mxu1  ;;  %v9956_v11 = vpop.f32.mrf.mxu2 }
 0x15d   : > { %15902 = vst [vmem:[#allocation106_spill] sm:$0xff] %v9956_v11  ;;  %v1040_v11 = vsel %vm635_vm0, %v1038_v38, %v1039_v61 }
 0x15e   : > { %8078 = vmatmul.msk.f32.gmra.mxu0 %vm544_vm1, %v9928_v16 }
 0x15f   : > { %v1666_v51 = vpop.f32.mrf.mxu3 }
 0x160   : > { %v9938_v63 = vadd.f32 %v1666_v51, %v1386_v12  ;;  %v9962_v51 = vsel %vm454_vm2, %v540_v3, %v9006_v5 }
 0x163   : > { %v9942_v6 = vpop.f32.mrf.mxu0 }
 0x164   : > { %15901 = vst [vmem:[#allocation105_spill] sm:$0xff] %v9942_v6  ;;  %8208 = vmatmul.msk.f32.gmra.mxu3 %vm544_vm1, %v1487_v20  ;;  %v1490_v20 = vrot.slane %v8841_v7, 4  ;;  %v955_v7 = vpop.f32.mrf.mxu1  ;;  %v9978_v0 = vpop.f32.mrf.mxu2 }
 0x165   : > { %15905 = vst [vmem:[#allocation109_spill] sm:$0xff] %v9978_v0  ;;  %v956_v40 = vadd.f32 %v955_v7, %v9783_v25 }
 0x166   : > { %8079 = vmatmul.msk.f32.gmra.mxu0 %vm544_vm1, %v9945_v47  ;;  %v1491_v3 = vsel %vm1422_vm3, %v1488_v57, %v1490_v20  ;;  %v9985_v57 = vld [vmem:[%s8998_s22 + $0x10] sm:$0xff]  ;;  %v1493_v38 = vsel %vm1422_vm3, %v1490_v20, %v1492_v14  ;;  %v10002_v20 = vld [vmem:[%s8998_s22 + $0x18] sm:$0xff] }
 0x167   : > { %v1669_v48 = vpop.f32.mrf.mxu3  ;;  %v1043_v25 = vrot.slane %v10002_v20, 2 }
 0x168   : > { %v9952_v43 = vadd.f32 %v1669_v48, %v1387_v52 }
 0x16b   : > { %v9958_v12 = vpop.f32.mrf.mxu0 }
 0x16c   : > { %15903 = vst [vmem:[#allocation107_spill] sm:$0xff] %v9958_v12  ;;  %8209 = vmatmul.msk.f32.gmra.mxu3 %vm544_vm1, %v1489_v15  ;;  %v953_v15 = vadd.f32 %v952_v22, %v9760_v9  ;;  %v1041_v9 = vrot.slane %v9985_v57, 2  ;;  %v9998_v39 = vpop.f32.mrf.mxu2 }
 0x16d   : > { %15907 = vst [vmem:[#allocation111_spill] sm:$0xff] %v9998_v39 }
 0x16e   : > { %8080 = vmatmul.msk.f32.gmra.mxu0 %vm544_vm1, %v9962_v51 }
 0x16f   : > { %v1672_v52 = vpop.f32.mrf.mxu3 }
 0x170   : > { %v9971_v48 = vadd.f32 %v1672_v52, %v1388_v55  ;;  %v1389_v55 = vadd.f32 %v9736_v8, %v953_v15  ;;  %v8846_v8 = vld [vmem:[%s8998_s22 + $0x130] sm:$0xff] }
 0x171   : > { %v1494_v15 = vrot.slane %v8846_v8, 4 }
 0x173   : > { %v9975_v23 = vpop.f32.mrf.mxu0 }
 0x174   : > { %15904 = vst [vmem:[#allocation108_spill] sm:$0xff] %v9975_v23  ;;  %8210 = vmatmul.msk.f32.gmra.mxu3 %vm544_vm1, %v1491_v3  ;;  %v958_v3 = vpop.f32.mrf.mxu1 }
 0x176   : > { %8130 = vmatmul.msk.f32.vlgmr.msrb.gmra.mxu0 %vm544_vm1, %v1040_v11  ;;  %v1042_v11 = vsel %vm635_vm0, %v1039_v61, %v1041_v9  ;;  %v1495_v61 = vsel %vm1422_vm3, %v1492_v14, %v1494_v15 }
 0x177   : > { %v1675_v22 = vpop.f32.mrf.mxu3 }
 0x178   : > { %v9988_v36 = vadd.f32 %v1675_v22, %v1389_v55  ;;  %v1390_v55 = vadd.f32 %v9762_v54, %v956_v40  ;;  %v8848_v54 = vld [vmem:[%s8998_s22 + $0x138] sm:$0xff] }
 0x179   : > { %v1496_v40 = vrot.slane %v8848_v54, 4 }
 0x17b   : > { %v9992_v52 = vpop.f32.mrf.mxu0 }
 0x17c   : > { %15906 = vst [vmem:[#allocation110_spill] sm:$0xff] %v9992_v52  ;;  %8211 = vmatmul.msk.f32.gmra.mxu3 %vm544_vm1, %v1493_v38  ;;  %v959_v38 = vadd.f32 %v958_v3, %v9806_v60  ;;  %v10020_v3 = vpop.f32.mrf.mxu2 }
 0x17d   : > { %15909 = vst [vmem:[#allocation113_spill] sm:$0xff] %v10020_v3 }
 0x17e   : > { %8131 = vmatmul.msk.f32.gmra.mxu0 %vm544_vm1, %v1042_v11  ;;  %v1044_v11 = vsel %vm635_vm0, %v1041_v9, %v1043_v25  ;;  %v1391_v8 = vadd.f32 %v9790_v27, %v959_v38  ;;  %v1497_v9 = vsel %vm1422_vm3, %v1494_v15, %v1496_v40  ;;  %v8850_v27 = vld [vmem:[%s8998_s22 + $0x140] sm:$0xff] }
 0x17f   : > { %v1678_v7 = vpop.f32.mrf.mxu3  ;;  %v1498_v38 = vrot.slane %v8850_v27, 4 }
 0x180   : > { %v10005_v22 = vadd.f32 %v1678_v7, %v1390_v55  ;;  %v10017_v55 = vld [vmem:[%s8998_s22 + $0x20] sm:$0xff]  ;;  %v961_v7 = vpop.f32.mrf.mxu1 }
 0x181   : > { %v1045_v14 = vrot.slane %v10017_v55, 2 }
 0x183   : > { %v10009_v0 = vpop.f32.mrf.mxu0  ;;  %v1046_v54 = vsel %vm635_vm0, %v1043_v25, %v1045_v14 }
 0x184   : > { %15908 = vst [vmem:[#allocation112_spill] sm:$0xff] %v10009_v0  ;;  %8212 = vmatmul.msk.f32.gmra.mxu3 %vm544_vm1, %v1495_v61  ;;  %v962_v61 = vadd.f32 %v961_v7, %v9827_v24  ;;  %v1499_v7 = vsel %vm1422_vm3, %v1496_v40, %v1498_v38  ;;  %v10040_v25 = vpop.f32.mrf.mxu2 }
 0x185   : > { %15911 = vst [vmem:[#allocation115_spill] sm:$0xff] %v10040_v25 }
 0x186   : > { %8132 = vmatmul.msk.f32.gmra.mxu0 %vm544_vm1, %v1044_v11  ;;  %v1392_v3 = vadd.f32 %v9816_v44, %v962_v61  ;;  %v8852_v44 = vld [vmem:[%s8998_s22 + $0x148] sm:$0xff] }
 0x187   : > { %v1681_v60 = vpop.f32.mrf.mxu3  ;;  %v1500_v61 = vrot.slane %v8852_v44, 4 }
 0x188   : > { %v10022_v39 = vadd.f32 %v1681_v60, %v1391_v8  ;;  %v10034_v8 = vld [vmem:[%s8998_s22 + $0x28] sm:$0xff] }
 0x189   : > { %v1047_v15 = vrot.slane %v10034_v8, 2  ;;  %v1501_v40 = vsel %vm1422_vm3, %v1498_v38, %v1500_v61  ;;  %v1051_v38 = vrot.slane %v10069_v37, 2 }
 0x18b   : > { %v10026_v11 = vpop.f32.mrf.mxu0 }
 0x18c   : > { %15910 = vst [vmem:[#allocation114_spill] sm:$0xff] %v10026_v11  ;;  %8213 = vmatmul.msk.f32.gmra.mxu3 %vm544_vm1, %v1497_v9  ;;  %v1048_v9 = vsel %vm635_vm0, %v1045_v14, %v1047_v15 }
 0x18e   : > { %8133 = vmatmul.msk.f32.gmra.mxu0 %vm544_vm1, %v1046_v54  ;;  %v10049_v54 = vld [vmem:[%s8998_s22 + $0x30] sm:$0xff] }
 0x18f   : > { %v1684_v60 = vpop.f32.mrf.mxu3 }
 0x190   : > { %v10037_v24 = vadd.f32 %v1684_v60, %v1392_v3  ;;  %v1049_v3 = vrot.slane %v10049_v54, 2  ;;  %v10055_v60 = vpop.f32.mrf.mxu1 }
 0x191   : > { %15914 = vst [vmem:[#allocation118_spill] sm:$0xff] %v10055_v60  ;;  %v15982_v60 = vld [vmem:[#allocation18_spill] sm:$0xff] }
 0x192   : > { %v10060_v14 = vsel %vm635_vm0, %v1047_v15, %v1049_v3  ;;  %v8316_v15 = vld [vmem:[%s15549_s1 + $0x30] sm:$0x3f] }
 0x193   : > { %v10042_v29 = vpop.f32.mrf.mxu0  ;;  %15916 = vst [vmem:[#allocation120_spill] sm:$0xff] %v10060_v14  ;;  %8317 = vmatpush.msk.msrb.mxu2 %vm635_vm0, %v8316_v15  ;;  %v8856_v15 = vld [vmem:[%s8998_s22 + $0x158] sm:$0xff] }
 0x194   : > { %15912 = vst [vmem:[#allocation116_spill] sm:$0xff] %v10042_v29  ;;  %8214 = vmatmul.msk.f32.gmra.mxu3 %vm544_vm1, %v1499_v7  ;;  %v10062_v7 = vpop.f32.mrf.mxu2  ;;  %8318 = vmatmul.msk.f32.vlgmr.msrb.gmra.mxu2 %vm544_vm1, %v10034_v8  ;;  %v8269_v29 = vld [vmem:[%s15549_s1 + $0x28] sm:$0x3f] }
 0x195   : > { %15917 = vst [vmem:[#allocation121_spill] sm:$0xff] %v10062_v7  ;;  %8270 = vmatpush.msk.msrb.mxu1 %vm635_vm0, %v8269_v29  ;;  %v2194_v29 = vrot.slane %v10017_v55, 6 }
 0x196   : > { %8134 = vmatmul.msk.f32.gmra.mxu0 %vm544_vm1, %v1048_v9  ;;  %v8854_v9 = vld [vmem:[%s8998_s22 + $0x150] sm:$0xff] }
 0x197   : > { %v10052_v27 = vpop.f32.mrf.mxu3  ;;  %v1502_v44 = vrot.slane %v8854_v9, 4  ;;  %v8222_v9 = vld [vmem:[%s15549_s1 + $0x20] sm:$0x3f] }
 0x198   : > { %15913 = vst [vmem:[#allocation117_spill] sm:$0xff] %v10052_v27  ;;  %8223 = vmatpush.msk.msra.mxu0 %vm635_vm0, %v8222_v9 }
 0x19b   : > { %v10057_v25 = vpop.f32.mrf.mxu0 }
 0x19c   : > { %15915 = vst [vmem:[#allocation119_spill] sm:$0xff] %v10057_v25  ;;  %8215 = vmatmul.msk.f32.gmra.mxu3 %vm544_vm1, %v1501_v40  ;;  %v1503_v25 = vsel %vm1422_vm3, %v1500_v61, %v1502_v44  ;;  %v10081_v40 = vsel %vm635_vm0, %v1049_v3, %v1051_v38  ;;  %v10089_v61 = vpop.f32.mrf.mxu1  ;;  %v2192_v3 = vrot.slane %v10002_v20, 6  ;;  %v10101_v11 = vpop.f32.mrf.mxu2  ;;  %8319 = vmatmul.msk.f32.gmra.mxu2 %vm544_vm1, %v10049_v54 }
 0x19d   : > { %15920 = vst [vmem:[#allocation124_spill] sm:$0xff] %v10081_v40 }
 0x19e   : > { %8135 = vmatmul.msk.f32.gmra.mxu0 %vm544_vm1, %v10060_v14  ;;  %15921 = vst [vmem:[#allocation125_spill] sm:$0xff] %v10089_v61  ;;  %v10538_v14 = vld [vmem:[%s8998_s22 + $0xd0] sm:$0xff] }
 0x19f   : > { %v10072_v27 = vpop.f32.mrf.mxu3  ;;  %15922 = vst [vmem:[#allocation126_spill] sm:$0xff] %v10101_v11 }
 0x1a0   : > { %15918 = vst [vmem:[#allocation122_spill] sm:$0xff] %v10072_v27  ;;  %v2191_v27 = vrot.slane %v9985_v57, 6 }
 0x1a2   : > { %v2193_v0 = vsel %vm2190_vm4, %v2191_v27, %v2192_v3  ;;  %v8858_v27 = vld [vmem:[%s8998_s22 + $0x160] sm:$0xff] }
 0x1a3   : > { %v10078_v7 = vpop.f32.mrf.mxu0  ;;  %8271 = vmatmul.msk.f32.vlgmr.msrb.gmra.mxu1 %vm544_vm1, %v2193_v0  ;;  %v1506_v0 = vrot.slane %v8858_v27, 4 }
 0x1a4   : > { %15919 = vst [vmem:[#allocation123_spill] sm:$0xff] %v10078_v7  ;;  %8216 = vmatmul.msk.f32.gmra.mxu3 %vm544_vm1, %v1503_v25  ;;  %v1504_v7 = vrot.slane %v8856_v15, 4  ;;  %v10104_v25 = vld [vmem:[%s8998_s22 + $0x40] sm:$0xff]  ;;  %8320 = vmatmul.msk.f32.gmra.mxu2 %vm544_vm1, %v10069_v37 }
 0x1a5   : > { %v1053_v9 = vrot.slane %v10104_v25, 2 }
 0x1a6   : > { %8136 = vmatmul.msk.f32.gmra.mxu0 %vm544_vm1, %v10081_v40  ;;  %v1505_v15 = vsel %vm1422_vm3, %v1502_v44, %v1504_v7  ;;  %v10128_v44 = vld [vmem:[%s8998_s22 + $0x48] sm:$0xff]  ;;  %v1507_v6 = vsel %vm1422_vm3, %v1504_v7, %v1506_v0  ;;  %v1508_v7 = vrot.slane %v401_v42, 4  ;;  %v402_v42 = vld [vmem:[%s8998_s22 + $0x170] sm:$0xff] }
 0x1a7   : > { %v10109_v52 = vpop.f32.mrf.mxu3  ;;  %v10116_v12 = vsel %vm635_vm0, %v1051_v38, %v1053_v9  ;;  %v1055_v38 = vrot.slane %v10128_v44, 2 }
 0x1a8   : > { %15923 = vst [vmem:[#allocation127_spill] sm:$0xff] %v10109_v52  ;;  %v10125_v52 = vpop.f32.mrf.mxu1 }
 0x1a9   : > { %15925 = vst [vmem:[#allocation129_spill] sm:$0xff] %v10116_v12  ;;  %v10141_v27 = vsel %vm635_vm0, %v1053_v9, %v1055_v38 }
 0x1aa   : > { %15926 = vst [vmem:[#allocation130_spill] sm:$0xff] %v10125_v52  ;;  %v8363_v52 = vld [vmem:[%s15549_s1 + $0x38] sm:$0x3f] }
 0x1ab   : > { %v10113_v23 = vpop.f32.mrf.mxu0  ;;  %15930 = vst [vmem:[#allocation134_spill] sm:$0xff] %v10141_v27  ;;  %8364 = vmatpush.msk.msrb.mxu3 %vm635_vm0, %v8363_v52 }
 0x1ac   : > { %15924 = vst [vmem:[#allocation128_spill] sm:$0xff] %v10113_v23  ;;  %8217 = vmatmul.msk.f32.gmra.mxu3 %vm544_vm1, %v1505_v15  ;;  %v2195_v23 = vsel %vm2190_vm4, %v2192_v3, %v2194_v29  ;;  %v10135_v15 = vpop.f32.mrf.mxu2  ;;  %8321 = vmatmul.msk.f32.gmra.mxu2 %vm544_vm1, %v10104_v25 }
 0x1ad   : > { %8272 = vmatmul.msk.f32.gmra.mxu1 %vm544_vm1, %v2195_v23  ;;  %15928 = vst [vmem:[#allocation132_spill] sm:$0xff] %v10135_v15  ;;  %v2196_v23 = vrot.slane %v10034_v8, 6  ;;  %v1509_v15 = vsel %vm1422_vm3, %v1506_v0, %v1508_v7  ;;  %v1510_v0 = vrot.slane %v402_v42, 4 }
 0x1ae   : > { %8137 = vmatmul.msk.f32.gmra.mxu0 %vm544_vm1, %v10116_v12  ;;  %v15988_v12 = vld [vmem:[#allocation63_spill] sm:$0xff] }
 0x1af   : > { %v10132_v11 = vpop.f32.mrf.mxu3  ;;  %v2197_v3 = vsel %vm2190_vm4, %v2194_v29, %v2196_v23  ;;  %v2198_v29 = vrot.slane %v10049_v54, 6 }
 0x1b0   : > { %15927 = vst [vmem:[#allocation131_spill] sm:$0xff] %v10132_v11  ;;  %v10158_v11 = vpop.f32.mrf.mxu1 }
 0x1b1   : > { %15932 = vst [vmem:[#allocation136_spill] sm:$0xff] %v10158_v11  ;;  %v15981_v11 = vld [vmem:[#allocation66_spill] sm:$0xff] }
 0x1b3   : > { %v10138_v17 = vpop.f32.mrf.mxu0 }
 0x1b4   : > { %15929 = vst [vmem:[#allocation133_spill] sm:$0xff] %v10138_v17  ;;  %8218 = vmatmul.msk.f32.gmra.mxu3 %vm544_vm1, %v1507_v6  ;;  %v10161_v17 = vpop.f32.mrf.mxu2  ;;  %v15935_v6 = vrot.slane %v9065_v26, 2  ;;  %v1808_v26 = vrot.slane %v10002_v20, 5  ;;  %8322 = vmatmul.msk.f32.gmra.mxu2 %vm544_vm1, %v10128_v44  ;;  %v2200_v20 = vrot.slane %v10069_v37, 6 }
 0x1b5   : > { %8273 = vmatmul.msk.f32.gmra.mxu1 %vm544_vm1, %v2197_v3  ;;  %15933 = vst [vmem:[#allocation137_spill] sm:$0xff] %v10161_v17  ;;  %v1807_v3 = vrot.slane %v9985_v57, 5 }
 0x1b6   : > { %8138 = vmatmul.msk.f32.gmra.mxu0 %vm544_vm1, %v10141_v27  ;;  %v10168_v10 = vsel %vm635_vm0, %v1055_v38, %v15935_v6  ;;  %v2199_v38 = vsel %vm2190_vm4, %v2196_v23, %v2198_v29  ;;  %v15987_v27 = vld [vmem:[#allocation16_spill] sm:$0xff] }
 0x1b7   : > { %v10155_v9 = vpop.f32.mrf.mxu3  ;;  %15936 = vst [vmem:[#allocation139_spill] sm:$0xff] %v10168_v10  ;;  %v1809_v42 = vsel %vm1806_vm5, %v1807_v3, %v1808_v26  ;;  %v1034_v40 = vadd.f32 %v15988_v12, %v15987_v27 }
 0x1b8   : > { %15931 = vst [vmem:[#allocation135_spill] sm:$0xff] %v10155_v9  ;;  %v1511_v9 = vsel %vm1422_vm3, %v1508_v7, %v1510_v0  ;;  %v1810_v7 = vrot.slane %v10017_v55, 5  ;;  %v2202_v55 = vrot.slane %v10104_v25, 6 }
 0x1bb   : > { %v10163_v52 = vpop.f32.mrf.mxu0 }
 0x1bc   : > { %15934 = vst [vmem:[#allocation138_spill] sm:$0xff] %v10163_v52  ;;  %8219 = vmatmul.msk.f32.gmra.mxu3 %vm544_vm1, %v1509_v15  ;;  %v10184_v15 = vpop.f32.mrf.mxu1  ;;  %v403_v52 = vld [vmem:[%s8998_s22 + $0x178] sm:$0xff]  ;;  %v10192_v57 = vpop.f32.mrf.mxu2 }
 0x1bd   : > { %8274 = vmatmul.msk.f32.gmra.mxu1 %vm544_vm1, %v2199_v38  ;;  %15938 = vst [vmem:[#allocation141_spill] sm:$0xff] %v10184_v15  ;;  %v1512_v23 = vrot.slane %v403_v52, 4  ;;  %v2201_v38 = vsel %vm2190_vm4, %v2198_v29, %v2200_v20  ;;  %v10490_v15 = vld [vmem:[%s8998_s22 + $0xc0] sm:$0xff] }
 0x1be   : > { %8139 = vmatmul.msk.f32.gmra.mxu0 %vm544_vm1, %v10168_v10  ;;  %15940 = vst [vmem:[#allocation143_spill] sm:$0xff] %v10192_v57  ;;  %v10207_v57 = vld [vmem:[%s8998_s22 + $0x50] sm:$0xff]  ;;  %v15983_v10 = vld [vmem:[#allocation17_spill] sm:$0xff] }
 0x1bf   : > { %v10180_v6 = vpop.f32.mrf.mxu3  ;;  %v1513_v3 = vsel %vm1422_vm3, %v1510_v0, %v1512_v23  ;;  %8323 = vmatmul.msk.f32.gmra.mxu2 %vm544_vm1, %v10207_v57  ;;  %v1812_v0 = vrot.slane %v10034_v8, 5  ;;  %v2204_v8 = vrot.slane %v10128_v44, 6 }
 0x1c0   : > { %15937 = vst [vmem:[#allocation140_spill] sm:$0xff] %v10180_v6 }
 0x1c3   : > { %v10186_v17 = vpop.f32.mrf.mxu0 }
 0x1c4   : > { %15939 = vst [vmem:[#allocation142_spill] sm:$0xff] %v10186_v17  ;;  %8220 = vmatmul.msk.f32.gmra.mxu3 %vm544_vm1, %v1511_v9  ;;  %v1811_v9 = vsel %vm1806_vm5, %v1808_v26, %v1810_v7  ;;  %v10211_v52 = vpop.f32.mrf.mxu1  ;;  %v10216_v29 = vpop.f32.mrf.mxu2 }
 0x1c5   : > { %8275 = vmatmul.msk.f32.gmra.mxu1 %vm544_vm1, %v2201_v38  ;;  %15943 = vst [vmem:[#allocation146_spill] sm:$0xff] %v10211_v52  ;;  %v1813_v38 = vsel %vm1806_vm5, %v1810_v7, %v1812_v0 }
 0x1c6   : > { %8224 = vmatmul.msk.f32.vlgmr.msra.gmra.mxu0 %vm544_vm1, %v1809_v42  ;;  %15944 = vst [vmem:[#allocation147_spill] sm:$0xff] %v10216_v29  ;;  %v2203_v42 = vsel %vm2190_vm4, %v2200_v20, %v2202_v55  ;;  %v10349_v29 = vld [vmem:[%s8998_s22 + $0x88] sm:$0xff] }
 0x1c7   : > { %v10199_v6 = vpop.f32.mrf.mxu3 }
 0x1c8   : > { %15941 = vst [vmem:[#allocation144_spill] sm:$0xff] %v10199_v6  ;;  %v10248_v6 = vld [vmem:[%s8998_s22 + $0x60] sm:$0xff] }
 0x1cb   : > { %v10203_v17 = vpop.f32.mrf.mxu0 }
 0x1cc   : > { %15942 = vst [vmem:[#allocation145_spill] sm:$0xff] %v10203_v17  ;;  %8221 = vmatmul.msk.f32.gmra.mxu3 %vm544_vm1, %v1513_v3  ;;  %v10227_v3 = vld [vmem:[%s8998_s22 + $0x58] sm:$0xff]  ;;  %v10235_v20 = vpop.f32.mrf.mxu1  ;;  %v10242_v7 = vpop.f32.mrf.mxu2  ;;  %v10370_v17 = vld [vmem:[%s8998_s22 + $0x90] sm:$0xff] }
 0x1cd   : > { %8276 = vmatmul.msk.f32.gmra.mxu1 %vm544_vm1, %v2203_v42  ;;  %8324 = vmatmul.msk.f32.gmra.mxu2 %vm544_vm1, %v10227_v3  ;;  %15947 = vst [vmem:[#allocation150_spill] sm:$0xff] %v10235_v20  ;;  %v2205_v42 = vsel %vm2190_vm4, %v2202_v55, %v2204_v8  ;;  %v1816_v55 = vrot.slane %v10069_v37, 5  ;;  %v2208_v37 = vrot.slane %v10227_v3, 6  ;;  %v15978_v20 = vld [vmem:[#allocation14_spill] sm:$0xff] }
 0x1ce   : > { %8225 = vmatmul.msk.f32.gmra.mxu0 %vm544_vm1, %v1811_v9  ;;  %v1814_v9 = vrot.slane %v10049_v54, 5  ;;  %15949 = vst [vmem:[#allocation152_spill] sm:$0xff] %v10242_v7  ;;  %v2206_v54 = vrot.slane %v10207_v57, 6  ;;  %v10269_v7 = vld [vmem:[%s8998_s22 + $0x68] sm:$0xff]  ;;  %v902_v52 = vadd.f32 %v15978_v20, %v9335_v45 }
 0x1cf   : > { %v10220_v26 = vpop.f32.mrf.mxu3 }
 0x1d0   : > { %15945 = vst [vmem:[#allocation148_spill] sm:$0xff] %v10220_v26 }
 0x1d3   : > { %v10223_v23 = vpop.f32.mrf.mxu0 }
 0x1d4   : > { %15946 = vst [vmem:[#allocation149_spill] sm:$0xff] %v10223_v23  ;;  %8365 = vmatmul.msk.f32.vlgmr.msrb.gmra.mxu3 %vm544_vm1, %v9092_v34  ;;  %v1815_v34 = vsel %vm1806_vm5, %v1812_v0, %v1814_v9  ;;  %v10261_v0 = vpop.f32.mrf.mxu1 }
 0x1d5   : > { %8277 = vmatmul.msk.f32.gmra.mxu1 %vm544_vm1, %v2205_v42  ;;  %8325 = vmatmul.msk.f32.gmra.mxu2 %vm544_vm1, %v10248_v6  ;;  %15952 = vst [vmem:[#allocation155_spill] sm:$0xff] %v10261_v0 }
 0x1d6   : > { %8226 = vmatmul.msk.f32.gmra.mxu0 %vm544_vm1, %v1813_v38  ;;  %v2207_v38 = vsel %vm2190_vm4, %v2204_v8, %v2206_v54  ;;  %v1818_v8 = vrot.slane %v10104_v25, 5  ;;  %v2210_v25 = vrot.slane %v10248_v6, 6 }
 0x1d7   : > { %v10239_v23 = vpop.f32.mrf.mxu3 }
 0x1d8   : > { %15948 = vst [vmem:[#allocation151_spill] sm:$0xff] %v10239_v23 }
 0x1db   : > { %v10244_v26 = vpop.f32.mrf.mxu0 }
 0x1dc   : > { %15950 = vst [vmem:[#allocation153_spill] sm:$0xff] %v10244_v26  ;;  %8366 = vmatmul.msk.f32.gmra.mxu3 %vm544_vm1, %v9117_v41  ;;  %v10263_v26 = vpop.f32.mrf.mxu2  ;;  %v1817_v41 = vsel %vm1806_vm5, %v1814_v9, %v1816_v55  ;;  %v10282_v9 = vpop.f32.mrf.mxu1 }
 0x1dd   : > { %8278 = vmatmul.msk.f32.gmra.mxu1 %vm544_vm1, %v2207_v38  ;;  %15953 = vst [vmem:[#allocation156_spill] sm:$0xff] %v10263_v26  ;;  %8326 = vmatmul.msk.f32.gmra.mxu2 %vm544_vm1, %v10269_v7 }
 0x1de   : > { %8227 = vmatmul.msk.f32.gmra.mxu0 %vm544_vm1, %v1815_v34  ;;  %v2209_v34 = vsel %vm2190_vm4, %v2206_v54, %v2208_v37  ;;  %15956 = vst [vmem:[#allocation159_spill] sm:$0xff] %v10282_v9  ;;  %v1820_v54 = vrot.slane %v10128_v44, 5  ;;  %v2212_v44 = vrot.slane %v10269_v7, 6  ;;  %v10467_v9 = vld [vmem:[%s8998_s22 + $0xb8] sm:$0xff] }
 0x1df   : > { %v10258_v42 = vpop.f32.mrf.mxu3 }
 0x1e0   : > { %15951 = vst [vmem:[#allocation154_spill] sm:$0xff] %v10258_v42  ;;  %v1819_v42 = vsel %vm1806_vm5, %v1816_v55, %v1818_v8 }
 0x1e3   : > { %v10265_v23 = vpop.f32.mrf.mxu0 }
 0x1e4   : > { %15954 = vst [vmem:[#allocation157_spill] sm:$0xff] %v10265_v23  ;;  %8367 = vmatmul.msk.f32.gmra.mxu3 %vm544_vm1, %v9146_v49  ;;  %v10288_v49 = vld [vmem:[%s8998_s22 + $0x70] sm:$0xff] }
 0x1e5   : > { %8279 = vmatmul.msk.f32.gmra.mxu1 %vm544_vm1, %v2209_v34  ;;  %8327 = vmatmul.msk.f32.gmra.mxu2 %vm544_vm1, %v10288_v49  ;;  %v2211_v34 = vsel %vm2190_vm4, %v2208_v37, %v2210_v25  ;;  %v1822_v37 = vrot.slane %v10207_v57, 5  ;;  %v2214_v57 = vrot.slane %v10288_v49, 6 }
 0x1e6   : > { %8228 = vmatmul.msk.f32.gmra.mxu0 %vm544_vm1, %v1817_v41  ;;  %v10292_v41 = vpop.f32.mrf.mxu2 }
 0x1e7   : > { %v10279_v38 = vpop.f32.mrf.mxu3  ;;  %15958 = vst [vmem:[#allocation161_spill] sm:$0xff] %v10292_v41  ;;  %v10307_v41 = vld [vmem:[%s8998_s22 + $0x78] sm:$0xff]  ;;  %v1823_v26 = vsel %vm1806_vm5, %v1820_v54, %v1822_v37 }
 0x1e8   : > { %15955 = vst [vmem:[#allocation158_spill] sm:$0xff] %v10279_v38  ;;  %v1821_v38 = vsel %vm1806_vm5, %v1818_v8, %v1820_v54  ;;  %v2213_v8 = vsel %vm2190_vm4, %v2210_v25, %v2212_v44  ;;  %v1824_v25 = vrot.slane %v10227_v3, 5  ;;  %v1826_v3 = vrot.slane %v10248_v6, 5 }
 0x1eb   : > { %v10284_v23 = vpop.f32.mrf.mxu0 }
 0x1ec   : > { %15957 = vst [vmem:[#allocation160_spill] sm:$0xff] %v10284_v23  ;;  %8368 = vmatmul.msk.f32.gmra.mxu3 %vm544_vm1, %v9171_v56  ;;  %v10311_v56 = vpop.f32.mrf.mxu1 }
 0x1ed   : > { %8280 = vmatmul.msk.f32.gmra.mxu1 %vm544_vm1, %v2211_v34  ;;  %8328 = vmatmul.msk.f32.gmra.mxu2 %vm544_vm1, %v10307_v41  ;;  %15960 = vst [vmem:[#allocation163_spill] sm:$0xff] %v10311_v56 }
 0x1ee   : > { %8229 = vmatmul.msk.f32.gmra.mxu0 %vm544_vm1, %v1819_v42  ;;  %v10317_v42 = vpop.f32.mrf.mxu2 }
 0x1ef   : > { %v10300_v23 = vpop.f32.mrf.mxu3  ;;  %15961 = vst [vmem:[#allocation164_spill] sm:$0xff] %v10317_v42 }
 0x1f0   : > { %15959 = vst [vmem:[#allocation162_spill] sm:$0xff] %v10300_v23 }
 0x1f3   : > { %v10303_v55 = vpop.f32.mrf.mxu0 }
 0x1f4   : > { %8369 = vmatmul.msk.f32.gmra.mxu3 %vm544_vm1, %v9193_v62  ;;  %v10328_v62 = vld [vmem:[%s8998_s22 + $0x80] sm:$0xff] }
 0x1f5   : > { %8281 = vmatmul.msk.f32.gmra.mxu1 %vm544_vm1, %v2213_v8  ;;  %8329 = vmatmul.msk.f32.gmra.mxu2 %vm544_vm1, %v10328_v62  ;;  %v2215_v8 = vsel %vm2190_vm4, %v2212_v44, %v2214_v57  ;;  %v2218_v6 = vrot.slane %v10328_v62, 6 }
 0x1f6   : > { %8230 = vmatmul.msk.f32.gmra.mxu0 %vm544_vm1, %v1821_v38  ;;  %v10336_v38 = vpop.f32.mrf.mxu1  ;;  %v10343_v54 = vpop.f32.mrf.mxu2 }
 0x1f7   : > { %v10321_v34 = vpop.f32.mrf.mxu3  ;;  %15963 = vst [vmem:[#allocation166_spill] sm:$0xff] %v10336_v38 }
 0x1f8   : > { %15962 = vst [vmem:[#allocation165_spill] sm:$0xff] %v10321_v34 }
 0x1f9   : > { %15965 = vst [vmem:[#allocation168_spill] sm:$0xff] %v10343_v54 }
 0x1fb   : > { %v10324_v23 = vpop.f32.mrf.mxu0 }
 0x1fc   : > { %8370 = vmatmul.msk.f32.gmra.mxu3 %vm544_vm1, %v9212_v4  ;;  %v1825_v4 = vsel %vm1806_vm5, %v1822_v37, %v1824_v25 }
 0x1fd   : > { %8282 = vmatmul.msk.f32.gmra.mxu1 %vm544_vm1, %v2215_v8  ;;  %8330 = vmatmul.msk.f32.gmra.mxu2 %vm544_vm1, %v10349_v29 }
 0x1fe   : > { %8231 = vmatmul.msk.f32.gmra.mxu0 %vm544_vm1, %v1823_v26  ;;  %v2216_v26 = vrot.slane %v10307_v41, 6  ;;  %v10362_v37 = vpop.f32.mrf.mxu1  ;;  %v10364_v54 = vpop.f32.mrf.mxu2 }
 0x1ff   : > { %v10340_v42 = vpop.f32.mrf.mxu3  ;;  %15967 = vst [vmem:[#allocation170_spill] sm:$0xff] %v10362_v37 }
 0x200   : > { %15964 = vst [vmem:[#allocation167_spill] sm:$0xff] %v10340_v42  ;;  %v2217_v44 = vsel %vm2190_vm4, %v2214_v57, %v2216_v26  ;;  %v1828_v57 = vrot.slane %v10269_v7, 5  ;;  %v2220_v7 = vrot.slane %v10349_v29, 6 }
 0x201   : > { %15968 = vst [vmem:[#allocation171_spill] sm:$0xff] %v10364_v54 }
 0x203   : > { %v10345_v34 = vpop.f32.mrf.mxu0 }
 0x204   : > { %8371 = vmatmul.msk.f32.gmra.mxu3 %vm544_vm1, %v9234_v18  ;;  %v1827_v18 = vsel %vm1806_vm5, %v1824_v25, %v1826_v3 }
 0x205   : > { %8283 = vmatmul.msk.f32.gmra.mxu1 %vm544_vm1, %v2217_v44  ;;  %8331 = vmatmul.msk.f32.gmra.mxu2 %vm544_vm1, %v10370_v17 }
 0x206   : > { %8232 = vmatmul.msk.f32.gmra.mxu0 %vm544_vm1, %v1825_v4  ;;  %v2219_v4 = vsel %vm2190_vm4, %v2216_v26, %v2218_v6  ;;  %v10383_v25 = vpop.f32.mrf.mxu1  ;;  %v1830_v26 = vrot.slane %v10288_v49, 5  ;;  %v2222_v49 = vrot.slane %v10370_v17, 6 }
 0x207   : > { %v10359_v8 = vpop.f32.mrf.mxu3  ;;  %15970 = vst [vmem:[#allocation173_spill] sm:$0xff] %v10383_v25  ;;  %v10408_v25 = vld [vmem:[%s8998_s22 + $0xa0] sm:$0xff] }
 0x208   : > { %15966 = vst [vmem:[#allocation169_spill] sm:$0xff] %v10359_v8  ;;  %v1829_v8 = vsel %vm1806_vm5, %v1826_v3, %v1828_v57 }
 0x20b   : > { %v10366_v42 = vpop.f32.mrf.mxu0 }
 0x20c   : > { %8372 = vmatmul.msk.f32.gmra.mxu3 %vm544_vm1, %v9254_v30  ;;  %v10389_v30 = vld [vmem:[%s8998_s22 + $0x98] sm:$0xff] }
 0x20d   : > { %8284 = vmatmul.msk.f32.gmra.mxu1 %vm544_vm1, %v2219_v4  ;;  %8332 = vmatmul.msk.f32.gmra.mxu2 %vm544_vm1, %v10389_v30  ;;  %v2221_v4 = vsel %vm2190_vm4, %v2218_v6, %v2220_v7  ;;  %v1832_v6 = vrot.slane %v10307_v41, 5 }
 0x20e   : > { %8233 = vmatmul.msk.f32.gmra.mxu0 %vm544_vm1, %v1827_v18  ;;  %v10393_v18 = vpop.f32.mrf.mxu2 }
 0x20f   : > { %v10380_v44 = vpop.f32.mrf.mxu3  ;;  %15971 = vst [vmem:[#allocation174_spill] sm:$0xff] %v10393_v18  ;;  %v1831_v18 = vsel %vm1806_vm5, %v1828_v57, %v1830_v26  ;;  %v2223_v57 = vsel %vm2190_vm4, %v2220_v7, %v2222_v49  ;;  %v1834_v7 = vrot.slane %v10328_v62, 5 }
 0x210   : > { %15969 = vst [vmem:[#allocation172_spill] sm:$0xff] %v10380_v44 }
 0x211   : > { %v1835_v38 = vsel %vm1806_vm5, %v1832_v6, %v1834_v7 }
 0x213   : > { %v10385_v54 = vpop.f32.mrf.mxu0 }
 0x214   : > { %8373 = vmatmul.msk.f32.gmra.mxu3 %vm544_vm1, %v9274_v46  ;;  %v10412_v46 = vpop.f32.mrf.mxu1 }
 0x215   : > { %8285 = vmatmul.msk.f32.gmra.mxu1 %vm544_vm1, %v2221_v4  ;;  %8333 = vmatmul.msk.f32.gmra.mxu2 %vm544_vm1, %v10408_v25  ;;  %15973 = vst [vmem:[#allocation176_spill] sm:$0xff] %v10412_v46  ;;  %v1833_v46 = vsel %vm1806_vm5, %v1830_v26, %v1832_v6 }
 0x216   : > { %8234 = vmatmul.msk.f32.gmra.mxu0 %vm544_vm1, %v1829_v8  ;;  %v10418_v8 = vpop.f32.mrf.mxu2 }
 0x217   : > { %v10401_v44 = vpop.f32.mrf.mxu3 }
 0x218   : > { %15972 = vst [vmem:[#allocation175_spill] sm:$0xff] %v10401_v44 }
 0x21b   : > { %v10404_v3 = vpop.f32.mrf.mxu0 }
 0x21c   : > { %8374 = vmatmul.msk.f32.gmra.mxu3 %vm544_vm1, %v9294_v1  ;;  %v10429_v1 = vld [vmem:[%s8998_s22 + $0xa8] sm:$0xff] }
 0x21d   : > { %8286 = vmatmul.msk.f32.gmra.mxu1 %vm544_vm1, %v2223_v57  ;;  %8334 = vmatmul.msk.f32.gmra.mxu2 %vm544_vm1, %v10429_v1 }
 0x21e   : > { %8235 = vmatmul.msk.f32.gmra.mxu0 %vm544_vm1, %v1831_v18  ;;  %v2224_v18 = vrot.slane %v10389_v30, 6  ;;  %v2606_v57 = vpop.f32.mrf.mxu2 }
 0x21f   : > { %v10422_v4 = vpop.f32.mrf.mxu3 }
 0x220   : > { %15974 = vst [vmem:[#allocation177_spill] sm:$0xff] %v10422_v4  ;;  %v2392_v41 = vpop.f32.mrf.mxu1  ;;  %v2225_v4 = vsel %vm2190_vm4, %v2222_v49, %v2224_v18  ;;  %v1836_v49 = vrot.slane %v10349_v29, 5 }
 0x223   : > { %v10425_v44 = vpop.f32.mrf.mxu0 }
 0x224   : > { %8375 = vmatmul.msk.f32.gmra.mxu3 %vm544_vm1, %v9314_v13  ;;  %v10446_v13 = vld [vmem:[%s8998_s22 + $0xb0] sm:$0xff] }
 0x225   : > { %8287 = vmatmul.msk.f32.gmra.mxu1 %vm544_vm1, %v2225_v4  ;;  %8335 = vmatmul.msk.f32.gmra.mxu2 %vm544_vm1, %v10446_v13 }
 0x226   : > { %8236 = vmatmul.msk.f32.gmra.mxu0 %vm544_vm1, %v1833_v46  ;;  %v2226_v46 = vrot.slane %v10408_v25, 6  ;;  %v10457_v4 = vpop.f32.mrf.mxu2 }
 0x227   : > { %v10439_v37 = vpop.f32.mrf.mxu3 }
 0x228   : > { %15975 = vst [vmem:[#allocation178_spill] sm:$0xff] %v10439_v37  ;;  %v2227_v6 = vsel %vm2190_vm4, %v2224_v18, %v2226_v46  ;;  %v1838_v18 = vrot.slane %v10370_v17, 5  ;;  %v15979_v17 = vld [vmem:[#allocation23_spill] sm:$0xff] }
 0x22a   : > { %v10452_v62 = vpop.f32.mrf.mxu1 }
 0x22b   : > { %v10442_v26 = vpop.f32.mrf.mxu0 }
 0x22c   : > { %8376 = vmatmul.msk.f32.gmra.mxu3 %vm544_vm1, %v9338_v21  ;;  %v1837_v21 = vsel %vm1806_vm5, %v1834_v7, %v1836_v49 }
 0x22d   : > { %8288 = vmatmul.msk.f32.gmra.mxu1 %vm544_vm1, %v2227_v6  ;;  %8336 = vmatmul.msk.f32.gmra.mxu2 %vm544_vm1, %v10467_v9 }
 0x22e   : > { %8237 = vmatmul.msk.f32.gmra.mxu0 %vm544_vm1, %v1835_v38  ;;  %v2228_v38 = vrot.slane %v10429_v1, 6  ;;  %v10478_v6 = vpop.f32.mrf.mxu2 }
 0x22f   : > { %v10460_v37 = vpop.f32.mrf.mxu3 }
 0x230   : > { %15976 = vst [vmem:[#allocation179_spill] sm:$0xff] %v10460_v37  ;;  %v2229_v7 = vsel %vm2190_vm4, %v2226_v46, %v2228_v38 }
 0x232   : > { %v10473_v29 = vpop.f32.mrf.mxu1 }
 0x233   : > { %v10463_v56 = vpop.f32.mrf.mxu0 }
 0x234   : > { %8377 = vmatmul.msk.f32.gmra.mxu3 %vm544_vm1, %v9364_v28  ;;  %v1839_v28 = vsel %vm1806_vm5, %v1836_v49, %v1838_v18  ;;  %v1840_v49 = vrot.slane %v10389_v30, 5  ;;  %v15984_v30 = vld [vmem:[#allocation28_spill] sm:$0xff] }
 0x235   : > { %8289 = vmatmul.msk.f32.gmra.mxu1 %vm544_vm1, %v2229_v7  ;;  %8337 = vmatmul.msk.f32.gmra.mxu2 %vm544_vm1, %v10490_v15  ;;  %v1372_v7 = vadd.f32 %v10303_v55, %v902_v52  ;;  %v905_v52 = vadd.f32 %v15983_v10, %v15982_v60  ;;  %v1842_v10 = vrot.slane %v10408_v25, 5 }
 0x236   : > { %8238 = vmatmul.msk.f32.gmra.mxu0 %vm544_vm1, %v1837_v21  ;;  %v2230_v21 = vrot.slane %v10446_v13, 6  ;;  %v10502_v45 = vpop.f32.mrf.mxu2  ;;  %v1841_v35 = vsel %vm1806_vm5, %v1838_v18, %v1840_v49 }
 0x237   : > { %v10481_v37 = vpop.f32.mrf.mxu3 }
 0x238   : > { %15977 = vst [vmem:[#allocation180_spill] sm:$0xff] %v10481_v37  ;;  %v2231_v20 = vsel %vm2190_vm4, %v2228_v38, %v2230_v21 }
 0x23a   : > { %v10496_v46 = vpop.f32.mrf.mxu1 }
 0x23b   : > { %v10484_v0 = vpop.f32.mrf.mxu0 }
 0x23c   : > { %8378 = vmatmul.msk.f32.gmra.mxu3 %vm544_vm1, %v15979_v17  ;;  %v1759_v17 = vadd.f32 %v15981_v11, %v1372_v7  ;;  %v1373_v11 = vadd.f32 %v10324_v23, %v905_v52  ;;  %v15990_v52 = vld [vmem:[#allocation21_spill] sm:$0xff] }
 0x23d   : > { %8290 = vmatmul.msk.f32.gmra.mxu1 %vm544_vm1, %v2231_v20  ;;  %v2232_v20 = vrot.slane %v10467_v9, 6 }
 0x23e   : > { %8239 = vmatmul.msk.f32.gmra.mxu0 %vm544_vm1, %v1839_v28  ;;  %v10513_v28 = vld [vmem:[%s8998_s22 + $0xc8] sm:$0xff]  ;;  %v10525_v60 = vpop.f32.mrf.mxu2 }
 0x23f   : > { %v10505_v37 = vpop.f32.mrf.mxu3  ;;  %8338 = vmatmul.msk.f32.gmra.mxu2 %vm544_vm1, %v10513_v28 }
 0x240   : > { %15980 = vst [vmem:[#allocation14_spill] sm:$0xff] %v10505_v37 }
 0x242   : > { %v10519_v38 = vpop.f32.mrf.mxu1 }
 0x243   : > { %v2008_v61 = vpop.f32.mrf.mxu0 }
 0x244   : > { %v2143_v55 = vadd.f32 %v2008_v61, %v1759_v17  ;;  %8379 = vmatmul.msk.f32.gmra.mxu3 %vm544_vm1, %v15984_v30  ;;  %v2233_v61 = vsel %vm2190_vm4, %v2230_v21, %v2232_v20  ;;  %v15986_v30 = vld [vmem:[#allocation69_spill] sm:$0xff] }
 0x245   : > { %8291 = vmatmul.msk.f32.gmra.mxu1 %vm544_vm1, %v2233_v61  ;;  %v1760_v37 = vadd.f32 %v15986_v30, %v1373_v11  ;;  %v2234_v11 = vrot.slane %v10490_v15, 6 }
 0x246   : > { %v2527_v18 = vadd.f32 %v2392_v41, %v2143_v55  ;;  %8240 = vmatmul.msk.f32.gmra.mxu0 %vm544_vm1, %v1841_v35  ;;  %v1843_v41 = vsel %vm1806_vm5, %v1840_v49, %v1842_v10  ;;  %v15989_v35 = vld [vmem:[#allocation22_spill] sm:$0xff]  ;;  %v1844_v49 = vrot.slane %v10429_v1, 5 }
 0x247   : > { %v10528_v17 = vpop.f32.mrf.mxu3  ;;  %v908_v25 = vadd.f32 %v15990_v52, %v15989_v35  ;;  %8339 = vmatmul.msk.f32.gmra.mxu2 %vm544_vm1, %v10538_v14  ;;  %v2235_v61 = vsel %vm2190_vm4, %v2232_v20, %v2234_v11  ;;  %v2236_v20 = vrot.slane %v10513_v28, 6 }
 0x248   : > { %v2741_v7 = vadd.f32 %v2606_v57, %v2527_v18  ;;  %15985 = vst [vmem:[#allocation23_spill] sm:$0xff] %v10528_v17  ;;  %v15991_v57 = vld [vmem:[#allocation33_spill] sm:$0xff]  ;;  %v10552_v18 = vpop.f32.mrf.mxu2  ;;  %v16088_v17 = vld [vmem:[#allocation99_spill] sm:$0xff] }
 0x249   : > { %v1374_v12 = vadd.f32 %v10345_v34, %v908_v25  ;;  %v15993_v34 = vld [vmem:[#allocation72_spill] sm:$0xff]  ;;  %v15994_v25 = vld [vmem:[#allocation27_spill] sm:$0xff] }
 0x24a   : > { %v10544_v21 = vpop.f32.mrf.mxu1 }
 0x24b   : > { %v2011_v23 = vpop.f32.mrf.mxu0  ;;  %v1761_v52 = vadd.f32 %v15993_v34, %v1374_v12 }
 0x24c   : > { %v2144_v55 = vadd.f32 %v2011_v23, %v1760_v37  ;;  %8380 = vmatmul.msk.f32.gmra.mxu3 %vm544_vm1, %v15991_v57  ;;  %v1416_v37 = vadd.f32 %v10418_v8, %v1034_v40  ;;  %v15995_v40 = vld [vmem:[#allocation26_spill] sm:$0xff] }
 0x24d   : > { %8292 = vmatmul.msk.f32.gmra.mxu1 %vm544_vm1, %v2235_v61  ;;  %v911_v8 = vadd.f32 %v15995_v40, %v15994_v25  ;;  %v15998_v25 = vld [vmem:[#allocation32_spill] sm:$0xff] }
 0x24e   : > { %v2528_v27 = vadd.f32 %v10452_v62, %v2144_v55  ;;  %8241 = vmatmul.msk.f32.gmra.mxu0 %vm544_vm1, %v1843_v41  ;;  %v1845_v41 = vsel %vm1806_vm5, %v1842_v10, %v1844_v49  ;;  %v10564_v55 = vld [vmem:[%s8998_s22 + $0xd8] sm:$0xff]  ;;  %v1846_v10 = vrot.slane %v10446_v13, 5  ;;  %v15999_v13 = vld [vmem:[#allocation31_spill] sm:$0xff] }
 0x24f   : > { %v1756_v23 = vpop.f32.mrf.mxu3  ;;  %8340 = vmatmul.msk.f32.gmra.mxu2 %vm544_vm1, %v10564_v55  ;;  %v1375_v57 = vadd.f32 %v10366_v42, %v911_v8  ;;  %v15997_v42 = vld [vmem:[#allocation75_spill] sm:$0xff]  ;;  %v914_v40 = vadd.f32 %v15999_v13, %v15998_v25 }
 0x250   : > { %v2742_v30 = vadd.f32 %v10457_v4, %v2528_v27  ;;  %v10557_v35 = vadd.f32 %v1756_v23, %v1416_v37  ;;  %v15996_v4 = vld [vmem:[#allocation38_spill] sm:$0xff]  ;;  %v2237_v37 = vsel %vm2190_vm4, %v2234_v11, %v2236_v20 }
 0x251   : > { %v1376_v11 = vadd.f32 %v10385_v54, %v914_v40  ;;  %v10614_v40 = vld [vmem:[%s8998_s22 + $0xe8] sm:$0xff] }
 0x252   : > { %15992 = vst [vmem:[#allocation66_spill] sm:$0xff] %v10557_v35  ;;  %v10575_v27 = vpop.f32.mrf.mxu1 }
 0x253   : > { %v2014_v62 = vpop.f32.mrf.mxu0 }
 0x254   : > { %v2145_v1 = vadd.f32 %v2014_v62, %v1761_v52  ;;  %8381 = vmatmul.msk.f32.gmra.mxu3 %vm544_vm1, %v15996_v4  ;;  %v10582_v52 = vpop.f32.mrf.mxu2  ;;  %v1762_v62 = vadd.f32 %v15997_v42, %v1375_v57 }
 0x255   : > { %8293 = vmatmul.msk.f32.gmra.mxu1 %vm544_vm1, %v2237_v37 }
 0x256   : > { %v2529_v12 = vadd.f32 %v10473_v29, %v2145_v1  ;;  %8242 = vmatmul.msk.f32.gmra.mxu0 %vm544_vm1, %v1845_v41  ;;  %v1847_v41 = vsel %vm1806_vm5, %v1844_v49, %v1846_v10  ;;  %v10589_v1 = vld [vmem:[%s8998_s22 + $0xe0] sm:$0xff]  ;;  %v1848_v49 = vrot.slane %v10467_v9, 5  ;;  %v16003_v9 = vld [vmem:[#allocation36_spill] sm:$0xff] }
 0x257   : > { %v2830_v23 = vpop.f32.mrf.mxu3  ;;  %8341 = vmatmul.msk.f32.gmra.mxu2 %vm544_vm1, %v10589_v1 }
 0x258   : > { %v2743_v61 = vadd.f32 %v10478_v6, %v2529_v12  ;;  %v10580_v34 = vadd.f32 %v2830_v23, %v2741_v7  ;;  %v16000_v6 = vld [vmem:[#allocation43_spill] sm:$0xff]  ;;  %v2238_v7 = vrot.slane %v10538_v14, 6 }
 0x25a   : > { %v2239_v57 = vsel %vm2190_vm4, %v2236_v20, %v2238_v7  ;;  %v10605_v42 = vpop.f32.mrf.mxu1 }
 0x25b   : > { %v2017_v29 = vpop.f32.mrf.mxu0 }
 0x25c   : > { %v2146_v8 = vadd.f32 %v2017_v29, %v1762_v62  ;;  %8382 = vmatmul.msk.f32.gmra.mxu3 %vm544_vm1, %v16000_v6  ;;  %v16001_v62 = vld [vmem:[#allocation78_spill] sm:$0xff]  ;;  %v10609_v25 = vpop.f32.mrf.mxu2  ;;  %v1850_v6 = vrot.slane %v10490_v15, 5 }
 0x25d   : > { %8294 = vmatmul.msk.f32.gmra.mxu1 %vm544_vm1, %v2239_v57  ;;  %v1763_v54 = vadd.f32 %v16001_v62, %v1376_v11  ;;  %v16005_v62 = vld [vmem:[#allocation81_spill] sm:$0xff] }
 0x25e   : > { %v2530_v4 = vadd.f32 %v10496_v46, %v2146_v8  ;;  %8243 = vmatmul.msk.f32.gmra.mxu0 %vm544_vm1, %v1847_v41  ;;  %v1849_v46 = vsel %vm1806_vm5, %v1846_v10, %v1848_v49  ;;  %v16002_v41 = vld [vmem:[#allocation37_spill] sm:$0xff]  ;;  %v1851_v15 = vsel %vm1806_vm5, %v1848_v49, %v1850_v6 }
 0x25f   : > { %v2833_v37 = vpop.f32.mrf.mxu3  ;;  %v917_v13 = vadd.f32 %v16003_v9, %v16002_v41  ;;  %8342 = vmatmul.msk.f32.gmra.mxu2 %vm544_vm1, %v10614_v40  ;;  %v10641_v9 = vld [vmem:[%s8998_s22 + $0xf0] sm:$0xff] }
 0x260   : > { %v2744_v12 = vadd.f32 %v10502_v45, %v2530_v4  ;;  %v10603_v23 = vadd.f32 %v2833_v37, %v2742_v30  ;;  %v16004_v45 = vld [vmem:[#allocation48_spill] sm:$0xff]  ;;  %v2240_v30 = vrot.slane %v10564_v55, 6 }
 0x261   : > { %v1377_v8 = vadd.f32 %v10404_v3, %v917_v13  ;;  %v8410_v3 = vld [vmem:[%s15549_s1 + $0x40] sm:$0x3f] }
 0x262   : > { %v2241_v11 = vsel %vm2190_vm4, %v2238_v7, %v2240_v30  ;;  %8411 = vmatpush.msk.msrb.mxu0 %vm635_vm0, %v8410_v3  ;;  %v16006_v7 = vld [vmem:[#allocation42_spill] sm:$0xff] }
 0x263   : > { %v2020_v29 = vpop.f32.mrf.mxu0 }
 0x264   : > { %v2147_v20 = vadd.f32 %v2020_v29, %v1763_v54  ;;  %8383 = vmatmul.msk.f32.gmra.mxu3 %vm544_vm1, %v16004_v45  ;;  %v10636_v29 = vpop.f32.mrf.mxu1  ;;  %v10647_v13 = vpop.f32.mrf.mxu2 }
 0x265   : > { %8295 = vmatmul.msk.f32.gmra.mxu1 %vm544_vm1, %v2241_v11 }
 0x266   : > { %v2531_v10 = vadd.f32 %v10519_v38, %v2147_v20  ;;  %8244 = vmatmul.msk.f32.gmra.mxu0 %vm544_vm1, %v1849_v46  ;;  %v1764_v38 = vadd.f32 %v16005_v62, %v1377_v8  ;;  %v2242_v20 = vrot.slane %v10589_v1, 6  ;;  %v1852_v8 = vrot.slane %v10513_v28, 5  ;;  %v16009_v62 = vld [vmem:[#allocation84_spill] sm:$0xff]  ;;  %v16012_v28 = vld [vmem:[#allocation58_spill] sm:$0xff] }
 0x267   : > { %v2836_v57 = vpop.f32.mrf.mxu3  ;;  %8343 = vmatmul.msk.f32.gmra.mxu2 %vm544_vm1, %v10641_v9 }
 0x268   : > { %v2745_v4 = vadd.f32 %v10525_v60, %v2531_v10  ;;  %v10628_v37 = vadd.f32 %v2836_v57, %v2743_v61  ;;  %v16007_v60 = vld [vmem:[#allocation41_spill] sm:$0xff]  ;;  %v2243_v10 = vsel %vm2190_vm4, %v2240_v30, %v2242_v20 }
 0x269   : > { %v920_v46 = vadd.f32 %v16007_v60, %v16006_v7  ;;  %v16008_v61 = vld [vmem:[#allocation53_spill] sm:$0xff]  ;;  %v16010_v7 = vld [vmem:[#allocation47_spill] sm:$0xff] }
 0x26b   : > { %v2023_v54 = vpop.f32.mrf.mxu0  ;;  %v1378_v49 = vadd.f32 %v10425_v44, %v920_v46  ;;  %v1853_v44 = vsel %vm1806_vm5, %v1850_v6, %v1852_v8  ;;  %v10664_v46 = vld [vmem:[%s8998_s22 + $0xf8] sm:$0xff] }
 0x26c   : > { %v2148_v41 = vadd.f32 %v2023_v54, %v1764_v38  ;;  %8384 = vmatmul.msk.f32.gmra.mxu3 %vm544_vm1, %v16008_v61  ;;  %v2633_v61 = vpop.f32.mrf.mxu2 }
 0x26d   : > { %8296 = vmatmul.msk.f32.gmra.mxu1 %vm544_vm1, %v2243_v10  ;;  %v1765_v38 = vadd.f32 %v16009_v62, %v1378_v49  ;;  %v16013_v62 = vld [vmem:[#allocation87_spill] sm:$0xff] }
 0x26e   : > { %v2532_v45 = vadd.f32 %v10544_v21, %v2148_v41  ;;  %8245 = vmatmul.msk.f32.gmra.mxu0 %vm544_vm1, %v1851_v15  ;;  %v16011_v21 = vld [vmem:[#allocation46_spill] sm:$0xff]  ;;  %v1854_v41 = vrot.slane %v10538_v14, 5 }
 0x26f   : > { %v2839_v57 = vpop.f32.mrf.mxu3  ;;  %v923_v60 = vadd.f32 %v16011_v21, %v16010_v7  ;;  %8344 = vmatmul.msk.f32.gmra.mxu2 %vm544_vm1, %v10664_v46  ;;  %v16015_v7 = vld [vmem:[#allocation51_spill] sm:$0xff]  ;;  %v10685_v14 = vld [vmem:[%s8998_s22 + $0x100] sm:$0xff] }
 0x270   : > { %v2746_v11 = vadd.f32 %v10552_v18, %v2532_v45  ;;  %v10657_v3 = vadd.f32 %v2839_v57, %v2744_v12  ;;  %v2419_v18 = vpop.f32.mrf.mxu1  ;;  %v2244_v12 = vrot.slane %v10614_v40, 6 }
 0x271   : > { %v1379_v30 = vadd.f32 %v10442_v26, %v923_v60  ;;  %v1855_v26 = vsel %vm1806_vm5, %v1852_v8, %v1854_v41  ;;  %v1856_v8 = vrot.slane %v10564_v55, 5 }
 0x272   : > { %v2245_v49 = vsel %vm2190_vm4, %v2242_v20, %v2244_v12 }
 0x273   : > { %v2026_v54 = vpop.f32.mrf.mxu0 }
 0x274   : > { %v2149_v15 = vadd.f32 %v2026_v54, %v1765_v38  ;;  %8385 = vmatmul.msk.f32.gmra.mxu3 %vm544_vm1, %v16012_v28  ;;  %v1766_v38 = vadd.f32 %v16013_v62, %v1379_v30  ;;  %v16018_v62 = vld [vmem:[#allocation90_spill] sm:$0xff] }
 0x275   : > { %8297 = vmatmul.msk.f32.gmra.mxu1 %vm544_vm1, %v2245_v49 }
 0x276   : > { %v2533_v6 = vadd.f32 %v10575_v27, %v2149_v15  ;;  %8246 = vmatmul.msk.f32.gmra.mxu0 %vm544_vm1, %v1853_v44  ;;  %v16014_v27 = vld [vmem:[#allocation52_spill] sm:$0xff] }
 0x277   : > { %v2842_v10 = vpop.f32.mrf.mxu3  ;;  %v926_v44 = vadd.f32 %v16015_v7, %v16014_v27  ;;  %8345 = vmatmul.msk.f32.gmra.mxu2 %vm544_vm1, %v10685_v14  ;;  %v10706_v7 = vld [vmem:[%s8998_s22 + $0x108] sm:$0xff] }
 0x278   : > { %v2747_v45 = vadd.f32 %v10582_v52, %v2533_v6  ;;  %v10678_v57 = vadd.f32 %v2842_v10, %v2745_v4  ;;  %v16016_v52 = vld [vmem:[#allocation61_spill] sm:$0xff]  ;;  %v2246_v4 = vrot.slane %v10641_v9, 6  ;;  %v2422_v15 = vpop.f32.mrf.mxu1  ;;  %v2636_v10 = vpop.f32.mrf.mxu2 }
 0x279   : > { %v1380_v20 = vadd.f32 %v10463_v56, %v926_v44 }
 0x27a   : > { %v2247_v28 = vsel %vm2190_vm4, %v2244_v12, %v2246_v4 }
 0x27b   : > { %v2029_v54 = vpop.f32.mrf.mxu0  ;;  %v1767_v56 = vadd.f32 %v16018_v62, %v1380_v20 }
 0x27c   : > { %v2150_v21 = vadd.f32 %v2029_v54, %v1766_v38  ;;  %8386 = vmatmul.msk.f32.gmra.mxu3 %vm544_vm1, %v16016_v52  ;;  %v16019_v54 = vld [vmem:[#allocation57_spill] sm:$0xff] }
 0x27d   : > { %8298 = vmatmul.msk.f32.gmra.mxu1 %vm544_vm1, %v2247_v28 }
 0x27e   : > { %v2534_v60 = vadd.f32 %v10605_v42, %v2150_v21  ;;  %8247 = vmatmul.msk.f32.gmra.mxu0 %vm544_vm1, %v1855_v26  ;;  %v1857_v42 = vsel %vm1806_vm5, %v1854_v41, %v1856_v8  ;;  %v16020_v26 = vld [vmem:[#allocation56_spill] sm:$0xff]  ;;  %v1858_v41 = vrot.slane %v10589_v1, 5  ;;  %v16023_v1 = vld [vmem:[#allocation67_spill] sm:$0xff] }
 0x27f   : > { %v2845_v6 = vpop.f32.mrf.mxu3  ;;  %v929_v27 = vadd.f32 %v16020_v26, %v16019_v54  ;;  %8346 = vmatmul.msk.f32.gmra.mxu2 %vm544_vm1, %v10706_v7 }
 0x280   : > { %v2748_v30 = vadd.f32 %v10609_v25, %v2534_v60  ;;  %v10699_v49 = vadd.f32 %v2845_v6, %v2746_v11  ;;  %v16021_v25 = vld [vmem:[#allocation64_spill] sm:$0xff]  ;;  %v2248_v11 = vrot.slane %v10664_v46, 6  ;;  %v2425_v28 = vpop.f32.mrf.mxu1 }
 0x281   : > { %v1381_v12 = vadd.f32 %v10484_v0, %v929_v27  ;;  %v1859_v0 = vsel %vm1806_vm5, %v1856_v8, %v1858_v41 }
 0x282   : > { %16017 = vst [vmem:[#allocation18_spill] sm:$0xff] %v10699_v49  ;;  %v2249_v21 = vsel %vm2190_vm4, %v2246_v4, %v2248_v11 }
 0x283   : > { %v2032_v38 = vpop.f32.mrf.mxu0  ;;  %v1768_v6 = vadd.f32 %v9841_v31, %v1381_v12  ;;  %v1860_v31 = vrot.slane %v10614_v40, 5  ;;  %v10741_v12 = vld [vmem:[%s8998_s22 + $0x118] sm:$0xff]  ;;  %v16025_v40 = vld [vmem:[#allocation70_spill] sm:$0xff] }
 0x284   : > { %v2151_v55 = vadd.f32 %v2032_v38, %v1767_v56  ;;  %8387 = vmatmul.msk.f32.gmra.mxu3 %vm544_vm1, %v16021_v25  ;;  %v10725_v38 = vld [vmem:[%s8998_s22 + $0x110] sm:$0xff] }
 0x285   : > { %8299 = vmatmul.msk.f32.gmra.mxu1 %vm544_vm1, %v2249_v21  ;;  %v1861_v27 = vsel %vm1806_vm5, %v1858_v41, %v1860_v31 }
 0x286   : > { %v2535_v44 = vadd.f32 %v10636_v29, %v2151_v55  ;;  %8248 = vmatmul.msk.f32.gmra.mxu0 %vm544_vm1, %v1857_v42  ;;  %v2639_v29 = vpop.f32.mrf.mxu2 }
 0x287   : > { %v2848_v20 = vpop.f32.mrf.mxu3  ;;  %8347 = vmatmul.msk.f32.gmra.mxu2 %vm544_vm1, %v10725_v38 }
 0x288   : > { %v2749_v52 = vadd.f32 %v10647_v13, %v2535_v44  ;;  %v10720_v60 = vadd.f32 %v2848_v20, %v2747_v45  ;;  %v2250_v13 = vrot.slane %v10685_v14, 6  ;;  %v2428_v55 = vpop.f32.mrf.mxu1 }
 0x28a   : > { %16022 = vst [vmem:[#allocation17_spill] sm:$0xff] %v10720_v60  ;;  %v2251_v4 = vsel %vm2190_vm4, %v2248_v11, %v2250_v13  ;;  %v1862_v11 = vrot.slane %v10641_v9, 5 }
 0x28b   : > { %v2035_v62 = vpop.f32.mrf.mxu0 }
 0x28c   : > { %v2152_v56 = vadd.f32 %v2035_v62, %v1768_v6  ;;  %8388 = vmatmul.msk.f32.gmra.mxu3 %vm544_vm1, %v16023_v1  ;;  %v1863_v6 = vsel %vm1806_vm5, %v1860_v31, %v1862_v11 }
 0x28d   : > { %8300 = vmatmul.msk.f32.gmra.mxu1 %vm544_vm1, %v2251_v4 }
 0x28e   : > { %v2536_v45 = vadd.f32 %v2419_v18, %v2152_v56  ;;  %8249 = vmatmul.msk.f32.gmra.mxu0 %vm544_vm1, %v1859_v0  ;;  %v2642_v18 = vpop.f32.mrf.mxu2  ;;  %v10757_v0 = vld [vmem:[%s8998_s22 + $0x120] sm:$0xff] }
 0x28f   : > { %v2851_v42 = vpop.f32.mrf.mxu3  ;;  %8348 = vmatmul.msk.f32.gmra.mxu2 %vm544_vm1, %v10741_v12 }
 0x290   : > { %v2750_v8 = vadd.f32 %v2633_v61, %v2536_v45  ;;  %v10736_v54 = vadd.f32 %v2851_v42, %v2748_v30  ;;  %v2252_v61 = vrot.slane %v10706_v7, 6  ;;  %v2431_v9 = vpop.f32.mrf.mxu1 }
 0x292   : > { %16024 = vst [vmem:[#allocation28_spill] sm:$0xff] %v10736_v54  ;;  %v2253_v44 = vsel %vm2190_vm4, %v2250_v13, %v2252_v61  ;;  %v16131_v54 = vld [vmem:[#allocation25_spill] sm:$0xff] }
 0x293   : > { %v2038_v26 = vpop.f32.mrf.mxu0 }
 0x294   : > { %v2153_v25 = vadd.f32 %v2038_v26, %v9868_v32  ;;  %8389 = vmatmul.msk.f32.gmra.mxu3 %vm544_vm1, %v16025_v40 }
 0x295   : > { %8301 = vmatmul.msk.f32.gmra.mxu1 %vm544_vm1, %v2253_v44 }
 0x296   : > { %v2537_v30 = vadd.f32 %v2422_v15, %v2153_v25  ;;  %8250 = vmatmul.msk.f32.gmra.mxu0 %vm544_vm1, %v1861_v27  ;;  %v16027_v15 = vld [vmem:[#allocation73_spill] sm:$0xff]  ;;  %v2645_v1 = vpop.f32.mrf.mxu2  ;;  %v10773_v27 = vld [vmem:[%s8998_s22 + $0x128] sm:$0xff] }
 0x297   : > { %v2854_v41 = vpop.f32.mrf.mxu3  ;;  %8349 = vmatmul.msk.f32.gmra.mxu2 %vm544_vm1, %v10757_v0 }
 0x298   : > { %v2751_v32 = vadd.f32 %v2636_v10, %v2537_v30  ;;  %v10752_v21 = vadd.f32 %v2854_v41, %v2749_v52  ;;  %v2254_v10 = vrot.slane %v10725_v38, 6  ;;  %v1864_v52 = vrot.slane %v10664_v46, 5  ;;  %v16029_v46 = vld [vmem:[#allocation76_spill] sm:$0xff]  ;;  %v2434_v25 = vpop.f32.mrf.mxu1 }
 0x29a   : > { %16026 = vst [vmem:[#allocation69_spill] sm:$0xff] %v10752_v21  ;;  %v1865_v42 = vsel %vm1806_vm5, %v1862_v11, %v1864_v52 }
 0x29b   : > { %v2041_v20 = vpop.f32.mrf.mxu0 }
 0x29c   : > { %v2154_v62 = vadd.f32 %v2041_v20, %v9887_v59  ;;  %8390 = vmatmul.msk.f32.gmra.mxu3 %vm544_vm1, %v16027_v15  ;;  %v2255_v59 = vsel %vm2190_vm4, %v2252_v61, %v2254_v10 }
 0x29d   : > { %8302 = vmatmul.msk.f32.gmra.mxu1 %vm544_vm1, %v2255_v59 }
 0x29e   : > { %v2538_v56 = vadd.f32 %v2425_v28, %v2154_v62  ;;  %8251 = vmatmul.msk.f32.gmra.mxu0 %vm544_vm1, %v1863_v6  ;;  %v2256_v28 = vrot.slane %v10741_v12, 6  ;;  %v2648_v11 = vpop.f32.mrf.mxu2 }
 0x29f   : > { %v2857_v45 = vpop.f32.mrf.mxu3  ;;  %8350 = vmatmul.msk.f32.gmra.mxu2 %vm544_vm1, %v10773_v27 }
 0x2a0   : > { %v2752_v13 = vadd.f32 %v2639_v29, %v2538_v56  ;;  %v10768_v31 = vadd.f32 %v2857_v45, %v2750_v8  ;;  %v1866_v8 = vrot.slane %v10685_v14, 5  ;;  %v2257_v40 = vsel %vm2190_vm4, %v2254_v10, %v2256_v28  ;;  %v16031_v14 = vld [vmem:[#allocation79_spill] sm:$0xff]  ;;  %v2437_v56 = vpop.f32.mrf.mxu1 }
 0x2a2   : > { %16028 = vst [vmem:[#allocation16_spill] sm:$0xff] %v10768_v31  ;;  %v1867_v41 = vsel %vm1806_vm5, %v1864_v52, %v1866_v8  ;;  %v16115_v31 = vld [vmem:[#allocation106_spill] sm:$0xff] }
 0x2a3   : > { %v2044_v4 = vpop.f32.mrf.mxu0 }
 0x2a4   : > { %v2155_v26 = vadd.f32 %v2044_v4, %v9904_v50  ;;  %8391 = vmatmul.msk.f32.gmra.mxu3 %vm544_vm1, %v16029_v46 }
 0x2a5   : > { %8303 = vmatmul.msk.f32.gmra.mxu1 %vm544_vm1, %v2257_v40 }
 0x2a6   : > { %v2539_v29 = vadd.f32 %v2428_v55, %v2155_v26  ;;  %8252 = vmatmul.msk.f32.gmra.mxu0 %vm544_vm1, %v1865_v42  ;;  %v10789_v55 = vld [vmem:[%s8998_s22 + $0x130] sm:$0xff]  ;;  %v2651_v45 = vpop.f32.mrf.mxu2  ;;  %v1870_v42 = vrot.slane %v10725_v38, 5  ;;  %v16035_v38 = vld [vmem:[#allocation85_spill] sm:$0xff] }
 0x2a7   : > { %v2860_v61 = vpop.f32.mrf.mxu3  ;;  %8351 = vmatmul.msk.f32.gmra.mxu2 %vm544_vm1, %v10789_v55 }
 0x2a8   : > { %v2753_v50 = vadd.f32 %v2642_v18, %v2539_v29  ;;  %v10784_v30 = vadd.f32 %v2860_v61, %v2751_v32  ;;  %v2258_v18 = vrot.slane %v10757_v0, 6  ;;  %v1868_v32 = vrot.slane %v10706_v7, 5  ;;  %v16033_v7 = vld [vmem:[#allocation82_spill] sm:$0xff]  ;;  %v2440_v40 = vpop.f32.mrf.mxu1 }
 0x2aa   : > { %16030 = vst [vmem:[#allocation63_spill] sm:$0xff] %v10784_v30  ;;  %v2259_v62 = vsel %vm2190_vm4, %v2256_v28, %v2258_v18  ;;  %v1869_v59 = vsel %vm1806_vm5, %v1866_v8, %v1868_v32  ;;  %v1871_v8 = vsel %vm1806_vm5, %v1868_v32, %v1870_v42 }
 0x2ab   : > { %v2047_v44 = vpop.f32.mrf.mxu0 }
 0x2ac   : > { %v2156_v20 = vadd.f32 %v2047_v44, %v9921_v2  ;;  %8392 = vmatmul.msk.f32.gmra.mxu3 %vm544_vm1, %v16031_v14  ;;  %v10821_v44 = vld [vmem:[%s8998_s22 + $0x140] sm:$0xff] }
 0x2ad   : > { %8304 = vmatmul.msk.f32.gmra.mxu1 %vm544_vm1, %v2259_v62 }
 0x2ae   : > { %v2540_v6 = vadd.f32 %v2431_v9, %v2156_v20  ;;  %8253 = vmatmul.msk.f32.gmra.mxu0 %vm544_vm1, %v1867_v41  ;;  %v10805_v9 = vld [vmem:[%s8998_s22 + $0x138] sm:$0xff]  ;;  %v1872_v41 = vrot.slane %v10741_v12, 5 }
 0x2af   : > { %v2863_v2 = vpop.f32.mrf.mxu3  ;;  %8352 = vmatmul.msk.f32.gmra.mxu2 %vm544_vm1, %v10805_v9 }
 0x2b0   : > { %v2754_v15 = vadd.f32 %v2645_v1, %v2540_v6  ;;  %v10800_v10 = vadd.f32 %v2863_v2, %v2752_v13  ;;  %v2260_v1 = vrot.slane %v10773_v27, 6  ;;  %v1873_v32 = vsel %vm1806_vm5, %v1870_v42, %v1872_v41  ;;  %v10837_v2 = vld [vmem:[%s8998_s22 + $0x148] sm:$0xff]  ;;  %v2443_v12 = vpop.f32.mrf.mxu1 }
 0x2b2   : > { %16032 = vst [vmem:[#allocation22_spill] sm:$0xff] %v10800_v10  ;;  %v2261_v26 = vsel %vm2190_vm4, %v2258_v18, %v2260_v1  ;;  %v16111_v10 = vld [vmem:[#allocation97_spill] sm:$0xff] }
 0x2b3   : > { %v2050_v52 = vpop.f32.mrf.mxu0 }
 0x2b4   : > { %v2157_v4 = vadd.f32 %v2050_v52, %v9938_v63  ;;  %8393 = vmatmul.msk.f32.gmra.mxu3 %vm544_vm1, %v16033_v7  ;;  %v2264_v52 = vrot.slane %v10805_v9, 6 }
 0x2b5   : > { %8305 = vmatmul.msk.f32.gmra.mxu1 %vm544_vm1, %v2261_v26 }
 0x2b6   : > { %v2541_v13 = vadd.f32 %v2434_v25, %v2157_v4  ;;  %8254 = vmatmul.msk.f32.gmra.mxu0 %vm544_vm1, %v1869_v59  ;;  %v2654_v25 = vpop.f32.mrf.mxu2 }
 0x2b7   : > { %v2866_v63 = vpop.f32.mrf.mxu3  ;;  %8353 = vmatmul.msk.f32.gmra.mxu2 %vm544_vm1, %v10821_v44 }
 0x2b8   : > { %v2755_v46 = vadd.f32 %v2648_v11, %v2541_v13  ;;  %v10816_v28 = vadd.f32 %v2866_v63, %v2753_v50  ;;  %v2262_v11 = vrot.slane %v10789_v55, 6  ;;  %v10853_v63 = vld [vmem:[%s8998_s22 + $0x150] sm:$0xff] }
 0x2ba   : > { %16034 = vst [vmem:[#allocation21_spill] sm:$0xff] %v10816_v28  ;;  %v2263_v20 = vsel %vm2190_vm4, %v2260_v1, %v2262_v11 }
 0x2bb   : > { %v2053_v29 = vpop.f32.mrf.mxu0 }
 0x2bc   : > { %v2158_v61 = vadd.f32 %v2053_v29, %v9952_v43  ;;  %8394 = vmatmul.msk.f32.gmra.mxu3 %vm544_vm1, %v16035_v38  ;;  %v2266_v29 = vrot.slane %v10821_v44, 6 }
 0x2bd   : > { %8306 = vmatmul.msk.f32.gmra.mxu1 %vm544_vm1, %v2263_v20 }
 0x2be   : > { %v2542_v50 = vadd.f32 %v2437_v56, %v2158_v61  ;;  %8255 = vmatmul.msk.f32.gmra.mxu0 %vm544_vm1, %v1871_v8  ;;  %v16037_v56 = vld [vmem:[#allocation88_spill] sm:$0xff]  ;;  %v2267_v61 = vsel %vm2190_vm4, %v2264_v52, %v2266_v29 }
 0x2bf   : > { %v2869_v14 = vpop.f32.mrf.mxu3  ;;  %8354 = vmatmul.msk.f32.gmra.mxu2 %vm544_vm1, %v10837_v2 }
 0x2c0   : > { %v2756_v43 = vadd.f32 %v2651_v45, %v2542_v50  ;;  %v10832_v18 = vadd.f32 %v2869_v14, %v2754_v15  ;;  %v1874_v15 = vrot.slane %v10757_v0, 5  ;;  %v2657_v45 = vpop.f32.mrf.mxu2  ;;  %v16039_v0 = vld [vmem:[#allocation91_spill] sm:$0xff]  ;;  %v10869_v14 = vld [vmem:[%s8998_s22 + $0x158] sm:$0xff] }
 0x2c2   : > { %16036 = vst [vmem:[#allocation33_spill] sm:$0xff] %v10832_v18  ;;  %v1875_v42 = vsel %vm1806_vm5, %v1872_v41, %v1874_v15 }
 0x2c3   : > { %v2056_v6 = vpop.f32.mrf.mxu0 }
 0x2c4   : > { %v2159_v62 = vadd.f32 %v2056_v6, %v9971_v48  ;;  %8395 = vmatmul.msk.f32.gmra.mxu3 %vm544_vm1, %v16037_v56  ;;  %v2265_v48 = vsel %vm2190_vm4, %v2262_v11, %v2264_v52 }
 0x2c5   : > { %8307 = vmatmul.msk.f32.gmra.mxu1 %vm544_vm1, %v2265_v48 }
 0x2c6   : > { %v2543_v59 = vadd.f32 %v2440_v40, %v2159_v62  ;;  %8256 = vmatmul.msk.f32.gmra.mxu0 %vm544_vm1, %v1873_v32  ;;  %v1876_v40 = vrot.slane %v10773_v27, 5  ;;  %v2268_v27 = vrot.slane %v10837_v2, 6 }
 0x2c7   : > { %v2872_v7 = vpop.f32.mrf.mxu3  ;;  %8355 = vmatmul.msk.f32.gmra.mxu2 %vm544_vm1, %v10853_v63 }
 0x2c8   : > { %v2757_v4 = vadd.f32 %v2654_v25, %v2543_v59  ;;  %v10848_v1 = vadd.f32 %v2872_v7, %v2755_v46  ;;  %v2446_v46 = vpop.f32.mrf.mxu1  ;;  %v2660_v11 = vpop.f32.mrf.mxu2  ;;  %v1877_v41 = vsel %vm1806_vm5, %v1874_v15, %v1876_v40  ;;  %v2269_v32 = vsel %vm2190_vm4, %v2266_v29, %v2268_v27 }
 0x2ca   : > { %16038 = vst [vmem:[#allocation72_spill] sm:$0xff] %v10848_v1 }
 0x2cb   : > { %v2059_v13 = vpop.f32.mrf.mxu0 }
 0x2cc   : > { %v2160_v26 = vadd.f32 %v2059_v13, %v9988_v36  ;;  %8396 = vmatmul.msk.f32.gmra.mxu3 %vm544_vm1, %v16039_v0 }
 0x2cd   : > { %8308 = vmatmul.msk.f32.gmra.mxu1 %vm544_vm1, %v2267_v61  ;;  %v1882_v61 = vrot.slane %v10821_v44, 5 }
 0x2ce   : > { %v2544_v8 = vadd.f32 %v2443_v12, %v2160_v26  ;;  %8257 = vmatmul.msk.f32.gmra.mxu0 %vm544_vm1, %v1875_v42 }
 0x2cf   : > { %v2875_v38 = vpop.f32.mrf.mxu3  ;;  %8356 = vmatmul.msk.f32.gmra.mxu2 %vm544_vm1, %v10869_v14 }
 0x2d0   : > { %v2758_v36 = vadd.f32 %v2657_v45, %v2544_v8  ;;  %v10864_v25 = vadd.f32 %v2875_v38, %v2756_v43  ;;  %v1878_v43 = vrot.slane %v10789_v55, 5  ;;  %v2449_v12 = vpop.f32.mrf.mxu1  ;;  %v10885_v45 = vld [vmem:[%s8998_s22 + $0x160] sm:$0xff]  ;;  %v2270_v55 = vrot.slane %v10853_v63, 6  ;;  %v10901_v8 = vld [vmem:[%s8998_s22 + $0x168] sm:$0xff] }
 0x2d1   : > { %v2274_v44 = vrot.slane %v10885_v45, 6 }
 0x2d2   : > { %16040 = vst [vmem:[#allocation27_spill] sm:$0xff] %v10864_v25  ;;  %v1879_v59 = vsel %vm1806_vm5, %v1876_v40, %v1878_v43  ;;  %v2271_v7 = vsel %vm2190_vm4, %v2268_v27, %v2270_v55 }
 0x2d3   : > { %v2062_v50 = vpop.f32.mrf.mxu0 }
 0x2d4   : > { %v2161_v20 = vadd.f32 %v2062_v50, %v10005_v22  ;;  %8397 = vmatmul.msk.f32.gmra.mxu3 %vm544_vm1, %v9851_v58  ;;  %v2663_v58 = vpop.f32.mrf.mxu2 }
 0x2d5   : > { %8309 = vmatmul.msk.f32.gmra.mxu1 %vm544_vm1, %v2269_v32 }
 0x2d6   : > { %v2545_v6 = vadd.f32 %v2446_v46, %v2161_v20  ;;  %8258 = vmatmul.msk.f32.gmra.mxu0 %vm544_vm1, %v1877_v41  ;;  %v2272_v46 = vrot.slane %v10869_v14, 6  ;;  %v10918_v41 = vld [vmem:[%s8998_s22 + $0x170] sm:$0xff]  ;;  %v1884_v20 = vrot.slane %v10837_v2, 5  ;;  %v1886_v2 = vrot.slane %v10853_v63, 5 }
 0x2d7   : > { %v2878_v22 = vpop.f32.mrf.mxu3  ;;  %8357 = vmatmul.msk.f32.gmra.mxu2 %vm544_vm1, %v10885_v45  ;;  %v1888_v63 = vrot.slane %v10869_v14, 5  ;;  %v2788_v14 = vrot.slane %v10901_v8, 1 }
 0x2d8   : > { %v2759_v62 = vadd.f32 %v2660_v11, %v2545_v6  ;;  %v10880_v56 = vadd.f32 %v2878_v22, %v2757_v4  ;;  %v1880_v4 = vrot.slane %v10805_v9, 5  ;;  %v2452_v0 = vpop.f32.mrf.mxu1  ;;  %v2275_v27 = vsel %vm2190_vm4, %v2272_v46, %v2274_v44  ;;  %v8897_v22 = vld [vmem:[%s8998_s22 + $0x178] sm:$0xff] }
 0x2da   : > { %16041 = vst [vmem:[#allocation26_spill] sm:$0xff] %v10880_v56  ;;  %v1881_v29 = vsel %vm1806_vm5, %v1878_v43, %v1880_v4 }
 0x2db   : > { %v2065_v52 = vpop.f32.mrf.mxu0 }
 0x2dc   : > { %v2162_v15 = vadd.f32 %v2065_v52, %v10022_v39  ;;  %8398 = vmatmul.msk.f32.gmra.mxu3 %vm544_vm1, %v9877_v33  ;;  %v2666_v9 = vpop.f32.mrf.mxu2 }
 0x2dd   : > { %8310 = vmatmul.msk.f32.gmra.mxu1 %vm544_vm1, %v2271_v7  ;;  %v1889_v7 = vsel %vm1806_vm5, %v1886_v2, %v1888_v63 }
 0x2de   : > { %v2546_v48 = vadd.f32 %v2449_v12, %v2162_v15  ;;  %8259 = vmatmul.msk.f32.gmra.mxu0 %vm544_vm1, %v1879_v59  ;;  %v1887_v15 = vsel %vm1806_vm5, %v1884_v20, %v1886_v2  ;;  %v16053_v2 = vld [vmem:[#allocation124_spill] sm:$0xff] }
 0x2df   : > { %v2881_v39 = vpop.f32.mrf.mxu3  ;;  %8358 = vmatmul.msk.f32.gmra.mxu2 %vm544_vm1, %v10901_v8 }
 0x2e0   : > { %v2760_v13 = vadd.f32 %v2663_v58, %v2546_v48  ;;  %v10896_v42 = vadd.f32 %v2881_v39, %v2758_v36  ;;  %v2273_v36 = vsel %vm2190_vm4, %v2270_v55, %v2272_v46  ;;  %v10949_v55 = vld [vmem:[%s8998_s22 + $0x180] sm:$0xff]  ;;  %v1890_v39 = vrot.slane %v10885_v45, 5 }
 0x2e2   : > { %16042 = vst [vmem:[#allocation38_spill] sm:$0xff] %v10896_v42 }
 0x2e3   : > { %v2068_v26 = vpop.f32.mrf.mxu0 }
 0x2e4   : > { %v2163_v33 = vadd.f32 %v2068_v26, %v10037_v24  ;;  %8399 = vmatmul.msk.f32.gmra.mxu3 %vm544_vm1, %v9894_v53  ;;  %v1883_v53 = vsel %vm1806_vm5, %v1880_v4, %v1882_v61 }
 0x2e5   : > { %8311 = vmatmul.msk.f32.gmra.mxu1 %vm544_vm1, %v2273_v36 }
 0x2e6   : > { %v2547_v40 = vadd.f32 %v2452_v0, %v2163_v33  ;;  %8260 = vmatmul.msk.f32.gmra.mxu0 %vm544_vm1, %v1881_v29  ;;  %v2789_v0 = vsel %vm454_vm2, %v9006_v5, %v2788_v14  ;;  %v1891_v33 = vsel %vm1806_vm5, %v1888_v63, %v1890_v39  ;;  %v2792_v5 = vrot.slane %v8897_v22, 1  ;;  %v8457_v63 = vld [vmem:[%s15551_s3 + $0x8] sm:$0xff] }
 0x2e7   : > { %v2884_v38 = vpop.f32.mrf.mxu3  ;;  %8359 = vmatmul.msk.f32.gmra.mxu2 %vm544_vm1, %v10918_v41  ;;  %4996 = vmatpush.msra.mxu1 %v8457_v63 }
 0x2e8   : > { %v2761_v24 = vadd.f32 %v2666_v9, %v2547_v40  ;;  %v10912_v11 = vadd.f32 %v2884_v38, %v2759_v62  ;;  %v1885_v62 = vsel %vm1806_vm5, %v1882_v61, %v1884_v20  ;;  %v1892_v9 = vrot.slane %v10901_v8, 5 }
 0x2e9   : > { %v1894_v61 = vrot.slane %v10918_v41, 5 }
 0x2ea   : > { %16043 = vst [vmem:[#allocation75_spill] sm:$0xff] %v10912_v11  ;;  %v1893_v40 = vsel %vm1806_vm5, %v1890_v39, %v1892_v9  ;;  %v16061_v39 = vld [vmem:[#allocation2_spill] sm:$0xff]  ;;  %v16103_v11 = vld [vmem:[#allocation159_spill] sm:$0xff] }
 0x2eb   : > { %v10914_v50 = vpop.f32.mrf.mxu0  ;;  %v1895_v38 = vsel %vm1806_vm5, %v1892_v9, %v1894_v61 }
 0x2ec   : > { %8400 = vmatmul.msk.f32.gmra.mxu3 %vm544_vm1, %v9911_v19  ;;  %v2276_v19 = vrot.slane %v10901_v8, 6  ;;  %v2794_v8 = vrot.slane %v10949_v55, 1 }
 0x2ed   : > { %8312 = vmatmul.msk.f32.gmra.mxu1 %vm544_vm1, %v2275_v27 }
 0x2ee   : > { %8261 = vmatmul.msk.f32.gmra.mxu0 %vm544_vm1, %v1883_v53  ;;  %v2277_v12 = vsel %vm2190_vm4, %v2274_v44, %v2276_v19  ;;  %v1896_v53 = vrot.slane %v8897_v22, 5  ;;  %v2795_v44 = vsel %vm454_vm2, %v2792_v5, %v2794_v8 }
 0x2ef   : > { %v2887_v6 = vpop.f32.mrf.mxu3  ;;  %8360 = vmatmul.msk.f32.gmra.mxu2 %vm544_vm1, %v8897_v22 }
 0x2f0   : > { %v10929_v43 = vadd.f32 %v2887_v6, %v2760_v13  ;;  %v10964_v13 = vld [vmem:[%s8998_s22 + $0x188] sm:$0xff]  ;;  %v1897_v27 = vsel %vm1806_vm5, %v1894_v61, %v1896_v53 }
 0x2f1   : > { %16046 = vst [vmem:[#allocation43_spill] sm:$0xff] %v10964_v13 }
 0x2f2   : > { %16044 = vst [vmem:[#allocation32_spill] sm:$0xff] %v10929_v43  ;;  %v16102_v43 = vld [vmem:[#allocation110_spill] sm:$0xff] }
 0x2f3   : > { %v10931_v32 = vpop.f32.mrf.mxu0  ;;  %v989_v42 = vadd.f32 %v16103_v11, %v16102_v43  ;;  %v16113_v43 = vld [vmem:[#allocation102_spill] sm:$0xff] }
 0x2f4   : > { %8401 = vmatmul.msk.f32.gmra.mxu3 %vm544_vm1, %v9928_v16  ;;  %v2278_v16 = vrot.slane %v10918_v41, 6 }
 0x2f5   : > { %8313 = vmatmul.msk.f32.gmra.mxu1 %vm544_vm1, %v2277_v12 }
 0x2f6   : > { %8262 = vmatmul.msk.f32.gmra.mxu0 %vm544_vm1, %v1885_v62  ;;  %v2279_v48 = vsel %vm2190_vm4, %v2276_v19, %v2278_v16  ;;  %v16051_v19 = vld [vmem:[#allocation120_spill] sm:$0xff] }
 0x2f7   : > { %v2890_v52 = vpop.f32.mrf.mxu3  ;;  %8361 = vmatmul.msk.f32.gmra.mxu2 %vm544_vm1, %v10949_v55 }
 0x2f8   : > { %v10943_v59 = vadd.f32 %v2890_v52, %v2761_v24  ;;  %v16055_v52 = vld [vmem:[#allocation129_spill] sm:$0xff] }
 0x2fa   : > { %16045 = vst [vmem:[#allocation31_spill] sm:$0xff] %v10943_v59  ;;  %v16100_v59 = vld [vmem:[#allocation108_spill] sm:$0xff] }
 0x2fb   : > { %v10945_v58 = vpop.f32.mrf.mxu0 }
 0x2fc   : > { %8402 = vmatmul.msk.f32.gmra.mxu3 %vm544_vm1, %v9945_v47  ;;  %v2280_v47 = vrot.slane %v8897_v22, 6 }
 0x2fd   : > { %8314 = vmatmul.msk.f32.gmra.mxu1 %vm544_vm1, %v2279_v48  ;;  %v16057_v48 = vld [vmem:[#allocation134_spill] sm:$0xff] }
 0x2fe   : > { %8263 = vmatmul.msk.f32.gmra.mxu0 %vm544_vm1, %v1887_v15  ;;  %v2281_v26 = vsel %vm2190_vm4, %v2278_v16, %v2280_v47  ;;  %v4818_v15 = vld [vmem:[%s15551_s3] sm:$0xff]  ;;  %v16059_v47 = vld [vmem:[#allocation139_spill] sm:$0xff] }
 0x2ff   : > { %8362 = vmatmul.msk.f32.gmra.mxu2 %vm544_vm1, %v10964_v13  ;;  %v11080_v63 = vpop.f32.mrf.mxu3 }
 0x300   : > { %5173 = vmatpush.msra.mxu2 %v4818_v15 }
 0x303   : > { %v10960_v4 = vpop.f32.mrf.mxu0 }
 0x304   : > { %8403 = vmatmul.msk.f32.gmra.mxu3 %vm544_vm1, %v9962_v51  ;;  %v2790_v51 = vrot.slane %v10918_v41, 1  ;;  %v2796_v41 = vrot.slane %v10964_v13, 1 }
 0x305   : > { %8315 = vmatmul.msk.f32.gmra.mxu1 %vm544_vm1, %v2281_v26 }
 0x306   : > { %8264 = vmatmul.msk.f32.gmra.mxu0 %vm544_vm1, %v1889_v7  ;;  %v2791_v45 = vsel %vm454_vm2, %v2788_v14, %v2790_v51  ;;  %v2793_v36 = vsel %vm454_vm2, %v2790_v51, %v2792_v5  ;;  %v2797_v6 = vsel %vm454_vm2, %v2794_v8, %v2796_v41  ;;  %v16065_v51 = vld [vmem:[#allocation4_spill] sm:$0xff]  ;;  %v16069_v5 = vld [vmem:[#allocation6_spill] sm:$0xff] }
 0x307   : > { %v16073_v8 = vld [vmem:[#allocation8_spill] sm:$0xff] }
 0x30b   : > { %v10977_v29 = vpop.f32.mrf.mxu0 }
 0x30c   : > { %8404 = vmatmul.msk.f32.gmra.mxu3 %vm544_vm1, %v2789_v0  ;;  %v16063_v0 = vld [vmem:[#allocation3_spill] sm:$0xff] }
 0x30e   : > { %8265 = vmatmul.msk.f32.gmra.mxu0 %vm544_vm1, %v1891_v33 }
 0x313   : > { %v10985_v46 = vpop.f32.mrf.mxu0 }
 0x314   : > { %16047 = vst [vmem:[#allocation78_spill] sm:$0xff] %v10985_v46  ;;  %8405 = vmatmul.msk.f32.gmra.mxu3 %vm544_vm1, %v2791_v45  ;;  %v16067_v45 = vld [vmem:[#allocation5_spill] sm:$0xff] }
 0x316   : > { %8266 = vmatmul.msk.f32.gmra.mxu0 %vm544_vm1, %v1893_v40 }
 0x31b   : > { %v10992_v24 = vpop.f32.mrf.mxu0 }
 0x31c   : > { %16048 = vst [vmem:[#allocation37_spill] sm:$0xff] %v10992_v24  ;;  %8406 = vmatmul.msk.f32.gmra.mxu3 %vm544_vm1, %v2793_v36  ;;  %v16071_v36 = vld [vmem:[#allocation7_spill] sm:$0xff] }
 0x31d   : > { %v16146_v24 = vld [vmem:[#allocation147_spill] sm:$0xff] }
 0x31e   : > { %8267 = vmatmul.msk.f32.gmra.mxu0 %vm544_vm1, %v1895_v38 }
 0x323   : > { %v10999_v20 = vpop.f32.mrf.mxu0 }
 0x324   : > { %16049 = vst [vmem:[#allocation36_spill] sm:$0xff] %v10999_v20  ;;  %8407 = vmatmul.msk.f32.gmra.mxu3 %vm544_vm1, %v2795_v44  ;;  %v11064_v44 = vpop.f32.mrf.mxu1 }
 0x326   : > { %8268 = vmatmul.msk.f32.gmra.mxu0 %vm544_vm1, %v1897_v27  ;;  %v16075_v27 = vld [vmem:[#allocation9_spill] sm:$0xff] }
 0x32b   : > { %v11006_v62 = vpop.f32.mrf.mxu0 }
 0x32c   : > { %16050 = vst [vmem:[#allocation48_spill] sm:$0xff] %v11006_v62  ;;  %8408 = vmatmul.msk.f32.gmra.mxu3 %vm544_vm1, %v2797_v6 }
 0x32e   : > { %8412 = vmatmul.msk.f32.vlgmr.msrb.gmra.mxu0 %vm544_vm1, %v16051_v19  ;;  %v11072_v19 = vpop.f32.mrf.mxu1 }
 0x333   : > { %v11011_v22 = vpop.f32.mrf.mxu0 }
 0x334   : > { %16052 = vst [vmem:[#allocation81_spill] sm:$0xff] %v11011_v22  ;;  %8409 = vmatmul.msk.f32.gmra.mxu3 %vm544_vm1, %v2796_v41  ;;  %v11068_v41 = vpop.f32.mrf.mxu2 }
 0x336   : > { %8413 = vmatmul.msk.f32.gmra.mxu0 %vm544_vm1, %v16053_v2  ;;  %v16077_v2 = vld [vmem:[#allocation10_spill] sm:$0xff] }
 0x33b   : > { %v11016_v12 = vpop.f32.mrf.mxu0 }
 0x33c   : > { %16054 = vst [vmem:[#allocation42_spill] sm:$0xff] %v11016_v12  ;;  %v11078_v15 = vpop.f32.mrf.mxu2  ;;  %v16116_v12 = vld [vmem:[#allocation109_spill] sm:$0xff] }
 0x33e   : > { %8414 = vmatmul.msk.f32.gmra.mxu0 %vm544_vm1, %v16055_v52 }
 0x343   : > { %v11023_v16 = vpop.f32.mrf.mxu0 }
 0x344   : > { %16056 = vst [vmem:[#allocation41_spill] sm:$0xff] %v11023_v16 }
 0x346   : > { %8415 = vmatmul.msk.f32.gmra.mxu0 %vm544_vm1, %v16057_v48  ;;  %v16079_v48 = vld [vmem:[#allocation11_spill] sm:$0xff] }
 0x34b   : > { %v11030_v7 = vpop.f32.mrf.mxu0 }
 0x34c   : > { %16058 = vst [vmem:[#allocation53_spill] sm:$0xff] %v11030_v7  ;;  %v16096_v7 = vld [vmem:[#allocation146_spill] sm:$0xff] }
 0x34e   : > { %8416 = vmatmul.msk.f32.gmra.mxu0 %vm544_vm1, %v16059_v47  ;;  %v11084_v47 = vpop.f32.mrf.mxu1 }
 0x353   : > { %v11034_v14 = vpop.f32.mrf.mxu0 }
 0x354   : > { %16060 = vst [vmem:[#allocation84_spill] sm:$0xff] %v11034_v14  ;;  %v16095_v14 = vld [vmem:[#allocation105_spill] sm:$0xff] }
 0x356   : > { %8417 = vmatmul.msk.f32.gmra.mxu0 %vm544_vm1, %v16061_v39 }
 0x35b   : > { %v11038_v26 = vpop.f32.mrf.mxu0 }
 0x35c   : > { %16062 = vst [vmem:[#allocation47_spill] sm:$0xff] %v11038_v26 }
 0x35e   : > { %8418 = vmatmul.msk.f32.gmra.mxu0 %vm544_vm1, %v16063_v0  ;;  %v11088_v0 = vpop.f32.mrf.mxu2 }
 0x363   : > { %v11042_v33 = vpop.f32.mrf.mxu0 }
 0x364   : > { %16064 = vst [vmem:[#allocation46_spill] sm:$0xff] %v11042_v33  ;;  %v16094_v33 = vld [vmem:[#allocation141_spill] sm:$0xff] }
 0x366   : > { %8419 = vmatmul.msk.f32.gmra.mxu0 %vm544_vm1, %v16065_v51  ;;  %v16081_v51 = vld [vmem:[#allocation12_spill] sm:$0xff] }
 0x36b   : > { %v11046_v9 = vpop.f32.mrf.mxu0 }
 0x36c   : > { %16066 = vst [vmem:[#allocation58_spill] sm:$0xff] %v11046_v9  ;;  %v16093_v9 = vld [vmem:[#allocation103_spill] sm:$0xff] }
 0x36d   : > { %v977_v26 = vadd.f32 %v16094_v33, %v16093_v9  ;;  %v16106_v33 = vld [vmem:[#allocation114_spill] sm:$0xff] }
 0x36e   : > { %8420 = vmatmul.msk.f32.gmra.mxu0 %vm544_vm1, %v16067_v45  ;;  %v11092_v45 = vpop.f32.mrf.mxu3  ;;  %v16107_v9 = vld [vmem:[#allocation166_spill] sm:$0xff] }
 0x36f   : > { %16082 = vst [vmem:[#allocation64_spill] sm:$0xff] %v11092_v45  ;;  %v995_v25 = vadd.f32 %v16107_v9, %v16106_v33 }
 0x373   : > { %v11050_v40 = vpop.f32.mrf.mxu0 }
 0x374   : > { %16068 = vst [vmem:[#allocation87_spill] sm:$0xff] %v11050_v40 }
 0x376   : > { %8421 = vmatmul.msk.f32.gmra.mxu0 %vm544_vm1, %v16069_v5  ;;  %v11094_v5 = vpop.f32.mrf.mxu1  ;;  %v11118_v16 = vpop.f32.mrf.mxu3 }
 0x377   : > { %16097 = vst [vmem:[#allocation70_spill] sm:$0xff] %v11118_v16 }
 0x37b   : > { %v11054_v61 = vpop.f32.mrf.mxu0 }
 0x37c   : > { %16070 = vst [vmem:[#allocation52_spill] sm:$0xff] %v11054_v61  ;;  %v11110_v61 = vpop.f32.mrf.mxu2 }
 0x37d   : > { %16090 = vst [vmem:[#allocation67_spill] sm:$0xff] %v11110_v61  ;;  %v16143_v61 = vld [vmem:[#allocation137_spill] sm:$0xff] }
 0x37e   : > { %8422 = vmatmul.msk.f32.gmra.mxu0 %vm544_vm1, %v16071_v36  ;;  %v11174_v60 = vpop.f32.mrf.mxu3 }
 0x37f   : > { %16140 = vst [vmem:[#allocation76_spill] sm:$0xff] %v11174_v60  ;;  %v16145_v60 = vld [vmem:[#allocation143_spill] sm:$0xff] }
 0x383   : > { %v11058_v38 = vpop.f32.mrf.mxu0 }
 0x384   : > { %16072 = vst [vmem:[#allocation51_spill] sm:$0xff] %v11058_v38 }
 0x386   : > { %8423 = vmatmul.msk.f32.gmra.mxu0 %vm544_vm1, %v16073_v8 }
 0x38b   : > { %v11062_v53 = vpop.f32.mrf.mxu0 }
 0x38c   : > { %16074 = vst [vmem:[#allocation61_spill] sm:$0xff] %v11062_v53 }
 0x38e   : > { %8424 = vmatmul.msk.f32.gmra.mxu0 %vm544_vm1, %v16075_v27  ;;  %v11100_v27 = vld [vmem:[%s15550_s2] ss:$0 sm:$0xff] }
 0x393   : > { %v11070_v6 = vpop.f32.mrf.mxu0 }
 0x394   : > { %16076 = vst [vmem:[#allocation90_spill] sm:$0xff] %v11070_v6  ;;  %v16089_v6 = vld [vmem:[#allocation130_spill] sm:$0xff] }
 0x395   : > { %v971_v38 = vadd.f32 %v16089_v6, %v16088_v17  ;;  %v16101_v17 = vld [vmem:[#allocation155_spill] sm:$0xff] }
 0x396   : > { %8425 = vmatmul.msk.f32.gmra.mxu0 %vm544_vm1, %v16077_v2  ;;  %v16083_v2 = vld [vmem:[#allocation13_spill] sm:$0xff]  ;;  %v986_v6 = vadd.f32 %v16101_v17, %v16100_v59  ;;  %v11136_v59 = vpop.f32.mrf.mxu1 }
 0x39b   : > { %v11076_v52 = vpop.f32.mrf.mxu0 }
 0x39c   : > { %16078 = vst [vmem:[#allocation57_spill] sm:$0xff] %v11076_v52  ;;  %v16086_v52 = vld [vmem:[#allocation98_spill] sm:$0xff] }
 0x39e   : > { %8426 = vmatmul.msk.f32.gmra.mxu0 %vm544_vm1, %v16079_v48  ;;  %v16084_v48 = vld [vmem:[#allocation94_spill] sm:$0xff]  ;;  %v11188_v46 = vpop.f32.mrf.mxu1 }
 0x3a3   : > { %v11086_v39 = vpop.f32.mrf.mxu0 }
 0x3a4   : > { %16080 = vst [vmem:[#allocation56_spill] sm:$0xff] %v11086_v39  ;;  %v16085_v39 = vld [vmem:[#allocation118_spill] sm:$0xff] }
 0x3a5   : > { %v965_v35 = vadd.f32 %v16085_v39, %v16084_v48  ;;  %v16098_v48 = vld [vmem:[#allocation107_spill] sm:$0xff] }
 0x3a6   : > { %8427 = vmatmul.msk.f32.gmra.mxu0 %vm544_vm1, %v16081_v51  ;;  %v16087_v51 = vld [vmem:[#allocation125_spill] sm:$0xff] }
 0x3a7   : > { %v968_v53 = vadd.f32 %v16087_v51, %v16086_v52  ;;  %v16099_v52 = vld [vmem:[#allocation150_spill] sm:$0xff] }
 0x3a8   : > { %v983_v51 = vadd.f32 %v16099_v52, %v16098_v48  ;;  %v16112_v52 = vld [vmem:[#allocation100_spill] sm:$0xff] }
 0x3a9   : > { %v1394_v48 = vadd.f32 %v16111_v10, %v968_v53  ;;  %v1395_v30 = vadd.f32 %v16112_v52, %v971_v38  ;;  %v16119_v38 = vld [vmem:[#allocation15_spill] sm:$0xff] }
 0x3aa   : > { %v16120_v53 = vld [vmem:[#allocation119_spill] sm:$0xff] }
 0x3ab   : > { %v3054_v36 = vpop.f32.mrf.mxu0 }
 0x3ac   : > { %v3189_v8 = vadd.f32 %v3054_v36, %v10580_v34  ;;  %v16091_v34 = vld [vmem:[#allocation101_spill] sm:$0xff]  ;;  %v16092_v36 = vld [vmem:[#allocation136_spill] sm:$0xff] }
 0x3ad   : > { %v974_v40 = vadd.f32 %v16092_v36, %v16091_v34  ;;  %v16104_v34 = vld [vmem:[#allocation112_spill] sm:$0xff]  ;;  %v16105_v36 = vld [vmem:[#allocation163_spill] sm:$0xff] }
 0x3ae   : > { %8428 = vmatmul.msk.f32.gmra.mxu0 %vm544_vm1, %v16083_v2  ;;  %v980_v2 = vadd.f32 %v16096_v7, %v16095_v14  ;;  %v3238_v39 = vadd.f32 %v11100_v27, %v3189_v8  ;;  %v992_v56 = vadd.f32 %v16105_v36, %v16104_v34  ;;  %v16108_v7 = vld [vmem:[#allocation116_spill] sm:$0xff]  ;;  %v16109_v14 = vld [vmem:[#allocation170_spill] sm:$0xff]  ;;  %v16110_v8 = vld [vmem:[#allocation93_spill] sm:$0xff] }
 0x3af   : > { %v998_v1 = vadd.f32 %v16109_v14, %v16108_v7  ;;  %v1393_v28 = vadd.f32 %v16110_v8, %v965_v35  ;;  %v1396_v17 = vadd.f32 %v16113_v43, %v974_v40  ;;  %v16114_v34 = vld [vmem:[#allocation104_spill] sm:$0xff]  ;;  %v1399_v7 = vadd.f32 %v16116_v12, %v983_v51  ;;  %v16117_v14 = vld [vmem:[#allocation111_spill] sm:$0xff]  ;;  %v16118_v35 = vld [vmem:[#allocation113_spill] sm:$0xff] }
 0x3b0   : > { %v1397_v36 = vadd.f32 %v16114_v34, %v977_v26  ;;  %v1398_v33 = vadd.f32 %v16115_v31, %v980_v2  ;;  %v3283_v9 = vmax.f32 %v3238_v39, 0.0  ;;  %v1400_v21 = vadd.f32 %v16117_v14, %v986_v6  ;;  %v16122_v40 = vld [vmem:[#allocation115_spill] sm:$0xff]  ;;  %v16123_v26 = vld [vmem:[#allocation121_spill] sm:$0xff]  ;;  %v16124_v31 = vld [vmem:[#allocation126_spill] sm:$0xff] }
 0x3b1   : > { %v1401_v8 = vadd.f32 %v16118_v35, %v989_v42  ;;  %v1402_v52 = vadd.f32 %v16122_v40, %v992_v56  ;;  %v1403_v43 = vadd.f32 %v16123_v26, %v995_v25  ;;  %v1404_v2 = vadd.f32 %v16124_v31, %v998_v1  ;;  %v16125_v39 = vld [vmem:[#allocation117_spill] sm:$0xff]  ;;  %v16126_v51 = vld [vmem:[#allocation123_spill] sm:$0xff]  ;;  %v16127_v6 = vld [vmem:[#allocation176_spill] sm:$0xff]  ;;  %v11162_v56 = vpop.f32.mrf.mxu2 }
 0x3b2   : > { %v1780_v12 = vadd.f32 %v16125_v39, %v1393_v28  ;;  %v1004_v34 = vadd.f32 %v16127_v6, %v16126_v51  ;;  %v16128_v42 = vld [vmem:[#allocation128_spill] sm:$0xff]  ;;  %16132 = vst [vmem:[#allocation73_spill] sm:$0xff] %v11162_v56  ;;  %v3663_v25 = vrot.slane %v3283_v9, 3  ;;  %v16133_v26 = vld [vmem:[#allocation138_spill] sm:$0xff]  ;;  %v16136_v51 = vld [vmem:[#allocation35_spill] sm:$0xff] }
 0x3b3   : > { %v3057_v18 = vpop.f32.mrf.mxu0  ;;  %v16129_v14 = vld [vmem:[#allocation20_spill] sm:$0xff]  ;;  %v16134_v31 = vld [vmem:[#allocation30_spill] sm:$0xff] }
 0x3b4   : > { %v3190_v11 = vadd.f32 %v3057_v18, %v10603_v23  ;;  %v16121_v23 = vld [vmem:[#allocation173_spill] sm:$0xff]  ;;  %v1013_v39 = vadd.f32 %v16134_v31, %v16133_v26  ;;  %v16141_v31 = vld [vmem:[#allocation122_spill] sm:$0xff] }
 0x3b5   : > { %v1001_v18 = vadd.f32 %v16121_v23, %v16120_v53  ;;  %v3365_v53 = vrot.slane %v3283_v9, 1  ;;  %v3513_v23 = vrot.slane %v3283_v9, 2  ;;  %v1781_v45 = vadd.f32 %v16141_v31, %v1394_v48  ;;  %v16149_v48 = vld [vmem:[#allocation140_spill] sm:$0xff] }
 0x3b6   : > { %v3239_v10 = vadd.f32 %v11100_v27, %v3190_v11  ;;  %8429 = vmatmul.msk.f32.gmra.mxu0 %vm544_vm1, %v16119_v38  ;;  %v1007_v11 = vadd.f32 %v16129_v14, %v16128_v42  ;;  %v16130_v38 = vld [vmem:[#allocation133_spill] sm:$0xff]  ;;  %v16155_v31 = vld [vmem:[#allocation148_spill] sm:$0xff] }
 0x3b7   : > { %v1010_v22 = vadd.f32 %v16131_v54, %v16130_v38  ;;  %v16137_v42 = vld [vmem:[#allocation145_spill] sm:$0xff]  ;;  %v16138_v54 = vld [vmem:[#allocation40_spill] sm:$0xff] }
 0x3b8   : > { %v11158_v35 = vmax.f32 %v3239_v10, 0.0  ;;  %v16135_v10 = vld [vmem:[#allocation142_spill] sm:$0xff]  ;;  %v1019_v14 = vadd.f32 %v16138_v54, %v16137_v42  ;;  %v16139_v38 = vld [vmem:[#allocation132_spill] sm:$0xff]  ;;  %v1406_v42 = vadd.f32 %v16143_v61, %v1004_v34  ;;  %v1407_v49 = vadd.f32 %v16145_v60, %v1007_v11  ;;  %v16153_v34 = vld [vmem:[#allocation161_spill] sm:$0xff] }
 0x3b9   : > { %v1016_v6 = vadd.f32 %v16136_v51, %v16135_v10  ;;  %v1405_v62 = vadd.f32 %v16139_v38, %v1001_v18  ;;  %v16142_v10 = vld [vmem:[#allocation127_spill] sm:$0xff]  ;;  %v16150_v61 = vld [vmem:[#allocation152_spill] sm:$0xff] }
 0x3ba   : > { %v3366_v1 = vrot.slane %v11158_v35, 1  ;;  %v3514_v28 = vrot.slane %v11158_v35, 2  ;;  %v3664_v40 = vrot.slane %v11158_v35, 3  ;;  %v1782_v51 = vadd.f32 %v16142_v10, %v1395_v30  ;;  %v16144_v18 = vld [vmem:[#allocation131_spill] sm:$0xff] }
 0x3bb   : > { %v3060_v20 = vpop.f32.mrf.mxu0  ;;  %v1783_v38 = vadd.f32 %v16144_v18, %v1396_v17  ;;  %v11195_v30 = vadd.f32 %v16149_v48, %v1398_v33  ;;  %v16151_v17 = vld [vmem:[#allocation144_spill] sm:$0xff]  ;;  %v11205_v11 = vadd.f32 %v16153_v34, %v1019_v14  ;;  %v11210_v10 = vadd.f32 %v16155_v31, %v1400_v21  ;;  %v16157_v18 = vld [vmem:[#allocation154_spill] sm:$0xff] }
 0x3bc   : > { %v3367_v16 = vsel %vm454_vm2, %v3365_v53, %v3366_v1  ;;  %v3515_v56 = vsel %vm635_vm0, %v3513_v23, %v3514_v28  ;;  %v11179_v13 = vsel %vm3662_vm6, %v3663_v25, %v3664_v40  ;;  %v3191_v26 = vadd.f32 %v3060_v20, %v10628_v37  ;;  %v16147_v25 = vld [vmem:[#allocation19_spill] sm:$0xff]  ;;  %v16159_v21 = vld [vmem:[#allocation162_spill] sm:$0xff] }
 0x3bd   : > { %v3475_v54 = vmax.f32 %v3283_v9, %v3367_v16  ;;  %v1408_v53 = vadd.f32 %v16146_v24, %v1010_v22  ;;  %v16148_v37 = vld [vmem:[#allocation135_spill] sm:$0xff]  ;;  %v1409_v16 = vadd.f32 %v16150_v61, %v1013_v39  ;;  %v11201_v60 = vadd.f32 %v16151_v17, %v1399_v7  ;;  %v16152_v24 = vld [vmem:[#allocation156_spill] sm:$0xff]  ;;  %16154 = vst [vmem:[#allocation79_spill] sm:$0xff] %v11205_v11 }
 0x3be   : > { %v3240_v23 = vadd.f32 %v11100_v27, %v3191_v26  ;;  %8430 = vmatmul.msk.f32.gmra.mxu0 %vm544_vm1, %v16147_v25  ;;  %v1784_v20 = vadd.f32 %v16148_v37, %v1397_v36  ;;  %v1410_v22 = vadd.f32 %v16152_v24, %v1016_v6  ;;  %v16156_v36 = vld [vmem:[#allocation151_spill] sm:$0xff]  ;;  %v11216_v39 = vadd.f32 %v16157_v18, %v1402_v52 }
 0x3bf   : > { %v11198_v9 = vmax.f32 %v3475_v54, %v3515_v56  ;;  %v11213_v33 = vadd.f32 %v16156_v36, %v1401_v8  ;;  %v16158_v56 = vld [vmem:[#allocation158_spill] sm:$0xff]  ;;  %v11227_v25 = vadd.f32 %v16159_v21, %v1404_v2  ;;  %v2164_v8 = vadd.f32 %v10914_v50, %v1780_v12  ;;  %v16160_v2 = vld [vmem:[#allocation165_spill] sm:$0xff]  ;;  %v16161_v50 = vld [vmem:[#allocation167_spill] sm:$0xff] }
 0x3c0   : > { %v11207_v26 = vmax.f32 %v3240_v23, 0.0  ;;  %v11221_v54 = vadd.f32 %v16158_v56, %v1403_v43  ;;  %v2165_v52 = vadd.f32 %v10931_v32, %v1781_v45  ;;  %v2166_v37 = vadd.f32 %v10945_v58, %v1782_v51  ;;  %v16163_v32 = vld [vmem:[#allocation169_spill] sm:$0xff]  ;;  %v11249_v45 = vpop.f32.mrf.mxu3  ;;  %v16165_v51 = vld [vmem:[#allocation172_spill] sm:$0xff]  ;;  %v11271_v56 = vpop.f32.mrf.mxu1 }
 0x3c1   : > { %v3775_v7 = vmax.f32 %v11198_v9, %v11179_v13  ;;  %v11232_v13 = vpop.f32.mrf.mxu2  ;;  %v11241_v24 = vadd.f32 %v16160_v2, %v1405_v62  ;;  %v11244_v12 = vadd.f32 %v16161_v50, %v1406_v42  ;;  %v11247_v58 = vadd.f32 %v16163_v32, %v1407_v49  ;;  %v16171_v42 = vld [vmem:[#allocation24_spill] sm:$0xff] }
 0x3c2   : > { %v3368_v6 = vrot.slane %v11207_v26, 1  ;;  %v3516_v14 = vrot.slane %v11207_v26, 2  ;;  %v3666_v23 = vrot.slane %v11207_v26, 3  ;;  %v2548_v49 = vadd.f32 %v11064_v44, %v2164_v8 }
 0x3c3   : > { %v3063_v48 = vpop.f32.mrf.mxu0  ;;  %16162 = vst [vmem:[#allocation82_spill] sm:$0xff] %v11244_v12  ;;  %v2549_v36 = vadd.f32 %v11072_v19, %v2165_v52  ;;  %v3814_v21 = vrot.slane %v11207_v26, 4  ;;  %v4112_v44 = vrot.slane %v11207_v26, 6 }
 0x3c4   : > { %v3192_v43 = vadd.f32 %v3063_v48, %v10657_v3  ;;  %v3369_v61 = vsel %vm454_vm2, %v3366_v1, %v3368_v6  ;;  %v3517_v9 = vsel %vm635_vm0, %v3514_v28, %v3516_v14  ;;  %v11238_v17 = vsel %vm3662_vm6, %v3664_v40, %v3666_v23  ;;  %16164 = vst [vmem:[#allocation85_spill] sm:$0xff] %v11247_v58  ;;  %v16167_v28 = vld [vmem:[#allocation175_spill] sm:$0xff]  ;;  %v16169_v40 = vld [vmem:[#allocation177_spill] sm:$0xff] }
 0x3c5   : > { %v3476_v3 = vmax.f32 %v11158_v35, %v3369_v61  ;;  %v11253_v1 = vadd.f32 %v16165_v51, %v1408_v53  ;;  %v11256_v34 = vadd.f32 %v16167_v28, %v1409_v16  ;;  %v11259_v31 = vadd.f32 %v16169_v40, %v1410_v22 }
 0x3c6   : > { %v3241_v62 = vadd.f32 %v11100_v27, %v3192_v43  ;;  %8431 = vmatmul.msk.f32.gmra.mxu0 %vm544_vm1, %v16171_v42  ;;  %v2550_v35 = vadd.f32 %v11084_v47, %v2166_v37  ;;  %v2167_v53 = vadd.f32 %v10960_v4, %v1783_v38  ;;  %v2168_v16 = vadd.f32 %v10977_v29, %v1784_v20 }
 0x3c7   : > { %16166 = vst [vmem:[#allocation88_spill] sm:$0xff] %v11253_v1  ;;  %v11267_v18 = vmax.f32 %v3476_v3, %v3517_v9  ;;  %v3963_v48 = vrot.slane %v11207_v26, 5  ;;  %v4262_v20 = vrot.slane %v11207_v26, 7  ;;  %v2762_v28 = vadd.f32 %v11068_v41, %v2548_v49 }
 0x3c8   : > { %16168 = vst [vmem:[#allocation91_spill] sm:$0xff] %v11256_v34  ;;  %v11273_v22 = vmax.f32 %v3241_v62, 0.0  ;;  %v2764_v62 = vadd.f32 %v11088_v0, %v2550_v35  ;;  %v2551_v49 = vadd.f32 %v11094_v5, %v2167_v53  ;;  %v16174_v0 = vld [vmem:[#allocation37_spill] sm:$0xff] }
 0x3c9   : > { %16170 = vst [vmem:[#allocation120_spill] sm:$0xff] %v11259_v31  ;;  %v3776_v19 = vmax.f32 %v11267_v18, %v11238_v17  ;;  %v11299_v40 = vpop.f32.mrf.mxu2  ;;  %v11308_v18 = vpop.f32.mrf.mxu3  ;;  %v11313_v41 = vadd.f32 %v11080_v63, %v2762_v28  ;;  %v2170_v35 = vadd.f32 %v16174_v0, %v11201_v60  ;;  %v16177_v0 = vld [vmem:[#allocation67_spill] sm:$0xff]  ;;  %v16189_v31 = vld [vmem:[#allocation44_spill] sm:$0xff] }
 0x3ca   : > { %v3370_v47 = vrot.slane %v11273_v22, 1  ;;  %v3518_v4 = vrot.slane %v11273_v22, 2  ;;  %v3668_v29 = vrot.slane %v11273_v22, 3  ;;  %v3815_v38 = vrot.slane %v11273_v22, 4 }
 0x3cb   : > { %v3964_v8 = vrot.slane %v11273_v22, 5  ;;  %v4113_v52 = vrot.slane %v11273_v22, 6  ;;  %v4263_v37 = vrot.slane %v11273_v22, 7  ;;  %v3066_v43 = vpop.f32.mrf.mxu0  ;;  %v2765_v42 = vadd.f32 %v16177_v0, %v2551_v49 }
 0x3cc   : > { %v3371_v61 = vsel %vm454_vm2, %v3368_v6, %v3370_v47  ;;  %v3519_v9 = vsel %vm635_vm0, %v3516_v14, %v3518_v4  ;;  %v11291_v17 = vsel %vm3662_vm6, %v3666_v23, %v3668_v29  ;;  %v3193_v2 = vadd.f32 %v3066_v43, %v10678_v57  ;;  %v16172_v14 = vld [vmem:[#allocation29_spill] sm:$0xff]  ;;  %v11325_v43 = vpop.f32.mrf.mxu1 }
 0x3cd   : > { %v3477_v50 = vmax.f32 %v11207_v26, %v3371_v61  ;;  %v3816_v32 = vsel %vm1422_vm3, %v3814_v21, %v3815_v38  ;;  %v3965_v3 = vsel %vm1806_vm5, %v3963_v48, %v3964_v8  ;;  %v4114_v51 = vsel %vm2190_vm4, %v4112_v44, %v4113_v52 }
 0x3ce   : > { %v3242_v6 = vadd.f32 %v11100_v27, %v3193_v2  ;;  %8432 = vmatmul.msk.f32.gmra.mxu0 %vm544_vm1, %v16172_v14  ;;  %v3926_v23 = vmax.f32 %v3775_v7, %v3816_v32  ;;  %v4264_v57 = vsel %vm4261_vm7, %v4262_v20, %v4263_v37  ;;  %v2763_v26 = vadd.f32 %v11078_v15, %v2549_v36  ;;  %v16173_v15 = vld [vmem:[#allocation78_spill] sm:$0xff] }
 0x3cf   : > { %v11310_v21 = vmax.f32 %v3477_v50, %v3519_v9  ;;  %v2552_v44 = vadd.f32 %v11136_v59, %v2168_v16  ;;  %v2169_v36 = vadd.f32 %v16173_v15, %v11195_v30  ;;  %v16176_v15 = vld [vmem:[#allocation34_spill] sm:$0xff]  ;;  %v2554_v49 = vadd.f32 %v11271_v56, %v2170_v35 }
 0x3d0   : > { %v11316_v48 = vmax.f32 %v3242_v6, 0.0  ;;  %v4075_v7 = vmax.f32 %v3926_v23, %v3965_v3  ;;  %v16175_v3 = vld [vmem:[#allocation18_spill] sm:$0xff] }
 0x3d1   : > { %v3777_v20 = vmax.f32 %v11310_v21, %v11291_v17  ;;  %v11367_v0 = vpop.f32.mrf.mxu3 }
 0x3d2   : > { %v3372_v63 = vrot.slane %v11316_v48, 1  ;;  %v3520_v5 = vrot.slane %v11316_v48, 2  ;;  %v3670_v53 = vrot.slane %v11316_v48, 3  ;;  %v4224_v61 = vmax.f32 %v4075_v7, %v4114_v51 }
 0x3d3   : > { %v3069_v9 = vpop.f32.mrf.mxu0  ;;  %v3817_v59 = vrot.slane %v11316_v48, 4  ;;  %v3966_v30 = vrot.slane %v11316_v48, 5  ;;  %v4115_v16 = vrot.slane %v11316_v48, 6  ;;  %v4265_v60 = vrot.slane %v11316_v48, 7 }
 0x3d4   : > { %v3373_v2 = vsel %vm454_vm2, %v3370_v47, %v3372_v63  ;;  %v3521_v50 = vsel %vm635_vm0, %v3518_v4, %v3520_v5  ;;  %v11337_v32 = vsel %vm3662_vm6, %v3668_v29, %v3670_v53  ;;  %v3194_v28 = vadd.f32 %v3069_v9, %v16175_v3  ;;  %v16178_v9 = vld [vmem:[#allocation64_spill] sm:$0xff]  ;;  %v2479_v35 = vpop.f32.mrf.mxu1 }
 0x3d5   : > { %v3478_v51 = vmax.f32 %v11273_v22, %v3373_v2  ;;  %v4374_v6 = vmax.f32 %v4224_v61, %v4264_v57  ;;  %v3818_v14 = vsel %vm1422_vm3, %v3815_v38, %v3817_v59  ;;  %v3967_v23 = vsel %vm1806_vm5, %v3964_v8, %v3966_v30  ;;  %v16179_v22 = vld [vmem:[#allocation43_spill] sm:$0xff]  ;;  %v16180_v8 = vld [vmem:[#allocation73_spill] sm:$0xff]  ;;  %v16181_v2 = vld [vmem:[#allocation70_spill] sm:$0xff] }
 0x3d6   : > { %v3243_v7 = vadd.f32 %v11100_v27, %v3194_v28  ;;  %8433 = vmatmul.msk.f32.gmra.mxu0 %vm544_vm1, %v16176_v15  ;;  %v3927_v47 = vmax.f32 %v3776_v19, %v3818_v14  ;;  %v4116_v4 = vsel %vm2190_vm4, %v4113_v52, %v4115_v16  ;;  %v4266_v29 = vsel %vm4261_vm7, %v4263_v37, %v4265_v60  ;;  %v11359_v15 = vpop.f32.mrf.mxu2 }
 0x3d7   : > { %v11350_v3 = vadd.f32 %v16178_v9, %v2763_v26  ;;  %v11353_v38 = vmax.f32 %v3478_v51, %v3521_v50  ;;  %v2766_v61 = vadd.f32 %v16180_v8, %v2552_v44  ;;  %v11357_v28 = vadd.f32 %v16181_v2, %v2764_v62  ;;  %v16182_v26 = vld [vmem:[#allocation36_spill] sm:$0xff] }
 0x3d8   : > { %v11361_v19 = vmax.f32 %v3243_v7, 0.0  ;;  %v4076_v52 = vmax.f32 %v3927_v47, %v3967_v23  ;;  %v2553_v37 = vadd.f32 %v11188_v46, %v2169_v36  ;;  %v2171_v14 = vadd.f32 %v16182_v26, %v11210_v10  ;;  %v16183_v47 = vld [vmem:[#allocation17_spill] sm:$0xff] }
 0x3d9   : > { %v3778_v44 = vmax.f32 %v11353_v38, %v11337_v32 }
 0x3da   : > { %v3374_v62 = vrot.slane %v11361_v19, 1  ;;  %v3522_v50 = vrot.slane %v11361_v19, 2  ;;  %v3672_v51 = vrot.slane %v11361_v19, 3  ;;  %v4411_v23 = vmax.f32 %v4374_v6, %v11361_v19 }
 0x3db   : > { %v3072_v7 = vpop.f32.mrf.mxu0  ;;  %v3819_v46 = vrot.slane %v11361_v19, 4  ;;  %v3968_v56 = vrot.slane %v11361_v19, 5  ;;  %v4117_v10 = vrot.slane %v11361_v19, 6  ;;  %v4225_v36 = vmax.f32 %v4076_v52, %v4116_v4 }
 0x3dc   : > { %v3195_v9 = vadd.f32 %v3072_v7, %v16183_v47  ;;  %v3375_v32 = vsel %vm454_vm2, %v3372_v63, %v3374_v62  ;;  %v3523_v38 = vsel %vm635_vm0, %v3520_v5, %v3522_v50  ;;  %v11382_v8 = vsel %vm3662_vm6, %v3670_v53, %v3672_v51  ;;  %v16184_v7 = vld [vmem:[#allocation39_spill] sm:$0xff]  ;;  %v16185_v53 = vld [vmem:[#allocation76_spill] sm:$0xff] }
 0x3dd   : > { %v3479_v6 = vmax.f32 %v11316_v48, %v3375_v32  ;;  %v3820_v2 = vsel %vm1422_vm3, %v3817_v59, %v3819_v46  ;;  %v3969_v26 = vsel %vm1806_vm5, %v3966_v30, %v3968_v56  ;;  %v4118_v57 = vsel %vm2190_vm4, %v4115_v16, %v4117_v10 }
 0x3de   : > { %v2767_v4 = vadd.f32 %v11232_v13, %v2553_v37  ;;  %v3244_v52 = vadd.f32 %v11100_v27, %v3195_v9  ;;  %8434 = vmatmul.msk.f32.gmra.mxu0 %vm544_vm1, %v16184_v7  ;;  %v4267_v63 = vrot.slane %v11361_v19, 7  ;;  %v4375_v5 = vmax.f32 %v4225_v36, %v4266_v29  ;;  %v11417_v21 = vpop.f32.mrf.mxu2 }
 0x3df   : > { %v11394_v47 = vadd.f32 %v16185_v53, %v2765_v42  ;;  %v11397_v48 = vadd.f32 %v11299_v40, %v2554_v49  ;;  %v11399_v59 = vmax.f32 %v3479_v6, %v3523_v38  ;;  %v3928_v13 = vmax.f32 %v3777_v20, %v3820_v2  ;;  %v16186_v42 = vld [vmem:[#allocation48_spill] sm:$0xff]  ;;  %v16187_v40 = vld [vmem:[#allocation81_spill] sm:$0xff] }
 0x3e0   : > { %v11405_v30 = vadd.f32 %v11249_v45, %v2766_v61  ;;  %v2555_v16 = vadd.f32 %v11325_v43, %v2171_v14  ;;  %v11408_v37 = vmax.f32 %v3244_v52, 0.0  ;;  %v4268_v29 = vsel %vm4261_vm7, %v4265_v60, %v4267_v63  ;;  %v11423_v61 = vpop.f32.mrf.mxu3 }
 0x3e1   : > { %v2172_v36 = vadd.f32 %v16186_v42, %v11213_v33  ;;  %v2173_v49 = vadd.f32 %v16187_v40, %v11216_v39  ;;  %v3779_v9 = vmax.f32 %v11399_v59, %v11382_v8  ;;  %v4077_v17 = vmax.f32 %v3928_v13, %v3969_v26  ;;  %v16188_v8 = vld [vmem:[#allocation28_spill] sm:$0xff]  ;;  %v2482_v42 = vpop.f32.mrf.mxu1 }
 0x3e2   : > { %v3376_v45 = vrot.slane %v11408_v37, 1  ;;  %v3524_v20 = vrot.slane %v11408_v37, 2  ;;  %v3674_v43 = vrot.slane %v11408_v37, 3  ;;  %v3821_v60 = vrot.slane %v11408_v37, 4 }
 0x3e3   : > { %v3075_v33 = vpop.f32.mrf.mxu0  ;;  %v3970_v14 = vrot.slane %v11408_v37, 5  ;;  %v4119_v39 = vrot.slane %v11408_v37, 6  ;;  %v4269_v32 = vrot.slane %v11408_v37, 7  ;;  %v4412_v38 = vmax.f32 %v4375_v5, %v11408_v37 }
 0x3e4   : > { %v3196_v6 = vadd.f32 %v3075_v33, %v16188_v8  ;;  %v3377_v2 = vsel %vm454_vm2, %v3374_v62, %v3376_v45  ;;  %v3525_v26 = vsel %vm635_vm0, %v3522_v50, %v3524_v20  ;;  %v11433_v52 = vsel %vm3662_vm6, %v3672_v51, %v3674_v43 }
 0x3e5   : > { %v3480_v7 = vmax.f32 %v11361_v19, %v3377_v2  ;;  %v4466_v53 = vmax.f32 %v4411_v23, %v3377_v2  ;;  %v4226_v59 = vmax.f32 %v4077_v17, %v4118_v57  ;;  %v3822_v13 = vsel %vm1422_vm3, %v3819_v46, %v3821_v60 }
 0x3e6   : > { %v3245_v40 = vadd.f32 %v11100_v27, %v3196_v6  ;;  %8435 = vmatmul.msk.f32.gmra.mxu0 %vm544_vm1, %v16189_v31  ;;  %v3929_v5 = vmax.f32 %v3778_v44, %v3822_v13  ;;  %v3971_v62 = vsel %vm1806_vm5, %v3968_v56, %v3970_v14  ;;  %v4120_v50 = vsel %vm2190_vm4, %v4117_v10, %v4119_v39  ;;  %v2696_v2 = vpop.f32.mrf.mxu2 }
 0x3e7   : > { %v11442_v33 = vmax.f32 %v3480_v7, %v3525_v26  ;;  %v11444_v51 = vmax.f32 %v4466_v53, %v3525_v26  ;;  %v4376_v19 = vmax.f32 %v4226_v59, %v4268_v29  ;;  %v11447_v57 = vsel %vm4261_vm7, %v4267_v63, %v4269_v32  ;;  %v16190_v26 = vld [vmem:[#allocation69_spill] sm:$0xff] }
 0x3e8   : > { %v2769_v23 = vadd.f32 %v11359_v15, %v2555_v16  ;;  %v11451_v46 = vadd.f32 %v11308_v18, %v2767_v4  ;;  %v11453_v17 = vmax.f32 %v3245_v40, 0.0  ;;  %v4078_v31 = vmax.f32 %v3929_v5, %v3971_v62  ;;  %v11476_v13 = vpop.f32.mrf.mxu3 }
 0x3e9   : > { %v2556_v44 = vadd.f32 %v2479_v35, %v2172_v36  ;;  %v2557_v56 = vadd.f32 %v2482_v42, %v2173_v49  ;;  %v3780_v10 = vmax.f32 %v11442_v33, %v11433_v52  ;;  %v4571_v8 = vmax.f32 %v11444_v51, %v11433_v52  ;;  %v8522_v49 = vld [vmem:[%s15551_s3 + $0x10] sm:$0xff]  ;;  %v16191_v51 = vld [vmem:[#allocation49_spill] sm:$0xff] }
 0x3ea   : > { %v3823_v29 = vrot.slane %v11453_v17, 4  ;;  %v3972_v63 = vrot.slane %v11453_v17, 5  ;;  %v4121_v15 = vrot.slane %v11453_v17, 6  ;;  %v4271_v18 = vrot.slane %v11453_v17, 7  ;;  %5415 = vmatpush.msra.mxu3 %v8522_v49 }
 0x3eb   : > { %v3078_v4 = vpop.f32.mrf.mxu0  ;;  %v3378_v16 = vrot.slane %v11453_v17, 1  ;;  %v3526_v35 = vrot.slane %v11453_v17, 2  ;;  %v3676_v36 = vrot.slane %v11453_v17, 3  ;;  %v11470_v6 = vmax.f32 %v4376_v19, %v11453_v17 }
 0x3ec   : > { %v3197_v52 = vadd.f32 %v3078_v4, %v16190_v26  ;;  %v3824_v7 = vsel %vm1422_vm3, %v3821_v60, %v3823_v29  ;;  %v3973_v53 = vsel %vm1806_vm5, %v3970_v14, %v3972_v63  ;;  %v4122_v59 = vsel %vm2190_vm4, %v4119_v39, %v4121_v15 }
 0x3ed   : > { %v3930_v42 = vmax.f32 %v3779_v9, %v3824_v7  ;;  %v4272_v40 = vsel %vm4261_vm7, %v4269_v32, %v4271_v18  ;;  %v3379_v5 = vsel %vm454_vm2, %v3376_v45, %v3378_v16  ;;  %v3527_v62 = vsel %vm635_vm0, %v3524_v20, %v3526_v35 }
 0x3ee   : > { %v3246_v33 = vadd.f32 %v11100_v27, %v3197_v52  ;;  %8436 = vmatmul.msk.f32.gmra.mxu0 %vm544_vm1, %v16191_v51  ;;  %v3481_v60 = vmax.f32 %v11408_v37, %v3379_v5  ;;  %v11486_v14 = vsel %vm3662_vm6, %v3674_v43, %v3676_v36  ;;  %v4467_v39 = vmax.f32 %v4412_v38, %v3379_v5  ;;  %v16192_v43 = vld [vmem:[#allocation42_spill] sm:$0xff]  ;;  %v2699_v51 = vpop.f32.mrf.mxu2 }
 0x3ef   : > { %v11489_v19 = vadd.f32 %v11417_v21, %v2556_v44  ;;  %v11493_v9 = vadd.f32 %v11367_v0, %v11397_v48  ;;  %v4079_v45 = vmax.f32 %v3930_v42, %v3973_v53  ;;  %v4227_v20 = vmax.f32 %v4078_v31, %v4120_v50 }
 0x3f0   : > { %v11495_v32 = vadd.f32 %v2696_v2, %v2557_v56  ;;  %v11497_v4 = vmax.f32 %v3246_v33, 0.0  ;;  %v3631_v49 = vmax.f32 %v3481_v60, %v3527_v62  ;;  %v4520_v26 = vmax.f32 %v4467_v39, %v3527_v62  ;;  %v2485_v33 = vpop.f32.mrf.mxu1  ;;  %v16194_v39 = vld [vmem:[#allocation54_spill] sm:$0xff] }
 0x3f1   : > { %v11500_v37 = vadd.f32 %v11423_v61, %v2769_v23  ;;  %v2174_v38 = vadd.f32 %v16192_v43, %v11221_v54  ;;  %v4228_v21 = vmax.f32 %v4079_v45, %v4122_v59  ;;  %v4377_v44 = vmax.f32 %v4227_v20, %v11447_v57  ;;  %v16193_v54 = vld [vmem:[#allocation16_spill] sm:$0xff] }
 0x3f2   : > { %v3825_v0 = vrot.slane %v11497_v4, 4  ;;  %v3974_v48 = vrot.slane %v11497_v4, 5  ;;  %v4123_v50 = vrot.slane %v11497_v4, 6  ;;  %v4273_v31 = vrot.slane %v11497_v4, 7 }
 0x3f3   : > { %v3081_v56 = vpop.f32.mrf.mxu0  ;;  %v4378_v2 = vmax.f32 %v4228_v21, %v4272_v40  ;;  %v3380_v52 = vrot.slane %v11497_v4, 1  ;;  %v3528_v61 = vrot.slane %v11497_v4, 2  ;;  %v3678_v23 = vrot.slane %v11497_v4, 3 }
 0x3f4   : > { %v3198_v7 = vadd.f32 %v3081_v56, %v16193_v54  ;;  %v3826_v57 = vsel %vm1422_vm3, %v3823_v29, %v3825_v0  ;;  %v3975_v53 = vsel %vm1806_vm5, %v3972_v63, %v3974_v48  ;;  %v4124_v59 = vsel %vm2190_vm4, %v4121_v15, %v4123_v50  ;;  %v11532_v63 = vpop.f32.mrf.mxu3 }
 0x3f5   : > { %v3931_v42 = vmax.f32 %v3780_v10, %v3826_v57  ;;  %v4274_v5 = vsel %vm4261_vm7, %v4271_v18, %v4273_v31  ;;  %v4625_v62 = vmax.f32 %v4571_v8, %v3826_v57  ;;  %v3381_v40 = vsel %vm454_vm2, %v3378_v16, %v3380_v52 }
 0x3f6   : > { %v3247_v60 = vadd.f32 %v11100_v27, %v3198_v7  ;;  %8437 = vmatmul.msk.f32.gmra.mxu0 %vm544_vm1, %v16194_v39  ;;  %v3482_v29 = vmax.f32 %v11453_v17, %v3381_v40  ;;  %v3529_v10 = vsel %vm635_vm0, %v3526_v35, %v3528_v61  ;;  %v11530_v8 = vsel %vm3662_vm6, %v3676_v36, %v3678_v23 }
 0x3f7   : > { %v4080_v15 = vmax.f32 %v3931_v42, %v3975_v53  ;;  %v4677_v18 = vmax.f32 %v4625_v62, %v3975_v53  ;;  %v3781_v16 = vmax.f32 %v3631_v49, %v11486_v14  ;;  %v4572_v45 = vmax.f32 %v4520_v26, %v11486_v14 }
 0x3f8   : > { %v11536_v20 = vmax.f32 %v3247_v60, 0.0  ;;  %v3632_v17 = vmax.f32 %v3482_v29, %v3529_v10  ;;  %v4468_v43 = vmax.f32 %v11470_v6, %v3381_v40  ;;  %v11540_v35 = vmax.f32 %v4377_v44, %v11497_v4 }
 0x3f9   : > { %v2558_v21 = vadd.f32 %v2485_v33, %v2174_v38  ;;  %v4229_v56 = vmax.f32 %v4080_v15, %v4124_v59  ;;  %v4729_v36 = vmax.f32 %v4677_v18, %v4124_v59  ;;  %v16195_v38 = vld [vmem:[#allocation63_spill] sm:$0xff]  ;;  %v11560_v29 = vadd.f32 %v11476_v13, %v11489_v19 }
 0x3fa   : > { %v11543_v54 = vmax.f32 %v4378_v2, %v11536_v20  ;;  %v3782_v7 = vmax.f32 %v3632_v17, %v11530_v8  ;;  %v3827_v49 = vrot.slane %v11536_v20, 4  ;;  %v3976_v14 = vrot.slane %v11536_v20, 5 }
 0x3fb   : > { %v3084_v26 = vpop.f32.mrf.mxu0  ;;  %v4379_v57 = vmax.f32 %v4229_v56, %v4274_v5  ;;  %v4781_v53 = vmax.f32 %v4729_v36, %v4274_v5  ;;  %v4125_v6 = vrot.slane %v11536_v20, 6  ;;  %v4275_v44 = vrot.slane %v11536_v20, 7 }
 0x3fc   : > { %v3199_v42 = vadd.f32 %v3084_v26, %v16195_v38  ;;  %v3828_v59 = vsel %vm1422_vm3, %v3825_v0, %v3827_v49  ;;  %v3977_v2 = vsel %vm1806_vm5, %v3974_v48, %v3976_v14  ;;  %v4521_v62 = vmax.f32 %v4468_v43, %v3529_v10  ;;  %v16197_v0 = vld [vmem:[#allocation59_spill] sm:$0xff]  ;;  %v11573_v17 = vpop.f32.mrf.mxu3 }
 0x3fd   : > { %8490 = vmatmul.msk.f32.vlgmr.msra.gmra.mxu2 %vm4916_vm8, %v4781_v53  ;;  %v3932_v40 = vmax.f32 %v3781_v16, %v3828_v59  ;;  %v4126_v33 = vsel %vm2190_vm4, %v4123_v50, %v4125_v6  ;;  %v4276_v60 = vsel %vm4261_vm7, %v4273_v31, %v4275_v44  ;;  %v4626_v39 = vmax.f32 %v4572_v45, %v3828_v59  ;;  %v11568_v16 = vpop.f32.mrf.mxu2 }
 0x3fe   : > { %v11556_v5 = vadd.f32 %v2699_v51, %v2558_v21  ;;  %v3248_v15 = vadd.f32 %v11100_v27, %v3199_v42  ;;  %8438 = vmatmul.msk.f32.gmra.mxu0 %vm544_vm1, %v16197_v0  ;;  %v4573_v48 = vmax.f32 %v4521_v62, %v11530_v8  ;;  %v3382_v50 = vrot.slane %v11536_v20, 1  ;;  %16198 = vst [vmem:[#allocation129_spill] sm:$0xff] %v11573_v17 }
 0x3ff   : > { %v4081_v10 = vmax.f32 %v3932_v40, %v3977_v2  ;;  %v4678_v18 = vmax.f32 %v4626_v39, %v3977_v2  ;;  %v15622_v31 = vrot.slane %v11536_v20, 2  ;;  %v4853_v45 = vrot.slane %v4781_v53, 1  ;;  %v16199_v40 = vld [vmem:[#allocation22_spill] sm:$0xff] }
 0x400   : > { %16196 = vst [vmem:[#allocation124_spill] sm:$0xff] %v11556_v5  ;;  %v11570_v51 = vmax.f32 %v3248_v15, 0.0  ;;  %v5273_v13 = vrot.slane %v4781_v53, 2  ;;  %v15621_v19 = vrot.slane %v11536_v20, 3  ;;  %v3383_v8 = vsel %vm454_vm2, %v3380_v52, %v3382_v50  ;;  %v11599_v15 = vpop.f32.mrf.mxu1 }
 0x401   : > { %v4230_v43 = vmax.f32 %v4081_v10, %v4126_v33  ;;  %v4730_v21 = vmax.f32 %v4678_v18, %v4126_v33  ;;  %v3531_v56 = vsel %vm635_vm0, %v3528_v61, %v15622_v31  ;;  %v3483_v62 = vmax.f32 %v11497_v4, %v3383_v8 }
 0x402   : > { %v11586_v36 = vmax.f32 %v4379_v57, %v11570_v51  ;;  %v3829_v26 = vrot.slane %v11570_v51, 4  ;;  %v3978_v53 = vrot.slane %v11570_v51, 5  ;;  %v4127_v38 = vrot.slane %v11570_v51, 6 }
 0x403   : > { %v3087_v42 = vpop.f32.mrf.mxu0  ;;  %v4277_v59 = vrot.slane %v11570_v51, 7  ;;  %v4380_v2 = vmax.f32 %v4230_v43, %v4276_v60  ;;  %v11592_v52 = vmax.f32 %v4730_v21, %v4276_v60  ;;  %v16215_v34 = vrot.slane %v11570_v51, 2 }
 0x404   : > { %v3200_v33 = vadd.f32 %v3087_v42, %v16199_v40  ;;  %v3830_v61 = vsel %vm1422_vm3, %v3827_v49, %v3829_v26  ;;  %v3979_v57 = vsel %vm1806_vm5, %v3976_v14, %v3978_v53  ;;  %v4128_v39 = vsel %vm2190_vm4, %v4125_v6, %v4127_v38  ;;  %v16200_v49 = vld [vmem:[#allocation62_spill] sm:$0xff] }
 0x405   : > { %v3933_v0 = vmax.f32 %v3782_v7, %v3830_v61  ;;  %v11602_v10 = vsel %vm4261_vm7, %v4275_v44, %v4277_v59  ;;  %v4854_v18 = vrot.slane %v11592_v52, 1  ;;  %8491 = vmatmul.msk.f32.gmra.mxu2 %vm4916_vm8, %v11592_v52  ;;  %v5274_v60 = vrot.slane %v11592_v52, 2 }
 0x406   : > { %v3249_v43 = vadd.f32 %v11100_v27, %v3200_v33  ;;  %8439 = vmatmul.msk.f32.gmra.mxu0 %vm544_vm1, %v16200_v49  ;;  %v4627_v14 = vmax.f32 %v4573_v48, %v3830_v61  ;;  %v3633_v6 = vmax.f32 %v3483_v62, %v3531_v56  ;;  %v3681_v7 = vsel %vm3662_vm6, %v3678_v23, %v15621_v19 }
 0x407   : > { %v4082_v44 = vmax.f32 %v3933_v0, %v3979_v57  ;;  %v4855_v21 = vsel %vm454_vm2, %v4853_v45, %v4854_v18  ;;  %v5275_v42 = vsel %vm635_vm0, %v5273_v13, %v5274_v60  ;;  %v4469_v52 = vmax.f32 %v11540_v35, %v3383_v8  ;;  %v11628_v13 = vpop.f32.mrf.mxu2 }
 0x408   : > { %v11619_v40 = vmax.f32 %v3249_v43, 0.0  ;;  %8458 = vmatmul.msk.f32.vlgmr.msra.gmra.mxu1 %vm4916_vm8, %v4855_v21  ;;  %8523 = vmatmul.msk.f32.vlgmr.msra.gmra.mxu3 %vm4916_vm8, %v5275_v42  ;;  %v4679_v48 = vmax.f32 %v4627_v14, %v3979_v57  ;;  %v3783_v62 = vmax.f32 %v3633_v6, %v3681_v7  ;;  %v15623_v33 = vrot.slane %v11570_v51, 1  ;;  %v11635_v43 = vpop.f32.mrf.mxu3  ;;  %v16202_v21 = vld [vmem:[#allocation21_spill] sm:$0xff] }
 0x409   : > { %v11624_v4 = vmax.f32 %v4082_v44, %v4128_v39  ;;  %v4522_v23 = vmax.f32 %v4469_v52, %v3531_v56  ;;  %v15624_v61 = vrot.slane %v11570_v51, 2  ;;  %16201 = vst [vmem:[#allocation134_spill] sm:$0xff] %v11635_v43 }
 0x40a   : > { %v11631_v35 = vmax.f32 %v4380_v2, %v11619_v40  ;;  %v4731_v8 = vmax.f32 %v4679_v48, %v4128_v39  ;;  %v3831_v0 = vrot.slane %v11619_v40, 4  ;;  %v3980_v57 = vrot.slane %v11619_v40, 5 }
 0x40b   : > { %v3090_v56 = vpop.f32.mrf.mxu0  ;;  %v4129_v14 = vrot.slane %v11619_v40, 6  ;;  %v4279_v6 = vrot.slane %v11619_v40, 7  ;;  %v4574_v44 = vmax.f32 %v4522_v23, %v3681_v7  ;;  %v16204_v7 = vld [vmem:[#allocation65_spill] sm:$0xff] }
 0x40c   : > { %v3201_v42 = vadd.f32 %v3090_v56, %v16202_v21  ;;  %v11643_v2 = vmax.f32 %v4731_v8, %v11602_v10  ;;  %v3832_v39 = vsel %vm1422_vm3, %v3829_v26, %v3831_v0  ;;  %v3981_v52 = vsel %vm1806_vm5, %v3978_v53, %v3980_v57 }
 0x40d   : > { %v3934_v48 = vmax.f32 %v3783_v62, %v3832_v39  ;;  %v4130_v19 = vsel %vm2190_vm4, %v4127_v38, %v4129_v14  ;;  %v11649_v49 = vsel %vm4261_vm7, %v4277_v59, %v4279_v6  ;;  %v4628_v45 = vmax.f32 %v4574_v44, %v3832_v39  ;;  %v11663_v38 = vpop.f32.mrf.mxu1 }
 0x40e   : > { %16203 = vst [vmem:[#allocation139_spill] sm:$0xff] %v11643_v2  ;;  %v3250_v31 = vadd.f32 %v11100_v27, %v3201_v42  ;;  %8492 = vmatmul.msk.f32.gmra.mxu2 %vm4916_vm8, %v11643_v2  ;;  %8440 = vmatmul.msk.f32.gmra.mxu0 %vm544_vm1, %v16204_v7  ;;  %v4856_v23 = vrot.slane %v11643_v2, 1  ;;  %v5276_v26 = vrot.slane %v11643_v2, 2  ;;  %v3385_v53 = vsel %vm454_vm2, %v3382_v50, %v15623_v33 }
 0x40f   : > { %v4083_v59 = vmax.f32 %v3934_v48, %v3981_v52  ;;  %v4680_v62 = vmax.f32 %v4628_v45, %v3981_v52  ;;  %v3484_v8 = vmax.f32 %v11536_v20, %v3385_v53  ;;  %v16205_v56 = vrot.slane %v11536_v20, 2 }
 0x410   : > { %v11671_v21 = vmax.f32 %v3250_v31, 0.0  ;;  %v4857_v42 = vsel %vm454_vm2, %v4854_v18, %v4856_v23  ;;  %v5277_v39 = vsel %vm635_vm0, %v5274_v60, %v5276_v26  ;;  %v16206_v50 = vrot.slane %v11570_v51, 3  ;;  %v11698_v11 = vpop.f32.mrf.mxu3 }
 0x411   : > { %v3533_v44 = vsel %vm635_vm0, %v16205_v56, %v15624_v61  ;;  %v16207_v7 = vrot.slane %v11536_v20, 3  ;;  %8459 = vmatmul.msk.f32.gmra.mxu1 %vm4916_vm8, %v4857_v42  ;;  %8524 = vmatmul.msk.f32.gmra.mxu3 %vm4916_vm8, %v5277_v39  ;;  %v4232_v52 = vmax.f32 %v4083_v59, %v4130_v19  ;;  %v4732_v48 = vmax.f32 %v4680_v62, %v4130_v19  ;;  %v11692_v59 = vpop.f32.mrf.mxu2  ;;  %v16210_v62 = vld [vmem:[#allocation33_spill] sm:$0xff] }
 0x412   : > { %v3634_v33 = vmax.f32 %v3484_v8, %v3533_v44  ;;  %v3833_v56 = vrot.slane %v11671_v21, 4  ;;  %v3982_v18 = vrot.slane %v11671_v21, 5  ;;  %v4131_v60 = vrot.slane %v11671_v21, 6  ;;  %16209 = vst [vmem:[#allocation3_spill] sm:$0xff] %v11692_v59 }
 0x413   : > { %v3683_v45 = vsel %vm3662_vm6, %v16207_v7, %v16206_v50  ;;  %v4281_v61 = vrot.slane %v11671_v21, 7  ;;  %v3093_v20 = vpop.f32.mrf.mxu0  ;;  %v4382_v50 = vmax.f32 %v4232_v52, %v11649_v49  ;;  %v11689_v42 = vmax.f32 %v4732_v48, %v11649_v49  ;;  %16211 = vst [vmem:[#allocation4_spill] sm:$0xff] %v11698_v11 }
 0x414   : > { %v3784_v39 = vmax.f32 %v3634_v33, %v3683_v45  ;;  %v4470_v19 = vmax.f32 %v11543_v54, %v3385_v53  ;;  %v3202_v8 = vadd.f32 %v3093_v20, %v16210_v62  ;;  %v3834_v7 = vsel %vm1422_vm3, %v3831_v0, %v3833_v56  ;;  %v16212_v53 = vld [vmem:[#allocation68_spill] sm:$0xff] }
 0x415   : > { %16208 = vst [vmem:[#allocation2_spill] sm:$0xff] %v11689_v42  ;;  %v3983_v31 = vsel %vm1806_vm5, %v3980_v57, %v3982_v18  ;;  %v4132_v2 = vsel %vm2190_vm4, %v4129_v14, %v4131_v60  ;;  %v15628_v52 = vrot.slane %v11689_v42, 1  ;;  %v15627_v49 = vrot.slane %v11689_v42, 2  ;;  %v11727_v1 = vpop.f32.mrf.mxu1 }
 0x416   : > { %v3935_v48 = vmax.f32 %v3784_v39, %v3834_v7  ;;  %v4282_v33 = vsel %vm4261_vm7, %v4279_v6, %v4281_v61  ;;  %v3251_v54 = vadd.f32 %v11100_v27, %v3202_v8  ;;  %8493 = vmatmul.msk.f32.gmra.mxu2 %vm4916_vm8, %v11689_v42  ;;  %8441 = vmatmul.msk.f32.gmra.mxu0 %vm544_vm1, %v16212_v53  ;;  %v16213_v57 = vrot.slane %v11619_v40, 1 }
 0x417   : > { %v4523_v0 = vmax.f32 %v4470_v19, %v3533_v44  ;;  %v16214_v14 = vrot.slane %v11570_v51, 1  ;;  %v3534_v62 = vrot.slane %v11619_v40, 2  ;;  %v4859_v6 = vsel %vm454_vm2, %v4856_v23, %v15628_v52  ;;  %16216 = vst [vmem:[#allocation5_spill] sm:$0xff] %v11727_v1  ;;  %v16220_v1 = vld [vmem:[#allocation71_spill] sm:$0xff] }
 0x418   : > { %v5279_v39 = vsel %vm635_vm0, %v5276_v26, %v15627_v49  ;;  %v4084_v8 = vmax.f32 %v3935_v48, %v3983_v31  ;;  %v11721_v44 = vmax.f32 %v3251_v54, 0.0 }
 0x419   : > { %v3387_v20 = vsel %vm454_vm2, %v16214_v14, %v16213_v57  ;;  %v4575_v19 = vmax.f32 %v4523_v0, %v3683_v45  ;;  %v3535_v57 = vsel %vm635_vm0, %v16215_v34, %v3534_v62  ;;  %v3684_v14 = vrot.slane %v11619_v40, 3  ;;  %8460 = vmatmul.msk.f32.gmra.mxu1 %vm4916_vm8, %v4859_v6  ;;  %8525 = vmatmul.msk.f32.gmra.mxu3 %vm4916_vm8, %v5279_v39  ;;  %v11747_v11 = vpop.f32.mrf.mxu2 }
 0x41a   : > { %v3485_v53 = vmax.f32 %v11570_v51, %v3387_v20  ;;  %v4233_v23 = vmax.f32 %v4084_v8, %v4132_v2  ;;  %v4471_v48 = vmax.f32 %v11586_v36, %v3387_v20  ;;  %v11734_v45 = vmax.f32 %v4382_v50, %v11721_v44  ;;  %v16218_v36 = vld [vmem:[#allocation72_spill] sm:$0xff]  ;;  %16219 = vst [vmem:[#allocation6_spill] sm:$0xff] %v11747_v11  ;;  %v16234_v11 = vld [vmem:[#allocation26_spill] sm:$0xff] }
 0x41b   : > { %v4629_v0 = vmax.f32 %v4575_v19, %v3834_v7  ;;  %v16217_v34 = vrot.slane %v11570_v51, 3  ;;  %v3835_v52 = vrot.slane %v11721_v44, 4  ;;  %v3096_v58 = vpop.f32.mrf.mxu0  ;;  %v3984_v39 = vrot.slane %v11721_v44, 5 }
 0x41c   : > { %v3635_v26 = vmax.f32 %v3485_v53, %v3535_v57  ;;  %v4383_v6 = vmax.f32 %v4233_v23, %v4282_v33  ;;  %v4133_v8 = vrot.slane %v11721_v44, 6  ;;  %v3203_v20 = vadd.f32 %v3096_v58, %v16218_v36 }
 0x41d   : > { %v3685_v49 = vsel %vm3662_vm6, %v16217_v34, %v3684_v14  ;;  %v4681_v53 = vmax.f32 %v4629_v0, %v3983_v31  ;;  %v3836_v50 = vsel %vm1422_vm3, %v3833_v56, %v3835_v52  ;;  %v4283_v7 = vrot.slane %v11721_v44, 7 }
 0x41e   : > { %v3785_v59 = vmax.f32 %v3635_v26, %v3685_v49  ;;  %v3985_v51 = vsel %vm1806_vm5, %v3982_v18, %v3984_v39  ;;  %v4134_v34 = vsel %vm2190_vm4, %v4131_v60, %v4133_v8  ;;  %v4524_v54 = vmax.f32 %v4471_v48, %v3535_v57  ;;  %8442 = vmatmul.msk.f32.gmra.mxu0 %vm544_vm1, %v16220_v1  ;;  %v11758_v18 = vpop.f32.mrf.mxu3 }
 0x41f   : > { %v3252_v23 = vadd.f32 %v11100_v27, %v3203_v20  ;;  %v4733_v26 = vmax.f32 %v4681_v53, %v4132_v2  ;;  %v4284_v58 = vsel %vm4261_vm7, %v4281_v61, %v4283_v7  ;;  %v16221_v31 = vrot.slane %v11671_v21, 1  ;;  %16223 = vst [vmem:[#allocation7_spill] sm:$0xff] %v11758_v18 }
 0x420   : > { %v3936_v19 = vmax.f32 %v3785_v59, %v3836_v50  ;;  %v16222_v56 = vrot.slane %v11619_v40, 1  ;;  %v4576_v57 = vmax.f32 %v4524_v54, %v3685_v49  ;;  %v3536_v27 = vrot.slane %v11671_v21, 2 }
 0x421   : > { %v11762_v2 = vmax.f32 %v3252_v23, 0.0  ;;  %v11764_v0 = vmax.f32 %v4733_v26, %v4282_v33  ;;  %v15629_v1 = vrot.slane %v11671_v21, 3  ;;  %v16226_v26 = vrot.slane %v11689_v42, 1 }
 0x422   : > { %v3389_v59 = vsel %vm454_vm2, %v16222_v56, %v16221_v31  ;;  %v4085_v60 = vmax.f32 %v3936_v19, %v3985_v51  ;;  %v4630_v20 = vmax.f32 %v4576_v57, %v3836_v50  ;;  %v3537_v53 = vsel %vm635_vm0, %v3534_v62, %v3536_v27  ;;  %v11777_v19 = vpop.f32.mrf.mxu1  ;;  %v16228_v57 = vld [vmem:[#allocation27_spill] sm:$0xff] }
 0x423   : > { %v3486_v48 = vmax.f32 %v11619_v40, %v3389_v59  ;;  %16224 = vst [vmem:[#allocation8_spill] sm:$0xff] %v11764_v0  ;;  %v4472_v61 = vmax.f32 %v11631_v35, %v3389_v59  ;;  %v11771_v49 = vmax.f32 %v4383_v6, %v11762_v2  ;;  %8494 = vmatmul.msk.f32.gmra.mxu2 %vm4916_vm8, %v11764_v0  ;;  %v4860_v40 = vrot.slane %v11764_v0, 1  ;;  %v3099_v35 = vpop.f32.mrf.mxu0 }
 0x424   : > { %v4234_v36 = vmax.f32 %v4085_v60, %v4134_v34  ;;  %v5280_v33 = vrot.slane %v11764_v0, 2  ;;  %16225 = vst [vmem:[#allocation9_spill] sm:$0xff] %v11777_v19  ;;  %v4682_v50 = vmax.f32 %v4630_v20, %v3985_v51  ;;  %v3687_v62 = vsel %vm3662_vm6, %v3684_v14, %v15629_v1 }
 0x425   : > { %v3636_v54 = vmax.f32 %v3486_v48, %v3537_v53  ;;  %v3837_v6 = vrot.slane %v11762_v2, 4  ;;  %v4861_v56 = vsel %vm454_vm2, %v16226_v26, %v4860_v40  ;;  %v16227_v59 = vrot.slane %v11689_v42, 2  ;;  %v11798_v26 = vld [vmem:[%s15550_s2] ss:$0 sm:$0xff] }
 0x426   : > { %v4384_v23 = vmax.f32 %v4234_v36, %v4284_v58  ;;  %v3204_v48 = vadd.f32 %v3099_v35, %v16228_v57  ;;  %8461 = vmatmul.msk.f32.gmra.mxu1 %vm4916_vm8, %v4861_v56  ;;  %v4734_v51 = vmax.f32 %v4682_v50, %v4134_v34  ;;  %v3986_v36 = vrot.slane %v11762_v2, 5  ;;  %v16229_v35 = vld [vmem:[#allocation74_spill] sm:$0xff] }
 0x427   : > { %v5281_v60 = vsel %vm635_vm0, %v16227_v59, %v5280_v33  ;;  %v3786_v31 = vmax.f32 %v3636_v54, %v3687_v62  ;;  %v3838_v14 = vsel %vm1422_vm3, %v3835_v52, %v3837_v6  ;;  %v4135_v20 = vrot.slane %v11762_v2, 6  ;;  %8443 = vmatmul.msk.f32.gmra.mxu0 %vm544_vm1, %v16229_v35 }
 0x428   : > { %8526 = vmatmul.msk.f32.gmra.mxu3 %vm4916_vm8, %v5281_v60  ;;  %v3253_v59 = vadd.f32 %v11798_v26, %v3204_v48  ;;  %v4285_v56 = vrot.slane %v11762_v2, 7  ;;  %v4525_v34 = vmax.f32 %v4472_v61, %v3537_v53  ;;  %v11804_v50 = vmax.f32 %v4734_v51, %v4284_v58  ;;  %v11813_v48 = vpop.f32.mrf.mxu2  ;;  %v11818_v58 = vpop.f32.mrf.mxu3 }
 0x429   : > { %v3937_v54 = vmax.f32 %v3786_v31, %v3838_v14  ;;  %v3987_v52 = vsel %vm1806_vm5, %v3984_v39, %v3986_v36  ;;  %v4136_v60 = vsel %vm2190_vm4, %v4133_v8, %v4135_v20  ;;  %v16230_v57 = vrot.slane %v11721_v44, 1  ;;  %16232 = vst [vmem:[#allocation10_spill] sm:$0xff] %v11813_v48 }
 0x42a   : > { %v16231_v1 = vrot.slane %v11671_v21, 1  ;;  %v11815_v42 = vmax.f32 %v3253_v59, 0.0  ;;  %v4286_v35 = vsel %vm4261_vm7, %v4283_v7, %v4285_v56  ;;  %v4577_v61 = vmax.f32 %v4525_v34, %v3687_v62  ;;  %16233 = vst [vmem:[#allocation11_spill] sm:$0xff] %v11818_v58  ;;  %v11835_v12 = vpop.f32.mrf.mxu1 }
 0x42b   : > { %v4086_v31 = vmax.f32 %v3937_v54, %v3987_v52  ;;  %v4862_v39 = vrot.slane %v11804_v50, 1  ;;  %v5282_v8 = vrot.slane %v11804_v50, 2  ;;  %v3538_v51 = vrot.slane %v11721_v44, 2  ;;  %8495 = vmatmul.msk.f32.gmra.mxu2 %vm4916_vm8, %v11804_v50  ;;  %16235 = vst [vmem:[#allocation12_spill] sm:$0xff] %v11835_v12 }
 0x42c   : > { %v3391_v0 = vsel %vm454_vm2, %v16231_v1, %v16230_v57  ;;  %v11825_v1 = vmax.f32 %v4384_v23, %v11815_v42  ;;  %v4631_v54 = vmax.f32 %v4577_v61, %v3838_v14  ;;  %v3688_v7 = vrot.slane %v11721_v44, 3  ;;  %v3102_v57 = vpop.f32.mrf.mxu0  ;;  %v16237_v61 = vld [vmem:[#allocation77_spill] sm:$0xff] }
 0x42d   : > { %v3487_v53 = vmax.f32 %v11671_v21, %v3391_v0  ;;  %v4235_v59 = vmax.f32 %v4086_v31, %v4136_v60  ;;  %v4863_v62 = vsel %vm454_vm2, %v4860_v40, %v4862_v39  ;;  %v5283_v34 = vsel %vm635_vm0, %v5280_v33, %v5282_v8 }
 0x42e   : > { %v3539_v58 = vsel %vm635_vm0, %v3536_v27, %v3538_v51  ;;  %v3839_v48 = vrot.slane %v11815_v42, 4  ;;  %v3205_v18 = vadd.f32 %v3102_v57, %v16234_v11  ;;  %v4683_v19 = vmax.f32 %v4631_v54, %v3987_v52  ;;  %8462 = vmatmul.msk.f32.gmra.mxu1 %vm4916_vm8, %v4863_v62 }
 0x42f   : > { %v4385_v23 = vmax.f32 %v4235_v59, %v4286_v35  ;;  %v3637_v43 = vmax.f32 %v3487_v53, %v3539_v58  ;;  %v16236_v40 = vrot.slane %v11671_v21, 3  ;;  %v3988_v27 = vrot.slane %v11815_v42, 5  ;;  %8444 = vmatmul.msk.f32.gmra.mxu0 %vm544_vm1, %v16237_v61 }
 0x430   : > { %8527 = vmatmul.msk.f32.gmra.mxu3 %vm4916_vm8, %v5283_v34  ;;  %v3840_v14 = vsel %vm1422_vm3, %v3837_v6, %v3839_v48  ;;  %v4137_v31 = vrot.slane %v11815_v42, 6  ;;  %v3254_v11 = vadd.f32 %v11798_v26, %v3205_v18  ;;  %v4735_v52 = vmax.f32 %v4683_v19, %v4136_v60 }
 0x431   : > { %v3689_v33 = vsel %vm3662_vm6, %v16236_v40, %v3688_v7  ;;  %v4287_v59 = vrot.slane %v11815_v42, 7  ;;  %v3989_v54 = vsel %vm1806_vm5, %v3986_v36, %v3988_v27  ;;  %v16238_v6 = vmax.f32 %v11624_v4, %v11602_v10  ;;  %v11866_v10 = vpop.f32.mrf.mxu2 }
 0x432   : > { %v3787_v53 = vmax.f32 %v3637_v43, %v3689_v33  ;;  %v4138_v62 = vsel %vm2190_vm4, %v4135_v20, %v4137_v31  ;;  %v3392_v57 = vrot.slane %v11762_v2, 1  ;;  %v11856_v40 = vmax.f32 %v3254_v11, 0.0  ;;  %16240 = vst [vmem:[#allocation13_spill] sm:$0xff] %v11866_v10 }
 0x433   : > { %v4418_v34 = vmax.f32 %v16238_v6, %v11671_v21  ;;  %v11858_v18 = vmax.f32 %v4735_v52, %v4286_v35  ;;  %v4288_v43 = vsel %vm4261_vm7, %v4285_v56, %v4287_v59  ;;  %v16239_v61 = vrot.slane %v11721_v44, 1  ;;  %v11875_v35 = vpop.f32.mrf.mxu3 }
 0x434   : > { %v3938_v19 = vmax.f32 %v3787_v53, %v3840_v14  ;;  %v3540_v20 = vrot.slane %v11762_v2, 2  ;;  %v3690_v12 = vrot.slane %v11762_v2, 3  ;;  %v11869_v4 = vmax.f32 %v4385_v23, %v11856_v40  ;;  %16241 = vst [vmem:[#allocation94_spill] sm:$0xff] %v11875_v35  ;;  %v3105_v11 = vpop.f32.mrf.mxu0 }
 0x435   : > { %v4473_v60 = vmax.f32 %v4418_v34, %v3391_v0  ;;  %v3393_v36 = vsel %vm454_vm2, %v16239_v61, %v3392_v57  ;;  %8496 = vmatmul.msk.f32.gmra.mxu2 %vm4916_vm8, %v11858_v18  ;;  %v15635_v21 = vrot.slane %v11858_v18, 1  ;;  %v15634_v0 = vrot.slane %v11858_v18, 2 }
 0x436   : > { %v4087_v56 = vmax.f32 %v3938_v19, %v3989_v54  ;;  %v3488_v53 = vmax.f32 %v11721_v44, %v3393_v36  ;;  %v3541_v6 = vsel %vm635_vm0, %v3538_v51, %v3540_v20  ;;  %v3691_v34 = vsel %vm3662_vm6, %v3688_v7, %v3690_v12  ;;  %v16244_v19 = vld [vmem:[#allocation38_spill] sm:$0xff] }
 0x437   : > { %v4526_v52 = vmax.f32 %v4473_v60, %v3539_v58  ;;  %v11883_v23 = vsel %vm454_vm2, %v4862_v39, %v15635_v21  ;;  %v11888_v61 = vsel %vm635_vm0, %v5282_v8, %v15634_v0  ;;  %v3206_v10 = vadd.f32 %v3105_v11, %v16244_v19  ;;  %v16245_v8 = vld [vmem:[#allocation80_spill] sm:$0xff]  ;;  %v11902_v19 = vpop.f32.mrf.mxu1 }
 0x438   : > { %16242 = vst [vmem:[#allocation118_spill] sm:$0xff] %v11883_v23  ;;  %v4236_v35 = vmax.f32 %v4087_v56, %v4138_v62  ;;  %8463 = vmatmul.msk.f32.gmra.mxu1 %vm4916_vm8, %v11883_v23  ;;  %8528 = vmatmul.msk.f32.gmra.mxu3 %vm4916_vm8, %v11888_v61  ;;  %v3638_v58 = vmax.f32 %v3488_v53, %v3541_v6  ;;  %v3841_v51 = vrot.slane %v11856_v40, 4  ;;  %v3990_v39 = vrot.slane %v11856_v40, 5 }
 0x439   : > { %16243 = vst [vmem:[#allocation98_spill] sm:$0xff] %v11888_v61  ;;  %v4578_v44 = vmax.f32 %v4526_v52, %v3689_v33  ;;  %v3255_v7 = vadd.f32 %v11798_v26, %v3206_v10  ;;  %8445 = vmatmul.msk.f32.gmra.mxu0 %vm544_vm1, %v16245_v8  ;;  %v4139_v56 = vrot.slane %v11856_v40, 6  ;;  %v4289_v11 = vrot.slane %v11856_v40, 7 }
 0x43a   : > { %v4386_v60 = vmax.f32 %v4236_v35, %v4288_v43  ;;  %16246 = vst [vmem:[#allocation125_spill] sm:$0xff] %v11902_v19  ;;  %v3788_v21 = vmax.f32 %v3638_v58, %v3691_v34  ;;  %v3842_v33 = vsel %vm1422_vm3, %v3839_v48, %v3841_v51  ;;  %v3991_v52 = vsel %vm1806_vm5, %v3988_v27, %v3990_v39 }
 0x43b   : > { %v4632_v0 = vmax.f32 %v4578_v44, %v3840_v14  ;;  %v11906_v53 = vmax.f32 %v3255_v7, 0.0  ;;  %v4140_v10 = vsel %vm2190_vm4, %v4137_v31, %v4139_v56  ;;  %v4290_v35 = vsel %vm4261_vm7, %v4287_v59, %v4289_v11 }
 0x43c   : > { %v4474_v8 = vmax.f32 %v11734_v45, %v3393_v36  ;;  %v3939_v61 = vmax.f32 %v3788_v21, %v3842_v33  ;;  %v3394_v17 = vrot.slane %v11815_v42, 1  ;;  %v3542_v19 = vrot.slane %v11815_v42, 2  ;;  %v3108_v31 = vpop.f32.mrf.mxu0  ;;  %v16248_v36 = vld [vmem:[#allocation75_spill] sm:$0xff] }
 0x43d   : > { %v4684_v23 = vmax.f32 %v4632_v0, %v3989_v54  ;;  %v11914_v14 = vmax.f32 %v4386_v60, %v11906_v53  ;;  %v3692_v27 = vrot.slane %v11815_v42, 3  ;;  %v15639_v44 = vrot.slane %v11906_v53, 4  ;;  %v11920_v54 = vpop.f32.mrf.mxu2 }
 0x43e   : > { %v4527_v48 = vmax.f32 %v4474_v8, %v3541_v6  ;;  %v4088_v7 = vmax.f32 %v3939_v61, %v3991_v52  ;;  %v3395_v59 = vsel %vm454_vm2, %v3392_v57, %v3394_v17  ;;  %v3543_v45 = vsel %vm635_vm0, %v3540_v20, %v3542_v19  ;;  %16247 = vst [vmem:[#allocation99_spill] sm:$0xff] %v11920_v54  ;;  %v11925_v8 = vpop.f32.mrf.mxu3 }
 0x43f   : > { %v4736_v58 = vmax.f32 %v4684_v23, %v4138_v62  ;;  %v3207_v21 = vadd.f32 %v3108_v31, %v16248_v36  ;;  %v3489_v60 = vmax.f32 %v11762_v2, %v3395_v59  ;;  %v3693_v6 = vsel %vm3662_vm6, %v3690_v12, %v3692_v27  ;;  %16249 = vst [vmem:[#allocation130_spill] sm:$0xff] %v11925_v8  ;;  %v16250_v31 = vld [vmem:[#allocation83_spill] sm:$0xff] }
 0x440   : > { %v4579_v0 = vmax.f32 %v4527_v48, %v3691_v34  ;;  %v4237_v62 = vmax.f32 %v4088_v7, %v4140_v10  ;;  %v3844_v57 = vsel %vm1422_vm3, %v3841_v51, %v15639_v44  ;;  %v3992_v20 = vrot.slane %v11906_v53, 5 }
 0x441   : > { %v11927_v5 = vmax.f32 %v4736_v58, %v4288_v43  ;;  %v3256_v23 = vadd.f32 %v11798_v26, %v3207_v21  ;;  %8446 = vmatmul.msk.f32.gmra.mxu0 %vm544_vm1, %v16250_v31  ;;  %v3639_v2 = vmax.f32 %v3489_v60, %v3543_v45  ;;  %v15638_v12 = vrot.slane %v11906_v53, 6  ;;  %v11947_v21 = vpop.f32.mrf.mxu1 }
 0x442   : > { %v4633_v61 = vmax.f32 %v4579_v0, %v3842_v33  ;;  %v4387_v48 = vmax.f32 %v4237_v62, %v4290_v35  ;;  %v3993_v51 = vsel %vm1806_vm5, %v3990_v39, %v3992_v20  ;;  %16251 = vst [vmem:[#allocation101_spill] sm:$0xff] %v11947_v21  ;;  %v16252_v0 = vrot.slane %v11858_v18, 1 }
 0x443   : > { %8497 = vmatmul.msk.f32.gmra.mxu2 %vm4916_vm8, %v11927_v5  ;;  %v4866_v43 = vrot.slane %v11927_v5, 1  ;;  %v5286_v34 = vrot.slane %v11927_v5, 2  ;;  %v11942_v58 = vmax.f32 %v3256_v23, 0.0  ;;  %v3789_v33 = vmax.f32 %v3639_v2, %v3693_v6 }
 0x444   : > { %v4685_v7 = vmax.f32 %v4633_v61, %v3991_v52  ;;  %v4142_v36 = vsel %vm2190_vm4, %v4139_v56, %v15638_v12  ;;  %v16254_v31 = vrot.slane %v11858_v18, 2  ;;  %v4291_v39 = vrot.slane %v11906_v53, 7 }
 0x445   : > { %v11952_v60 = vsel %vm454_vm2, %v16252_v0, %v4866_v43  ;;  %v4475_v52 = vmax.f32 %v11771_v49, %v3395_v59  ;;  %v11966_v56 = vmax.f32 %v4387_v48, %v11942_v58  ;;  %v3940_v61 = vmax.f32 %v3789_v33, %v3844_v57  ;;  %v3111_v0 = vpop.f32.mrf.mxu0 }
 0x446   : > { %16253 = vst [vmem:[#allocation136_spill] sm:$0xff] %v11952_v60  ;;  %v11957_v62 = vsel %vm635_vm0, %v16254_v31, %v5286_v34  ;;  %8464 = vmatmul.msk.f32.gmra.mxu1 %vm4916_vm8, %v11952_v60  ;;  %v4737_v23 = vmax.f32 %v4685_v7, %v4140_v10  ;;  %v3396_v2 = vrot.slane %v11856_v40, 1  ;;  %v4292_v31 = vsel %vm4261_vm7, %v4289_v11, %v4291_v39  ;;  %v16256_v60 = vld [vmem:[#allocation32_spill] sm:$0xff] }
 0x447   : > { %16255 = vst [vmem:[#allocation103_spill] sm:$0xff] %v11957_v62  ;;  %8529 = vmatmul.msk.f32.gmra.mxu3 %vm4916_vm8, %v11957_v62  ;;  %v4528_v12 = vmax.f32 %v4475_v52, %v3543_v45  ;;  %v3544_v44 = vrot.slane %v11856_v40, 2  ;;  %v15642_v49 = vrot.slane %v11856_v40, 3  ;;  %v3208_v54 = vadd.f32 %v3111_v0, %v16256_v60  ;;  %v11981_v45 = vpop.f32.mrf.mxu2 }
 0x448   : > { %v11972_v59 = vmax.f32 %v4737_v23, %v4290_v35  ;;  %v4089_v62 = vmax.f32 %v3940_v61, %v3993_v51  ;;  %v3397_v48 = vsel %vm454_vm2, %v3394_v17, %v3396_v2  ;;  %16257 = vst [vmem:[#allocation141_spill] sm:$0xff] %v11981_v45  ;;  %v16258_v23 = vld [vmem:[#allocation86_spill] sm:$0xff]  ;;  %v11988_v17 = vpop.f32.mrf.mxu3 }
 0x449   : > { %v4580_v21 = vmax.f32 %v4528_v12, %v3693_v6  ;;  %v3490_v10 = vmax.f32 %v11815_v42, %v3397_v48  ;;  %v3545_v7 = vsel %vm635_vm0, %v3542_v19, %v3544_v44  ;;  %v3695_v11 = vsel %vm3662_vm6, %v3692_v27, %v15642_v49  ;;  %8447 = vmatmul.msk.f32.gmra.mxu0 %vm544_vm1, %v16258_v23 }
 0x44a   : > { %v4868_v33 = vrot.slane %v11972_v59, 1  ;;  %v5288_v35 = vrot.slane %v11972_v59, 2  ;;  %v3257_v60 = vadd.f32 %v11798_v26, %v3208_v54  ;;  %v4238_v52 = vmax.f32 %v4089_v62, %v4142_v36  ;;  %16259 = vst [vmem:[#allocation105_spill] sm:$0xff] %v11988_v17 }
 0x44b   : > { %8498 = vmatmul.msk.f32.gmra.mxu2 %vm4916_vm8, %v11972_v59  ;;  %v4634_v42 = vmax.f32 %v4580_v21, %v3844_v57  ;;  %v3640_v19 = vmax.f32 %v3490_v10, %v3545_v7  ;;  %v3845_v27 = vrot.slane %v11942_v58, 4  ;;  %v15643_v6 = vrot.slane %v11942_v58, 5 }
 0x44c   : > { %v11995_v12 = vsel %vm454_vm2, %v4866_v43, %v4868_v33  ;;  %v11998_v54 = vsel %vm635_vm0, %v5286_v34, %v5288_v35  ;;  %v12000_v62 = vmax.f32 %v3257_v60, 0.0  ;;  %v4388_v61 = vmax.f32 %v4238_v52, %v4292_v31 }
 0x44d   : > { %16260 = vst [vmem:[#allocation146_spill] sm:$0xff] %v11995_v12  ;;  %v4686_v0 = vmax.f32 %v4634_v42, %v3993_v51  ;;  %v3790_v23 = vmax.f32 %v3640_v19, %v3695_v11  ;;  %v16262_v49 = vrot.slane %v11906_v53, 4  ;;  %v3995_v21 = vsel %vm1806_vm5, %v3992_v20, %v15643_v6  ;;  %v3114_v52 = vpop.f32.mrf.mxu0  ;;  %v16264_v6 = vld [vmem:[#allocation31_spill] sm:$0xff] }
 0x44e   : > { %16261 = vst [vmem:[#allocation107_spill] sm:$0xff] %v11998_v54  ;;  %8465 = vmatmul.msk.f32.gmra.mxu1 %vm4916_vm8, %v11995_v12  ;;  %v12013_v43 = vmax.f32 %v4388_v61, %v12000_v62  ;;  %v4143_v34 = vrot.slane %v11942_v58, 6  ;;  %v4293_v51 = vrot.slane %v11942_v58, 7  ;;  %v4476_v10 = vmax.f32 %v11825_v1, %v3397_v48 }
 0x44f   : > { %v3846_v57 = vsel %vm1422_vm3, %v16262_v49, %v3845_v27  ;;  %8530 = vmatmul.msk.f32.gmra.mxu3 %vm4916_vm8, %v11998_v54  ;;  %v12018_v49 = vpop.f32.mrf.mxu1  ;;  %v4738_v60 = vmax.f32 %v4686_v0, %v4142_v36  ;;  %v3398_v42 = vrot.slane %v11906_v53, 1  ;;  %v15646_v19 = vrot.slane %v11906_v53, 2 }
 0x450   : > { %16263 = vst [vmem:[#allocation150_spill] sm:$0xff] %v12018_v49  ;;  %v3941_v20 = vmax.f32 %v3790_v23, %v3846_v57  ;;  %v3209_v12 = vadd.f32 %v3114_v52, %v16264_v6  ;;  %v16265_v61 = vrot.slane %v11906_v53, 6  ;;  %v4294_v17 = vsel %vm4261_vm7, %v4291_v39, %v4293_v51  ;;  %v16267_v6 = vld [vmem:[#allocation89_spill] sm:$0xff] }
 0x451   : > { %v4529_v45 = vmax.f32 %v4476_v10, %v3545_v7  ;;  %v12027_v8 = vmax.f32 %v4738_v60, %v4292_v31  ;;  %v3399_v36 = vsel %vm454_vm2, %v3396_v2, %v3398_v42  ;;  %v3547_v48 = vsel %vm635_vm0, %v3544_v44, %v15646_v19  ;;  %8448 = vmatmul.msk.f32.gmra.mxu0 %vm544_vm1, %v16267_v6  ;;  %v12043_v10 = vpop.f32.mrf.mxu2 }
 0x452   : > { %v4144_v54 = vsel %vm2190_vm4, %v16265_v61, %v4143_v34  ;;  %v4090_v1 = vmax.f32 %v3941_v20, %v3995_v21  ;;  %v3258_v0 = vadd.f32 %v11798_v26, %v3209_v12  ;;  %v3491_v52 = vmax.f32 %v11856_v40, %v3399_v36  ;;  %16268 = vst [vmem:[#allocation155_spill] sm:$0xff] %v12043_v10  ;;  %v12050_v61 = vpop.f32.mrf.mxu3 }
 0x453   : > { %16266 = vst [vmem:[#allocation108_spill] sm:$0xff] %v12027_v8  ;;  %v4581_v23 = vmax.f32 %v4529_v45, %v3695_v11  ;;  %v3696_v39 = vrot.slane %v11906_v53, 3  ;;  %8499 = vmatmul.msk.f32.gmra.mxu2 %vm4916_vm8, %v12027_v8  ;;  %v4870_v31 = vrot.slane %v12027_v8, 1  ;;  %v5290_v2 = vrot.slane %v12027_v8, 2  ;;  %v16282_v8 = vld [vmem:[#allocation96_spill] sm:$0xff] }
 0x454   : > { %v4239_v7 = vmax.f32 %v4090_v1, %v4144_v54  ;;  %v3847_v44 = vrot.slane %v12000_v62, 4  ;;  %v12045_v11 = vmax.f32 %v3258_v0, 0.0  ;;  %v3641_v12 = vmax.f32 %v3491_v52, %v3547_v48  ;;  %16270 = vst [vmem:[#allocation110_spill] sm:$0xff] %v12050_v61 }
 0x455   : > { %v4635_v45 = vmax.f32 %v4581_v23, %v3846_v57  ;;  %v16269_v60 = vrot.slane %v11856_v40, 3  ;;  %v12053_v6 = vsel %vm454_vm2, %v4868_v33, %v4870_v31  ;;  %v12056_v19 = vsel %vm635_vm0, %v5288_v35, %v5290_v2  ;;  %v3117_v35 = vpop.f32.mrf.mxu0 }
 0x456   : > { %16271 = vst [vmem:[#allocation159_spill] sm:$0xff] %v12053_v6  ;;  %v4389_v1 = vmax.f32 %v4239_v7, %v4294_v17  ;;  %v3848_v49 = vsel %vm1422_vm3, %v3845_v27, %v3847_v44  ;;  %8466 = vmatmul.msk.f32.gmra.mxu1 %vm4916_vm8, %v12053_v6  ;;  %v3996_v0 = vrot.slane %v12000_v62, 5  ;;  %v4145_v23 = vrot.slane %v12000_v62, 6 }
 0x457   : > { %v3697_v20 = vsel %vm3662_vm6, %v16269_v60, %v3696_v39  ;;  %16272 = vst [vmem:[#allocation112_spill] sm:$0xff] %v12056_v19  ;;  %8531 = vmatmul.msk.f32.gmra.mxu3 %vm4916_vm8, %v12056_v19  ;;  %v4687_v40 = vmax.f32 %v4635_v45, %v3995_v21  ;;  %v4295_v52 = vrot.slane %v12000_v62, 7  ;;  %v4477_v27 = vmax.f32 %v11869_v4, %v3399_v36 }
 0x458   : > { %v3791_v57 = vmax.f32 %v3641_v12, %v3697_v20  ;;  %v12066_v33 = vmax.f32 %v4389_v1, %v12045_v11  ;;  %v15649_v7 = vrot.slane %v11942_v58, 1  ;;  %v3210_v6 = vadd.f32 %v3117_v35, %v11313_v41  ;;  %v12075_v12 = vpop.f32.mrf.mxu1 }
 0x459   : > { %v4739_v60 = vmax.f32 %v4687_v40, %v4144_v54  ;;  %v16273_v21 = vrot.slane %v11942_v58, 5  ;;  %16274 = vst [vmem:[#allocation163_spill] sm:$0xff] %v12075_v12  ;;  %v4146_v1 = vsel %vm2190_vm4, %v4143_v34, %v4145_v23  ;;  %v4296_v10 = vsel %vm4261_vm7, %v4293_v51, %v4295_v52  ;;  %v16276_v40 = vld [vmem:[#allocation92_spill] sm:$0xff] }
 0x45a   : > { %v3942_v19 = vmax.f32 %v3791_v57, %v3848_v49  ;;  %v4530_v61 = vmax.f32 %v4477_v27, %v3547_v48  ;;  %v3401_v4 = vsel %vm454_vm2, %v3398_v42, %v15649_v7  ;;  %v3259_v41 = vadd.f32 %v11798_v26, %v3210_v6  ;;  %8449 = vmatmul.msk.f32.gmra.mxu0 %vm544_vm1, %v16276_v40  ;;  %v12102_v40 = vpop.f32.mrf.mxu2 }
 0x45b   : > { %v3997_v45 = vsel %vm1806_vm5, %v16273_v21, %v3996_v0  ;;  %v12082_v36 = vmax.f32 %v4739_v60, %v4294_v17  ;;  %v3492_v57 = vmax.f32 %v11906_v53, %v3401_v4  ;;  %v3548_v34 = vrot.slane %v11942_v58, 2  ;;  %16278 = vst [vmem:[#allocation166_spill] sm:$0xff] %v12102_v40 }
 0x45c   : > { %v4091_v54 = vmax.f32 %v3942_v19, %v3997_v45  ;;  %v4582_v35 = vmax.f32 %v4530_v61, %v3697_v20  ;;  %v3698_v51 = vrot.slane %v11942_v58, 3  ;;  %v3849_v48 = vrot.slane %v12045_v11, 4 }
 0x45d   : > { %16275 = vst [vmem:[#allocation114_spill] sm:$0xff] %v12082_v36  ;;  %8500 = vmatmul.msk.f32.gmra.mxu2 %vm4916_vm8, %v12082_v36  ;;  %v4872_v17 = vrot.slane %v12082_v36, 1  ;;  %v5292_v42 = vrot.slane %v12082_v36, 2  ;;  %v12095_v19 = vmax.f32 %v3259_v41, 0.0  ;;  %v16277_v60 = vrot.slane %v11906_v53, 2 }
 0x45e   : > { %v4240_v6 = vmax.f32 %v4091_v54, %v4146_v1  ;;  %v4636_v27 = vmax.f32 %v4582_v35, %v3848_v49  ;;  %v3699_v61 = vsel %vm3662_vm6, %v3696_v39, %v3698_v51  ;;  %v3850_v21 = vsel %vm1422_vm3, %v3847_v44, %v3849_v48  ;;  %v12110_v54 = vpop.f32.mrf.mxu3  ;;  %v3120_v49 = vpop.f32.mrf.mxu0 }
 0x45f   : > { %v3549_v20 = vsel %vm635_vm0, %v16277_v60, %v3548_v34  ;;  %v12105_v7 = vsel %vm454_vm2, %v4870_v31, %v4872_v17  ;;  %v12108_v12 = vsel %vm635_vm0, %v5290_v2, %v5292_v42  ;;  %16281 = vst [vmem:[#allocation93_spill] sm:$0xff] %v12110_v54  ;;  %v3998_v39 = vrot.slane %v12045_v11, 5 }
 0x460   : > { %16279 = vst [vmem:[#allocation116_spill] sm:$0xff] %v12105_v7  ;;  %v4390_v41 = vmax.f32 %v4240_v6, %v4296_v10  ;;  %v3642_v36 = vmax.f32 %v3492_v57, %v3549_v20  ;;  %8467 = vmatmul.msk.f32.gmra.mxu1 %vm4916_vm8, %v12105_v7  ;;  %8532 = vmatmul.msk.f32.gmra.mxu3 %vm4916_vm8, %v12108_v12  ;;  %v4147_v31 = vrot.slane %v12045_v11, 6  ;;  %v4297_v44 = vrot.slane %v12045_v11, 7 }
 0x461   : > { %16280 = vst [vmem:[#allocation170_spill] sm:$0xff] %v12108_v12  ;;  %v4688_v53 = vmax.f32 %v4636_v27, %v3997_v45  ;;  %v3211_v57 = vadd.f32 %v3120_v49, %v11350_v3  ;;  %v4478_v6 = vmax.f32 %v11914_v14, %v3401_v4  ;;  %v3999_v7 = vsel %vm1806_vm5, %v3996_v0, %v3998_v39  ;;  %v12131_v3 = vpop.f32.mrf.mxu1 }
 0x462   : > { %v12120_v2 = vmax.f32 %v4390_v41, %v12095_v19  ;;  %v3792_v35 = vmax.f32 %v3642_v36, %v3699_v61  ;;  %v4148_v45 = vsel %vm2190_vm4, %v4145_v23, %v4147_v31  ;;  %v4298_v27 = vsel %vm4261_vm7, %v4295_v52, %v4297_v44  ;;  %8450 = vmatmul.msk.f32.gmra.mxu0 %vm544_vm1, %v16282_v8 }
 0x463   : > { %v4740_v60 = vmax.f32 %v4688_v53, %v4146_v1  ;;  %v3260_v12 = vadd.f32 %v11798_v26, %v3211_v57  ;;  %v4531_v54 = vmax.f32 %v4478_v6, %v3549_v20  ;;  %v3402_v41 = vrot.slane %v12000_v62, 1  ;;  %16283 = vst [vmem:[#allocation97_spill] sm:$0xff] %v12131_v3  ;;  %v12160_v3 = vpop.f32.mrf.mxu2 }
 0x464   : > { %v3943_v40 = vmax.f32 %v3792_v35, %v3850_v21  ;;  %v3550_v14 = vrot.slane %v12000_v62, 2  ;;  %v3700_v0 = vrot.slane %v12000_v62, 3  ;;  %v15656_v23 = vrot.slane %v12095_v19, 4  ;;  %16288 = vst [vmem:[#allocation106_spill] sm:$0xff] %v12160_v3 }
 0x465   : > { %v12133_v36 = vmax.f32 %v4740_v60, %v4296_v10  ;;  %v12138_v52 = vmax.f32 %v3260_v12, 0.0  ;;  %v4583_v4 = vmax.f32 %v4531_v54, %v3699_v61  ;;  %v16285_v20 = vrot.slane %v11942_v58, 1 }
 0x466   : > { %v4092_v1 = vmax.f32 %v3943_v40, %v3999_v7  ;;  %v3551_v57 = vsel %vm635_vm0, %v3548_v34, %v3550_v14  ;;  %v3701_v40 = vsel %vm3662_vm6, %v3698_v51, %v3700_v0  ;;  %v3852_v61 = vsel %vm1422_vm3, %v3849_v48, %v15656_v23  ;;  %v3123_v60 = vpop.f32.mrf.mxu0 }
 0x467   : > { %16284 = vst [vmem:[#allocation100_spill] sm:$0xff] %v12133_v36  ;;  %v3403_v8 = vsel %vm454_vm2, %v16285_v20, %v3402_v41  ;;  %8501 = vmatmul.msk.f32.gmra.mxu2 %vm4916_vm8, %v12133_v36  ;;  %v4874_v10 = vrot.slane %v12133_v36, 1  ;;  %v5294_v53 = vrot.slane %v12133_v36, 2  ;;  %v4637_v12 = vmax.f32 %v4583_v4, %v3850_v21 }
 0x468   : > { %v3493_v49 = vmax.f32 %v11942_v58, %v3403_v8  ;;  %v4241_v35 = vmax.f32 %v4092_v1, %v4148_v45  ;;  %v4000_v58 = vrot.slane %v12095_v19, 5  ;;  %v3212_v48 = vadd.f32 %v3123_v60, %v11357_v28 }
 0x469   : > { %v12154_v54 = vsel %vm454_vm2, %v4872_v17, %v4874_v10  ;;  %v12157_v6 = vsel %vm635_vm0, %v5292_v42, %v5294_v53  ;;  %v4689_v51 = vmax.f32 %v4637_v12, %v3999_v7  ;;  %v4149_v17 = vrot.slane %v12095_v19, 6  ;;  %v12168_v42 = vpop.f32.mrf.mxu3 }
 0x46a   : > { %16286 = vst [vmem:[#allocation102_spill] sm:$0xff] %v12154_v54  ;;  %v3643_v20 = vmax.f32 %v3493_v49, %v3551_v57  ;;  %8468 = vmatmul.msk.f32.gmra.mxu1 %vm4916_vm8, %v12154_v54  ;;  %8533 = vmatmul.msk.f32.gmra.mxu3 %vm4916_vm8, %v12157_v6  ;;  %v4391_v34 = vmax.f32 %v4241_v35, %v4298_v27  ;;  %v4299_v4 = vrot.slane %v12095_v19, 7 }
 0x46b   : > { %16287 = vst [vmem:[#allocation104_spill] sm:$0xff] %v12157_v6  ;;  %v4001_v1 = vsel %vm1806_vm5, %v3998_v39, %v4000_v58  ;;  %v4479_v49 = vmax.f32 %v11966_v56, %v3403_v8  ;;  %v4741_v54 = vmax.f32 %v4689_v51, %v4148_v45  ;;  %v3261_v35 = vadd.f32 %v11798_v26, %v3212_v48  ;;  %v8899_v6 = vld [vmem:[%s8998_s22 + $0x168] sm:$0xff] }
 0x46c   : > { %16289 = vst [vmem:[#allocation109_spill] sm:$0xff] %v12168_v42  ;;  %v3793_v21 = vmax.f32 %v3643_v20, %v3701_v40  ;;  %v12174_v23 = vmax.f32 %v4391_v34, %v12138_v52  ;;  %v4150_v7 = vsel %vm2190_vm4, %v4147_v31, %v4149_v17  ;;  %v4300_v12 = vsel %vm4261_vm7, %v4297_v44, %v4299_v4  ;;  %v12186_v34 = vpop.f32.mrf.mxu1  ;;  %v16292_v48 = vld [vmem:[#allocation95_spill] sm:$0xff] }
 0x46d   : > { %v4532_v60 = vmax.f32 %v4479_v49, %v3551_v57  ;;  %v3012_v20 = vrot.slane %v8899_v6, 2  ;;  %v12180_v42 = vmax.f32 %v4741_v54, %v4298_v27  ;;  %v12182_v39 = vmax.f32 %v3261_v35, 0.0  ;;  %16291 = vst [vmem:[#allocation113_spill] sm:$0xff] %v12186_v34  ;;  %v8900_v34 = vld [vmem:[%s8998_s22 + $0x170] sm:$0xff] }
 0x46e   : > { %v3944_v28 = vmax.f32 %v3793_v21, %v3852_v61  ;;  %v3404_v56 = vrot.slane %v12045_v11, 1  ;;  %v3552_v8 = vrot.slane %v12045_v11, 2  ;;  %v15659_v44 = vrot.slane %v12045_v11, 3  ;;  %v3126_v49 = vpop.f32.mrf.mxu0 }
 0x46f   : > { %16290 = vst [vmem:[#allocation111_spill] sm:$0xff] %v12180_v42  ;;  %v4584_v51 = vmax.f32 %v4532_v60, %v3701_v40  ;;  %v3013_v31 = vsel %vm635_vm0, %v16292_v48, %v3012_v20  ;;  %8502 = vmatmul.msk.f32.gmra.mxu2 %vm4916_vm8, %v12180_v42  ;;  %v4876_v27 = vrot.slane %v12180_v42, 1  ;;  %v5296_v57 = vrot.slane %v12180_v42, 2 }
 0x470   : > { %v4093_v45 = vmax.f32 %v3944_v28, %v4001_v1  ;;  %8451 = vmatmul.msk.f32.gmra.mxu0 %vm544_vm1, %v3013_v31  ;;  %v3405_v54 = vsel %vm454_vm2, %v3402_v41, %v3404_v56  ;;  %v3553_v6 = vsel %vm635_vm0, %v3550_v14, %v3552_v8  ;;  %v3703_v28 = vsel %vm3662_vm6, %v3700_v0, %v15659_v44 }
 0x471   : > { %v4638_v40 = vmax.f32 %v4584_v51, %v3852_v61  ;;  %v3494_v35 = vmax.f32 %v12000_v62, %v3405_v54  ;;  %v12203_v60 = vsel %vm454_vm2, %v4874_v10, %v4876_v27  ;;  %v12206_v48 = vsel %vm635_vm0, %v5294_v53, %v5296_v57  ;;  %v12215_v10 = vpop.f32.mrf.mxu2  ;;  %v12223_v44 = vpop.f32.mrf.mxu3 }
 0x472   : > { %v4242_v21 = vmax.f32 %v4093_v45, %v4150_v7  ;;  %16293 = vst [vmem:[#allocation15_spill] sm:$0xff] %v12203_v60  ;;  %v3213_v31 = vadd.f32 %v3126_v49, %v11394_v47  ;;  %v3853_v41 = vrot.slane %v12138_v52, 4  ;;  %8469 = vmatmul.msk.f32.gmra.mxu1 %vm4916_vm8, %v12203_v60  ;;  %8534 = vmatmul.msk.f32.gmra.mxu3 %vm4916_vm8, %v12206_v48  ;;  %v4002_v0 = vrot.slane %v12138_v52, 5 }
 0x473   : > { %16294 = vst [vmem:[#allocation119_spill] sm:$0xff] %v12206_v48  ;;  %v4690_v14 = vmax.f32 %v4638_v40, %v4001_v1  ;;  %v3644_v61 = vmax.f32 %v3494_v35, %v3553_v6  ;;  %v16296_v47 = vrot.slane %v12095_v19, 4  ;;  %v4151_v51 = vrot.slane %v12138_v52, 6 }
 0x474   : > { %v4392_v62 = vmax.f32 %v4242_v21, %v4300_v12  ;;  %16295 = vst [vmem:[#allocation173_spill] sm:$0xff] %v12215_v10  ;;  %v3262_v53 = vadd.f32 %v11798_v26, %v3213_v31  ;;  %v4301_v49 = vrot.slane %v12138_v52, 7  ;;  %v4003_v35 = vsel %vm1806_vm5, %v4000_v58, %v4002_v0 }
 0x475   : > { %v3854_v45 = vsel %vm1422_vm3, %v16296_v47, %v3853_v41  ;;  %16297 = vst [vmem:[#allocation115_spill] sm:$0xff] %v12223_v44  ;;  %v4742_v21 = vmax.f32 %v4690_v14, %v4150_v7  ;;  %v3794_v40 = vmax.f32 %v3644_v61, %v3703_v28  ;;  %v4152_v31 = vsel %vm2190_vm4, %v4149_v17, %v4151_v51  ;;  %v12241_v61 = vpop.f32.mrf.mxu1 }
 0x476   : > { %v12226_v1 = vmax.f32 %v4392_v62, %v12182_v39  ;;  %v12229_v60 = vmax.f32 %v3262_v53, 0.0  ;;  %v4302_v48 = vsel %vm4261_vm7, %v4299_v4, %v4301_v49  ;;  %v4480_v47 = vmax.f32 %v12013_v43, %v3405_v54  ;;  %16298 = vst [vmem:[#allocation121_spill] sm:$0xff] %v12241_v61 }
 0x477   : > { %v12234_v10 = vmax.f32 %v4742_v21, %v4300_v12  ;;  %v3945_v3 = vmax.f32 %v3794_v40, %v3854_v45  ;;  %v3014_v44 = vrot.slane %v8900_v34, 2  ;;  %v3406_v62 = vrot.slane %v12095_v19, 1  ;;  %v3129_v34 = vpop.f32.mrf.mxu0 }
 0x478   : > { %v4533_v42 = vmax.f32 %v4480_v47, %v3553_v6  ;;  %v3554_v7 = vrot.slane %v12095_v19, 2  ;;  %v15667_v58 = vrot.slane %v12095_v19, 3  ;;  %v15665_v14 = vrot.slane %v12182_v39, 4 }
 0x479   : > { %8503 = vmatmul.msk.f32.gmra.mxu2 %vm4916_vm8, %v12234_v10  ;;  %v15666_v43 = vrot.slane %v12234_v10, 1  ;;  %v15664_v17 = vrot.slane %v12234_v10, 2  ;;  %v4094_v4 = vmax.f32 %v3945_v3, %v4003_v35  ;;  %v3015_v12 = vsel %vm635_vm0, %v3012_v20, %v3014_v44 }
 0x47a   : > { %v4585_v54 = vmax.f32 %v4533_v42, %v3703_v28  ;;  %8452 = vmatmul.msk.f32.gmra.mxu0 %vm544_vm1, %v3015_v12  ;;  %v3214_v6 = vadd.f32 %v3129_v34, %v11405_v30  ;;  %v3407_v53 = vsel %vm454_vm2, %v3404_v56, %v3406_v62  ;;  %v3555_v21 = vsel %vm635_vm0, %v3552_v8, %v3554_v7  ;;  %v16301_v28 = vld [vmem:[#allocation41_spill] sm:$0xff]  ;;  %v12281_v34 = vpop.f32.mrf.mxu2 }
 0x47b   : > { %v12255_v40 = vsel %vm454_vm2, %v4876_v27, %v15666_v43  ;;  %v12260_v3 = vsel %vm635_vm0, %v5296_v57, %v15664_v17  ;;  %v4243_v20 = vmax.f32 %v4094_v4, %v4152_v31  ;;  %v3495_v42 = vmax.f32 %v12045_v11, %v3407_v53  ;;  %16303 = vst [vmem:[#allocation123_spill] sm:$0xff] %v12281_v34 }
 0x47c   : > { %16299 = vst [vmem:[#allocation126_spill] sm:$0xff] %v12255_v40  ;;  %v12265_v30 = vadd.f32 %v16301_v28, %v11227_v25  ;;  %8470 = vmatmul.msk.f32.gmra.mxu1 %vm4916_vm8, %v12255_v40  ;;  %8535 = vmatmul.msk.f32.gmra.mxu3 %vm4916_vm8, %v12260_v3  ;;  %v4639_v56 = vmax.f32 %v4585_v54, %v3854_v45  ;;  %v16302_v8 = vrot.slane %v12045_v11, 3  ;;  %v4004_v57 = vrot.slane %v12182_v39, 5 }
 0x47d   : > { %16300 = vst [vmem:[#allocation117_spill] sm:$0xff] %v12260_v3  ;;  %v4393_v47 = vmax.f32 %v4243_v20, %v4302_v48  ;;  %v3645_v4 = vmax.f32 %v3495_v42, %v3555_v21  ;;  %v3856_v25 = vsel %vm1422_vm3, %v3853_v41, %v15665_v14  ;;  %v4153_v12 = vrot.slane %v12182_v39, 6 }
 0x47e   : > { %v3705_v27 = vsel %vm3662_vm6, %v16302_v8, %v15667_v58  ;;  %v4691_v45 = vmax.f32 %v4639_v56, %v4003_v35  ;;  %v3263_v54 = vadd.f32 %v11798_v26, %v3214_v6  ;;  %v4005_v11 = vsel %vm1806_vm5, %v4002_v0, %v4004_v57  ;;  %v12286_v8 = vpop.f32.mrf.mxu3  ;;  %v8901_v35 = vld [vmem:[%s8998_s22 + $0x178] sm:$0xff] }
 0x47f   : > { %v4303_v28 = vrot.slane %v12182_v39, 7  ;;  %16304 = vst [vmem:[#allocation176_spill] sm:$0xff] %v12286_v8  ;;  %v12289_v20 = vmax.f32 %v4393_v47, %v12229_v60  ;;  %v3795_v42 = vmax.f32 %v3645_v4, %v3705_v27  ;;  %v4154_v17 = vsel %vm2190_vm4, %v4151_v51, %v4153_v12  ;;  %v3132_v40 = vpop.f32.mrf.mxu0 }
 0x480   : > { %v4481_v41 = vmax.f32 %v12066_v33, %v3407_v53  ;;  %v4743_v14 = vmax.f32 %v4691_v45, %v4152_v31  ;;  %v3016_v56 = vrot.slane %v8901_v35, 2  ;;  %v15672_v6 = vrot.slane %v12138_v52, 1  ;;  %v12305_v31 = vpop.f32.mrf.mxu1 }
 0x481   : > { %v4304_v43 = vsel %vm4261_vm7, %v4301_v49, %v4303_v28  ;;  %v3946_v0 = vmax.f32 %v3795_v42, %v3856_v25  ;;  %v15671_v3 = vrot.slane %v12138_v52, 2  ;;  %v15670_v47 = vrot.slane %v12138_v52, 3  ;;  %16305 = vst [vmem:[#allocation128_spill] sm:$0xff] %v12305_v31  ;;  %v16404_v31 = vld [vmem:[#allocation11_spill] sm:$0xff] }
 0x482   : > { %v4534_v58 = vmax.f32 %v4481_v41, %v3555_v21  ;;  %v12298_v34 = vmax.f32 %v4743_v14, %v4302_v48  ;;  %v3017_v51 = vsel %vm635_vm0, %v3014_v44, %v3016_v56  ;;  %v3215_v33 = vadd.f32 %v3132_v40, %v11451_v46 }
 0x483   : > { %v3409_v49 = vsel %vm454_vm2, %v3406_v62, %v15672_v6  ;;  %v4095_v53 = vmax.f32 %v3946_v0, %v4005_v11  ;;  %8453 = vmatmul.msk.f32.gmra.mxu0 %vm544_vm1, %v3017_v51  ;;  %v3557_v48 = vsel %vm635_vm0, %v3554_v7, %v15671_v3  ;;  %v12316_v62 = vmax.f32 %v3263_v54, 0.0  ;;  %v12336_v51 = vpop.f32.mrf.mxu2 }
 0x484   : > { %v4586_v4 = vmax.f32 %v4534_v58, %v3705_v27  ;;  %v3496_v21 = vmax.f32 %v12095_v19, %v3409_v49  ;;  %8504 = vmatmul.msk.f32.gmra.mxu2 %vm4916_vm8, %v12298_v34  ;;  %v4880_v46 = vrot.slane %v12298_v34, 1  ;;  %v5300_v44 = vrot.slane %v12298_v34, 2  ;;  %16311 = vst [vmem:[#allocation25_spill] sm:$0xff] %v12336_v51 }
 0x485   : > { %v16306_v58 = vrot.slane %v12095_v19, 3  ;;  %v4244_v40 = vmax.f32 %v4095_v53, %v4154_v17  ;;  %v15675_v7 = vrot.slane %v12229_v60, 4  ;;  %v16307_v42 = vrot.slane %v12234_v10, 1 }
 0x486   : > { %v4640_v27 = vmax.f32 %v4586_v4, %v3856_v25  ;;  %v3646_v45 = vmax.f32 %v3496_v21, %v3557_v48  ;;  %v16309_v35 = vrot.slane %v12234_v10, 2  ;;  %v3264_v0 = vadd.f32 %v11798_v26, %v3215_v33  ;;  %v12351_v3 = vpop.f32.mrf.mxu3 }
 0x487   : > { %v3707_v14 = vsel %vm3662_vm6, %v16306_v58, %v15670_v47  ;;  %v12327_v41 = vsel %vm454_vm2, %v16307_v42, %v4880_v46  ;;  %v4006_v19 = vrot.slane %v12229_v60, 5  ;;  %v4394_v25 = vmax.f32 %v4244_v40, %v4304_v43  ;;  %16313 = vst [vmem:[#allocation138_spill] sm:$0xff] %v12351_v3  ;;  %v3135_v6 = vpop.f32.mrf.mxu0 }
 0x488   : > { %16308 = vst [vmem:[#allocation20_spill] sm:$0xff] %v12327_v41  ;;  %v12332_v54 = vsel %vm635_vm0, %v16309_v35, %v5300_v44  ;;  %8471 = vmatmul.msk.f32.gmra.mxu1 %vm4916_vm8, %v12327_v41  ;;  %v4692_v53 = vmax.f32 %v4640_v27, %v4005_v11  ;;  %v3796_v4 = vmax.f32 %v3646_v45, %v3707_v14  ;;  %v4155_v21 = vrot.slane %v12229_v60, 6 }
 0x489   : > { %16310 = vst [vmem:[#allocation133_spill] sm:$0xff] %v12332_v54  ;;  %8536 = vmatmul.msk.f32.gmra.mxu3 %vm4916_vm8, %v12332_v54  ;;  %v16312_v58 = vrot.slane %v12182_v39, 4  ;;  %v4007_v42 = vsel %vm1806_vm5, %v4004_v57, %v4006_v19  ;;  %v4305_v35 = vrot.slane %v12229_v60, 7  ;;  %v4482_v47 = vmax.f32 %v12120_v2, %v3409_v49 }
 0x48a   : > { %v12354_v40 = vmax.f32 %v4394_v25, %v12316_v62  ;;  %v4744_v11 = vmax.f32 %v4692_v53, %v4154_v17  ;;  %v4156_v45 = vsel %vm2190_vm4, %v4153_v12, %v4155_v21  ;;  %v12365_v25 = vpop.f32.mrf.mxu1  ;;  %v3410_v17 = vrot.slane %v12182_v39, 1 }
 0x48b   : > { %v3858_v33 = vsel %vm1422_vm3, %v16312_v58, %v15675_v7  ;;  %v4306_v41 = vsel %vm4261_vm7, %v4303_v28, %v4305_v35  ;;  %v4535_v54 = vmax.f32 %v4482_v47, %v3557_v48  ;;  %v16314_v58 = vrot.slane %v10949_v55, 2  ;;  %16315 = vst [vmem:[#allocation30_spill] sm:$0xff] %v12365_v25 }
 0x48c   : > { %v3947_v27 = vmax.f32 %v3796_v4, %v3858_v33  ;;  %v3216_v7 = vadd.f32 %v3135_v6, %v11493_v9  ;;  %v12362_v2 = vmax.f32 %v4744_v11, %v4304_v43  ;;  %v3558_v12 = vrot.slane %v12182_v39, 2 }
 0x48d   : > { %v3019_v57 = vsel %vm635_vm0, %v3016_v56, %v16314_v58  ;;  %v2559_v28 = vadd.f32 %v11599_v15, %v12265_v30  ;;  %v12371_v47 = vmax.f32 %v3264_v0, 0.0  ;;  %v4587_v48 = vmax.f32 %v4535_v54, %v3707_v14  ;;  %v12386_v0 = vpop.f32.mrf.mxu2 }
 0x48e   : > { %v4096_v49 = vmax.f32 %v3947_v27, %v4007_v42  ;;  %8454 = vmatmul.msk.f32.gmra.mxu0 %vm544_vm1, %v3019_v57  ;;  %v15676_v56 = vrot.slane %v12182_v39, 3  ;;  %8505 = vmatmul.msk.f32.gmra.mxu2 %vm4916_vm8, %v12362_v2  ;;  %v4882_v9 = vrot.slane %v12362_v2, 1  ;;  %v5302_v43 = vrot.slane %v12362_v2, 2  ;;  %16318 = vst [vmem:[#allocation142_spill] sm:$0xff] %v12386_v0 }
 0x48f   : > { %v16316_v53 = vrot.slane %v12138_v52, 1  ;;  %v4641_v11 = vmax.f32 %v4587_v48, %v3858_v33  ;;  %v3265_v15 = vadd.f32 %v11798_v26, %v3216_v7  ;;  %v16317_v14 = vrot.slane %v12138_v52, 2 }
 0x490   : > { %v4245_v6 = vmax.f32 %v4096_v49, %v4156_v45  ;;  %v12389_v27 = vsel %vm454_vm2, %v4880_v46, %v4882_v9  ;;  %v12392_v58 = vsel %vm635_vm0, %v5300_v44, %v5302_v43  ;;  %v16321_v33 = vrot.slane %v12138_v52, 3 }
 0x491   : > { %v3411_v4 = vsel %vm454_vm2, %v16316_v53, %v3410_v17  ;;  %v3559_v54 = vsel %vm635_vm0, %v16317_v14, %v3558_v12  ;;  %16319 = vst [vmem:[#allocation35_spill] sm:$0xff] %v12389_v27  ;;  %8472 = vmatmul.msk.f32.gmra.mxu1 %vm4916_vm8, %v12389_v27  ;;  %8537 = vmatmul.msk.f32.gmra.mxu3 %vm4916_vm8, %v12392_v58  ;;  %v3859_v46 = vrot.slane %v12316_v62, 4  ;;  %v4008_v44 = vrot.slane %v12316_v62, 5  ;;  %v3138_v14 = vpop.f32.mrf.mxu0 }
 0x492   : > { %v3497_v30 = vmax.f32 %v12138_v52, %v3411_v4  ;;  %16320 = vst [vmem:[#allocation145_spill] sm:$0xff] %v12392_v58  ;;  %v4395_v57 = vmax.f32 %v4245_v6, %v4306_v41  ;;  %v3709_v26 = vsel %vm3662_vm6, %v16321_v33, %v15676_v56  ;;  %v4693_v7 = vmax.f32 %v4641_v11, %v4007_v42  ;;  %v12411_v33 = vpop.f32.mrf.mxu3 }
 0x493   : > { %v4157_v6 = vrot.slane %v12316_v62, 6  ;;  %v4307_v52 = vrot.slane %v12316_v62, 7  ;;  %v4483_v53 = vmax.f32 %v12174_v23, %v3411_v4  ;;  %16322 = vst [vmem:[#allocation40_spill] sm:$0xff] %v12411_v33  ;;  %v16323_v42 = vrot.slane %v12229_v60, 4  ;;  %v12434_v33 = vpop.f32.mrf.mxu1 }
 0x494   : > { %v3647_v49 = vmax.f32 %v3497_v30, %v3559_v54  ;;  %v12406_v48 = vmax.f32 %v4395_v57, %v12371_v47  ;;  %v4745_v56 = vmax.f32 %v4693_v7, %v4156_v45  ;;  %v4009_v30 = vsel %vm1806_vm5, %v4006_v19, %v4008_v44  ;;  %v8654_v57 = vld [vmem:[%s15551_s3 + $0x30] sm:$0xff]  ;;  %16326 = vst [vmem:[#allocation132_spill] sm:$0xff] %v12434_v33 }
 0x495   : > { %v3860_v11 = vsel %vm1422_vm3, %v16323_v42, %v3859_v46  ;;  %v4158_v58 = vsel %vm2190_vm4, %v4155_v21, %v4157_v6  ;;  %v4308_v0 = vsel %vm4261_vm7, %v4305_v35, %v4307_v52  ;;  %v4536_v23 = vmax.f32 %v4483_v53, %v3559_v54  ;;  %6405 = vmatpush.msra.mxu0 %v8654_v57  ;;  %v16327_v35 = vld [vmem:[#allocation53_spill] sm:$0xff] }
 0x496   : > { %v3797_v27 = vmax.f32 %v3647_v49, %v3709_v26  ;;  %v16324_v4 = vrot.slane %v16179_v22, 2  ;;  %v16325_v45 = vrot.slane %v10949_v55, 2  ;;  %v12428_v49 = vadd.f32 %v11568_v16, %v2559_v28 }
 0x497   : > { %v12430_v19 = vmax.f32 %v4745_v56, %v4306_v41  ;;  %v3217_v21 = vadd.f32 %v3138_v14, %v11500_v37  ;;  %v2176_v54 = vadd.f32 %v16327_v35, %v11241_v24  ;;  %v4588_v53 = vmax.f32 %v4536_v23, %v3709_v26  ;;  %v12449_v14 = vpop.f32.mrf.mxu2 }
 0x498   : > { %v3021_v7 = vsel %vm635_vm0, %v16325_v45, %v16324_v4  ;;  %v3948_v42 = vmax.f32 %v3797_v27, %v3860_v11  ;;  %v3412_v55 = vrot.slane %v12229_v60, 1  ;;  %v3560_v57 = vrot.slane %v12229_v60, 2  ;;  %16328 = vst [vmem:[#allocation122_spill] sm:$0xff] %v12449_v14 }
 0x499   : > { %8455 = vmatmul.msk.f32.gmra.mxu0 %vm544_vm1, %v3021_v7  ;;  %8506 = vmatmul.msk.f32.gmra.mxu2 %vm4916_vm8, %v12430_v19  ;;  %v4884_v16 = vrot.slane %v12430_v19, 1  ;;  %v5304_v41 = vrot.slane %v12430_v19, 2  ;;  %v12444_v28 = vmax.f32 %v3265_v15, 0.0  ;;  %v4642_v56 = vmax.f32 %v4588_v53, %v3860_v11  ;;  %v12460_v15 = vld [vmem:[%s15550_s2] ss:$0 sm:$0xff] }
 0x49a   : > { %v4097_v37 = vmax.f32 %v3948_v42, %v4009_v30  ;;  %v3413_v27 = vsel %vm454_vm2, %v3410_v17, %v3412_v55  ;;  %v3561_v24 = vsel %vm635_vm0, %v3558_v12, %v3560_v57  ;;  %v3710_v26 = vrot.slane %v12229_v60, 3  ;;  %v3141_v42 = vpop.f32.mrf.mxu0 }
 0x49b   : > { %v12452_v23 = vsel %vm454_vm2, %v4882_v9, %v4884_v16  ;;  %v12455_v4 = vsel %vm635_vm0, %v5302_v43, %v5304_v41  ;;  %v3266_v17 = vadd.f32 %v12460_v15, %v3217_v21  ;;  %v4694_v12 = vmax.f32 %v4642_v56, %v4009_v30 }
 0x49c   : > { %16329 = vst [vmem:[#allocation127_spill] sm:$0xff] %v12452_v23  ;;  %v4246_v45 = vmax.f32 %v4097_v37, %v4158_v58  ;;  %8473 = vmatmul.msk.f32.gmra.mxu1 %vm4916_vm8, %v12452_v23  ;;  %8538 = vmatmul.msk.f32.gmra.mxu3 %vm4916_vm8, %v12455_v4  ;;  %v3498_v9 = vmax.f32 %v12182_v39, %v3413_v27  ;;  %v16331_v43 = vrot.slane %v12182_v39, 3  ;;  %v3861_v7 = vrot.slane %v12371_v47, 4  ;;  %v12475_v23 = vpop.f32.mrf.mxu3 }
 0x49d   : > { %16330 = vst [vmem:[#allocation137_spill] sm:$0xff] %v12455_v4  ;;  %v4010_v53 = vrot.slane %v12371_v47, 5  ;;  %v4159_v21 = vrot.slane %v12371_v47, 6  ;;  %v4309_v37 = vrot.slane %v12371_v47, 7  ;;  %v4746_v4 = vmax.f32 %v4694_v12, %v4158_v58 }
 0x49e   : > { %v3711_v11 = vsel %vm3662_vm6, %v16331_v43, %v3710_v26  ;;  %v4396_v35 = vmax.f32 %v4246_v45, %v4308_v0  ;;  %16332 = vst [vmem:[#allocation131_spill] sm:$0xff] %v12475_v23  ;;  %v3648_v30 = vmax.f32 %v3498_v9, %v3561_v24  ;;  %v3862_v56 = vsel %vm1422_vm3, %v3859_v46, %v3861_v7 }
 0x49f   : > { %v4484_v39 = vmax.f32 %v12226_v1, %v3413_v27  ;;  %v4011_v14 = vsel %vm1806_vm5, %v4008_v44, %v4010_v53  ;;  %v4160_v45 = vsel %vm2190_vm4, %v4157_v6, %v4159_v21  ;;  %v4310_v33 = vsel %vm4261_vm7, %v4307_v52, %v4309_v37  ;;  %v12494_v44 = vpop.f32.mrf.mxu1 }
 0x4a0   : > { %v12480_v43 = vmax.f32 %v4396_v35, %v12444_v28  ;;  %v16333_v51 = vrot.slane %v16179_v22, 2  ;;  %v2995_v58 = vadd.f32 %v11532_v63, %v11495_v32  ;;  %v12490_v12 = vmax.f32 %v4746_v4, %v4308_v0  ;;  %16334 = vst [vmem:[#allocation143_spill] sm:$0xff] %v12494_v44 }
 0x4a1   : > { %v3798_v46 = vmax.f32 %v3648_v30, %v3711_v11  ;;  %v4537_v1 = vmax.f32 %v4484_v39, %v3561_v24  ;;  %v2560_v27 = vadd.f32 %v11663_v38, %v2176_v54  ;;  %v3218_v9 = vadd.f32 %v3141_v42, %v11560_v29  ;;  %v12513_v30 = vpop.f32.mrf.mxu2 }
 0x4a2   : > { %8456 = vmatmul.msk.f32.gmra.mxu0 %vm544_vm1, %v16333_v51  ;;  %v3414_v6 = vrot.slane %v12316_v62, 1  ;;  %v3562_v52 = vrot.slane %v12316_v62, 2  ;;  %8507 = vmatmul.msk.f32.gmra.mxu2 %vm4916_vm8, %v12490_v12  ;;  %v4886_v22 = vrot.slane %v12490_v12, 1  ;;  %v5306_v32 = vrot.slane %v12490_v12, 2  ;;  %16337 = vst [vmem:[#allocation135_spill] sm:$0xff] %v12513_v30  ;;  %v3144_v39 = vpop.f32.mrf.mxu0 }
 0x4a3   : > { %v3949_v63 = vmax.f32 %v3798_v46, %v3862_v56  ;;  %v4589_v51 = vmax.f32 %v4537_v1, %v3711_v11  ;;  %v12502_v0 = vmax.f32 %v3266_v17, 0.0  ;;  %v3712_v54 = vrot.slane %v12316_v62, 3 }
 0x4a4   : > { %v3415_v38 = vsel %vm454_vm2, %v3412_v55, %v3414_v6  ;;  %v3563_v29 = vsel %vm635_vm0, %v3560_v57, %v3562_v52  ;;  %v12508_v24 = vsel %vm454_vm2, %v4884_v16, %v4886_v22  ;;  %v12511_v4 = vsel %vm635_vm0, %v5304_v41, %v5306_v32 }
 0x4a5   : > { %16335 = vst [vmem:[#allocation147_spill] sm:$0xff] %v12508_v24  ;;  %v4098_v42 = vmax.f32 %v3949_v63, %v4011_v14  ;;  %v4643_v35 = vmax.f32 %v4589_v51, %v3862_v56  ;;  %8474 = vmatmul.msk.f32.gmra.mxu1 %vm4916_vm8, %v12508_v24  ;;  %8539 = vmatmul.msk.f32.gmra.mxu3 %vm4916_vm8, %v12511_v4  ;;  %v3863_v41 = vrot.slane %v12444_v28, 4  ;;  %v4012_v56 = vrot.slane %v12444_v28, 5 }
 0x4a6   : > { %16336 = vst [vmem:[#allocation19_spill] sm:$0xff] %v12511_v4  ;;  %v3267_v55 = vadd.f32 %v12460_v15, %v3218_v9  ;;  %v3499_v57 = vmax.f32 %v12229_v60, %v3415_v38  ;;  %v3713_v16 = vsel %vm3662_vm6, %v3710_v26, %v3712_v54  ;;  %v4161_v46 = vrot.slane %v12444_v28, 6  ;;  %v12530_v60 = vpop.f32.mrf.mxu3 }
 0x4a7   : > { %v4247_v17 = vmax.f32 %v4098_v42, %v4160_v45  ;;  %v4695_v11 = vmax.f32 %v4643_v35, %v4011_v14  ;;  %v3864_v63 = vsel %vm1422_vm3, %v3861_v7, %v3863_v41  ;;  %v4311_v51 = vrot.slane %v12444_v28, 7  ;;  %16338 = vst [vmem:[#allocation140_spill] sm:$0xff] %v12530_v60 }
 0x4a8   : > { %v3649_v1 = vmax.f32 %v3499_v57, %v3563_v29  ;;  %v4485_v24 = vmax.f32 %v12289_v20, %v3415_v38  ;;  %v4013_v14 = vsel %vm1806_vm5, %v4010_v53, %v4012_v56  ;;  %v4162_v42 = vsel %vm2190_vm4, %v4159_v21, %v4161_v46 }
 0x4a9   : > { %v4397_v26 = vmax.f32 %v4247_v17, %v4310_v33  ;;  %v4747_v9 = vmax.f32 %v4695_v11, %v4160_v45  ;;  %v4312_v57 = vsel %vm4261_vm7, %v4309_v37, %v4311_v51  ;;  %v3219_v7 = vadd.f32 %v3144_v39, %v2995_v58  ;;  %v16339_v45 = vld [vmem:[#allocation124_spill] sm:$0xff]  ;;  %v16340_v11 = vld [vmem:[#allocation129_spill] sm:$0xff] }
 0x4aa   : > { %8655 = vmatmul.msk.f32.vlgmr.msra.gmra.mxu0 %vm4916_vm8, %v11804_v50  ;;  %v3799_v35 = vmax.f32 %v3649_v1, %v3713_v16  ;;  %v4538_v4 = vmax.f32 %v4485_v24, %v3563_v29  ;;  %v12536_v30 = vadd.f32 %v11628_v13, %v2560_v27  ;;  %v3416_v17 = vrot.slane %v12371_v47, 1  ;;  %v12546_v1 = vpop.f32.mrf.mxu1 }
 0x4ab   : > { %v12539_v20 = vmax.f32 %v4397_v26, %v12502_v0  ;;  %v12541_v38 = vmax.f32 %v4747_v9, %v4310_v33  ;;  %v2996_v53 = vadd.f32 %v16340_v11, %v16339_v45  ;;  %16341 = vst [vmem:[#allocation152_spill] sm:$0xff] %v12546_v1  ;;  %v15683_v37 = vrot.slane %v12371_v47, 2 }
 0x4ac   : > { %v3950_v60 = vmax.f32 %v3799_v35, %v3864_v63  ;;  %v4590_v21 = vmax.f32 %v4538_v4, %v3713_v16  ;;  %v12553_v33 = vmax.f32 %v3267_v55, 0.0  ;;  %v3417_v27 = vsel %vm454_vm2, %v3414_v6, %v3416_v17  ;;  %v3147_v16 = vpop.f32.mrf.mxu0  ;;  %v12568_v6 = vpop.f32.mrf.mxu2 }
 0x4ad   : > { %8508 = vmatmul.msk.f32.gmra.mxu2 %vm4916_vm8, %v12541_v38  ;;  %v4888_v13 = vrot.slane %v12541_v38, 1  ;;  %v5308_v58 = vrot.slane %v12541_v38, 2  ;;  %v3268_v39 = vadd.f32 %v12460_v15, %v3219_v7  ;;  %v3500_v4 = vmax.f32 %v12316_v62, %v3417_v27  ;;  %16344 = vst [vmem:[#allocation161_spill] sm:$0xff] %v12568_v6 }
 0x4ae   : > { %v4099_v29 = vmax.f32 %v3950_v60, %v4013_v14  ;;  %v4644_v24 = vmax.f32 %v4590_v21, %v3864_v63  ;;  %v3565_v55 = vsel %vm635_vm0, %v3562_v52, %v15683_v37  ;;  %v3714_v35 = vrot.slane %v12371_v47, 3 }
 0x4af   : > { %v12559_v26 = vsel %vm454_vm2, %v4886_v22, %v4888_v13  ;;  %v12562_v9 = vsel %vm635_vm0, %v5306_v32, %v5308_v58  ;;  %v3650_v63 = vmax.f32 %v3500_v4, %v3565_v55  ;;  %v3865_v32 = vrot.slane %v12502_v0, 4 }
 0x4b0   : > { %16342 = vst [vmem:[#allocation144_spill] sm:$0xff] %v12559_v26  ;;  %8475 = vmatmul.msk.f32.gmra.mxu1 %vm4916_vm8, %v12559_v26  ;;  %8540 = vmatmul.msk.f32.gmra.mxu3 %vm4916_vm8, %v12562_v9  ;;  %v4248_v62 = vmax.f32 %v4099_v29, %v4162_v42  ;;  %v4696_v22 = vmax.f32 %v4644_v24, %v4013_v14  ;;  %v4014_v7 = vrot.slane %v12502_v0, 5  ;;  %v4163_v52 = vrot.slane %v12502_v0, 6  ;;  %v12582_v14 = vpop.f32.mrf.mxu3 }
 0x4b1   : > { %16343 = vst [vmem:[#allocation156_spill] sm:$0xff] %v12562_v9  ;;  %v3715_v60 = vsel %vm3662_vm6, %v3712_v54, %v3714_v35  ;;  %v4313_v45 = vrot.slane %v12502_v0, 7  ;;  %v3866_v29 = vsel %vm1422_vm3, %v3863_v41, %v3865_v32  ;;  %v4486_v26 = vmax.f32 %v12354_v40, %v3417_v27 }
 0x4b2   : > { %8656 = vmatmul.msk.f32.gmra.mxu0 %vm4916_vm8, %v11858_v18  ;;  %v4398_v11 = vmax.f32 %v4248_v62, %v4312_v57  ;;  %v4748_v21 = vmax.f32 %v4696_v22, %v4162_v42  ;;  %v3800_v37 = vmax.f32 %v3650_v63, %v3715_v60  ;;  %16345 = vst [vmem:[#allocation148_spill] sm:$0xff] %v12582_v14  ;;  %v16346_v22 = vld [vmem:[#allocation82_spill] sm:$0xff]  ;;  %v16347_v63 = vld [vmem:[#allocation84_spill] sm:$0xff]  ;;  %v12597_v44 = vpop.f32.mrf.mxu1 }
 0x4b3   : > { %v4015_v24 = vsel %vm1806_vm5, %v4012_v56, %v4014_v7  ;;  %v4164_v54 = vsel %vm2190_vm4, %v4161_v46, %v4163_v52  ;;  %v4314_v4 = vsel %vm4261_vm7, %v4311_v51, %v4313_v45  ;;  %v3220_v42 = vadd.f32 %v3147_v16, %v2996_v53  ;;  %v16348_v14 = vld [vmem:[#allocation134_spill] sm:$0xff]  ;;  %16349 = vst [vmem:[#allocation151_spill] sm:$0xff] %v12597_v44 }
 0x4b4   : > { %v12589_v9 = vmax.f32 %v4398_v11, %v12553_v33  ;;  %v12591_v6 = vmax.f32 %v4748_v21, %v4312_v57  ;;  %v3951_v62 = vmax.f32 %v3800_v37, %v3866_v29  ;;  %v2177_v41 = vadd.f32 %v16347_v63, %v16346_v22 }
 0x4b5   : > { %v2997_v1 = vadd.f32 %v16348_v14, %v12428_v49  ;;  %v4539_v56 = vmax.f32 %v4486_v26, %v3565_v55  ;;  %v3418_v46 = vrot.slane %v12444_v28, 1  ;;  %v12604_v57 = vmax.f32 %v3268_v39, 0.0 }
 0x4b6   : > { %8509 = vmatmul.msk.f32.gmra.mxu2 %vm4916_vm8, %v12591_v6  ;;  %v15687_v40 = vrot.slane %v12591_v6, 1  ;;  %v15686_v51 = vrot.slane %v12591_v6, 2  ;;  %v4100_v53 = vmax.f32 %v3951_v62, %v4015_v24  ;;  %v3566_v49 = vrot.slane %v12444_v28, 2 }
 0x4b7   : > { %v4591_v37 = vmax.f32 %v4539_v56, %v3715_v60  ;;  %v3419_v27 = vsel %vm454_vm2, %v3416_v17, %v3418_v46  ;;  %v3716_v16 = vrot.slane %v12444_v28, 3  ;;  %v3269_v11 = vadd.f32 %v12460_v15, %v3220_v42  ;;  %v12620_v60 = vpop.f32.mrf.mxu2  ;;  %v3150_v17 = vpop.f32.mrf.mxu0 }
 0x4b8   : > { %v12612_v26 = vsel %vm454_vm2, %v4888_v13, %v15687_v40  ;;  %v12617_v55 = vsel %vm635_vm0, %v5308_v58, %v15686_v51  ;;  %v4249_v39 = vmax.f32 %v4100_v53, %v4164_v54  ;;  %16352 = vst [vmem:[#allocation162_spill] sm:$0xff] %v12620_v60  ;;  %v3501_v13 = vmax.f32 %v12371_v47, %v3419_v27  ;;  %v12638_v51 = vpop.f32.mrf.mxu3  ;;  %v16356_v60 = vld [vmem:[#allocation4_spill] sm:$0xff] }
 0x4b9   : > { %16350 = vst [vmem:[#allocation154_spill] sm:$0xff] %v12612_v26  ;;  %8476 = vmatmul.msk.f32.gmra.mxu1 %vm4916_vm8, %v12612_v26  ;;  %8541 = vmatmul.msk.f32.gmra.mxu3 %vm4916_vm8, %v12617_v55  ;;  %v4645_v21 = vmax.f32 %v4591_v37, %v3866_v29  ;;  %v16353_v14 = vrot.slane %v12371_v47, 2  ;;  %v3867_v62 = vrot.slane %v12553_v33, 4  ;;  %v3717_v42 = vsel %vm3662_vm6, %v3714_v35, %v3716_v16 }
 0x4ba   : > { %16351 = vst [vmem:[#allocation158_spill] sm:$0xff] %v12617_v55  ;;  %v4399_v22 = vmax.f32 %v4249_v39, %v4314_v4  ;;  %v4016_v63 = vrot.slane %v12553_v33, 5  ;;  %v4165_v56 = vrot.slane %v12553_v33, 6  ;;  %8657 = vmatmul.msk.f32.gmra.mxu0 %vm4916_vm8, %v11927_v5  ;;  %v4315_v47 = vrot.slane %v12553_v33, 7  ;;  %v12655_v25 = vpop.f32.mrf.mxu1 }
 0x4bb   : > { %v3567_v58 = vsel %vm635_vm0, %v16353_v14, %v3566_v49  ;;  %v4697_v53 = vmax.f32 %v4645_v21, %v4015_v24  ;;  %v3868_v37 = vsel %vm1422_vm3, %v3865_v32, %v3867_v62  ;;  %16354 = vst [vmem:[#allocation165_spill] sm:$0xff] %v12638_v51  ;;  %v4487_v40 = vmax.f32 %v12406_v48, %v3419_v27 }
 0x4bc   : > { %v3651_v29 = vmax.f32 %v3501_v13, %v3567_v58  ;;  %v12641_v14 = vmax.f32 %v4399_v22, %v12604_v57  ;;  %v4017_v35 = vsel %vm1806_vm5, %v4014_v7, %v4016_v63  ;;  %v4166_v39 = vsel %vm2190_vm4, %v4163_v52, %v4165_v56  ;;  %v16355_v13 = vld [vmem:[#allocation5_spill] sm:$0xff]  ;;  %16358 = vst [vmem:[#allocation169_spill] sm:$0xff] %v12655_v25  ;;  %v16367_v25 = vld [vmem:[#allocation47_spill] sm:$0xff] }
 0x4bd   : > { %v4749_v26 = vmax.f32 %v4697_v53, %v4164_v54  ;;  %v4316_v24 = vsel %vm4261_vm7, %v4313_v45, %v4315_v47  ;;  %v3221_v21 = vadd.f32 %v3150_v17, %v2997_v1  ;;  %v2561_v32 = vadd.f32 %v16355_v13, %v2177_v41 }
 0x4be   : > { %v3801_v55 = vmax.f32 %v3651_v29, %v3717_v42  ;;  %v2998_v44 = vadd.f32 %v16356_v60, %v12536_v30  ;;  %v4540_v51 = vmax.f32 %v4487_v40, %v3567_v58  ;;  %v3420_v22 = vrot.slane %v12502_v0, 1 }
 0x4bf   : > { %v12651_v23 = vmax.f32 %v4749_v26, %v4314_v4  ;;  %v12653_v7 = vmax.f32 %v3269_v11, 0.0  ;;  %v3568_v48 = vrot.slane %v12502_v0, 2  ;;  %v3718_v45 = vrot.slane %v12502_v0, 3  ;;  %v12671_v11 = vpop.f32.mrf.mxu2  ;;  %v3153_v60 = vpop.f32.mrf.mxu0 }
 0x4c0   : > { %v3952_v52 = vmax.f32 %v3801_v55, %v3868_v37  ;;  %v4592_v54 = vmax.f32 %v4540_v51, %v3717_v42  ;;  %v3421_v1 = vsel %vm454_vm2, %v3418_v46, %v3420_v22  ;;  %v15690_v41 = vrot.slane %v12604_v57, 4  ;;  %16359 = vst [vmem:[#allocation172_spill] sm:$0xff] %v12671_v11  ;;  %v16366_v11 = vld [vmem:[#allocation85_spill] sm:$0xff] }
 0x4c1   : > { %16357 = vst [vmem:[#allocation167_spill] sm:$0xff] %v12651_v23  ;;  %8510 = vmatmul.msk.f32.gmra.mxu2 %vm4916_vm8, %v12651_v23  ;;  %v4892_v30 = vrot.slane %v12651_v23, 1  ;;  %v5312_v4 = vrot.slane %v12651_v23, 2  ;;  %v3270_v27 = vadd.f32 %v12460_v15, %v3221_v21  ;;  %v3502_v55 = vmax.f32 %v12444_v28, %v3421_v1 }
 0x4c2   : > { %v4101_v40 = vmax.f32 %v3952_v52, %v4017_v35  ;;  %v4646_v26 = vmax.f32 %v4592_v54, %v3868_v37  ;;  %v3569_v51 = vsel %vm635_vm0, %v3566_v49, %v3568_v48  ;;  %v3719_v46 = vsel %vm3662_vm6, %v3716_v16, %v3718_v45  ;;  %8658 = vmatmul.msk.f32.gmra.mxu0 %vm4916_vm8, %v11972_v59 }
 0x4c3   : > { %v16360_v17 = vrot.slane %v12591_v6, 1  ;;  %v16362_v42 = vrot.slane %v12591_v6, 2  ;;  %v3870_v49 = vsel %vm1422_vm3, %v3867_v62, %v15690_v41  ;;  %v3652_v29 = vmax.f32 %v3502_v55, %v3569_v51 }
 0x4c4   : > { %v4250_v28 = vmax.f32 %v4101_v40, %v4166_v39  ;;  %v4698_v16 = vmax.f32 %v4646_v26, %v4017_v35  ;;  %v4018_v37 = vrot.slane %v12604_v57, 5  ;;  %v4167_v21 = vrot.slane %v12604_v57, 6  ;;  %v16365_v35 = vld [vmem:[#allocation3_spill] sm:$0xff] }
 0x4c5   : > { %v12676_v58 = vsel %vm454_vm2, %v16360_v17, %v4892_v30  ;;  %v12681_v53 = vsel %vm635_vm0, %v16362_v42, %v5312_v4  ;;  %v4317_v52 = vrot.slane %v12604_v57, 7  ;;  %v4488_v54 = vmax.f32 %v12480_v43, %v3421_v1  ;;  %v12694_v17 = vpop.f32.mrf.mxu3 }
 0x4c6   : > { %16361 = vst [vmem:[#allocation175_spill] sm:$0xff] %v12676_v58  ;;  %8477 = vmatmul.msk.f32.gmra.mxu1 %vm4916_vm8, %v12676_v58  ;;  %8542 = vmatmul.msk.f32.gmra.mxu3 %vm4916_vm8, %v12681_v53  ;;  %v4400_v13 = vmax.f32 %v4250_v28, %v4316_v24  ;;  %v3222_v40 = vadd.f32 %v3153_v60, %v2998_v44  ;;  %v12708_v60 = vmax.f32 %v3270_v27, 0.0 }
 0x4c7   : > { %16363 = vst [vmem:[#allocation177_spill] sm:$0xff] %v12681_v53  ;;  %v4750_v62 = vmax.f32 %v4698_v16, %v4166_v39  ;;  %v3802_v42 = vmax.f32 %v3652_v29, %v3719_v46  ;;  %v4019_v41 = vsel %vm1806_vm5, %v4016_v63, %v4018_v37  ;;  %v4168_v58 = vsel %vm2190_vm4, %v4165_v56, %v4167_v21  ;;  %v12710_v56 = vpop.f32.mrf.mxu1  ;;  %v3156_v3 = vpop.f32.mrf.mxu0 }
 0x4c8   : > { %16364 = vst [vmem:[#allocation24_spill] sm:$0xff] %v12694_v17  ;;  %v2775_v26 = vadd.f32 %v16365_v35, %v2561_v32  ;;  %v12700_v55 = vmax.f32 %v4400_v13, %v12653_v7  ;;  %v4318_v28 = vsel %vm4261_vm7, %v4315_v47, %v4317_v52  ;;  %v4541_v53 = vmax.f32 %v4488_v54, %v3569_v51 }
 0x4c9   : > { %v2178_v43 = vadd.f32 %v16367_v25, %v16366_v11  ;;  %v12705_v44 = vmax.f32 %v4750_v62, %v4316_v24  ;;  %v3953_v1 = vmax.f32 %v3802_v42, %v3870_v49  ;;  %v3422_v39 = vrot.slane %v12553_v33, 1  ;;  %16369 = vst [vmem:[#allocation78_spill] sm:$0xff] %v12710_v56  ;;  %v16370_v11 = vld [vmem:[#allocation108_spill] sm:$0xff]  ;;  %v12733_v42 = vpop.f32.mrf.mxu2 }
 0x4ca   : > { %v4593_v63 = vmax.f32 %v4541_v53, %v3719_v46  ;;  %v3570_v32 = vrot.slane %v12553_v33, 2  ;;  %v15693_v16 = vrot.slane %v12553_v33, 3  ;;  %v3271_v51 = vadd.f32 %v12460_v15, %v3222_v40  ;;  %8659 = vmatmul.msk.f32.gmra.mxu0 %vm4916_vm8, %v16370_v11  ;;  %16373 = vst [vmem:[#allocation34_spill] sm:$0xff] %v12733_v42  ;;  %v16376_v42 = vld [vmem:[#allocation9_spill] sm:$0xff] }
 0x4cb   : > { %16368 = vst [vmem:[#allocation29_spill] sm:$0xff] %v12705_v44  ;;  %8511 = vmatmul.msk.f32.gmra.mxu2 %vm4916_vm8, %v12705_v44  ;;  %v4894_v47 = vrot.slane %v12705_v44, 1  ;;  %v5314_v25 = vrot.slane %v12705_v44, 2  ;;  %v4102_v24 = vmax.f32 %v3953_v1, %v4019_v41  ;;  %v3423_v46 = vsel %vm454_vm2, %v3420_v22, %v3422_v39 }
 0x4cc   : > { %v4647_v27 = vmax.f32 %v4593_v63, %v3870_v49  ;;  %v3571_v53 = vsel %vm635_vm0, %v3568_v48, %v3570_v32  ;;  %v3721_v29 = vsel %vm3662_vm6, %v3718_v45, %v15693_v16  ;;  %v3503_v40 = vmax.f32 %v12502_v0, %v3423_v46 }
 0x4cd   : > { %v12727_v13 = vsel %vm454_vm2, %v4892_v30, %v4894_v47  ;;  %v12730_v54 = vsel %vm635_vm0, %v5312_v4, %v5314_v25  ;;  %v4251_v62 = vmax.f32 %v4102_v24, %v4168_v58  ;;  %v3871_v48 = vrot.slane %v12653_v7, 4 }
 0x4ce   : > { %16371 = vst [vmem:[#allocation37_spill] sm:$0xff] %v12727_v13  ;;  %8478 = vmatmul.msk.f32.gmra.mxu1 %vm4916_vm8, %v12727_v13  ;;  %8543 = vmatmul.msk.f32.gmra.mxu3 %vm4916_vm8, %v12730_v54  ;;  %v4699_v22 = vmax.f32 %v4647_v27, %v4019_v41  ;;  %v4020_v45 = vrot.slane %v12653_v7, 5  ;;  %v4169_v30 = vrot.slane %v12653_v7, 6  ;;  %v3653_v49 = vmax.f32 %v3503_v40, %v3571_v53  ;;  %v12749_v27 = vpop.f32.mrf.mxu3 }
 0x4cf   : > { %16372 = vst [vmem:[#allocation18_spill] sm:$0xff] %v12730_v54  ;;  %v4401_v4 = vmax.f32 %v4251_v62, %v4318_v28  ;;  %v4319_v35 = vrot.slane %v12653_v7, 7  ;;  %v4489_v0 = vmax.f32 %v12539_v20, %v3423_v46  ;;  %v16374_v63 = vrot.slane %v12604_v57, 4  ;;  %v16378_v46 = vld [vmem:[#allocation46_spill] sm:$0xff] }
 0x4d0   : > { %v4751_v1 = vmax.f32 %v4699_v22, %v4168_v58  ;;  %v4021_v16 = vsel %vm1806_vm5, %v4018_v37, %v4020_v45  ;;  %v4170_v41 = vsel %vm2190_vm4, %v4167_v21, %v4169_v30  ;;  %16375 = vst [vmem:[#allocation67_spill] sm:$0xff] %v12749_v27  ;;  %v3803_v62 = vmax.f32 %v3653_v49, %v3721_v29  ;;  %v16377_v58 = vld [vmem:[#allocation88_spill] sm:$0xff]  ;;  %v16381_v21 = vld [vmem:[#allocation7_spill] sm:$0xff] }
 0x4d1   : > { %v3872_v24 = vsel %vm1422_vm3, %v16374_v63, %v3871_v48  ;;  %v12752_v13 = vmax.f32 %v4401_v4, %v12708_v60  ;;  %v4320_v40 = vsel %vm4261_vm7, %v4317_v52, %v4319_v35  ;;  %v4542_v54 = vmax.f32 %v4489_v0, %v3571_v53  ;;  %v12760_v63 = vpop.f32.mrf.mxu1  ;;  %v16382_v52 = vld [vmem:[#allocation114_spill] sm:$0xff] }
 0x4d2   : > { %v2562_v20 = vadd.f32 %v16376_v42, %v2178_v43  ;;  %v2179_v22 = vadd.f32 %v16378_v46, %v16377_v58  ;;  %v12758_v56 = vmax.f32 %v4751_v1, %v4318_v28  ;;  %16380 = vst [vmem:[#allocation43_spill] sm:$0xff] %v12760_v63  ;;  %v15697_v37 = vrot.slane %v12604_v57, 1  ;;  %8660 = vmatmul.msk.f32.gmra.mxu0 %vm4916_vm8, %v16382_v52 }
 0x4d3   : > { %v2999_v27 = vadd.f32 %v16381_v21, %v2775_v26  ;;  %v3954_v17 = vmax.f32 %v3803_v62, %v3872_v24  ;;  %v4594_v4 = vmax.f32 %v4542_v54, %v3721_v29  ;;  %v15696_v49 = vrot.slane %v12604_v57, 2  ;;  %v8588_v29 = vld [vmem:[%s15551_s3 + $0x20] sm:$0xff]  ;;  %v8555_v54 = vld [vmem:[%s15551_s3 + $0x18] sm:$0xff]  ;;  %v12786_v62 = vpop.f32.mrf.mxu2 }
 0x4d4   : > { %16379 = vst [vmem:[#allocation64_spill] sm:$0xff] %v12758_v56  ;;  %8512 = vmatmul.msk.f32.gmra.mxu2 %vm4916_vm8, %v12758_v56  ;;  %v4896_v28 = vrot.slane %v12758_v56, 1  ;;  %v5316_v43 = vrot.slane %v12758_v56, 2  ;;  %v12771_v53 = vmax.f32 %v3271_v51, 0.0  ;;  %v3425_v26 = vsel %vm454_vm2, %v3422_v39, %v15697_v37  ;;  %5694 = vmatpush.msrb.mxu1 %v8555_v54 }
 0x4d5   : > { %v4103_v42 = vmax.f32 %v3954_v17, %v4021_v16  ;;  %v4648_v0 = vmax.f32 %v4594_v4, %v3872_v24  ;;  %v3504_v1 = vmax.f32 %v12553_v33, %v3425_v26  ;;  %v3573_v51 = vsel %vm635_vm0, %v3570_v32, %v15696_v49  ;;  %16383 = vst [vmem:[#allocation73_spill] sm:$0xff] %v12786_v62 }
 0x4d6   : > { %5970 = vmatpush.msrb.mxu2 %v8588_v29  ;;  %v12789_v39 = vsel %vm454_vm2, %v4894_v47, %v4896_v28  ;;  %v12792_v58 = vsel %vm635_vm0, %v5314_v25, %v5316_v43  ;;  %v3223_v46 = vadd.f32 %v3156_v3, %v2999_v27  ;;  %v3722_v21 = vrot.slane %v12604_v57, 3  ;;  %v12806_v54 = vpop.f32.mrf.mxu3 }
 0x4d7   : > { %16384 = vst [vmem:[#allocation70_spill] sm:$0xff] %v12789_v39  ;;  %8479 = vmatmul.msk.f32.gmra.mxu1 %vm4916_vm8, %v12789_v39  ;;  %8544 = vmatmul.msk.f32.gmra.mxu3 %vm4916_vm8, %v12792_v58  ;;  %v4252_v17 = vmax.f32 %v4103_v42, %v4170_v41  ;;  %v4700_v32 = vmax.f32 %v4648_v0, %v4021_v16  ;;  %v3873_v4 = vrot.slane %v12708_v60, 4  ;;  %v16386_v47 = vrot.slane %v12553_v33, 3 }
 0x4d8   : > { %16385 = vst [vmem:[#allocation36_spill] sm:$0xff] %v12792_v58  ;;  %v3654_v24 = vmax.f32 %v3504_v1, %v3573_v51  ;;  %v4022_v3 = vrot.slane %v12708_v60, 5  ;;  %v4171_v27 = vrot.slane %v12708_v60, 6  ;;  %v4321_v29 = vrot.slane %v12708_v60, 7 }
 0x4d9   : > { %v3723_v25 = vsel %vm3662_vm6, %v16386_v47, %v3722_v21  ;;  %16387 = vst [vmem:[#allocation17_spill] sm:$0xff] %v12806_v54  ;;  %v4402_v49 = vmax.f32 %v4252_v17, %v4320_v40  ;;  %v4752_v37 = vmax.f32 %v4700_v32, %v4170_v41  ;;  %v3874_v16 = vsel %vm1422_vm3, %v3871_v48, %v3873_v4  ;;  %v12813_v47 = vpop.f32.mrf.mxu1  ;;  %v16390_v48 = vld [vmem:[#allocation6_spill] sm:$0xff]  ;;  %v16401_v54 = vld [vmem:[#allocation111_spill] sm:$0xff] }
 0x4da   : > { %v3804_v62 = vmax.f32 %v3654_v24, %v3723_v25  ;;  %v4023_v42 = vsel %vm1806_vm5, %v4020_v45, %v4022_v3  ;;  %v4172_v0 = vsel %vm2190_vm4, %v4169_v30, %v4171_v27  ;;  %v4322_v33 = vsel %vm4261_vm7, %v4319_v35, %v4321_v29  ;;  %16388 = vst [vmem:[#allocation39_spill] sm:$0xff] %v12813_v47  ;;  %v16391_v30 = vld [vmem:[#allocation12_spill] sm:$0xff]  ;;  %v16393_v24 = vld [vmem:[#allocation58_spill] sm:$0xff] }
 0x4db   : > { %v4490_v1 = vmax.f32 %v12589_v9, %v3425_v26  ;;  %v12816_v39 = vmax.f32 %v4402_v49, %v12771_v53  ;;  %v12818_v58 = vmax.f32 %v4752_v37, %v4320_v40  ;;  %v3272_v41 = vadd.f32 %v12460_v15, %v3223_v46  ;;  %8661 = vmatmul.msk.f32.gmra.mxu0 %vm4916_vm8, %v12133_v36  ;;  %v16392_v26 = vld [vmem:[#allocation91_spill] sm:$0xff] }
 0x4dc   : > { %v3955_v17 = vmax.f32 %v3804_v62, %v3874_v16  ;;  %v2776_v45 = vadd.f32 %v16390_v48, %v2562_v20  ;;  %v2563_v32 = vadd.f32 %v16391_v30, %v2179_v22  ;;  %v3426_v9 = vrot.slane %v12653_v7, 1  ;;  %v12832_v62 = vpop.f32.mrf.mxu2  ;;  %v3159_v20 = vpop.f32.mrf.mxu0 }
 0x4dd   : > { %16389 = vst [vmem:[#allocation76_spill] sm:$0xff] %v12818_v58  ;;  %v4543_v35 = vmax.f32 %v4490_v1, %v3573_v51  ;;  %v2180_v47 = vadd.f32 %v16393_v24, %v16392_v26  ;;  %8513 = vmatmul.msk.f32.gmra.mxu2 %vm4916_vm8, %v12818_v58  ;;  %v15700_v40 = vrot.slane %v12818_v58, 1  ;;  %v15701_v37 = vrot.slane %v12818_v58, 2 }
 0x4de   : > { %v4104_v49 = vmax.f32 %v3955_v17, %v4023_v42  ;;  %16394 = vst [vmem:[#allocation48_spill] sm:$0xff] %v12832_v62  ;;  %v16395_v22 = vrot.slane %v12604_v57, 1  ;;  %v3574_v1 = vrot.slane %v12653_v7, 2  ;;  %v3724_v48 = vrot.slane %v12653_v7, 3 }
 0x4df   : > { %v4595_v46 = vmax.f32 %v4543_v35, %v3723_v25  ;;  %v12842_v30 = vsel %vm454_vm2, %v4896_v28, %v15700_v40  ;;  %v12847_v17 = vsel %vm635_vm0, %v5316_v43, %v15701_v37  ;;  %v12849_v25 = vmax.f32 %v3272_v41, 0.0  ;;  %v12860_v43 = vpop.f32.mrf.mxu3 }
 0x4e0   : > { %v3427_v51 = vsel %vm454_vm2, %v16395_v22, %v3426_v9  ;;  %16396 = vst [vmem:[#allocation81_spill] sm:$0xff] %v12842_v30  ;;  %v4253_v35 = vmax.f32 %v4104_v49, %v4172_v0  ;;  %8480 = vmatmul.msk.f32.gmra.mxu1 %vm4916_vm8, %v12842_v30  ;;  %8545 = vmatmul.msk.f32.gmra.mxu3 %vm4916_vm8, %v12847_v17  ;;  %v16398_v28 = vrot.slane %v12604_v57, 2  ;;  %v3875_v40 = vrot.slane %v12771_v53, 4 }
 0x4e1   : > { %16397 = vst [vmem:[#allocation28_spill] sm:$0xff] %v12847_v17  ;;  %v4649_v26 = vmax.f32 %v4595_v46, %v3874_v16  ;;  %v3505_v24 = vmax.f32 %v12604_v57, %v3427_v51  ;;  %v3725_v49 = vsel %vm3662_vm6, %v3722_v21, %v3724_v48  ;;  %v4024_v37 = vrot.slane %v12771_v53, 5  ;;  %v12873_v21 = vpop.f32.mrf.mxu1 }
 0x4e2   : > { %v3575_v22 = vsel %vm635_vm0, %v16398_v28, %v3574_v1  ;;  %16399 = vst [vmem:[#allocation44_spill] sm:$0xff] %v12860_v43  ;;  %v4403_v41 = vmax.f32 %v4253_v35, %v4322_v33  ;;  %v4173_v62 = vrot.slane %v12771_v53, 6  ;;  %v3876_v16 = vsel %vm1422_vm3, %v3873_v4, %v3875_v40 }
 0x4e3   : > { %v4701_v30 = vmax.f32 %v4649_v26, %v4023_v42  ;;  %v3655_v17 = vmax.f32 %v3505_v24, %v3575_v22  ;;  %v4323_v46 = vrot.slane %v12771_v53, 7  ;;  %v4025_v28 = vsel %vm1806_vm5, %v4022_v3, %v4024_v37  ;;  %16400 = vst [vmem:[#allocation69_spill] sm:$0xff] %v12873_v21  ;;  %8662 = vmatmul.msk.f32.gmra.mxu0 %vm4916_vm8, %v16401_v54  ;;  %v16402_v42 = vld [vmem:[#allocation10_spill] sm:$0xff] }
 0x4e4   : > { %v12868_v57 = vmax.f32 %v4403_v41, %v12849_v25  ;;  %v4174_v43 = vsel %vm2190_vm4, %v4171_v27, %v4173_v62  ;;  %v4491_v35 = vmax.f32 %v12641_v14, %v3427_v51  ;;  %v2777_v26 = vadd.f32 %v16402_v42, %v2563_v32  ;;  %v16403_v41 = vld [vmem:[#allocation125_spill] sm:$0xff]  ;;  %v16405_v14 = vld [vmem:[#allocation94_spill] sm:$0xff]  ;;  %v12888_v32 = vpop.f32.mrf.mxu2 }
 0x4e5   : > { %v4753_v24 = vmax.f32 %v4701_v30, %v4172_v0  ;;  %v3805_v4 = vmax.f32 %v3655_v17, %v3725_v49  ;;  %v12879_v63 = vsel %vm4261_vm7, %v4321_v29, %v4323_v46  ;;  %v2564_v8 = vadd.f32 %v16403_v41, %v2180_v47  ;;  %16407 = vst [vmem:[#allocation42_spill] sm:$0xff] %v12888_v32  ;;  %v16431_v32 = vld [vmem:[#allocation150_spill] sm:$0xff] }
 0x4e6   : > { %v3000_v3 = vadd.f32 %v16404_v31, %v2776_v45  ;;  %v4544_v61 = vmax.f32 %v4491_v35, %v3575_v22  ;;  %v15712_v27 = vrot.slane %v12708_v60, 1  ;;  %v3001_v51 = vadd.f32 %v16405_v14, %v2777_v26  ;;  %v3162_v22 = vpop.f32.mrf.mxu0 }
 0x4e7   : > { %v12885_v21 = vmax.f32 %v4753_v24, %v4322_v33  ;;  %v3956_v36 = vmax.f32 %v3805_v4, %v3876_v16  ;;  %v15708_v54 = vrot.slane %v12708_v60, 2  ;;  %v15707_v47 = vrot.slane %v12708_v60, 3  ;;  %v12906_v42 = vpop.f32.mrf.mxu3 }
 0x4e8   : > { %v4596_v0 = vmax.f32 %v4544_v61, %v3725_v49  ;;  %v3429_v29 = vsel %vm454_vm2, %v3426_v9, %v15712_v27  ;;  %v15706_v31 = vrot.slane %v12849_v25, 4  ;;  %v3224_v30 = vadd.f32 %v3159_v20, %v3000_v3  ;;  %16408 = vst [vmem:[#allocation16_spill] sm:$0xff] %v12906_v42 }
 0x4e9   : > { %16406 = vst [vmem:[#allocation49_spill] sm:$0xff] %v12885_v21  ;;  %8514 = vmatmul.msk.f32.gmra.mxu2 %vm4916_vm8, %v12885_v21  ;;  %v4900_v33 = vrot.slane %v12885_v21, 1  ;;  %v5320_v45 = vrot.slane %v12885_v21, 2  ;;  %v4105_v17 = vmax.f32 %v3956_v36, %v4025_v28  ;;  %v3506_v61 = vmax.f32 %v12653_v7, %v3429_v29 }
 0x4ea   : > { %v4650_v35 = vmax.f32 %v4596_v0, %v3876_v16  ;;  %v3577_v9 = vsel %vm635_vm0, %v3574_v1, %v15708_v54  ;;  %v3727_v49 = vsel %vm3662_vm6, %v3724_v48, %v15707_v47  ;;  %v16409_v26 = vrot.slane %v12818_v58, 1  ;;  %v16418_v47 = vld [vmem:[#allocation87_spill] sm:$0xff] }
 0x4eb   : > { %v16411_v36 = vrot.slane %v12818_v58, 2  ;;  %v12918_v7 = vmax.f32 %v4105_v17, %v4174_v43  ;;  %v3878_v1 = vsel %vm1422_vm3, %v3875_v40, %v15706_v31  ;;  %v3656_v16 = vmax.f32 %v3506_v61, %v3577_v9  ;;  %v12934_v17 = vpop.f32.mrf.mxu1  ;;  %8663 = vmatmul.msk.f32.gmra.mxu0 %vm4916_vm8, %v12234_v10 }
 0x4ec   : > { %v12911_v24 = vsel %vm454_vm2, %v16409_v26, %v4900_v33  ;;  %v4702_v48 = vmax.f32 %v4650_v35, %v4025_v28  ;;  %v15709_v4 = vrot.slane %v12849_v25, 5  ;;  %v15710_v41 = vrot.slane %v12849_v25, 6  ;;  %16413 = vst [vmem:[#allocation59_spill] sm:$0xff] %v12934_v17  ;;  %v16414_v26 = vld [vmem:[#allocation79_spill] sm:$0xff] }
 0x4ed   : > { %16410 = vst [vmem:[#allocation54_spill] sm:$0xff] %v12911_v24  ;;  %v12916_v20 = vsel %vm635_vm0, %v16411_v36, %v5320_v45  ;;  %8481 = vmatmul.msk.f32.gmra.mxu1 %vm4916_vm8, %v12911_v24  ;;  %v3273_v3 = vadd.f32 %v12460_v15, %v3224_v30  ;;  %v15711_v0 = vrot.slane %v12849_v25, 7  ;;  %v4492_v40 = vmax.f32 %v12700_v55, %v3429_v29  ;;  %v16415_v36 = vld [vmem:[#allocation178_spill] sm:$0xff] }
 0x4ee   : > { %16412 = vst [vmem:[#allocation63_spill] sm:$0xff] %v12916_v20  ;;  %8546 = vmatmul.msk.f32.gmra.mxu3 %vm4916_vm8, %v12916_v20  ;;  %v4754_v28 = vmax.f32 %v4702_v48, %v4174_v43  ;;  %v3806_v35 = vmax.f32 %v3656_v16, %v3727_v49  ;;  %v4027_v61 = vsel %vm1806_vm5, %v4024_v37, %v15709_v4  ;;  %v16416_v43 = vld [vmem:[#allocation13_spill] sm:$0xff]  ;;  %v16417_v16 = vld [vmem:[#allocation120_spill] sm:$0xff]  ;;  %v16447_v20 = vld [vmem:[#allocation110_spill] sm:$0xff] }
 0x4ef   : > { %v4176_v30 = vsel %vm2190_vm4, %v4173_v62, %v15710_v41  ;;  %v1798_v14 = vadd.f32 %v16415_v36, %v16414_v26  ;;  %v3225_v31 = vadd.f32 %v3162_v22, %v3001_v51  ;;  %v12949_v55 = vsel %vm4261_vm7, %v4323_v46, %v15711_v0  ;;  %v12957_v62 = vpop.f32.mrf.mxu2  ;;  %v16422_v26 = vld [vmem:[#allocation130_spill] sm:$0xff] }
 0x4f0   : > { %v4545_v29 = vmax.f32 %v4492_v40, %v3577_v9  ;;  %v2778_v48 = vadd.f32 %v16416_v43, %v2564_v8  ;;  %v2181_v54 = vadd.f32 %v16418_v47, %v16417_v16  ;;  %v12955_v37 = vmax.f32 %v4754_v28, %v12879_v63  ;;  %16420 = vst [vmem:[#allocation62_spill] sm:$0xff] %v12957_v62  ;;  %v16421_v28 = vld [vmem:[#allocation52_spill] sm:$0xff]  ;;  %v12971_v43 = vpop.f32.mrf.mxu3 }
 0x4f1   : > { %v3957_v4 = vmax.f32 %v3806_v35, %v3878_v1  ;;  %v12959_v41 = vmax.f32 %v3273_v3, 0.0  ;;  %v3430_v22 = vrot.slane %v12771_v53, 1  ;;  %v3578_v46 = vrot.slane %v12771_v53, 2  ;;  %16423 = vst [vmem:[#allocation21_spill] sm:$0xff] %v12971_v43 }
 0x4f2   : > { %16419 = vst [vmem:[#allocation22_spill] sm:$0xff] %v12955_v37  ;;  %v4597_v51 = vmax.f32 %v4545_v29, %v3727_v49  ;;  %8515 = vmatmul.msk.f32.gmra.mxu2 %vm4916_vm8, %v12955_v37  ;;  %v4902_v8 = vrot.slane %v12955_v37, 1  ;;  %v5322_v47 = vrot.slane %v12955_v37, 2  ;;  %v3728_v40 = vrot.slane %v12771_v53, 3  ;;  %v3165_v29 = vpop.f32.mrf.mxu0 }
 0x4f3   : > { %v4106_v9 = vmax.f32 %v3957_v4, %v4027_v61  ;;  %v2182_v35 = vadd.f32 %v16421_v28, %v1798_v14  ;;  %v3002_v3 = vadd.f32 %v16422_v26, %v2778_v48  ;;  %v3274_v49 = vadd.f32 %v12460_v15, %v3225_v31  ;;  %8664 = vmatmul.msk.f32.gmra.mxu0 %vm4916_vm8, %v12298_v34 }
 0x4f4   : > { %v4651_v36 = vmax.f32 %v4597_v51, %v3878_v1  ;;  %v12974_v16 = vsel %vm454_vm2, %v4900_v33, %v4902_v8  ;;  %v12977_v0 = vsel %vm635_vm0, %v5320_v45, %v5322_v47  ;;  %v16426_v4 = vrot.slane %v12708_v60, 1 }
 0x4f5   : > { %16424 = vst [vmem:[#allocation65_spill] sm:$0xff] %v12974_v16  ;;  %v12979_v27 = vmax.f32 %v4106_v9, %v4176_v30  ;;  %8482 = vmatmul.msk.f32.gmra.mxu1 %vm4916_vm8, %v12974_v16  ;;  %v16427_v33 = vrot.slane %v12708_v60, 2  ;;  %v3879_v48 = vrot.slane %v12959_v41, 4  ;;  %v3226_v9 = vadd.f32 %v3165_v29, %v3002_v3 }
 0x4f6   : > { %16425 = vst [vmem:[#allocation33_spill] sm:$0xff] %v12977_v0  ;;  %v3431_v14 = vsel %vm454_vm2, %v16426_v4, %v3430_v22  ;;  %8547 = vmatmul.msk.f32.gmra.mxu3 %vm4916_vm8, %v12977_v0  ;;  %v4703_v31 = vmax.f32 %v4651_v36, %v4027_v61  ;;  %v16428_v28 = vrot.slane %v12708_v60, 3  ;;  %v12998_v4 = vpop.f32.mrf.mxu1  ;;  %v4028_v62 = vrot.slane %v12959_v41, 5 }
 0x4f7   : > { %v3507_v1 = vmax.f32 %v12708_v60, %v3431_v14  ;;  %v3579_v45 = vsel %vm635_vm0, %v16427_v33, %v3578_v46  ;;  %16429 = vst [vmem:[#allocation68_spill] sm:$0xff] %v12998_v4  ;;  %v16430_v33 = vld [vmem:[#allocation101_spill] sm:$0xff]  ;;  %v2566_v17 = vadd.f32 %v16431_v32, %v2182_v35  ;;  %v16432_v51 = vrot.slane %v12849_v25, 4 }
 0x4f8   : > { %v3729_v26 = vsel %vm3662_vm6, %v16428_v28, %v3728_v40  ;;  %v4755_v61 = vmax.f32 %v4703_v31, %v4176_v30  ;;  %v2565_v43 = vadd.f32 %v16430_v33, %v2181_v54  ;;  %v4493_v60 = vmax.f32 %v12752_v13, %v3431_v14  ;;  %v13015_v31 = vpop.f32.mrf.mxu2  ;;  %v13030_v33 = vpop.f32.mrf.mxu3 }
 0x4f9   : > { %v3657_v36 = vmax.f32 %v3507_v1, %v3579_v45  ;;  %v3880_v3 = vsel %vm1422_vm3, %v16432_v51, %v3879_v48  ;;  %v13009_v29 = vmax.f32 %v3274_v49, 0.0  ;;  %v4177_v30 = vrot.slane %v12959_v41, 6  ;;  %16434 = vst [vmem:[#allocation71_spill] sm:$0xff] %v13015_v31 }
 0x4fa   : > { %v13012_v28 = vmax.f32 %v4755_v61, %v12949_v55  ;;  %v3275_v54 = vadd.f32 %v12460_v15, %v3226_v9  ;;  %v4546_v35 = vmax.f32 %v4493_v60, %v3579_v45  ;;  %v3432_v1 = vrot.slane %v12849_v25, 1  ;;  %16436 = vst [vmem:[#allocation27_spill] sm:$0xff] %v13030_v33 }
 0x4fb   : > { %v3807_v4 = vmax.f32 %v3657_v36, %v3729_v26  ;;  %v16435_v51 = vrot.slane %v12849_v25, 5  ;;  %v15713_v9 = vrot.slane %v12849_v25, 2  ;;  %v16439_v31 = vrot.slane %v12849_v25, 6  ;;  %8665 = vmatmul.msk.f32.gmra.mxu0 %vm4916_vm8, %v12362_v2 }
 0x4fc   : > { %16433 = vst [vmem:[#allocation72_spill] sm:$0xff] %v13012_v28  ;;  %8516 = vmatmul.msk.f32.gmra.mxu2 %vm4916_vm8, %v13012_v28  ;;  %v4904_v13 = vrot.slane %v13012_v28, 1  ;;  %v5324_v49 = vrot.slane %v13012_v28, 2  ;;  %v4598_v36 = vmax.f32 %v4546_v35, %v3729_v26  ;;  %v3433_v15 = vsel %vm454_vm2, %v3430_v22, %v3432_v1  ;;  %v16440_v35 = vld [vmem:[#allocation99_spill] sm:$0xff] }
 0x4fd   : > { %v3958_v14 = vmax.f32 %v3807_v4, %v3880_v3  ;;  %v4029_v61 = vsel %vm1806_vm5, %v16435_v51, %v4028_v62  ;;  %v4178_v51 = vsel %vm2190_vm4, %v16439_v31, %v4177_v30  ;;  %v3508_v26 = vmax.f32 %v12771_v53, %v3433_v15 }
 0x4fe   : > { %v13033_v60 = vsel %vm454_vm2, %v4902_v8, %v4904_v13  ;;  %v13036_v32 = vsel %vm635_vm0, %v5322_v47, %v5324_v49  ;;  %v4652_v22 = vmax.f32 %v4598_v36, %v3880_v3  ;;  %v3581_v8 = vsel %vm635_vm0, %v3578_v46, %v15713_v9  ;;  %v16442_v3 = vld [vmem:[#allocation141_spill] sm:$0xff] }
 0x4ff   : > { %16437 = vst [vmem:[#allocation74_spill] sm:$0xff] %v13033_v60  ;;  %v4107_v4 = vmax.f32 %v3958_v14, %v4029_v61  ;;  %8483 = vmatmul.msk.f32.gmra.mxu1 %vm4916_vm8, %v13033_v60  ;;  %8548 = vmatmul.msk.f32.gmra.mxu3 %vm4916_vm8, %v13036_v32  ;;  %v3881_v47 = vrot.slane %v13009_v29, 4  ;;  %v2779_v14 = vadd.f32 %v16440_v35, %v2565_v43  ;;  %v13051_v45 = vmax.f32 %v3275_v54, 0.0  ;;  %v3168_v43 = vpop.f32.mrf.mxu0  ;;  %v13064_v35 = vpop.f32.mrf.mxu1 }
 0x500   : > { %16438 = vst [vmem:[#allocation26_spill] sm:$0xff] %v13036_v32  ;;  %v16441_v33 = vrot.slane %v12849_v25, 3  ;;  %v2780_v53 = vadd.f32 %v16442_v3, %v2566_v17  ;;  %v16443_v36 = vrot.slane %v12959_v41, 7  ;;  %v16444_v46 = vrot.slane %v12849_v25, 7  ;;  %v16446_v32 = vld [vmem:[#allocation105_spill] sm:$0xff] }
 0x501   : > { %v4256_v31 = vmax.f32 %v4107_v4, %v4178_v51  ;;  %v4704_v60 = vmax.f32 %v4652_v22, %v4029_v61  ;;  %v3658_v54 = vmax.f32 %v3508_v26, %v3581_v8  ;;  %16445 = vst [vmem:[#allocation77_spill] sm:$0xff] %v13064_v35  ;;  %v3882_v16 = vsel %vm1422_vm3, %v3879_v48, %v3881_v47  ;;  %v13075_v26 = vpop.f32.mrf.mxu2  ;;  %v8621_v35 = vld [vmem:[%s15551_s3 + $0x28] sm:$0xff] }
 0x502   : > { %v3731_v42 = vsel %vm3662_vm6, %v3728_v40, %v16441_v33  ;;  %v4328_v9 = vsel %vm4261_vm7, %v16444_v46, %v16443_v36  ;;  %v4030_v40 = vrot.slane %v13009_v29, 5  ;;  %v4494_v33 = vmax.f32 %v12816_v39, %v3433_v15  ;;  %16448 = vst [vmem:[#allocation38_spill] sm:$0xff] %v13075_v26  ;;  %6246 = vmatpush.msrb.mxu3 %v8621_v35 }
 0x503   : > { %v4406_v4 = vmax.f32 %v4256_v31, %v4328_v9  ;;  %v3003_v17 = vadd.f32 %v16446_v32, %v2779_v14  ;;  %v4756_v3 = vmax.f32 %v4704_v60, %v4178_v51  ;;  %v3808_v24 = vmax.f32 %v3658_v54, %v3731_v42  ;;  %v13092_v14 = vpop.f32.mrf.mxu3  ;;  %8666 = vmatmul.msk.f32.gmra.mxu0 %vm4916_vm8, %v12430_v19 }
 0x504   : > { %v15722_v0 = vrot.slane %v13009_v29, 6  ;;  %v3004_v36 = vadd.f32 %v16447_v20, %v2780_v53  ;;  %v4547_v22 = vmax.f32 %v4494_v33, %v3581_v8  ;;  %v3434_v39 = vrot.slane %v12959_v41, 1  ;;  %16450 = vst [vmem:[#allocation75_spill] sm:$0xff] %v13092_v14 }
 0x505   : > { %v13073_v61 = vmax.f32 %v4406_v4, %v13051_v45  ;;  %v13077_v31 = vmax.f32 %v4756_v3, %v4328_v9  ;;  %v3227_v48 = vadd.f32 %v3168_v43, %v3003_v17  ;;  %v3959_v46 = vmax.f32 %v3808_v24, %v3882_v16  ;;  %v13127_v3 = vld [vmem:[%s15550_s2] ss:$0 sm:$0xff] }
 0x506   : > { %v4031_v32 = vsel %vm1806_vm5, %v4028_v62, %v4030_v40  ;;  %v15721_v15 = vrot.slane %v13009_v29, 7  ;;  %v4599_v60 = vmax.f32 %v4547_v22, %v3731_v42  ;;  %v15720_v20 = vrot.slane %v12959_v41, 2 }
 0x507   : > { %16449 = vst [vmem:[#allocation80_spill] sm:$0xff] %v13077_v31  ;;  %8517 = vmatmul.msk.f32.gmra.mxu2 %vm4916_vm8, %v13077_v31  ;;  %v4906_v51 = vrot.slane %v13077_v31, 1  ;;  %v5326_v9 = vrot.slane %v13077_v31, 2  ;;  %v4108_v8 = vmax.f32 %v3959_v46, %v4031_v32  ;;  %v4180_v24 = vsel %vm2190_vm4, %v4177_v30, %v15722_v0 }
 0x508   : > { %v4653_v62 = vmax.f32 %v4599_v60, %v3882_v16  ;;  %v3435_v53 = vsel %vm454_vm2, %v3432_v1, %v3434_v39  ;;  %v15726_v42 = vrot.slane %v12959_v41, 3  ;;  %v15723_v43 = vrot.slane %v13051_v45, 4  ;;  %v3171_v60 = vpop.f32.mrf.mxu0 }
 0x509   : > { %v13100_v54 = vsel %vm454_vm2, %v4904_v13, %v4906_v51  ;;  %v13103_v4 = vsel %vm635_vm0, %v5324_v49, %v5326_v9  ;;  %v13105_v33 = vmax.f32 %v4108_v8, %v4180_v24  ;;  %v3509_v30 = vmax.f32 %v12849_v25, %v3435_v53 }
 0x50a   : > { %16451 = vst [vmem:[#allocation83_spill] sm:$0xff] %v13100_v54  ;;  %8484 = vmatmul.msk.f32.gmra.mxu1 %vm4916_vm8, %v13100_v54  ;;  %8549 = vmatmul.msk.f32.gmra.mxu3 %vm4916_vm8, %v13103_v4  ;;  %v16453_v16 = vrot.slane %v12959_v41, 7  ;;  %v4705_v13 = vmax.f32 %v4653_v62, %v4031_v32  ;;  %v16454_v49 = vrot.slane %v12849_v25, 2  ;;  %v3276_v22 = vadd.f32 %v13127_v3, %v3227_v48  ;;  %v13133_v62 = vpop.f32.mrf.mxu1 }
 0x50b   : > { %16452 = vst [vmem:[#allocation32_spill] sm:$0xff] %v13103_v4  ;;  %v4495_v32 = vmax.f32 %v12868_v57, %v3435_v53  ;;  %v3884_v48 = vsel %vm1422_vm3, %v3881_v47, %v15723_v43  ;;  %v16457_v57 = vmax.f32 %v12918_v7, %v12879_v63  ;;  %8667 = vmatmul.msk.f32.gmra.mxu0 %vm4916_vm8, %v12490_v12 }
 0x50c   : > { %v13117_v1 = vsel %vm4261_vm7, %v16453_v16, %v15721_v15  ;;  %v3583_v17 = vsel %vm635_vm0, %v16454_v49, %v15720_v20  ;;  %16455 = vst [vmem:[#allocation86_spill] sm:$0xff] %v13133_v62  ;;  %v4757_v16 = vmax.f32 %v4705_v13, %v4180_v24  ;;  %v16456_v49 = vrot.slane %v12849_v25, 3  ;;  %v13152_v13 = vpop.f32.mrf.mxu2 }
 0x50d   : > { %v3659_v8 = vmax.f32 %v3509_v30, %v3583_v17  ;;  %v15725_v15 = vrot.slane %v13051_v45, 5  ;;  %v4548_v0 = vmax.f32 %v4495_v32, %v3583_v17  ;;  %v4441_v53 = vmax.f32 %v16457_v57, %v12959_v41  ;;  %16459 = vst [vmem:[#allocation89_spill] sm:$0xff] %v13152_v13 }
 0x50e   : > { %v3733_v20 = vsel %vm3662_vm6, %v16456_v49, %v15726_v42  ;;  %v13149_v24 = vmax.f32 %v4757_v16, %v13117_v1  ;;  %v3228_v30 = vadd.f32 %v3171_v60, %v3004_v36  ;;  %v15724_v25 = vrot.slane %v13051_v45, 6  ;;  %v13176_v60 = vpop.f32.mrf.mxu3 }
 0x50f   : > { %v3809_v46 = vmax.f32 %v3659_v8, %v3733_v20  ;;  %v13154_v49 = vmax.f32 %v3276_v22, 0.0  ;;  %v4600_v43 = vmax.f32 %v4548_v0, %v3733_v20  ;;  %v13157_v8 = vrot.slane %v13009_v29, 1  ;;  %16460 = vst [vmem:[#allocation92_spill] sm:$0xff] %v13176_v60 }
 0x510   : > { %16458 = vst [vmem:[#allocation31_spill] sm:$0xff] %v13149_v24  ;;  %8518 = vmatmul.msk.f32.gmra.mxu2 %vm4916_vm8, %v13149_v24  ;;  %v4908_v63 = vrot.slane %v13149_v24, 1  ;;  %v5328_v7 = vrot.slane %v13149_v24, 2  ;;  %v4033_v36 = vsel %vm1806_vm5, %v4030_v40, %v15725_v15  ;;  %v4331_v17 = vrot.slane %v13051_v45, 7 }
 0x511   : > { %v3960_v47 = vmax.f32 %v3809_v46, %v3884_v48  ;;  %v4654_v20 = vmax.f32 %v4600_v43, %v3884_v48  ;;  %v13173_v22 = vsel %vm454_vm2, %v3434_v39, %v13157_v8  ;;  %v3584_v46 = vrot.slane %v13009_v29, 2 }
 0x512   : > { %v13179_v32 = vsel %vm454_vm2, %v4906_v51, %v4908_v63  ;;  %v13182_v40 = vsel %vm635_vm0, %v5326_v9, %v5328_v7  ;;  %v3277_v16 = vadd.f32 %v13127_v3, %v3228_v30  ;;  %v16463_v43 = vrot.slane %v13009_v29, 6 }
 0x513   : > { %v4109_v0 = vmax.f32 %v3960_v47, %v4033_v36  ;;  %16461 = vst [vmem:[#allocation96_spill] sm:$0xff] %v13179_v32  ;;  %8485 = vmatmul.msk.f32.gmra.mxu1 %vm4916_vm8, %v13179_v32  ;;  %8550 = vmatmul.msk.f32.gmra.mxu3 %vm4916_vm8, %v13182_v40  ;;  %v4706_v51 = vmax.f32 %v4654_v20, %v4033_v36  ;;  %v3734_v9 = vrot.slane %v13009_v29, 3  ;;  %v3885_v57 = vrot.slane %v13154_v49, 4 }
 0x514   : > { %16462 = vst [vmem:[#allocation95_spill] sm:$0xff] %v13182_v40  ;;  %v4182_v48 = vsel %vm2190_vm4, %v16463_v43, %v15724_v25  ;;  %v16464_v30 = vrot.slane %v13009_v29, 7  ;;  %v4496_v43 = vmax.f32 %v4441_v53, %v13173_v22  ;;  %v13204_v25 = vpop.f32.mrf.mxu1  ;;  %v13214_v60 = vmax.f32 %v3277_v16, 0.0  ;;  %v13231_v15 = vpop.f32.mrf.mxu2  ;;  %8668 = vmatmul.msk.f32.gmra.mxu0 %vm4916_vm8, %v12541_v38 }
 0x515   : > { %v13194_v39 = vmax.f32 %v4109_v0, %v4182_v48  ;;  %16465 = vst [vmem:[#allocation41_spill] sm:$0xff] %v13204_v25  ;;  %v4758_v42 = vmax.f32 %v4706_v51, %v4182_v48  ;;  %v16466_v0 = vrot.slane %v12959_v41, 2  ;;  %v16467_v53 = vrot.slane %v12959_v41, 3 }
 0x516   : > { %v13201_v47 = vsel %vm4261_vm7, %v16464_v30, %v4331_v17  ;;  %v16468_v48 = vrot.slane %v13051_v45, 4  ;;  %16469 = vst [vmem:[#allocation53_spill] sm:$0xff] %v13231_v15  ;;  %v4183_v20 = vrot.slane %v13154_v49, 6  ;;  %v16470_v16 = vmax.f32 %v12979_v27, %v12949_v55  ;;  %v13253_v14 = vpop.f32.mrf.mxu3 }
 0x517   : > { %v13211_v36 = vsel %vm635_vm0, %v16466_v0, %v3584_v46  ;;  %v13218_v13 = vmax.f32 %v4758_v42, %v13201_v47  ;;  %v13223_v25 = vsel %vm3662_vm6, %v16467_v53, %v3734_v9  ;;  %v4034_v0 = vrot.slane %v13154_v49, 5  ;;  %16472 = vst [vmem:[#allocation124_spill] sm:$0xff] %v13253_v14 }
 0x518   : > { %v4549_v30 = vmax.f32 %v4496_v43, %v13211_v36  ;;  %v13228_v51 = vsel %vm1422_vm3, %v16468_v48, %v3885_v57  ;;  %v4442_v26 = vmax.f32 %v16470_v16, %v13009_v29  ;;  %v16471_v42 = vrot.slane %v13051_v45, 1 }
 0x519   : > { %8519 = vmatmul.msk.f32.gmra.mxu2 %vm4916_vm8, %v13218_v13  ;;  %v4910_v53 = vrot.slane %v13218_v13, 1  ;;  %v5330_v48 = vrot.slane %v13218_v13, 2  ;;  %v16475_v55 = vrot.slane %v13051_v45, 5 }
 0x51a   : > { %v4601_v43 = vmax.f32 %v4549_v30, %v13223_v25  ;;  %v4333_v30 = vrot.slane %v13154_v49, 7  ;;  %v4451_v15 = vsel %vm454_vm2, %v13157_v8, %v16471_v42 }
 0x51b   : > { %v13259_v32 = vsel %vm454_vm2, %v4908_v63, %v4910_v53  ;;  %v13262_v27 = vsel %vm635_vm0, %v5328_v7, %v5330_v48  ;;  %v13267_v16 = vsel %vm1806_vm5, %v16475_v55, %v4034_v0  ;;  %v4497_v42 = vmax.f32 %v4442_v26, %v4451_v15 }
 0x51c   : > { %v4655_v62 = vmax.f32 %v4601_v43, %v13228_v51  ;;  %16473 = vst [vmem:[#allocation129_spill] sm:$0xff] %v13259_v32  ;;  %8486 = vmatmul.msk.f32.gmra.mxu1 %vm4916_vm8, %v13259_v32  ;;  %8551 = vmatmul.msk.f32.gmra.mxu3 %vm4916_vm8, %v13262_v27  ;;  %v16476_v7 = vrot.slane %v13051_v45, 6  ;;  %v16477_v55 = vrot.slane %v13051_v45, 2  ;;  %v13285_v35 = vpop.f32.mrf.mxu1  ;;  %v16479_v26 = vrot.slane %v13051_v45, 3 }
 0x51d   : > { %16474 = vst [vmem:[#allocation82_spill] sm:$0xff] %v13262_v27  ;;  %v13290_v27 = vsel %vm4261_vm7, %v4331_v17, %v4333_v30  ;;  %8669 = vmatmul.msk.f32.gmra.mxu0 %vm4916_vm8, %v12591_v6 }
 0x51e   : > { %v4707_v63 = vmax.f32 %v4655_v62, %v13267_v16  ;;  %v13278_v14 = vsel %vm2190_vm4, %v16476_v7, %v4183_v20  ;;  %v13283_v54 = vsel %vm635_vm0, %v3584_v46, %v16477_v55  ;;  %16478 = vst [vmem:[#allocation84_spill] sm:$0xff] %v13285_v35  ;;  %v13295_v15 = vsel %vm3662_vm6, %v3734_v9, %v16479_v26 }
 0x51f   : > { %v4550_v32 = vmax.f32 %v4497_v42, %v13283_v54  ;;  %v16480_v62 = vrot.slane %v13214_v60, 4  ;;  %v15731_v46 = vrot.slane %v13214_v60, 5  ;;  %v13307_v42 = vpop.f32.mrf.mxu2 }
 0x520   : > { %v4759_v43 = vmax.f32 %v4707_v63, %v13278_v14  ;;  %16481 = vst [vmem:[#allocation134_spill] sm:$0xff] %v13307_v42 }
 0x521   : > { %v13300_v7 = vsel %vm1422_vm3, %v3885_v57, %v16480_v62  ;;  %v4602_v63 = vmax.f32 %v4550_v32, %v13295_v15  ;;  %v13320_v32 = vsel %vm1806_vm5, %v4034_v0, %v15731_v46  ;;  %v13323_v62 = vpop.f32.mrf.mxu3  ;;  %v16485_v0 = vrot.slane %v13214_v60, 6 }
 0x522   : > { %v13304_v55 = vmax.f32 %v4759_v43, %v13290_v27  ;;  %v15732_v43 = vrot.slane %v13214_v60, 7  ;;  %16482 = vst [vmem:[#allocation5_spill] sm:$0xff] %v13323_v62 }
 0x523   : > { %v4656_v26 = vmax.f32 %v4602_v63, %v13300_v7  ;;  %v13339_v63 = vsel %vm2190_vm4, %v4183_v20, %v16485_v0 }
 0x524   : > { %8520 = vmatmul.msk.f32.gmra.mxu2 %vm4916_vm8, %v13304_v55  ;;  %v4912_v9 = vrot.slane %v13304_v55, 1  ;;  %v5332_v57 = vrot.slane %v13304_v55, 2  ;;  %16486 = vst [vmem:[#allocation85_spill] sm:$0xff] %v13339_v63 }
 0x525   : > { %v4708_v35 = vmax.f32 %v4656_v26, %v13320_v32  ;;  %8670 = vmatmul.msk.f32.gmra.mxu0 %vm4916_vm8, %v12651_v23 }
 0x526   : > { %v13326_v17 = vsel %vm454_vm2, %v4910_v53, %v4912_v9  ;;  %v13329_v42 = vsel %vm635_vm0, %v5330_v48, %v5332_v57  ;;  %v13342_v53 = vpop.f32.mrf.mxu1  ;;  %v13347_v48 = vsel %vm4261_vm7, %v4333_v30, %v15732_v43  ;;  %v16496_v43 = vld [vmem:[#allocation2_spill] sm:$0xff] }
 0x527   : > { %16483 = vst [vmem:[#allocation4_spill] sm:$0xff] %v13326_v17  ;;  %8487 = vmatmul.msk.f32.gmra.mxu1 %vm4916_vm8, %v13326_v17  ;;  %8552 = vmatmul.msk.f32.gmra.mxu3 %vm4916_vm8, %v13329_v42  ;;  %v4760_v46 = vmax.f32 %v4708_v35, %v13339_v63  ;;  %v13354_v62 = vpop.f32.mrf.mxu2  ;;  %v6103_v40 = vrot.slane %v16496_v43, 6 }
 0x528   : > { %16484 = vst [vmem:[#allocation3_spill] sm:$0xff] %v13329_v42 }
 0x529   : > { %16487 = vst [vmem:[#allocation47_spill] sm:$0xff] %v13342_v53  ;;  %v13350_v26 = vmax.f32 %v4760_v46, %v13347_v48  ;;  %v13372_v0 = vpop.f32.mrf.mxu3  ;;  %v16497_v53 = vld [vmem:[#allocation139_spill] sm:$0xff] }
 0x52a   : > { %16488 = vst [vmem:[#allocation108_spill] sm:$0xff] %v13347_v48  ;;  %v5826_v17 = vrot.slane %v16497_v53, 5  ;;  %v16529_v48 = vld [vmem:[#allocation14_spill] sm:$0xff] }
 0x52b   : > { %16489 = vst [vmem:[#allocation9_spill] sm:$0xff] %v13350_v26  ;;  %v13359_v20 = vrot.slane %v13350_v26, 1  ;;  %v13362_v35 = vrot.slane %v13350_v26, 2 }
 0x52c   : > { %16490 = vst [vmem:[#allocation88_spill] sm:$0xff] %v13354_v62  ;;  %8521 = vmatmul.msk.f32.gmra.mxu2 %vm4916_vm8, %v13350_v26  ;;  %v5827_v62 = vrot.slane %v16496_v43, 5 }
 0x52d   : > { %16491 = vst [vmem:[#allocation46_spill] sm:$0xff] %v13359_v20  ;;  %v13366_v30 = vsel %vm454_vm2, %v4912_v9, %v13359_v20  ;;  %v13370_v46 = vsel %vm635_vm0, %v5332_v57, %v13362_v35  ;;  %8671 = vmatmul.msk.f32.gmra.mxu0 %vm4916_vm8, %v12705_v44 }
 0x52e   : > { %16492 = vst [vmem:[#allocation7_spill] sm:$0xff] %v13362_v35  ;;  %v13380_v42 = vpop.f32.mrf.mxu1  ;;  %v5828_v9 = vsel %vm1806_vm5, %v5826_v17, %v5827_v62 }
 0x52f   : > { %16493 = vst [vmem:[#allocation114_spill] sm:$0xff] %v13366_v30  ;;  %8488 = vmatmul.msk.f32.gmra.mxu1 %vm4916_vm8, %v13366_v30  ;;  %8553 = vmatmul.msk.f32.gmra.mxu3 %vm4916_vm8, %v13370_v46 }
 0x530   : > { %16494 = vst [vmem:[#allocation6_spill] sm:$0xff] %v13370_v46  ;;  %v13386_v57 = vpop.f32.mrf.mxu2 }
 0x531   : > { %16495 = vst [vmem:[#allocation12_spill] sm:$0xff] %v13372_v0  ;;  %v16500_v0 = vld [vmem:[#allocation8_spill] sm:$0xff] }
 0x532   : > { %16498 = vst [vmem:[#allocation91_spill] sm:$0xff] %v13380_v42  ;;  %v5829_v30 = vrot.slane %v16500_v0, 5  ;;  %v5551_v42 = vrot.slane %v16496_v43, 4  ;;  %v5831_v43 = vrot.slane %v11804_v50, 5 }
 0x533   : > { %16499 = vst [vmem:[#allocation58_spill] sm:$0xff] %v13386_v57  ;;  %v13393_v46 = vpop.f32.mrf.mxu3  ;;  %v5550_v57 = vrot.slane %v16497_v53, 4 }
 0x534   : > { %8589 = vmatmul.msk.f32.vlgmr.msrb.gmra.mxu2 %vm4916_vm8, %v5828_v9  ;;  %16501 = vst [vmem:[#allocation10_spill] sm:$0xff] %v13393_v46  ;;  %v5830_v17 = vsel %vm1806_vm5, %v5827_v62, %v5829_v30  ;;  %v13400_v9 = vpop.f32.mrf.mxu0 }
 0x535   : > { %8672 = vmatmul.msk.f32.gmra.mxu0 %vm4916_vm8, %v12758_v56  ;;  %v5552_v46 = vsel %vm1422_vm3, %v5550_v57, %v5551_v42  ;;  %v6105_v56 = vrot.slane %v16500_v0, 6 }
 0x537   : > { %8489 = vmatmul.msk.f32.gmra.mxu1 %vm4916_vm8, %v13359_v20  ;;  %8554 = vmatmul.msk.f32.gmra.mxu3 %vm4916_vm8, %v13362_v35  ;;  %v6102_v20 = vrot.slane %v16497_v53, 6  ;;  %v13405_v35 = vpop.f32.mrf.mxu1  ;;  %v5832_v53 = vsel %vm1806_vm5, %v5829_v30, %v5831_v43  ;;  %v5555_v30 = vrot.slane %v11804_v50, 4 }
 0x538   : > { %16502 = vst [vmem:[#allocation125_spill] sm:$0xff] %v13405_v35  ;;  %v16517_v35 = vld [vmem:[#allocation45_spill] sm:$0xff] }
 0x539   : > { %v6104_v4 = vsel %vm2190_vm4, %v6102_v20, %v6103_v40  ;;  %v13412_v62 = vpop.f32.mrf.mxu2 }
 0x53a   : > { %16503 = vst [vmem:[#allocation11_spill] sm:$0xff] %v13412_v62 }
 0x53c   : > { %8590 = vmatmul.msk.f32.gmra.mxu2 %vm4916_vm8, %v5830_v17  ;;  %v5553_v17 = vrot.slane %v16500_v0, 4  ;;  %v13416_v44 = vpop.f32.mrf.mxu3  ;;  %v13422_v20 = vpop.f32.mrf.mxu0  ;;  %v5833_v0 = vrot.slane %v11858_v18, 5 }
 0x53d   : > { %16504 = vst [vmem:[#allocation94_spill] sm:$0xff] %v13416_v44  ;;  %8673 = vmatmul.msk.f32.gmra.mxu0 %vm4916_vm8, %v12818_v58 }
 0x53f   : > { %8556 = vmatmul.msk.f32.vlgmr.msrb.gmra.mxu1 %vm4916_vm8, %v5552_v46  ;;  %8622 = vmatmul.msk.f32.vlgmr.msrb.gmra.mxu3 %vm4916_vm8, %v6104_v4  ;;  %v5554_v4 = vsel %vm1422_vm3, %v5551_v42, %v5553_v17  ;;  %v6106_v46 = vsel %vm2190_vm4, %v6103_v40, %v6105_v56  ;;  %v5834_v42 = vsel %vm1806_vm5, %v5831_v43, %v5833_v0  ;;  %v5557_v43 = vrot.slane %v11858_v18, 4 }
 0x543   : > { %v13426_v57 = vpop.f32.mrf.mxu1 }
 0x544   : > { %8591 = vmatmul.msk.f32.gmra.mxu2 %vm4916_vm8, %v5832_v53  ;;  %16505 = vst [vmem:[#allocation79_spill] sm:$0xff] %v13426_v57  ;;  %v13431_v62 = vpop.f32.mrf.mxu2  ;;  %v6107_v53 = vrot.slane %v11804_v50, 6  ;;  %v13448_v57 = vpop.f32.mrf.mxu0 }
 0x545   : > { %16506 = vst [vmem:[#allocation178_spill] sm:$0xff] %v13431_v62  ;;  %8674 = vmatmul.msk.f32.gmra.mxu0 %vm4916_vm8, %v12885_v21  ;;  %v5835_v62 = vrot.slane %v11927_v5, 5  ;;  %v16525_v21 = vld [vmem:[#allocation60_spill] sm:$0xff] }
 0x547   : > { %8557 = vmatmul.msk.f32.gmra.mxu1 %vm4916_vm8, %v5554_v4  ;;  %8623 = vmatmul.msk.f32.gmra.mxu3 %vm4916_vm8, %v6106_v46  ;;  %v5556_v4 = vsel %vm1422_vm3, %v5553_v17, %v5555_v30  ;;  %v6108_v46 = vsel %vm2190_vm4, %v6105_v56, %v6107_v53  ;;  %v5836_v56 = vsel %vm1806_vm5, %v5833_v0, %v5835_v62  ;;  %v5559_v0 = vrot.slane %v11927_v5, 4 }
 0x549   : > { %v13439_v40 = vpop.f32.mrf.mxu3 }
 0x54a   : > { %16507 = vst [vmem:[#allocation13_spill] sm:$0xff] %v13439_v40 }
 0x54b   : > { %v13446_v50 = vpop.f32.mrf.mxu1 }
 0x54c   : > { %8592 = vmatmul.msk.f32.gmra.mxu2 %vm4916_vm8, %v5834_v42  ;;  %16508 = vst [vmem:[#allocation120_spill] sm:$0xff] %v13446_v50  ;;  %v6109_v42 = vrot.slane %v11858_v18, 6  ;;  %v5837_v18 = vrot.slane %v11972_v59, 5 }
 0x54d   : > { %8675 = vmatmul.msk.f32.gmra.mxu0 %vm4916_vm8, %v12955_v37  ;;  %v16524_v37 = vld [vmem:[#allocation160_spill] sm:$0xff] }
 0x54e   : > { %v13452_v44 = vpop.f32.mrf.mxu2  ;;  %v1031_v58 = vadd.f32 %v16525_v21, %v16524_v37  ;;  %v16533_v37 = vld [vmem:[#allocation100_spill] sm:$0xff] }
 0x54f   : > { %8558 = vmatmul.msk.f32.gmra.mxu1 %vm4916_vm8, %v5556_v4  ;;  %8624 = vmatmul.msk.f32.gmra.mxu3 %vm4916_vm8, %v6108_v46  ;;  %16509 = vst [vmem:[#allocation87_spill] sm:$0xff] %v13452_v44  ;;  %v5558_v4 = vsel %vm1422_vm3, %v5555_v30, %v5557_v43  ;;  %v6110_v46 = vsel %vm2190_vm4, %v6107_v53, %v6109_v42  ;;  %v13467_v44 = vpop.f32.mrf.mxu0 }
 0x550   : > { %v5838_v30 = vsel %vm1806_vm5, %v5835_v62, %v5837_v18  ;;  %v6113_v62 = vrot.slane %v11972_v59, 6 }
 0x551   : > { %v13458_v17 = vpop.f32.mrf.mxu3 }
 0x552   : > { %16510 = vst [vmem:[#allocation52_spill] sm:$0xff] %v13458_v17 }
 0x554   : > { %8593 = vmatmul.msk.f32.gmra.mxu2 %vm4916_vm8, %v5836_v56  ;;  %v13465_v40 = vpop.f32.mrf.mxu1  ;;  %v6111_v56 = vrot.slane %v11927_v5, 6  ;;  %v5839_v5 = vrot.slane %v16370_v11, 5 }
 0x555   : > { %16511 = vst [vmem:[#allocation130_spill] sm:$0xff] %v13465_v40  ;;  %8676 = vmatmul.msk.f32.gmra.mxu0 %vm4916_vm8, %v13012_v28  ;;  %v5561_v40 = vrot.slane %v11972_v59, 4 }
 0x557   : > { %8559 = vmatmul.msk.f32.gmra.mxu1 %vm4916_vm8, %v5558_v4  ;;  %8625 = vmatmul.msk.f32.gmra.mxu3 %vm4916_vm8, %v6110_v46  ;;  %v13474_v53 = vpop.f32.mrf.mxu2  ;;  %v5560_v4 = vsel %vm1422_vm3, %v5557_v43, %v5559_v0  ;;  %v6112_v46 = vsel %vm2190_vm4, %v6109_v42, %v6111_v56  ;;  %v5840_v43 = vsel %vm1806_vm5, %v5837_v18, %v5839_v5  ;;  %v13491_v42 = vpop.f32.mrf.mxu0  ;;  %v16518_v18 = vld [vmem:[#allocation157_spill] sm:$0xff] }
 0x558   : > { %16512 = vst [vmem:[#allocation101_spill] sm:$0xff] %v13474_v53  ;;  %v5841_v53 = vrot.slane %v16382_v52, 5 }
 0x55a   : > { %v13479_v17 = vpop.f32.mrf.mxu3 }
 0x55b   : > { %16513 = vst [vmem:[#allocation150_spill] sm:$0xff] %v13479_v17  ;;  %v16516_v17 = vld [vmem:[#allocation149_spill] sm:$0xff] }
 0x55c   : > { %8594 = vmatmul.msk.f32.gmra.mxu2 %vm4916_vm8, %v5838_v30  ;;  %v1022_v59 = vadd.f32 %v16517_v35, %v16516_v17  ;;  %v16522_v35 = vld [vmem:[#allocation50_spill] sm:$0xff] }
 0x55d   : > { %v13486_v50 = vpop.f32.mrf.mxu1  ;;  %8677 = vmatmul.msk.f32.gmra.mxu0 %vm4916_vm8, %v13077_v31 }
 0x55e   : > { %16514 = vst [vmem:[#allocation99_spill] sm:$0xff] %v13486_v50  ;;  %v16519_v50 = vld [vmem:[#allocation55_spill] sm:$0xff] }
 0x55f   : > { %8560 = vmatmul.msk.f32.gmra.mxu1 %vm4916_vm8, %v5560_v4  ;;  %8626 = vmatmul.msk.f32.gmra.mxu3 %vm4916_vm8, %v6112_v46  ;;  %v5562_v4 = vsel %vm1422_vm3, %v5559_v0, %v5561_v40  ;;  %v6114_v46 = vsel %vm2190_vm4, %v6111_v56, %v6113_v62  ;;  %v1028_v31 = vadd.f32 %v16519_v50, %v16518_v18  ;;  %v6115_v0 = vrot.slane %v16370_v11, 6  ;;  %v16521_v56 = vld [vmem:[#allocation153_spill] sm:$0xff]  ;;  %v16526_v50 = vld [vmem:[#allocation171_spill] sm:$0xff]  ;;  %v13523_v63 = vpop.f32.mrf.mxu0 }
 0x560   : > { %v13494_v30 = vpop.f32.mrf.mxu2  ;;  %v1025_v17 = vadd.f32 %v16522_v35, %v16521_v56  ;;  %16530 = vst [vmem:[#allocation2_spill] sm:$0xff] %v13523_v63  ;;  %v16538_v63 = vld [vmem:[#allocation23_spill] sm:$0xff] }
 0x561   : > { %16515 = vst [vmem:[#allocation141_spill] sm:$0xff] %v13494_v30  ;;  %v1414_v18 = vadd.f32 %v16526_v50, %v1028_v31  ;;  %v5843_v31 = vrot.slane %v16533_v37, 5  ;;  %v16536_v50 = vld [vmem:[#allocation90_spill] sm:$0xff] }
 0x563   : > { %v13505_v28 = vpop.f32.mrf.mxu3 }
 0x564   : > { %8595 = vmatmul.msk.f32.gmra.mxu2 %vm4916_vm8, %v5840_v43  ;;  %16520 = vst [vmem:[#allocation105_spill] sm:$0xff] %v13505_v28  ;;  %v5563_v43 = vrot.slane %v16370_v11, 4  ;;  %v16528_v11 = vld [vmem:[#allocation179_spill] sm:$0xff] }
 0x565   : > { %8678 = vmatmul.msk.f32.gmra.mxu0 %vm4916_vm8, %v13149_v24  ;;  %v1801_v24 = vadd.f32 %v16529_v48, %v1414_v18 }
 0x566   : > { %v5564_v56 = vsel %vm1422_vm3, %v5561_v40, %v5563_v43 }
 0x567   : > { %8561 = vmatmul.msk.f32.gmra.mxu1 %vm4916_vm8, %v5562_v4  ;;  %8627 = vmatmul.msk.f32.gmra.mxu3 %vm4916_vm8, %v6114_v46  ;;  %v16523_v4 = vld [vmem:[#allocation164_spill] sm:$0xff]  ;;  %v5842_v46 = vsel %vm1806_vm5, %v5839_v5, %v5841_v53  ;;  %v2185_v18 = vadd.f32 %v16536_v50, %v1801_v24  ;;  %v16542_v24 = vld [vmem:[#allocation113_spill] sm:$0xff] }
 0x568   : > { %v1412_v30 = vadd.f32 %v16523_v4, %v1022_v59  ;;  %v6116_v59 = vsel %vm2190_vm4, %v6113_v62, %v6115_v0  ;;  %v16531_v5 = vld [vmem:[#allocation168_spill] sm:$0xff]  ;;  %v16532_v4 = vld [vmem:[#allocation51_spill] sm:$0xff] }
 0x569   : > { %v1413_v35 = vadd.f32 %v16531_v5, %v1025_v17  ;;  %v5565_v17 = vrot.slane %v16382_v52, 4 }
 0x56a   : > { %v13519_v28 = vpop.f32.mrf.mxu1  ;;  %v1799_v23 = vadd.f32 %v16528_v11, %v1412_v30  ;;  %v16535_v30 = vld [vmem:[#allocation174_spill] sm:$0xff]  ;;  %v16537_v11 = vld [vmem:[#allocation180_spill] sm:$0xff] }
 0x56b   : > { %16527 = vst [vmem:[#allocation110_spill] sm:$0xff] %v13519_v28  ;;  %v1415_v48 = vadd.f32 %v16535_v30, %v1031_v58  ;;  %v1800_v40 = vadd.f32 %v16537_v11, %v1413_v35  ;;  %v5844_v58 = vsel %vm1806_vm5, %v5841_v53, %v5843_v31  ;;  %v2569_v30 = vadd.f32 %v16542_v24, %v2185_v18  ;;  %v16543_v35 = vld [vmem:[#allocation57_spill] sm:$0xff]  ;;  %v16545_v11 = vld [vmem:[#allocation155_spill] sm:$0xff] }
 0x56c   : > { %8596 = vmatmul.msk.f32.gmra.mxu2 %vm4916_vm8, %v5842_v46  ;;  %v2183_v21 = vadd.f32 %v16532_v4, %v1799_v23  ;;  %v13532_v46 = vpop.f32.mrf.mxu2  ;;  %v6117_v23 = vrot.slane %v16382_v52, 6  ;;  %v16541_v4 = vld [vmem:[#allocation61_spill] sm:$0xff]  ;;  %v5566_v52 = vsel %vm1422_vm3, %v5563_v43, %v5565_v17  ;;  %v16547_v53 = vld [vmem:[#allocation111_spill] sm:$0xff] }
 0x56d   : > { %16534 = vst [vmem:[#allocation139_spill] sm:$0xff] %v13532_v46  ;;  %v1802_v62 = vadd.f32 %v16538_v63, %v1415_v48  ;;  %8679 = vmatmul.msk.f32.gmra.mxu0 %vm4916_vm8, %v13218_v13  ;;  %v2184_v46 = vadd.f32 %v16541_v4, %v1800_v40  ;;  %v16546_v28 = vld [vmem:[#allocation97_spill] sm:$0xff]  ;;  %v5845_v18 = vrot.slane %v16547_v53, 5  ;;  %v16548_v40 = vld [vmem:[#allocation106_spill] sm:$0xff] }
 0x56e   : > { %v6118_v48 = vsel %vm2190_vm4, %v6115_v0, %v6117_v23  ;;  %v16552_v43 = vld [vmem:[#allocation93_spill] sm:$0xff] }
 0x56f   : > { %8562 = vmatmul.msk.f32.gmra.mxu1 %vm4916_vm8, %v5564_v56  ;;  %8628 = vmatmul.msk.f32.gmra.mxu3 %vm4916_vm8, %v6116_v59  ;;  %v16540_v56 = vld [vmem:[#allocation163_spill] sm:$0xff]  ;;  %v2186_v50 = vadd.f32 %v16543_v35, %v1802_v62  ;;  %v2783_v62 = vadd.f32 %v16548_v40, %v2569_v30  ;;  %v16553_v35 = vld [vmem:[#allocation66_spill] sm:$0xff] }
 0x570   : > { %v2567_v59 = vadd.f32 %v16540_v56, %v2183_v21  ;;  %v2568_v21 = vadd.f32 %v16546_v28, %v2184_v46  ;;  %v16549_v56 = vld [vmem:[#allocation121_spill] sm:$0xff]  ;;  %v16555_v28 = vld [vmem:[#allocation115_spill] sm:$0xff]  ;;  %v16556_v30 = vld [vmem:[#allocation166_spill] sm:$0xff] }
 0x571   : > { %v13540_v5 = vpop.f32.mrf.mxu3  ;;  %v2570_v4 = vadd.f32 %v16549_v56, %v2186_v50  ;;  %v3007_v46 = vadd.f32 %v16555_v28, %v2783_v62  ;;  %v5846_v56 = vsel %vm1806_vm5, %v5843_v31, %v5845_v18  ;;  %v16559_v62 = vld [vmem:[#allocation109_spill] sm:$0xff] }
 0x572   : > { %16539 = vst [vmem:[#allocation8_spill] sm:$0xff] %v13540_v5  ;;  %v13550_v63 = vpop.f32.mrf.mxu1  ;;  %v2781_v5 = vadd.f32 %v16545_v11, %v2567_v59  ;;  %v16554_v59 = vld [vmem:[#allocation56_spill] sm:$0xff]  ;;  %v2782_v50 = vadd.f32 %v16556_v30, %v2568_v21 }
 0x573   : > { %16544 = vst [vmem:[#allocation149_spill] sm:$0xff] %v13550_v63  ;;  %v2187_v11 = vadd.f32 %v16554_v59, %v16553_v35  ;;  %v3231_v35 = vadd.f32 %v13448_v57, %v3007_v46  ;;  %v5847_v57 = vrot.slane %v12234_v10, 5  ;;  %v16563_v46 = vld [vmem:[#allocation123_spill] sm:$0xff] }
 0x574   : > { %8597 = vmatmul.msk.f32.gmra.mxu2 %vm4916_vm8, %v5844_v58  ;;  %v13561_v58 = vpop.f32.mrf.mxu0  ;;  %v3005_v0 = vadd.f32 %v16552_v43, %v2781_v5  ;;  %v16558_v5 = vld [vmem:[#allocation173_spill] sm:$0xff]  ;;  %v3006_v59 = vadd.f32 %v16559_v62, %v2782_v50  ;;  %v5569_v50 = vrot.slane %v16547_v53, 4 }
 0x575   : > { %16550 = vst [vmem:[#allocation45_spill] sm:$0xff] %v13561_v58  ;;  %v13563_v24 = vpop.f32.mrf.mxu2  ;;  %8680 = vmatmul.msk.f32.gmra.mxu0 %vm4916_vm8, %v13304_v55  ;;  %v2784_v43 = vadd.f32 %v16558_v5, %v2570_v4  ;;  %v16565_v5 = vld [vmem:[#allocation138_spill] sm:$0xff] }
 0x576   : > { %16551 = vst [vmem:[#allocation157_spill] sm:$0xff] %v13563_v24  ;;  %v3229_v40 = vadd.f32 %v13400_v9, %v3005_v0  ;;  %v16561_v24 = vld [vmem:[#allocation176_spill] sm:$0xff]  ;;  %v3230_v0 = vadd.f32 %v13422_v20, %v3006_v59  ;;  %v5848_v20 = vsel %vm1806_vm5, %v5845_v18, %v5847_v57  ;;  %v15762_v18 = vrot.slane %v12234_v10, 4 }
 0x577   : > { %8563 = vmatmul.msk.f32.gmra.mxu1 %vm4916_vm8, %v5566_v52  ;;  %8629 = vmatmul.msk.f32.gmra.mxu3 %vm4916_vm8, %v6118_v48  ;;  %v5567_v52 = vrot.slane %v16533_v37, 4  ;;  %v6119_v48 = vrot.slane %v16533_v37, 6  ;;  %v16560_v37 = vld [vmem:[#allocation128_spill] sm:$0xff]  ;;  %v3008_v63 = vadd.f32 %v16561_v24, %v2784_v43 }
 0x578   : > { %v2571_v28 = vadd.f32 %v16560_v37, %v2187_v11  ;;  %v3278_v31 = vadd.f32 %v13127_v3, %v3229_v40  ;;  %v3280_v11 = vadd.f32 %v13127_v3, %v3231_v35  ;;  %v6121_v40 = vrot.slane %v16547_v53, 6 }
 0x579   : > { %v13576_v58 = vpop.f32.mrf.mxu3  ;;  %v5568_v21 = vsel %vm1422_vm3, %v5565_v17, %v5567_v52  ;;  %v6120_v9 = vsel %vm2190_vm4, %v6117_v23, %v6119_v48  ;;  %v3232_v24 = vadd.f32 %v13467_v44, %v3008_v63  ;;  %v3279_v44 = vadd.f32 %v13127_v3, %v3230_v0 }
 0x57a   : > { %16557 = vst [vmem:[#allocation55_spill] sm:$0xff] %v13576_v58  ;;  %v2785_v17 = vadd.f32 %v16563_v46, %v2571_v28  ;;  %v13607_v63 = vmax.f32 %v3280_v11, 0.0  ;;  %v16566_v53 = vmax.f32 %v13105_v33, %v13117_v1  ;;  %v4452_v37 = vrot.slane %v13154_v49, 1 }
 0x57b   : > { %v3281_v35 = vadd.f32 %v13127_v3, %v3232_v24  ;;  %v4504_v28 = vrot.slane %v13154_v49, 2  ;;  %v15761_v0 = vrot.slane %v12234_v10, 6  ;;  %v16568_v33 = vmax.f32 %v13194_v39, %v13201_v47 }
 0x57c   : > { %8598 = vmatmul.msk.f32.gmra.mxu2 %vm4916_vm8, %v5846_v56  ;;  %v13589_v4 = vpop.f32.mrf.mxu1  ;;  %v13596_v30 = vpop.f32.mrf.mxu0  ;;  %v13602_v56 = vmax.f32 %v3278_v31, 0.0  ;;  %v3009_v43 = vadd.f32 %v16565_v5, %v2785_v17  ;;  %v13615_v62 = vmax.f32 %v16566_v53, %v13154_v49  ;;  %v5849_v31 = vrot.slane %v12298_v34, 5 }
 0x57d   : > { %16562 = vst [vmem:[#allocation153_spill] sm:$0xff] %v13589_v4  ;;  %8681 = vmatmul.msk.f32.gmra.mxu0 %vm4916_vm8, %v13350_v26  ;;  %v13630_v1 = vmax.f32 %v16568_v33, %v13214_v60  ;;  %v16569_v11 = vrot.slane %v13051_v45, 1  ;;  %v13639_v46 = vmax.f32 %v3279_v44, 0.0  ;;  %v4506_v17 = vrot.slane %v13214_v60, 2 }
 0x57e   : > { %16564 = vst [vmem:[#allocation50_spill] sm:$0xff] %v13596_v30  ;;  %v4610_v24 = vrot.slane %v13602_v56, 4  ;;  %v3233_v5 = vadd.f32 %v13491_v42, %v3009_v43  ;;  %v16571_v42 = vrot.slane %v13051_v45, 3 }
 0x57f   : > { %8564 = vmatmul.msk.f32.gmra.mxu1 %vm4916_vm8, %v5568_v21  ;;  %8630 = vmatmul.msk.f32.gmra.mxu3 %vm4916_vm8, %v6120_v9  ;;  %v5253_v23 = vpop.f32.mrf.mxu2  ;;  %v5570_v21 = vsel %vm1422_vm3, %v5567_v52, %v5569_v50  ;;  %v6122_v9 = vsel %vm2190_vm4, %v6119_v48, %v6121_v40  ;;  %v4453_v52 = vsel %vm454_vm2, %v16569_v11, %v4452_v37  ;;  %v4556_v48 = vrot.slane %v13154_v49, 3 }
 0x580   : > { %v4498_v39 = vmax.f32 %v13073_v61, %v4453_v52  ;;  %v16570_v49 = vrot.slane %v13051_v45, 2  ;;  %v16572_v11 = vrot.slane %v13214_v60, 4  ;;  %v4662_v52 = vrot.slane %v13602_v56, 5 }
 0x581   : > { %v4557_v43 = vsel %vm3662_vm6, %v16571_v42, %v4556_v48  ;;  %v4766_v45 = vrot.slane %v13602_v56, 7  ;;  %v4454_v42 = vrot.slane %v13214_v60, 1  ;;  %v4768_v61 = vrot.slane %v13639_v46, 7 }
 0x582   : > { %v13617_v59 = vpop.f32.mrf.mxu3  ;;  %v4505_v44 = vsel %vm635_vm0, %v16570_v49, %v4504_v28  ;;  %v4714_v49 = vrot.slane %v13602_v56, 6 }
 0x583   : > { %16567 = vst [vmem:[#allocation164_spill] sm:$0xff] %v13617_v59  ;;  %v4551_v33 = vmax.f32 %v4498_v39, %v4505_v44  ;;  %v4507_v59 = vsel %vm635_vm0, %v4504_v28, %v4506_v17  ;;  %v4769_v58 = vsel %vm4261_vm7, %v4766_v45, %v4768_v61 }
 0x584   : > { %8599 = vmatmul.msk.f32.gmra.mxu2 %vm4916_vm8, %v5848_v20  ;;  %v13642_v20 = vmax.f32 %v3281_v35, 0.0  ;;  %v6124_v35 = vsel %vm2190_vm4, %v6121_v40, %v15761_v0  ;;  %v13696_v26 = vpop.f32.mrf.mxu0 }
 0x585   : > { %v4603_v39 = vmax.f32 %v4551_v33, %v4557_v43  ;;  %v16574_v43 = vrot.slane %v13214_v60, 6 }
 0x587   : > { %8565 = vmatmul.msk.f32.gmra.mxu1 %vm4916_vm8, %v5570_v21  ;;  %8631 = vmatmul.msk.f32.gmra.mxu3 %vm4916_vm8, %v6122_v9  ;;  %v5076_v53 = vpop.f32.mrf.mxu1  ;;  %v5572_v21 = vsel %vm1422_vm3, %v5569_v50, %v15762_v18  ;;  %v5850_v9 = vsel %vm1806_vm5, %v5847_v57, %v5849_v31  ;;  %v4611_v50 = vsel %vm1422_vm3, %v16572_v11, %v4610_v24  ;;  %v4612_v11 = vrot.slane %v13639_v46, 4 }
 0x588   : > { %v5254_v44 = vadd.f32 %v5253_v23, %v5076_v53  ;;  %v4657_v0 = vmax.f32 %v4603_v39, %v4611_v50  ;;  %v4664_v18 = vrot.slane %v13639_v46, 5  ;;  %v16573_v23 = vrot.slane %v13214_v60, 5 }
 0x589   : > { %v4715_v47 = vsel %vm2190_vm4, %v16574_v43, %v4714_v49  ;;  %v4455_v50 = vsel %vm454_vm2, %v4452_v37, %v4454_v42  ;;  %v4558_v39 = vrot.slane %v13214_v60, 3  ;;  %v4718_v43 = vrot.slane %v13607_v63, 6 }
 0x58a   : > { %v5256_v57 = vpop.f32.mrf.mxu2  ;;  %v4663_v53 = vsel %vm1806_vm5, %v16573_v23, %v4662_v52  ;;  %v4665_v4 = vsel %vm1806_vm5, %v4662_v52, %v4664_v18  ;;  %v16576_v52 = vrot.slane %v13214_v60, 7  ;;  %v16578_v37 = vrot.slane %v12234_v10, 4 }
 0x58b   : > { %v4709_v30 = vmax.f32 %v4657_v0, %v4663_v53  ;;  %v4559_v53 = vsel %vm3662_vm6, %v4556_v48, %v4558_v39  ;;  %v15765_v48 = vrot.slane %v12362_v2, 4 }
 0x58c   : > { %8600 = vmatmul.msk.f32.gmra.mxu2 %vm4916_vm8, %v5850_v9  ;;  %v4716_v9 = vrot.slane %v13639_v46, 6 }
 0x58d   : > { %v5495_v33 = vpop.f32.mrf.mxu3  ;;  %v4761_v0 = vmax.f32 %v4709_v30, %v4715_v47 }
 0x58e   : > { %v13686_v40 = vadd.f32 %v5495_v33, %v5254_v44  ;;  %v4717_v23 = vsel %vm2190_vm4, %v4714_v49, %v4716_v9  ;;  %v4767_v49 = vsel %vm4261_vm7, %v16576_v52, %v4766_v45  ;;  %v4456_v45 = vrot.slane %v13602_v56, 1 }
 0x58f   : > { %8566 = vmatmul.msk.f32.gmra.mxu1 %vm4916_vm8, %v5572_v21  ;;  %8632 = vmatmul.msk.f32.gmra.mxu3 %vm4916_vm8, %v6124_v35  ;;  %v4499_v21 = vmax.f32 %v13615_v62, %v4455_v50  ;;  %v4613_v35 = vsel %vm1422_vm3, %v4610_v24, %v4612_v11  ;;  %v3282_v62 = vadd.f32 %v13127_v3, %v3233_v5  ;;  %v16575_v24 = vrot.slane %v12362_v2, 5 }
 0x590   : > { %v5079_v44 = vpop.f32.mrf.mxu1  ;;  %v16577_v50 = vrot.slane %v12298_v34, 4  ;;  %v16579_v3 = vrot.slane %v12298_v34, 6  ;;  %v13717_v47 = vmax.f32 %v4761_v0, %v4767_v49  ;;  %v16583_v52 = vrot.slane %v13607_v63, 7 }
 0x591   : > { %v4552_v33 = vmax.f32 %v4499_v21, %v4507_v59  ;;  %v5852_v28 = vsel %vm1806_vm5, %v5849_v31, %v16575_v24  ;;  %v16580_v59 = vrot.slane %v12234_v10, 6  ;;  %v4508_v21 = vrot.slane %v13602_v56, 2 }
 0x592   : > { %v5574_v30 = vsel %vm1422_vm3, %v16578_v37, %v16577_v50  ;;  %v16581_v24 = vrot.slane %v13607_v63, 4  ;;  %8682 = vmatmul.msk.f32.gmra.mxu0 %vm4916_vm8, %v13717_v47  ;;  %v13736_v49 = vsel %vm4261_vm7, %v4768_v61, %v16583_v52  ;;  %v4616_v61 = vrot.slane %v13642_v20, 4 }
 0x593   : > { %v6126_v31 = vsel %vm2190_vm4, %v16580_v59, %v16579_v3  ;;  %v4604_v60 = vmax.f32 %v4552_v33, %v4559_v53  ;;  %v5259_v5 = vpop.f32.mrf.mxu2  ;;  %v4719_v33 = vsel %vm2190_vm4, %v4716_v9, %v4718_v43  ;;  %v5257_v53 = vadd.f32 %v5256_v57, %v5079_v44 }
 0x594   : > { %8601 = vmatmul.msk.f32.gmra.mxu2 %vm4916_vm8, %v5852_v28  ;;  %v4615_v37 = vsel %vm1422_vm3, %v4612_v11, %v16581_v24  ;;  %v16582_v28 = vrot.slane %v13607_v63, 5  ;;  %v5853_v11 = vrot.slane %v12430_v19, 5  ;;  %v6127_v3 = vrot.slane %v12362_v2, 6 }
 0x595   : > { %v4658_v10 = vmax.f32 %v4604_v60, %v4613_v35  ;;  %v4457_v35 = vsel %vm454_vm2, %v4454_v42, %v4456_v45  ;;  %v15768_v57 = vrot.slane %v13642_v20, 5  ;;  %v15767_v42 = vrot.slane %v13642_v20, 7 }
 0x596   : > { %v4667_v0 = vsel %vm1806_vm5, %v4664_v18, %v16582_v28  ;;  %v4560_v18 = vrot.slane %v13602_v56, 3  ;;  %v5498_v50 = vpop.f32.mrf.mxu3  ;;  %v4500_v59 = vmax.f32 %v13630_v1, %v4457_v35  ;;  %v13752_v28 = vmax.f32 %v3282_v62, 0.0  ;;  %v13763_v35 = vpop.f32.mrf.mxu0 }
 0x597   : > { %8567 = vmatmul.msk.f32.gmra.mxu1 %vm4916_vm8, %v5574_v30  ;;  %8633 = vmatmul.msk.f32.gmra.mxu3 %vm4916_vm8, %v6126_v31  ;;  %v4710_v9 = vmax.f32 %v4658_v10, %v4665_v4  ;;  %v13747_v44 = vadd.f32 %v5498_v50, %v5257_v53  ;;  %v4509_v30 = vsel %vm635_vm0, %v4506_v17, %v4508_v21  ;;  %v4720_v31 = vrot.slane %v13642_v20, 6 }
 0x598   : > { %v4553_v24 = vmax.f32 %v4500_v59, %v4509_v30  ;;  %v16584_v4 = vrot.slane %v12362_v2, 5  ;;  %v16585_v10 = vrot.slane %v12298_v34, 4  ;;  %v4561_v17 = vsel %vm3662_vm6, %v4558_v39, %v4560_v18 }
 0x599   : > { %v4762_v60 = vmax.f32 %v4710_v9, %v4717_v23  ;;  %v5082_v52 = vpop.f32.mrf.mxu1  ;;  %v16586_v23 = vrot.slane %v12298_v34, 6  ;;  %v5577_v50 = vrot.slane %v12430_v19, 4  ;;  %v3510_v30 = vmax.f32 %v12959_v41, %v13173_v22 }
 0x59a   : > { %v5854_v1 = vsel %vm1806_vm5, %v16584_v4, %v5853_v11  ;;  %v5576_v53 = vsel %vm1422_vm3, %v16585_v10, %v15765_v48  ;;  %v4605_v59 = vmax.f32 %v4553_v24, %v4561_v17  ;;  %v15766_v4 = vrot.slane %v13639_v46, 1 }
 0x59b   : > { %v6128_v62 = vsel %vm2190_vm4, %v16586_v23, %v6127_v3  ;;  %v13770_v9 = vmax.f32 %v4762_v60, %v4769_v58  ;;  %v4510_v39 = vrot.slane %v13639_v46, 2  ;;  %v4562_v10 = vrot.slane %v13639_v46, 3 }
 0x59c   : > { %8602 = vmatmul.msk.f32.gmra.mxu2 %vm4916_vm8, %v5854_v1  ;;  %v5262_v48 = vpop.f32.mrf.mxu2  ;;  %v4659_v34 = vmax.f32 %v4605_v59, %v4615_v37  ;;  %v16587_v58 = vrot.slane %v13607_v63, 4  ;;  %v16588_v41 = vrot.slane %v13607_v63, 5  ;;  %v13796_v24 = vsel %vm2190_vm4, %v4718_v43, %v4720_v31 }
 0x59d   : > { %8683 = vmatmul.msk.f32.gmra.mxu0 %vm4916_vm8, %v13770_v9  ;;  %v5855_v37 = vrot.slane %v12490_v12, 5  ;;  %v3660_v1 = vmax.f32 %v3510_v30, %v13211_v36  ;;  %v4459_v17 = vsel %vm454_vm2, %v4456_v45, %v15766_v4  ;;  %v4511_v23 = vsel %vm635_vm0, %v4508_v21, %v4510_v39 }
 0x59e   : > { %v13784_v60 = vsel %vm1422_vm3, %v16587_v58, %v4616_v61  ;;  %v13791_v22 = vsel %vm1806_vm5, %v16588_v41, %v15768_v57  ;;  %v5260_v59 = vadd.f32 %v5259_v5, %v5082_v52  ;;  %v4711_v58 = vmax.f32 %v4659_v34, %v4667_v0 }
 0x59f   : > { %8568 = vmatmul.msk.f32.gmra.mxu1 %vm4916_vm8, %v5576_v53  ;;  %8634 = vmatmul.msk.f32.gmra.mxu3 %vm4916_vm8, %v6128_v62  ;;  %v13807_v41 = vsel %vm3662_vm6, %v4560_v18, %v4562_v10  ;;  %v16589_v43 = vrot.slane %v13607_v63, 7  ;;  %v4512_v36 = vrot.slane %v13607_v63, 2  ;;  %v4618_v62 = vrot.slane %v13752_v28, 4  ;;  %v5501_v30 = vpop.f32.mrf.mxu3 }
 0x5a0   : > { %v6129_v45 = vrot.slane %v12430_v19, 6  ;;  %v3810_v5 = vmax.f32 %v3660_v1, %v13223_v25  ;;  %v4670_v21 = vrot.slane %v13752_v28, 5  ;;  %v4722_v0 = vrot.slane %v13752_v28, 6 }
 0x5a1   : > { %v13814_v53 = vsel %vm4261_vm7, %v16589_v43, %v15767_v42  ;;  %v13822_v18 = vadd.f32 %v5501_v30, %v5260_v59  ;;  %v4763_v52 = vmax.f32 %v4711_v58, %v4719_v33  ;;  %v4774_v34 = vrot.slane %v13752_v28, 7  ;;  %v13843_v59 = vpop.f32.mrf.mxu0 }
 0x5a2   : > { %v5856_v43 = vsel %vm1806_vm5, %v5853_v11, %v5855_v37  ;;  %v3961_v4 = vmax.f32 %v3810_v5, %v13228_v51  ;;  %v16590_v25 = vrot.slane %v12362_v2, 4  ;;  %v6130_v33 = vsel %vm2190_vm4, %v6127_v3, %v6129_v45 }
 0x5a3   : > { %v13834_v57 = vmax.f32 %v4763_v52, %v13736_v49  ;;  %v3511_v11 = vmax.f32 %v13009_v29, %v13157_v8  ;;  %v13841_v51 = vsel %vm635_vm0, %v4510_v39, %v4512_v36  ;;  %v4564_v2 = vrot.slane %v13607_v63, 3 }
 0x5a4   : > { %v5085_v42 = vpop.f32.mrf.mxu1  ;;  %8603 = vmatmul.msk.f32.gmra.mxu2 %vm4916_vm8, %v5856_v43  ;;  %v5578_v1 = vsel %vm1422_vm3, %v16590_v25, %v5577_v50  ;;  %v4110_v28 = vmax.f32 %v3961_v4, %v13267_v16  ;;  %v13851_v49 = vsel %vm1422_vm3, %v4616_v61, %v4618_v62  ;;  %v16591_v16 = vrot.slane %v13642_v20, 5 }
 0x5a5   : > { %8684 = vmatmul.msk.f32.gmra.mxu0 %vm4916_vm8, %v13834_v57  ;;  %v13859_v29 = vsel %vm2190_vm4, %v4720_v31, %v4722_v0  ;;  %v5857_v63 = vrot.slane %v12541_v38, 5  ;;  %v3661_v61 = vmax.f32 %v3511_v11, %v13283_v54  ;;  %v16592_v39 = vrot.slane %v13642_v20, 7 }
 0x5a6   : > { %v13856_v3 = vsel %vm1806_vm5, %v16591_v16, %v4670_v21  ;;  %v4259_v4 = vmax.f32 %v4110_v28, %v13278_v14  ;;  %v4565_v36 = vsel %vm3662_vm6, %v4562_v10, %v4564_v2  ;;  %v5263_v31 = vadd.f32 %v5262_v48, %v5085_v42  ;;  %v16593_v10 = vld [vmem:[#allocation85_spill] sm:$0xff] }
 0x5a7   : > { %v5265_v8 = vpop.f32.mrf.mxu2  ;;  %8569 = vmatmul.msk.f32.gmra.mxu1 %vm4916_vm8, %v5578_v1  ;;  %8635 = vmatmul.msk.f32.gmra.mxu3 %vm4916_vm8, %v6130_v33  ;;  %v13869_v58 = vsel %vm4261_vm7, %v16592_v39, %v4774_v34  ;;  %v3811_v30 = vmax.f32 %v3661_v61, %v13295_v15  ;;  %v5579_v21 = vrot.slane %v12490_v12, 4  ;;  %v6131_v0 = vrot.slane %v12490_v12, 6 }
 0x5a8   : > { %v4409_v62 = vmax.f32 %v4259_v4, %v13290_v27  ;;  %v5858_v54 = vsel %vm1806_vm5, %v5855_v37, %v5857_v63  ;;  %v16595_v2 = vrot.slane %v13639_v46, 1 }
 0x5a9   : > { %v3962_v52 = vmax.f32 %v3811_v30, %v13300_v7  ;;  %v5580_v15 = vsel %vm1422_vm3, %v5577_v50, %v5579_v21  ;;  %v6132_v12 = vsel %vm2190_vm4, %v6129_v45, %v6131_v0  ;;  %v5581_v50 = vrot.slane %v12541_v38, 4 }
 0x5aa   : > { %v5504_v5 = vpop.f32.mrf.mxu3  ;;  %v4446_v20 = vmax.f32 %v4409_v62, %v13602_v56  ;;  %v5859_v56 = vrot.slane %v12591_v6, 5  ;;  %v6133_v45 = vrot.slane %v12541_v38, 6 }
 0x5ab   : > { %v13876_v14 = vadd.f32 %v5504_v5, %v5263_v31  ;;  %v4111_v27 = vmax.f32 %v3962_v52, %v13320_v32  ;;  %v16594_v32 = vld [vmem:[#allocation108_spill] sm:$0xff]  ;;  %v16597_v31 = vld [vmem:[#allocation30_spill] sm:$0xff] }
 0x5ac   : > { %v5088_v34 = vpop.f32.mrf.mxu1  ;;  %8604 = vmatmul.msk.f32.gmra.mxu2 %vm4916_vm8, %v5858_v54  ;;  %v4501_v48 = vmax.f32 %v4446_v20, %v4459_v17  ;;  %v5860_v33 = vsel %vm1806_vm5, %v5857_v63, %v5859_v56  ;;  %v6134_v38 = vsel %vm2190_vm4, %v6131_v0, %v6133_v45  ;;  %v5583_v54 = vrot.slane %v12591_v6, 4  ;;  %v16599_v52 = vld [vmem:[#allocation40_spill] sm:$0xff] }
 0x5ad   : > { %v4260_v37 = vmax.f32 %v4111_v27, %v16593_v10  ;;  %v5266_v43 = vadd.f32 %v5265_v8, %v5088_v34  ;;  %v5582_v8 = vsel %vm1422_vm3, %v5579_v21, %v5581_v50  ;;  %v6135_v20 = vrot.slane %v12591_v6, 6  ;;  %v16602_v10 = vld [vmem:[#allocation142_spill] sm:$0xff] }
 0x5ae   : > { %v4554_v7 = vmax.f32 %v4501_v48, %v4511_v23 }
 0x5af   : > { %v5268_v42 = vpop.f32.mrf.mxu2  ;;  %8570 = vmatmul.msk.f32.gmra.mxu1 %vm4916_vm8, %v5580_v15  ;;  %8636 = vmatmul.msk.f32.gmra.mxu3 %vm4916_vm8, %v6132_v12  ;;  %v4410_v25 = vmax.f32 %v4260_v37, %v16594_v32  ;;  %v5584_v15 = vsel %vm1422_vm3, %v5581_v50, %v5583_v54  ;;  %v6136_v6 = vsel %vm2190_vm4, %v6133_v45, %v6135_v20 }
 0x5b0   : > { %v4606_v17 = vmax.f32 %v4554_v7, %v13807_v41 }
 0x5b1   : > { %v4447_v23 = vmax.f32 %v4410_v25, %v13639_v46  ;;  %v13913_v46 = vpop.f32.mrf.mxu0 }
 0x5b2   : > { %v5507_v19 = vpop.f32.mrf.mxu3  ;;  %v4660_v28 = vmax.f32 %v4606_v17, %v13784_v60  ;;  %v16596_v60 = vld [vmem:[#allocation167_spill] sm:$0xff] }
 0x5b3   : > { %v13895_v1 = vadd.f32 %v5507_v19, %v5266_v43  ;;  %v4502_v16 = vmax.f32 %v4447_v23, %v16595_v2  ;;  %v5861_v63 = vrot.slane %v16596_v60, 5  ;;  %v5585_v32 = vrot.slane %v16596_v60, 4  ;;  %v16603_v19 = vld [vmem:[#allocation131_spill] sm:$0xff]  ;;  %v16604_v2 = vld [vmem:[#allocation64_spill] sm:$0xff] }
 0x5b4   : > { %v5091_v11 = vpop.f32.mrf.mxu1  ;;  %8605 = vmatmul.msk.f32.gmra.mxu2 %vm4916_vm8, %v5860_v33  ;;  %v4712_v41 = vmax.f32 %v4660_v28, %v13791_v22  ;;  %v16598_v22 = vld [vmem:[#allocation25_spill] sm:$0xff]  ;;  %v6137_v25 = vrot.slane %v16596_v60, 6 }
 0x5b5   : > { %v4555_v39 = vmax.f32 %v4502_v16, %v13841_v51  ;;  %v5176_v62 = vadd.f32 %v16598_v22, %v16597_v31  ;;  %v5269_v30 = vadd.f32 %v5268_v42, %v5091_v11  ;;  %v5862_v51 = vsel %vm1806_vm5, %v5859_v56, %v5861_v63  ;;  %v16600_v42 = vld [vmem:[#allocation29_spill] sm:$0xff]  ;;  %v16607_v31 = vld [vmem:[#allocation140_spill] sm:$0xff] }
 0x5b6   : > { %v4764_v61 = vmax.f32 %v4712_v41, %v13796_v24  ;;  %v5863_v56 = vrot.slane %v16600_v42, 5  ;;  %v5586_v23 = vsel %vm1422_vm3, %v5583_v54, %v5585_v32  ;;  %v6138_v11 = vsel %vm2190_vm4, %v6135_v20, %v6137_v25 }
 0x5b7   : > { %8571 = vmatmul.msk.f32.gmra.mxu1 %vm4916_vm8, %v5582_v8  ;;  %v5972_v4 = vpop.f32.mrf.mxu2  ;;  %8637 = vmatmul.msk.f32.gmra.mxu3 %vm4916_vm8, %v6134_v38  ;;  %v4607_v21 = vmax.f32 %v4555_v39, %v4565_v36  ;;  %v5513_v34 = vadd.f32 %v16599_v52, %v5176_v62  ;;  %v5865_v16 = vrot.slane %v16604_v2, 5  ;;  %v16605_v8 = vld [vmem:[#allocation143_spill] sm:$0xff]  ;;  %v16606_v38 = vld [vmem:[#allocation122_spill] sm:$0xff]  ;;  %v6139_v39 = vrot.slane %v16600_v42, 6 }
 0x5b8   : > { %v13916_v5 = vmax.f32 %v4764_v61, %v13814_v53  ;;  %v5587_v61 = vrot.slane %v16600_v42, 4  ;;  %v16611_v42 = vld [vmem:[#allocation148_spill] sm:$0xff] }
 0x5b9   : > { %v4661_v48 = vmax.f32 %v4607_v21, %v13851_v49  ;;  %v16601_v49 = vld [vmem:[#allocation132_spill] sm:$0xff]  ;;  %v13943_v45 = vpop.f32.mrf.mxu0  ;;  %v6140_v20 = vsel %vm2190_vm4, %v6137_v25, %v6139_v39  ;;  %v16612_v25 = vld [vmem:[#allocation49_spill] sm:$0xff] }
 0x5ba   : > { %v5510_v0 = vpop.f32.mrf.mxu3  ;;  %8685 = vmatmul.msk.f32.gmra.mxu0 %vm4916_vm8, %v13916_v5  ;;  %v5179_v37 = vadd.f32 %v16602_v10, %v16601_v49  ;;  %v5588_v54 = vsel %vm1422_vm3, %v5585_v32, %v5587_v61 }
 0x5bb   : > { %v13921_v24 = vadd.f32 %v5510_v0, %v5269_v30  ;;  %v4713_v36 = vmax.f32 %v4661_v48, %v13856_v3  ;;  %v5866_v30 = vsel %vm1806_vm5, %v5863_v56, %v5865_v16  ;;  %v16609_v48 = vld [vmem:[#allocation152_spill] sm:$0xff] }
 0x5bc   : > { %v5696_v27 = vpop.f32.mrf.mxu1  ;;  %8606 = vmatmul.msk.f32.gmra.mxu2 %vm4916_vm8, %v5862_v51  ;;  %v5514_v50 = vadd.f32 %v16603_v19, %v5179_v37  ;;  %v5869_v19 = vrot.slane %v16612_v25, 5 }
 0x5bd   : > { %v5792_v53 = vadd.f32 %v5696_v27, %v5513_v34  ;;  %v4765_v7 = vmax.f32 %v4713_v36, %v13859_v29  ;;  %v5864_v29 = vsel %vm1806_vm5, %v5861_v63, %v5863_v56  ;;  %v16608_v34 = vld [vmem:[#allocation76_spill] sm:$0xff]  ;;  %v16610_v27 = vld [vmem:[#allocation135_spill] sm:$0xff] }
 0x5be   : > { %v5867_v51 = vrot.slane %v16608_v34, 5 }
 0x5bf   : > { %8572 = vmatmul.msk.f32.gmra.mxu1 %vm4916_vm8, %v5584_v15  ;;  %v5975_v12 = vpop.f32.mrf.mxu2  ;;  %8638 = vmatmul.msk.f32.gmra.mxu3 %vm4916_vm8, %v6136_v6  ;;  %v6068_v43 = vadd.f32 %v5972_v4, %v5792_v53  ;;  %v13938_v17 = vmax.f32 %v4765_v7, %v13869_v58  ;;  %v5182_v4 = vadd.f32 %v16606_v38, %v16605_v8  ;;  %v5589_v6 = vrot.slane %v16604_v2, 4 }
 0x5c0   : > { %v5185_v53 = vadd.f32 %v16610_v27, %v16609_v48  ;;  %v5868_v49 = vsel %vm1806_vm5, %v5865_v16, %v5867_v51  ;;  %v5870_v38 = vsel %vm1806_vm5, %v5867_v51, %v5869_v19  ;;  %v6145_v51 = vrot.slane %v16612_v25, 6  ;;  %v16619_v48 = vld [vmem:[#allocation24_spill] sm:$0xff] }
 0x5c1   : > { %v5515_v22 = vadd.f32 %v16607_v31, %v5182_v4  ;;  %v16616_v31 = vld [vmem:[#allocation22_spill] sm:$0xff] }
 0x5c2   : > { %v6248_v3 = vpop.f32.mrf.mxu3  ;;  %8686 = vmatmul.msk.f32.gmra.mxu0 %vm4916_vm8, %v13938_v17  ;;  %v5516_v56 = vadd.f32 %v16611_v42, %v5185_v53 }
 0x5c3   : > { %v13945_v33 = vadd.f32 %v6248_v3, %v6068_v43  ;;  %v5590_v43 = vsel %vm1422_vm3, %v5587_v61, %v5589_v6 }
 0x5c4   : > { %v5699_v28 = vpop.f32.mrf.mxu1  ;;  %8607 = vmatmul.msk.f32.gmra.mxu2 %vm4916_vm8, %v5864_v29  ;;  %v16614_v29 = vld [vmem:[#allocation161_spill] sm:$0xff] }
 0x5c5   : > { %v5793_v58 = vadd.f32 %v5699_v28, %v5514_v50  ;;  %v16613_v50 = vld [vmem:[#allocation151_spill] sm:$0xff] }
 0x5c6   : > { %v5188_v28 = vadd.f32 %v16614_v29, %v16613_v50  ;;  %v5595_v50 = vrot.slane %v16616_v31, 4  ;;  %v6147_v29 = vrot.slane %v16616_v31, 6 }
 0x5c7   : > { %8573 = vmatmul.msk.f32.gmra.mxu1 %vm4916_vm8, %v5586_v23  ;;  %v5978_v41 = vpop.f32.mrf.mxu2  ;;  %8639 = vmatmul.msk.f32.gmra.mxu3 %vm4916_vm8, %v6138_v11  ;;  %v6069_v60 = vadd.f32 %v5975_v12, %v5793_v58  ;;  %v6141_v12 = vrot.slane %v16604_v2, 6  ;;  %v5591_v11 = vrot.slane %v16608_v34, 4  ;;  %v16615_v2 = vld [vmem:[#allocation165_spill] sm:$0xff] }
 0x5c8   : > { %v5517_v16 = vadd.f32 %v16615_v2, %v5188_v28  ;;  %v16623_v28 = vld [vmem:[#allocation67_spill] sm:$0xff] }
 0x5c9   : > { %v6142_v3 = vsel %vm2190_vm4, %v6139_v39, %v6141_v12 }
 0x5ca   : > { %v6251_v63 = vpop.f32.mrf.mxu3 }
 0x5cb   : > { %v13961_v62 = vadd.f32 %v6251_v63, %v6069_v60  ;;  %v5592_v63 = vsel %vm1422_vm3, %v5589_v6, %v5591_v11 }
 0x5cc   : > { %v5702_v21 = vpop.f32.mrf.mxu1  ;;  %8608 = vmatmul.msk.f32.gmra.mxu2 %vm4916_vm8, %v5866_v30  ;;  %v8720_v30 = vld [vmem:[%s15551_s3 + $0x40] sm:$0xff] }
 0x5cd   : > { %v5794_v0 = vadd.f32 %v5702_v21, %v5515_v22  ;;  %v5871_v22 = vrot.slane %v16616_v31, 5  ;;  %6743 = vmatpush.msra.mxu2 %v8720_v30  ;;  %v16617_v21 = vld [vmem:[#allocation169_spill] sm:$0xff] }
 0x5cf   : > { %8574 = vmatmul.msk.f32.gmra.mxu1 %vm4916_vm8, %v5588_v54  ;;  %v5981_v52 = vpop.f32.mrf.mxu2  ;;  %8640 = vmatmul.msk.f32.gmra.mxu3 %vm4916_vm8, %v6140_v20  ;;  %v6070_v36 = vadd.f32 %v5978_v41, %v5794_v0  ;;  %v6143_v41 = vrot.slane %v16608_v34, 6  ;;  %v16618_v0 = vld [vmem:[#allocation162_spill] sm:$0xff]  ;;  %v5593_v34 = vrot.slane %v16612_v25, 4 }
 0x5d0   : > { %v5191_v54 = vadd.f32 %v16618_v0, %v16617_v21 }
 0x5d1   : > { %v6144_v61 = vsel %vm2190_vm4, %v6141_v12, %v6143_v41  ;;  %v5594_v42 = vsel %vm1422_vm3, %v5591_v11, %v5593_v34 }
 0x5d2   : > { %v6254_v15 = vpop.f32.mrf.mxu3  ;;  %v5518_v27 = vadd.f32 %v16619_v48, %v5191_v54  ;;  %v16627_v54 = vld [vmem:[#allocation17_spill] sm:$0xff] }
 0x5d3   : > { %v13975_v7 = vadd.f32 %v6254_v15, %v6070_v36  ;;  %v5872_v36 = vsel %vm1806_vm5, %v5869_v19, %v5871_v22  ;;  %v8687_v15 = vld [vmem:[%s15551_s3 + $0x38] sm:$0xff] }
 0x5d4   : > { %v5705_v10 = vpop.f32.mrf.mxu1  ;;  %8609 = vmatmul.msk.f32.gmra.mxu2 %vm4916_vm8, %v5868_v49  ;;  %6574 = vmatpush.msra.mxu1 %v8687_v15 }
 0x5d5   : > { %v5795_v37 = vadd.f32 %v5705_v10, %v5516_v56  ;;  %v6146_v56 = vsel %vm2190_vm4, %v6143_v41, %v6145_v51  ;;  %v16620_v10 = vld [vmem:[#allocation72_spill] sm:$0xff] }
 0x5d6   : > { %v5597_v21 = vrot.slane %v16620_v10, 4  ;;  %v6149_v0 = vrot.slane %v16620_v10, 6 }
 0x5d7   : > { %8575 = vmatmul.msk.f32.gmra.mxu1 %vm4916_vm8, %v5590_v43  ;;  %v5984_v32 = vpop.f32.mrf.mxu2  ;;  %8641 = vmatmul.msk.f32.gmra.mxu3 %vm4916_vm8, %v6142_v3  ;;  %v6071_v58 = vadd.f32 %v5981_v52, %v5795_v37  ;;  %v5873_v37 = vrot.slane %v16620_v10, 5  ;;  %v16621_v43 = vld [vmem:[#allocation78_spill] sm:$0xff]  ;;  %v16622_v3 = vld [vmem:[#allocation172_spill] sm:$0xff] }
 0x5d9   : > { %v5874_v11 = vsel %vm1806_vm5, %v5871_v22, %v5873_v37 }
 0x5da   : > { %v6257_v23 = vpop.f32.mrf.mxu3 }
 0x5db   : > { %v13989_v8 = vadd.f32 %v6257_v23, %v6071_v58 }
 0x5dc   : > { %v5708_v4 = vpop.f32.mrf.mxu1  ;;  %8610 = vmatmul.msk.f32.gmra.mxu2 %vm4916_vm8, %v5870_v38  ;;  %v6148_v38 = vsel %vm2190_vm4, %v6145_v51, %v6147_v29 }
 0x5dd   : > { %v5796_v60 = vadd.f32 %v5708_v4, %v5517_v16  ;;  %v5596_v16 = vsel %vm1422_vm3, %v5593_v34, %v5595_v50 }
 0x5df   : > { %8576 = vmatmul.msk.f32.gmra.mxu1 %vm4916_vm8, %v5592_v63  ;;  %v5987_v39 = vpop.f32.mrf.mxu2  ;;  %8642 = vmatmul.msk.f32.gmra.mxu3 %vm4916_vm8, %v6144_v61  ;;  %v6072_v20 = vadd.f32 %v5984_v32, %v5796_v60  ;;  %v5194_v32 = vadd.f32 %v16622_v3, %v16621_v43  ;;  %v16624_v60 = vld [vmem:[#allocation80_spill] sm:$0xff]  ;;  %v16625_v61 = vld [vmem:[#allocation43_spill] sm:$0xff] }
 0x5e0   : > { %v5875_v63 = vrot.slane %v16624_v60, 5  ;;  %v6151_v10 = vrot.slane %v16624_v60, 6 }
 0x5e1   : > { %v5519_v58 = vadd.f32 %v16623_v28, %v5194_v32 }
 0x5e2   : > { %v6260_v52 = vpop.f32.mrf.mxu3  ;;  %v5876_v34 = vsel %vm1806_vm5, %v5873_v37, %v5875_v63 }
 0x5e3   : > { %v14006_v53 = vadd.f32 %v6260_v52, %v6072_v20 }
 0x5e4   : > { %v5711_v6 = vpop.f32.mrf.mxu1  ;;  %8611 = vmatmul.msk.f32.gmra.mxu2 %vm4916_vm8, %v5872_v36  ;;  %v6150_v36 = vsel %vm2190_vm4, %v6147_v29, %v6149_v0 }
 0x5e5   : > { %v5797_v12 = vadd.f32 %v5711_v6, %v5518_v27  ;;  %v5598_v27 = vsel %vm1422_vm3, %v5595_v50, %v5597_v21  ;;  %v16628_v6 = vld [vmem:[#allocation31_spill] sm:$0xff]  ;;  %v5879_v50 = vrot.slane %v13218_v13, 5 }
 0x5e6   : > { %v5601_v28 = vrot.slane %v16628_v6, 4 }
 0x5e7   : > { %8577 = vmatmul.msk.f32.gmra.mxu1 %vm4916_vm8, %v5594_v42  ;;  %v5990_v49 = vpop.f32.mrf.mxu2  ;;  %8643 = vmatmul.msk.f32.gmra.mxu3 %vm4916_vm8, %v6146_v56  ;;  %v6073_v25 = vadd.f32 %v5987_v39, %v5797_v12  ;;  %v16626_v39 = vld [vmem:[#allocation34_spill] sm:$0xff]  ;;  %v5877_v12 = vrot.slane %v16628_v6, 5 }
 0x5e8   : > { %v5197_v31 = vadd.f32 %v16626_v39, %v16625_v61  ;;  %v6155_v61 = vrot.slane %v13218_v13, 6 }
 0x5e9   : > { %v5878_v43 = vsel %vm1806_vm5, %v5875_v63, %v5877_v12  ;;  %v5603_v63 = vrot.slane %v13218_v13, 4  ;;  %v5605_v13 = vrot.slane %v13304_v55, 4 }
 0x5ea   : > { %v6263_v19 = vpop.f32.mrf.mxu3  ;;  %v5520_v20 = vadd.f32 %v16627_v54, %v5197_v31 }
 0x5eb   : > { %v14023_v23 = vadd.f32 %v6263_v19, %v6073_v25  ;;  %v6152_v25 = vsel %vm2190_vm4, %v6149_v0, %v6151_v10  ;;  %v16629_v0 = vld [vmem:[#allocation9_spill] sm:$0xff] }
 0x5ec   : > { %v5714_v41 = vpop.f32.mrf.mxu1  ;;  %8612 = vmatmul.msk.f32.gmra.mxu2 %vm4916_vm8, %v5874_v11  ;;  %v5880_v11 = vsel %vm1806_vm5, %v5877_v12, %v5879_v50  ;;  %v5883_v54 = vrot.slane %v16629_v0, 5  ;;  %v5885_v12 = vrot.slane %v13717_v47, 5 }
 0x5ed   : > { %v5798_v2 = vadd.f32 %v5714_v41, %v5519_v58  ;;  %v6153_v58 = vrot.slane %v16628_v6, 6 }
 0x5ef   : > { %8578 = vmatmul.msk.f32.gmra.mxu1 %vm4916_vm8, %v5596_v16  ;;  %v5993_v4 = vpop.f32.mrf.mxu2  ;;  %8644 = vmatmul.msk.f32.gmra.mxu3 %vm4916_vm8, %v6148_v38  ;;  %v6074_v30 = vadd.f32 %v5990_v49, %v5798_v2  ;;  %v5599_v49 = vrot.slane %v16624_v60, 4  ;;  %v6154_v16 = vsel %vm2190_vm4, %v6151_v10, %v6153_v58 }
 0x5f1   : > { %v5600_v32 = vsel %vm1422_vm3, %v5597_v21, %v5599_v49  ;;  %v5602_v2 = vsel %vm1422_vm3, %v5599_v49, %v5601_v28  ;;  %v5886_v49 = vsel %vm1806_vm5, %v5883_v54, %v5885_v12 }
 0x5f2   : > { %v6266_v22 = vpop.f32.mrf.mxu3 }
 0x5f3   : > { %v14037_v52 = vadd.f32 %v6266_v22, %v6074_v30  ;;  %v5604_v30 = vsel %vm1422_vm3, %v5601_v28, %v5603_v63  ;;  %v6156_v22 = vsel %vm2190_vm4, %v6153_v58, %v6155_v61  ;;  %v5609_v58 = vrot.slane %v13717_v47, 4 }
 0x5f4   : > { %v5717_v51 = vpop.f32.mrf.mxu1  ;;  %8613 = vmatmul.msk.f32.gmra.mxu2 %vm4916_vm8, %v5876_v34  ;;  %v6157_v34 = vrot.slane %v13304_v55, 6 }
 0x5f5   : > { %v5799_v48 = vadd.f32 %v5717_v51, %v5520_v20 }
 0x5f7   : > { %8579 = vmatmul.msk.f32.gmra.mxu1 %vm4916_vm8, %v5598_v27  ;;  %v14044_v15 = vpop.f32.mrf.mxu2  ;;  %8645 = vmatmul.msk.f32.gmra.mxu3 %vm4916_vm8, %v6150_v36  ;;  %v6075_v42 = vadd.f32 %v5993_v4, %v5799_v48  ;;  %v5881_v4 = vrot.slane %v13304_v55, 5  ;;  %v5606_v27 = vsel %vm1422_vm3, %v5603_v63, %v5605_v13  ;;  %v6158_v36 = vsel %vm2190_vm4, %v6155_v61, %v6157_v34 }
 0x5f8   : > { %v5607_v55 = vrot.slane %v16629_v0, 4 }
 0x5f9   : > { %v5882_v39 = vsel %vm1806_vm5, %v5879_v50, %v5881_v4  ;;  %v5884_v51 = vsel %vm1806_vm5, %v5881_v4, %v5883_v54  ;;  %v5887_v50 = vrot.slane %v13770_v9, 5 }
 0x5fa   : > { %v6269_v56 = vpop.f32.mrf.mxu3  ;;  %v5610_v4 = vsel %vm1422_vm3, %v5607_v55, %v5609_v58 }
 0x5fb   : > { %v14050_v37 = vadd.f32 %v6269_v56, %v6075_v42  ;;  %v6159_v56 = vrot.slane %v16629_v0, 6  ;;  %v6163_v0 = vrot.slane %v13770_v9, 6 }
 0x5fc   : > { %v14053_v3 = vpop.f32.mrf.mxu1  ;;  %8614 = vmatmul.msk.f32.gmra.mxu2 %vm4916_vm8, %v5878_v43  ;;  %v5608_v43 = vsel %vm1422_vm3, %v5605_v13, %v5607_v55  ;;  %v6165_v55 = vrot.slane %v13834_v57, 6 }
 0x5ff   : > { %8580 = vmatmul.msk.f32.gmra.mxu1 %vm4916_vm8, %v5600_v32  ;;  %v14059_v19 = vpop.f32.mrf.mxu2  ;;  %8646 = vmatmul.msk.f32.gmra.mxu3 %vm4916_vm8, %v6152_v25  ;;  %v6160_v32 = vsel %vm2190_vm4, %v6157_v34, %v6159_v56 }
 0x602   : > { %v14063_v29 = vpop.f32.mrf.mxu3 }
 0x604   : > { %v14068_v41 = vpop.f32.mrf.mxu1  ;;  %8615 = vmatmul.msk.f32.gmra.mxu2 %vm4916_vm8, %v5880_v11  ;;  %v6161_v11 = vrot.slane %v13717_v47, 6 }
 0x606   : > { %v6162_v63 = vsel %vm2190_vm4, %v6159_v56, %v6161_v11 }
 0x607   : > { %8581 = vmatmul.msk.f32.gmra.mxu1 %vm4916_vm8, %v5602_v2  ;;  %v14074_v38 = vpop.f32.mrf.mxu2  ;;  %8647 = vmatmul.msk.f32.gmra.mxu3 %vm4916_vm8, %v6154_v16  ;;  %v5888_v2 = vsel %vm1806_vm5, %v5885_v12, %v5887_v50  ;;  %v5613_v12 = vrot.slane %v13834_v57, 4 }
 0x60a   : > { %v14078_v60 = vpop.f32.mrf.mxu3 }
 0x60c   : > { %v14083_v31 = vpop.f32.mrf.mxu1  ;;  %8616 = vmatmul.msk.f32.gmra.mxu2 %vm4916_vm8, %v5882_v39  ;;  %v5889_v39 = vrot.slane %v13834_v57, 5 }
 0x60e   : > { %v5890_v54 = vsel %vm1806_vm5, %v5887_v50, %v5889_v39 }
 0x60f   : > { %8582 = vmatmul.msk.f32.gmra.mxu1 %vm4916_vm8, %v5604_v30  ;;  %v14089_v21 = vpop.f32.mrf.mxu2  ;;  %8648 = vmatmul.msk.f32.gmra.mxu3 %vm4916_vm8, %v6156_v22  ;;  %v5611_v22 = vrot.slane %v13770_v9, 4 }
 0x611   : > { %v5612_v34 = vsel %vm1422_vm3, %v5609_v58, %v5611_v22 }
 0x612   : > { %v14093_v20 = vpop.f32.mrf.mxu3 }
 0x614   : > { %v14098_v48 = vpop.f32.mrf.mxu1  ;;  %8617 = vmatmul.msk.f32.gmra.mxu2 %vm4916_vm8, %v5884_v51  ;;  %v6164_v51 = vsel %vm2190_vm4, %v6161_v11, %v6163_v0 }
 0x617   : > { %8583 = vmatmul.msk.f32.gmra.mxu1 %vm4916_vm8, %v5606_v27  ;;  %v14104_v6 = vpop.f32.mrf.mxu2  ;;  %8649 = vmatmul.msk.f32.gmra.mxu3 %vm4916_vm8, %v6158_v36 }
 0x61a   : > { %v14108_v42 = vpop.f32.mrf.mxu3 }
 0x61c   : > { %v14113_v10 = vpop.f32.mrf.mxu1  ;;  %8618 = vmatmul.msk.f32.gmra.mxu2 %vm4916_vm8, %v5886_v49  ;;  %v16635_v49 = vld [vmem:[#allocation98_spill] sm:$0xff] }
 0x61f   : > { %8584 = vmatmul.msk.f32.gmra.mxu1 %vm4916_vm8, %v5608_v43  ;;  %v14119_v25 = vpop.f32.mrf.mxu2  ;;  %8650 = vmatmul.msk.f32.gmra.mxu3 %vm4916_vm8, %v6160_v32  ;;  %v5614_v43 = vsel %vm1422_vm3, %v5611_v22, %v5613_v12  ;;  %v6166_v32 = vsel %vm2190_vm4, %v6163_v0, %v6165_v55  ;;  %v16642_v0 = vld [vmem:[#allocation107_spill] sm:$0xff]  ;;  %v16646_v55 = vld [vmem:[#allocation112_spill] sm:$0xff] }
 0x620   : > { %16630 = vst [vmem:[#allocation160_spill] sm:$0xff] %v14119_v25 }
 0x622   : > { %v14123_v28 = vpop.f32.mrf.mxu3 }
 0x624   : > { %v14128_v16 = vpop.f32.mrf.mxu1  ;;  %8619 = vmatmul.msk.f32.gmra.mxu2 %vm4916_vm8, %v5888_v2  ;;  %v16638_v2 = vld [vmem:[#allocation103_spill] sm:$0xff] }
 0x627   : > { %8585 = vmatmul.msk.f32.gmra.mxu1 %vm4916_vm8, %v5610_v4  ;;  %v14134_v61 = vpop.f32.mrf.mxu2  ;;  %8651 = vmatmul.msk.f32.gmra.mxu3 %vm4916_vm8, %v6162_v63  ;;  %v16640_v63 = vld [vmem:[#allocation118_spill] sm:$0xff] }
 0x628   : > { %16631 = vst [vmem:[#allocation60_spill] sm:$0xff] %v14134_v61  ;;  %v16662_v61 = vld [vmem:[#allocation102_spill] sm:$0xff] }
 0x62a   : > { %v14138_v30 = vpop.f32.mrf.mxu3 }
 0x62b   : > { %16632 = vst [vmem:[#allocation171_spill] sm:$0xff] %v14138_v30  ;;  %v16658_v30 = vld [vmem:[#allocation116_spill] sm:$0xff] }
 0x62c   : > { %v14143_v13 = vpop.f32.mrf.mxu1  ;;  %8620 = vmatmul.msk.f32.gmra.mxu2 %vm4916_vm8, %v5890_v54 }
 0x62f   : > { %8586 = vmatmul.msk.f32.gmra.mxu1 %vm4916_vm8, %v5612_v34  ;;  %v14149_v27 = vpop.f32.mrf.mxu2  ;;  %8652 = vmatmul.msk.f32.gmra.mxu3 %vm4916_vm8, %v6164_v51  ;;  %v16644_v34 = vld [vmem:[#allocation136_spill] sm:$0xff] }
 0x630   : > { %16633 = vst [vmem:[#allocation179_spill] sm:$0xff] %v14149_v27  ;;  %v16676_v27 = vld [vmem:[#allocation139_spill] sm:$0xff] }
 0x632   : > { %v14152_v36 = vpop.f32.mrf.mxu3 }
 0x633   : > { %16634 = vst [vmem:[#allocation14_spill] sm:$0xff] %v14152_v36 }
 0x634   : > { %v14156_v56 = vpop.f32.mrf.mxu1  ;;  %8721 = vmatmul.msk.f32.vlgmr.msra.gmra.mxu2 %vm4916_vm8, %v16635_v49 }
 0x637   : > { %8587 = vmatmul.msk.f32.gmra.mxu1 %vm4916_vm8, %v5614_v43  ;;  %v14163_v50 = vpop.f32.mrf.mxu2  ;;  %8653 = vmatmul.msk.f32.gmra.mxu3 %vm4916_vm8, %v6166_v32  ;;  %v16648_v43 = vld [vmem:[#allocation146_spill] sm:$0xff] }
 0x638   : > { %16636 = vst [vmem:[#allocation168_spill] sm:$0xff] %v14163_v50  ;;  %v16671_v50 = vld [vmem:[#allocation8_spill] sm:$0xff] }
 0x63a   : > { %v14166_v58 = vpop.f32.mrf.mxu3 }
 0x63b   : > { %16637 = vst [vmem:[#allocation51_spill] sm:$0xff] %v14166_v58  ;;  %v16668_v58 = vld [vmem:[#allocation15_spill] sm:$0xff] }
 0x63c   : > { %v14168_v11 = vpop.f32.mrf.mxu1  ;;  %8722 = vmatmul.msk.f32.gmra.mxu2 %vm4916_vm8, %v16638_v2 }
 0x63f   : > { %v14172_v4 = vpop.f32.mrf.mxu2  ;;  %8688 = vmatmul.msk.f32.vlgmr.msra.gmra.mxu1 %vm4916_vm8, %v16640_v63  ;;  %v16651_v63 = vld [vmem:[#allocation170_spill] sm:$0xff] }
 0x640   : > { %16639 = vst [vmem:[#allocation100_spill] sm:$0xff] %v14172_v4 }
 0x642   : > { %v14176_v39 = vpop.f32.mrf.mxu3 }
 0x643   : > { %16641 = vst [vmem:[#allocation174_spill] sm:$0xff] %v14176_v39 }
 0x644   : > { %v14178_v22 = vpop.f32.mrf.mxu1  ;;  %8723 = vmatmul.msk.f32.gmra.mxu2 %vm4916_vm8, %v16642_v0 }
 0x647   : > { %v14182_v54 = vpop.f32.mrf.mxu2  ;;  %8689 = vmatmul.msk.f32.gmra.mxu1 %vm4916_vm8, %v16644_v34  ;;  %v16653_v34 = vld [vmem:[#allocation159_spill] sm:$0xff] }
 0x648   : > { %16643 = vst [vmem:[#allocation90_spill] sm:$0xff] %v14182_v54 }
 0x64a   : > { %v14186_v51 = vpop.f32.mrf.mxu3 }
 0x64b   : > { %16645 = vst [vmem:[#allocation180_spill] sm:$0xff] %v14186_v51  ;;  %v16664_v51 = vld [vmem:[#allocation101_spill] sm:$0xff] }
 0x64c   : > { %v14188_v12 = vpop.f32.mrf.mxu1  ;;  %8724 = vmatmul.msk.f32.gmra.mxu2 %vm4916_vm8, %v16646_v55 }
 0x64f   : > { %v14192_v49 = vpop.f32.mrf.mxu2  ;;  %8690 = vmatmul.msk.f32.gmra.mxu1 %vm4916_vm8, %v16648_v43 }
 0x650   : > { %16647 = vst [vmem:[#allocation23_spill] sm:$0xff] %v14192_v49  ;;  %v16656_v49 = vld [vmem:[#allocation104_spill] sm:$0xff] }
 0x652   : > { %v14196_v32 = vpop.f32.mrf.mxu3 }
 0x653   : > { %16649 = vst [vmem:[#allocation163_spill] sm:$0xff] %v14196_v32 }
 0x654   : > { %v14198_v2 = vpop.f32.mrf.mxu1  ;;  %8725 = vmatmul.msk.f32.gmra.mxu2 %vm4916_vm8, %v16651_v63 }
 0x655   : > { %16650 = vst [vmem:[#allocation61_spill] sm:$0xff] %v14198_v2 }
 0x657   : > { %v14202_v0 = vpop.f32.mrf.mxu2  ;;  %8691 = vmatmul.msk.f32.gmra.mxu1 %vm4916_vm8, %v16653_v34 }
 0x658   : > { %16652 = vst [vmem:[#allocation113_spill] sm:$0xff] %v14202_v0  ;;  %v16661_v0 = vld [vmem:[#allocation119_spill] sm:$0xff] }
 0x65a   : > { %v14206_v36 = vpop.f32.mrf.mxu3 }
 0x65b   : > { %16654 = vst [vmem:[#allocation57_spill] sm:$0xff] %v14206_v36  ;;  %v16663_v36 = vld [vmem:[#allocation99_spill] sm:$0xff] }
 0x65c   : > { %v14208_v55 = vpop.f32.mrf.mxu1  ;;  %8726 = vmatmul.msk.f32.gmra.mxu2 %vm4916_vm8, %v16656_v49  ;;  %v5242_v25 = vadd.f32 %v16664_v51, %v16663_v36 }
 0x65d   : > { %16655 = vst [vmem:[#allocation155_spill] sm:$0xff] %v14208_v55  ;;  %v16670_v55 = vld [vmem:[#allocation141_spill] sm:$0xff] }
 0x65f   : > { %v14212_v43 = vpop.f32.mrf.mxu2  ;;  %8692 = vmatmul.msk.f32.gmra.mxu1 %vm4916_vm8, %v16658_v30  ;;  %v16667_v30 = vld [vmem:[#allocation117_spill] sm:$0xff] }
 0x660   : > { %16657 = vst [vmem:[#allocation97_spill] sm:$0xff] %v14212_v43  ;;  %v16666_v43 = vld [vmem:[#allocation105_spill] sm:$0xff] }
 0x661   : > { %v5535_v54 = vadd.f32 %v16666_v43, %v5242_v25  ;;  %v16673_v25 = vld [vmem:[#allocation133_spill] sm:$0xff] }
 0x662   : > { %v14216_v32 = vpop.f32.mrf.mxu3 }
 0x663   : > { %16659 = vst [vmem:[#allocation111_spill] sm:$0xff] %v14216_v32 }
 0x664   : > { %v14218_v63 = vpop.f32.mrf.mxu1  ;;  %8727 = vmatmul.msk.f32.gmra.mxu2 %vm4916_vm8, %v16661_v0  ;;  %v16669_v0 = vld [vmem:[#allocation110_spill] sm:$0xff] }
 0x665   : > { %16660 = vst [vmem:[#allocation106_spill] sm:$0xff] %v14218_v63  ;;  %v5245_v2 = vadd.f32 %v16670_v55, %v16669_v0 }
 0x667   : > { %v6038_v34 = vpop.f32.mrf.mxu2  ;;  %8693 = vmatmul.msk.f32.gmra.mxu1 %vm4916_vm8, %v16662_v61  ;;  %v5536_v36 = vadd.f32 %v16671_v50, %v5245_v2  ;;  %v16678_v50 = vld [vmem:[#allocation145_spill] sm:$0xff] }
 0x66a   : > { %v14226_v49 = vpop.f32.mrf.mxu3 }
 0x66b   : > { %16665 = vst [vmem:[#allocation121_spill] sm:$0xff] %v14226_v49 }
 0x66c   : > { %v5762_v39 = vpop.f32.mrf.mxu1  ;;  %8728 = vmatmul.msk.f32.gmra.mxu2 %vm4916_vm8, %v16667_v30 }
 0x66d   : > { %v5814_v32 = vadd.f32 %v5762_v39, %v5535_v54  ;;  %v16674_v39 = vld [vmem:[#allocation126_spill] sm:$0xff] }
 0x66f   : > { %v6041_v63 = vpop.f32.mrf.mxu2  ;;  %8694 = vmatmul.msk.f32.gmra.mxu1 %vm4916_vm8, %v16668_v58  ;;  %v6090_v61 = vadd.f32 %v6038_v34, %v5814_v32  ;;  %v16675_v58 = vld [vmem:[#allocation149_spill] sm:$0xff]  ;;  %v16677_v32 = vld [vmem:[#allocation55_spill] sm:$0xff] }
 0x670   : > { %v5248_v55 = vadd.f32 %v16676_v27, %v16675_v58  ;;  %v16683_v27 = vld [vmem:[#allocation137_spill] sm:$0xff] }
 0x672   : > { %v6314_v4 = vpop.f32.mrf.mxu3  ;;  %v5537_v34 = vadd.f32 %v16677_v32, %v5248_v55  ;;  %v16684_v32 = vld [vmem:[#allocation35_spill] sm:$0xff] }
 0x673   : > { %v14236_v51 = vadd.f32 %v6314_v4, %v6090_v61  ;;  %v16679_v61 = vld [vmem:[#allocation20_spill] sm:$0xff] }
 0x674   : > { %v5765_v49 = vpop.f32.mrf.mxu1  ;;  %8729 = vmatmul.msk.f32.gmra.mxu2 %vm4916_vm8, %v16673_v25  ;;  %v16681_v25 = vld [vmem:[#allocation157_spill] sm:$0xff] }
 0x675   : > { %16672 = vst [vmem:[#allocation93_spill] sm:$0xff] %v14236_v51  ;;  %v5815_v43 = vadd.f32 %v5765_v49, %v5536_v36  ;;  %v16680_v36 = vld [vmem:[#allocation153_spill] sm:$0xff] }
 0x677   : > { %v6044_v30 = vpop.f32.mrf.mxu2  ;;  %8695 = vmatmul.msk.f32.gmra.mxu1 %vm4916_vm8, %v16674_v39  ;;  %v14242_v54 = vadd.f32 %v6041_v63, %v5815_v43  ;;  %v5251_v63 = vadd.f32 %v16681_v25, %v16680_v36  ;;  %v16682_v43 = vld [vmem:[#allocation164_spill] sm:$0xff] }
 0x679   : > { %v5538_v39 = vadd.f32 %v16682_v43, %v5251_v63  ;;  %v16688_v43 = vld [vmem:[#allocation147_spill] sm:$0xff] }
 0x67c   : > { %v5768_v0 = vpop.f32.mrf.mxu1  ;;  %8730 = vmatmul.msk.f32.gmra.mxu2 %vm4916_vm8, %v16678_v50  ;;  %v16685_v50 = vld [vmem:[#allocation19_spill] sm:$0xff] }
 0x67d   : > { %v5816_v4 = vadd.f32 %v5768_v0, %v5537_v34 }
 0x67f   : > { %v6047_v2 = vpop.f32.mrf.mxu2  ;;  %8696 = vmatmul.msk.f32.gmra.mxu1 %vm4916_vm8, %v16679_v61  ;;  %v14251_v49 = vadd.f32 %v6044_v30, %v5816_v4  ;;  %v16686_v61 = vld [vmem:[#allocation127_spill] sm:$0xff] }
 0x684   : > { %v5771_v51 = vpop.f32.mrf.mxu1  ;;  %8731 = vmatmul.msk.f32.gmra.mxu2 %vm4916_vm8, %v16683_v27 }
 0x685   : > { %v5817_v58 = vadd.f32 %v5771_v51, %v5538_v39  ;;  %v16687_v51 = vld [vmem:[#allocation156_spill] sm:$0xff] }
 0x687   : > { %v6050_v55 = vpop.f32.mrf.mxu2  ;;  %8697 = vmatmul.msk.f32.gmra.mxu1 %vm4916_vm8, %v16684_v32  ;;  %v14260_v34 = vadd.f32 %v6047_v2, %v5817_v58  ;;  %v16690_v32 = vld [vmem:[#allocation144_spill] sm:$0xff] }
 0x68c   : > { %v5774_v0 = vpop.f32.mrf.mxu1  ;;  %8732 = vmatmul.msk.f32.gmra.mxu2 %vm4916_vm8, %v16685_v50  ;;  %v14283_v50 = vpop.f32.mrf.mxu0 }
 0x68d   : > { %v5818_v30 = vadd.f32 %v5774_v0, %v13686_v40  ;;  %v16689_v40 = vld [vmem:[#allocation158_spill] sm:$0xff] }
 0x68f   : > { %v6053_v4 = vpop.f32.mrf.mxu2  ;;  %8698 = vmatmul.msk.f32.gmra.mxu1 %vm4916_vm8, %v16686_v61  ;;  %v14267_v36 = vadd.f32 %v6050_v55, %v5818_v30  ;;  %v16691_v30 = vld [vmem:[#allocation177_spill] sm:$0xff] }
 0x694   : > { %v5777_v25 = vpop.f32.mrf.mxu1  ;;  %8733 = vmatmul.msk.f32.gmra.mxu2 %vm4916_vm8, %v16687_v51 }
 0x695   : > { %v5819_v63 = vadd.f32 %v5777_v25, %v13747_v44  ;;  %v16692_v25 = vld [vmem:[#allocation154_spill] sm:$0xff] }
 0x697   : > { %v6056_v2 = vpop.f32.mrf.mxu2  ;;  %8699 = vmatmul.msk.f32.gmra.mxu1 %vm4916_vm8, %v16688_v43  ;;  %v14274_v39 = vadd.f32 %v6053_v4, %v5819_v63  ;;  %v16694_v43 = vld [vmem:[#allocation18_spill] sm:$0xff] }
 0x69c   : > { %v5780_v27 = vpop.f32.mrf.mxu1  ;;  %8734 = vmatmul.msk.f32.gmra.mxu2 %vm4916_vm8, %v16689_v40  ;;  %v16695_v40 = vld [vmem:[#allocation175_spill] sm:$0xff] }
 0x69d   : > { %v5820_v58 = vadd.f32 %v5780_v27, %v13822_v18  ;;  %v14292_v18 = vpop.f32.mrf.mxu0 }
 0x69f   : > { %v6059_v55 = vpop.f32.mrf.mxu2  ;;  %8700 = vmatmul.msk.f32.gmra.mxu1 %vm4916_vm8, %v16690_v32  ;;  %v14281_v0 = vadd.f32 %v6056_v2, %v5820_v58 }
 0x6a4   : > { %v5783_v44 = vpop.f32.mrf.mxu1  ;;  %8735 = vmatmul.msk.f32.gmra.mxu2 %vm4916_vm8, %v16691_v30  ;;  %v16698_v30 = vld [vmem:[#allocation37_spill] sm:$0xff] }
 0x6a5   : > { %v5821_v4 = vadd.f32 %v5783_v44, %v13876_v14  ;;  %v14301_v14 = vpop.f32.mrf.mxu0  ;;  %v16697_v44 = vld [vmem:[#allocation36_spill] sm:$0xff] }
 0x6a7   : > { %v6062_v61 = vpop.f32.mrf.mxu2  ;;  %8701 = vmatmul.msk.f32.gmra.mxu1 %vm4916_vm8, %v16692_v25  ;;  %v14290_v51 = vadd.f32 %v6059_v55, %v5821_v4 }
 0x6a9   : > { %16693 = vst [vmem:[#allocation66_spill] sm:$0xff] %v14290_v51 }
 0x6ac   : > { %v5786_v63 = vpop.f32.mrf.mxu1  ;;  %8736 = vmatmul.msk.f32.gmra.mxu2 %vm4916_vm8, %v16694_v43 }
 0x6ad   : > { %v5822_v2 = vadd.f32 %v5786_v63, %v13895_v1  ;;  %v16700_v1 = vld [vmem:[#allocation2_spill] sm:$0xff] }
 0x6ae   : > { %v6503_v63 = vadd.f32 %v16700_v1, %v13945_v33  ;;  %v16704_v1 = vld [vmem:[#allocation63_spill] sm:$0xff] }
 0x6af   : > { %v6065_v27 = vpop.f32.mrf.mxu2  ;;  %8702 = vmatmul.msk.f32.gmra.mxu1 %vm4916_vm8, %v16695_v40  ;;  %v14299_v58 = vadd.f32 %v6062_v61, %v5822_v2  ;;  %v16701_v61 = vld [vmem:[#allocation28_spill] sm:$0xff]  ;;  %v14314_v40 = vpop.f32.mrf.mxu0 }
 0x6b1   : > { %16696 = vst [vmem:[#allocation56_spill] sm:$0xff] %v14299_v58 }
 0x6b4   : > { %v5789_v32 = vpop.f32.mrf.mxu1  ;;  %8737 = vmatmul.msk.f32.gmra.mxu2 %vm4916_vm8, %v16697_v44  ;;  %v16702_v44 = vld [vmem:[#allocation70_spill] sm:$0xff] }
 0x6b5   : > { %v5823_v55 = vadd.f32 %v5789_v32, %v13921_v24  ;;  %v16703_v32 = vld [vmem:[#allocation45_spill] sm:$0xff] }
 0x6b6   : > { %v6504_v33 = vadd.f32 %v16703_v32, %v13961_v62  ;;  %v16708_v62 = vld [vmem:[#allocation50_spill] sm:$0xff] }
 0x6b7   : > { %8703 = vmatmul.msk.f32.gmra.mxu1 %vm4916_vm8, %v16698_v30  ;;  %v6745_v4 = vpop.f32.mrf.mxu2  ;;  %v14308_v25 = vadd.f32 %v6065_v27, %v5823_v55  ;;  %v14321_v27 = vld [vmem:[%s15552_s4] ss:$0 sm:$0xff] }
 0x6b9   : > { %16699 = vst [vmem:[#allocation115_spill] sm:$0xff] %v14308_v25 }
 0x6bc   : > { %v6576_v43 = vpop.f32.mrf.mxu1  ;;  %8738 = vmatmul.msk.f32.gmra.mxu2 %vm4916_vm8, %v16701_v61 }
 0x6bd   : > { %v6672_v2 = vadd.f32 %v6576_v43, %v6503_v63  ;;  %v16705_v43 = vld [vmem:[#allocation81_spill] sm:$0xff] }
 0x6bf   : > { %v6841_v58 = vadd.f32 %v6745_v4, %v6672_v2  ;;  %8704 = vmatmul.msk.f32.gmra.mxu1 %vm4916_vm8, %v16702_v44  ;;  %v6748_v24 = vpop.f32.mrf.mxu2  ;;  %v14330_v2 = vpop.f32.mrf.mxu0 }
 0x6c1   : > { %v6877_v55 = vadd.f32 %v14321_v27, %v6841_v58  ;;  %v6505_v58 = vadd.f32 %v16708_v62, %v13975_v7 }
 0x6c3   : > { %v14332_v44 = vmax.f32 %v6877_v55, 0.0 }
 0x6c4   : > { %v6579_v30 = vpop.f32.mrf.mxu1  ;;  %8739 = vmatmul.msk.f32.gmra.mxu2 %vm4916_vm8, %v16704_v1 }
 0x6c5   : > { %v6673_v63 = vadd.f32 %v6579_v30, %v6504_v33  ;;  %16706 = vst [vmem:[#allocation166_spill] sm:$0xff] %v14332_v44  ;;  %v6968_v32 = vrot.slane %v14332_v44, 1  ;;  %v16709_v33 = vld [vmem:[#allocation33_spill] sm:$0xff] }
 0x6c7   : > { %v6842_v4 = vadd.f32 %v6748_v24, %v6673_v63  ;;  %8705 = vmatmul.msk.f32.gmra.mxu1 %vm4916_vm8, %v16705_v43  ;;  %v6751_v61 = vpop.f32.mrf.mxu2  ;;  %v7075_v24 = vrot.slane %v14332_v44, 2  ;;  %v16712_v43 = vld [vmem:[#allocation54_spill] sm:$0xff]  ;;  %v16715_v44 = vld [vmem:[#allocation32_spill] sm:$0xff] }
 0x6c9   : > { %v6878_v25 = vadd.f32 %v14321_v27, %v6842_v4 }
 0x6cb   : > { %v14335_v51 = vmax.f32 %v6878_v25, 0.0 }
 0x6cc   : > { %v6582_v1 = vpop.f32.mrf.mxu1  ;;  %8740 = vmatmul.msk.f32.gmra.mxu2 %vm4916_vm8, %v16709_v33 }
 0x6cd   : > { %16707 = vst [vmem:[#allocation173_spill] sm:$0xff] %v14335_v51  ;;  %v15769_v30 = vrot.slane %v14335_v51, 1  ;;  %v15770_v55 = vrot.slane %v14335_v51, 2  ;;  %v6674_v63 = vadd.f32 %v6582_v1, %v6505_v58  ;;  %v14361_v58 = vpop.f32.mrf.mxu0  ;;  %v16724_v51 = vld [vmem:[#allocation3_spill] sm:$0xff] }
 0x6cf   : > { %v14348_v25 = vsel %vm454_vm2, %v6968_v32, %v15769_v30  ;;  %v14353_v7 = vsel %vm635_vm0, %v7075_v24, %v15770_v55  ;;  %v14355_v4 = vadd.f32 %v6751_v61, %v6674_v63  ;;  %8706 = vmatmul.msk.f32.gmra.mxu1 %vm4916_vm8, %v16712_v43  ;;  %v6754_v62 = vpop.f32.mrf.mxu2  ;;  %v6506_v32 = vadd.f32 %v13696_v26, %v13989_v8  ;;  %v16713_v30 = vld [vmem:[#allocation26_spill] sm:$0xff]  ;;  %v16714_v61 = vld [vmem:[#allocation65_spill] sm:$0xff] }
 0x6d0   : > { %16710 = vst [vmem:[#allocation109_spill] sm:$0xff] %v14348_v25  ;;  %v6507_v43 = vadd.f32 %v13763_v35, %v14006_v53 }
 0x6d1   : > { %16711 = vst [vmem:[#allocation128_spill] sm:$0xff] %v14353_v7 }
 0x6d4   : > { %v6585_v1 = vpop.f32.mrf.mxu1  ;;  %8741 = vmatmul.msk.f32.gmra.mxu2 %vm4916_vm8, %v16713_v30  ;;  %v16716_v30 = vld [vmem:[#allocation74_spill] sm:$0xff] }
 0x6d5   : > { %v6675_v24 = vadd.f32 %v6585_v1, %v6506_v32  ;;  %v14373_v33 = vpop.f32.mrf.mxu0  ;;  %v6508_v32 = vadd.f32 %v13843_v59, %v14023_v23  ;;  %v16720_v59 = vld [vmem:[#allocation39_spill] sm:$0xff]  ;;  %v16721_v23 = vld [vmem:[#allocation73_spill] sm:$0xff] }
 0x6d7   : > { %v14367_v55 = vadd.f32 %v6754_v62, %v6675_v24  ;;  %8707 = vmatmul.msk.f32.gmra.mxu1 %vm4916_vm8, %v16714_v61  ;;  %v6757_v63 = vpop.f32.mrf.mxu2  ;;  %v16717_v24 = vld [vmem:[#allocation95_spill] sm:$0xff] }
 0x6dc   : > { %v6588_v25 = vpop.f32.mrf.mxu1  ;;  %8742 = vmatmul.msk.f32.gmra.mxu2 %vm4916_vm8, %v16715_v44  ;;  %v16718_v44 = vld [vmem:[#allocation83_spill] sm:$0xff] }
 0x6dd   : > { %v6676_v26 = vadd.f32 %v6588_v25, %v6507_v43  ;;  %v14385_v53 = vpop.f32.mrf.mxu0 }
 0x6df   : > { %v14377_v8 = vadd.f32 %v6757_v63, %v6676_v26  ;;  %8708 = vmatmul.msk.f32.gmra.mxu1 %vm4916_vm8, %v16716_v30  ;;  %v6760_v62 = vpop.f32.mrf.mxu2  ;;  %v6509_v63 = vadd.f32 %v13913_v46, %v14037_v52  ;;  %v16719_v26 = vld [vmem:[#allocation82_spill] sm:$0xff]  ;;  %v5200_v30 = vadd.f32 %v16721_v23, %v16720_v59  ;;  %v6510_v52 = vadd.f32 %v13943_v45, %v14050_v37 }
 0x6e4   : > { %v6591_v1 = vpop.f32.mrf.mxu1  ;;  %8743 = vmatmul.msk.f32.gmra.mxu2 %vm4916_vm8, %v16717_v24 }
 0x6e5   : > { %v6677_v35 = vadd.f32 %v6591_v1, %v6508_v32  ;;  %v16722_v32 = vld [vmem:[#allocation44_spill] sm:$0xff] }
 0x6e6   : > { %v5521_v1 = vadd.f32 %v16722_v32, %v5200_v30  ;;  %v16727_v30 = vld [vmem:[#allocation16_spill] sm:$0xff] }
 0x6e7   : > { %v14387_v61 = vadd.f32 %v6760_v62, %v6677_v35  ;;  %8709 = vmatmul.msk.f32.gmra.mxu1 %vm4916_vm8, %v16718_v44  ;;  %v6763_v25 = vpop.f32.mrf.mxu2  ;;  %v16723_v62 = vld [vmem:[#allocation96_spill] sm:$0xff]  ;;  %v14402_v44 = vpop.f32.mrf.mxu0 }
 0x6e8   : > { %v5800_v46 = vadd.f32 %v14053_v3, %v5521_v1  ;;  %v16729_v3 = vld [vmem:[#allocation129_spill] sm:$0xff] }
 0x6ec   : > { %v6594_v43 = vpop.f32.mrf.mxu1  ;;  %8744 = vmatmul.msk.f32.gmra.mxu2 %vm4916_vm8, %v16719_v26 }
 0x6ed   : > { %v6678_v24 = vadd.f32 %v6594_v43, %v6509_v63  ;;  %v16725_v63 = vld [vmem:[#allocation69_spill] sm:$0xff]  ;;  %v16726_v43 = vld [vmem:[#allocation48_spill] sm:$0xff] }
 0x6ee   : > { %v5203_v59 = vadd.f32 %v16726_v43, %v16725_v63  ;;  %v16730_v43 = vld [vmem:[#allocation6_spill] sm:$0xff] }
 0x6ef   : > { %v14398_v7 = vadd.f32 %v6763_v25, %v6678_v24  ;;  %8710 = vmatmul.msk.f32.gmra.mxu1 %vm4916_vm8, %v16723_v62  ;;  %v6766_v35 = vpop.f32.mrf.mxu2  ;;  %v6076_v25 = vadd.f32 %v14044_v15, %v5800_v46  ;;  %v14419_v1 = vpop.f32.mrf.mxu0  ;;  %v16731_v15 = vld [vmem:[#allocation59_spill] sm:$0xff]  ;;  %v16732_v46 = vld [vmem:[#allocation42_spill] sm:$0xff] }
 0x6f0   : > { %v5522_v24 = vadd.f32 %v16727_v30, %v5203_v59  ;;  %v16733_v59 = vld [vmem:[#allocation21_spill] sm:$0xff]  ;;  %v16735_v30 = vld [vmem:[#allocation4_spill] sm:$0xff] }
 0x6f1   : > { %v6352_v32 = vadd.f32 %v14063_v29, %v6076_v25 }
 0x6f2   : > { %v5801_v37 = vadd.f32 %v14068_v41, %v5522_v24  ;;  %v6706_v24 = vrot.slane %v13717_v47, 2 }
 0x6f4   : > { %v6597_v26 = vpop.f32.mrf.mxu1  ;;  %8745 = vmatmul.msk.f32.gmra.mxu2 %vm4916_vm8, %v16724_v51  ;;  %v6511_v51 = vadd.f32 %v14283_v50, %v6352_v32  ;;  %v6077_v29 = vadd.f32 %v14059_v19, %v5801_v37  ;;  %v16736_v19 = vld [vmem:[#allocation7_spill] sm:$0xff] }
 0x6f5   : > { %v6679_v23 = vadd.f32 %v6597_v26, %v6510_v52  ;;  %v5206_v52 = vadd.f32 %v16732_v46, %v16731_v15  ;;  %v14427_v26 = vpop.f32.mrf.mxu3  ;;  %v6707_v37 = vsel %vm635_vm0, %v16736_v19, %v6706_v24  ;;  %v6537_v19 = vrot.slane %v13717_v47, 1 }
 0x6f6   : > { %v6353_v41 = vadd.f32 %v14078_v60, %v6077_v29  ;;  %v16737_v60 = vld [vmem:[#allocation68_spill] sm:$0xff] }
 0x6f7   : > { %v14414_v62 = vadd.f32 %v6766_v35, %v6679_v23  ;;  %8711 = vmatmul.msk.f32.gmra.mxu1 %vm4916_vm8, %v16729_v3  ;;  %v6769_v45 = vpop.f32.mrf.mxu2  ;;  %v5523_v25 = vadd.f32 %v16733_v59, %v5206_v52  ;;  %v16739_v52 = vld [vmem:[#allocation27_spill] sm:$0xff] }
 0x6f8   : > { %v6512_v3 = vadd.f32 %v14292_v18, %v6353_v41  ;;  %v16741_v18 = vld [vmem:[#allocation114_spill] sm:$0xff] }
 0x6f9   : > { %16728 = vst [vmem:[#allocation176_spill] sm:$0xff] %v14414_v62  ;;  %v5802_v32 = vadd.f32 %v14083_v31, %v5523_v25  ;;  %v6708_v25 = vrot.slane %v13770_v9, 2 }
 0x6fb   : > { %v6078_v15 = vadd.f32 %v14074_v38, %v5802_v32  ;;  %v6709_v32 = vsel %vm635_vm0, %v6706_v24, %v6708_v25 }
 0x6fc   : > { %v6600_v63 = vpop.f32.mrf.mxu1  ;;  %8746 = vmatmul.msk.f32.gmra.mxu2 %vm4916_vm8, %v16730_v43 }
 0x6fd   : > { %v6680_v35 = vadd.f32 %v6600_v63, %v6511_v51  ;;  %v14440_v51 = vpop.f32.mrf.mxu0  ;;  %v6354_v31 = vadd.f32 %v14093_v20, %v6078_v15  ;;  %v14453_v41 = vpop.f32.mrf.mxu3  ;;  %v16742_v20 = vld [vmem:[#allocation77_spill] sm:$0xff]  ;;  %v16746_v15 = vld [vmem:[#allocation75_spill] sm:$0xff] }
 0x6ff   : > { %v14431_v23 = vadd.f32 %v6769_v45, %v6680_v35  ;;  %8712 = vmatmul.msk.f32.gmra.mxu1 %vm4916_vm8, %v16735_v30  ;;  %v6772_v50 = vpop.f32.mrf.mxu2  ;;  %v16738_v45 = vld [vmem:[#allocation62_spill] sm:$0xff]  ;;  %v6513_v38 = vadd.f32 %v14301_v14, %v6354_v31  ;;  %v6539_v31 = vrot.slane %v13770_v9, 1  ;;  %v6712_v9 = vrot.slane %v13916_v5, 2 }
 0x700   : > { %v5209_v43 = vadd.f32 %v16738_v45, %v16737_v60 }
 0x701   : > { %16734 = vst [vmem:[#allocation123_spill] sm:$0xff] %v14431_v23  ;;  %v16775_v23 = vld [vmem:[#allocation120_spill] sm:$0xff] }
 0x702   : > { %v5524_v29 = vadd.f32 %v16739_v52, %v5209_v43  ;;  %v16745_v43 = vld [vmem:[#allocation46_spill] sm:$0xff]  ;;  %v6710_v52 = vrot.slane %v13834_v57, 2 }
 0x704   : > { %v6603_v63 = vpop.f32.mrf.mxu1  ;;  %8747 = vmatmul.msk.f32.gmra.mxu2 %vm4916_vm8, %v6707_v37  ;;  %v5803_v30 = vadd.f32 %v14098_v48, %v5524_v29  ;;  %v6538_v48 = vsel %vm454_vm2, %v16745_v43, %v6537_v19 }
 0x705   : > { %v6681_v46 = vadd.f32 %v6603_v63, %v6512_v3  ;;  %v14463_v45 = vpop.f32.mrf.mxu0 }
 0x706   : > { %v6079_v63 = vadd.f32 %v14089_v21, %v5803_v30  ;;  %16744 = vst [vmem:[#allocation85_spill] sm:$0xff] %v14463_v45  ;;  %v14474_v21 = vpop.f32.mrf.mxu3  ;;  %v6711_v30 = vsel %vm635_vm0, %v6708_v25, %v6710_v52  ;;  %v6541_v25 = vrot.slane %v13834_v57, 1  ;;  %v6714_v57 = vrot.slane %v13938_v17, 2  ;;  %v16787_v45 = vld [vmem:[#allocation61_spill] sm:$0xff] }
 0x707   : > { %v14448_v35 = vadd.f32 %v6772_v50, %v6681_v46  ;;  %8713 = vmatmul.msk.f32.gmra.mxu1 %vm4916_vm8, %v16741_v18  ;;  %v6775_v59 = vpop.f32.mrf.mxu2  ;;  %v16743_v50 = vld [vmem:[#allocation71_spill] sm:$0xff] }
 0x708   : > { %v5212_v37 = vadd.f32 %v16743_v50, %v16742_v20  ;;  %v6355_v14 = vadd.f32 %v14108_v42, %v6079_v63  ;;  %v6542_v63 = vsel %vm454_vm2, %v6539_v31, %v6541_v25 }
 0x709   : > { %16740 = vst [vmem:[#allocation138_spill] sm:$0xff] %v14448_v35 }
 0x70a   : > { %v5525_v47 = vadd.f32 %v16746_v15, %v5212_v37  ;;  %v6514_v18 = vadd.f32 %v14314_v40, %v6355_v14  ;;  %v6715_v15 = vsel %vm635_vm0, %v6712_v9, %v6714_v57 }
 0x70c   : > { %v6606_v3 = vpop.f32.mrf.mxu1  ;;  %8748 = vmatmul.msk.f32.gmra.mxu2 %vm4916_vm8, %v6709_v32  ;;  %v5804_v29 = vadd.f32 %v14113_v10, %v5525_v47  ;;  %v6540_v32 = vsel %vm454_vm2, %v6537_v19, %v6539_v31 }
 0x70d   : > { %v6682_v60 = vadd.f32 %v6606_v3, %v6513_v38  ;;  %v14487_v40 = vpop.f32.mrf.mxu0 }
 0x70e   : > { %v6080_v42 = vadd.f32 %v14104_v6, %v5804_v29  ;;  %16749 = vst [vmem:[#allocation30_spill] sm:$0xff] %v14487_v40  ;;  %v6713_v6 = vsel %vm635_vm0, %v6710_v52, %v6712_v9  ;;  %v14492_v37 = vpop.f32.mrf.mxu3  ;;  %v6545_v29 = vrot.slane %v13938_v17, 1  ;;  %v16767_v40 = vld [vmem:[#allocation38_spill] sm:$0xff] }
 0x70f   : > { %v14469_v46 = vadd.f32 %v6775_v59, %v6682_v60  ;;  %8714 = vmatmul.msk.f32.gmra.mxu1 %vm4916_vm8, %v6538_v48  ;;  %v6778_v24 = vpop.f32.mrf.mxu2 }
 0x710   : > { %v6356_v3 = vadd.f32 %v14123_v28, %v6080_v42 }
 0x711   : > { %16747 = vst [vmem:[#allocation108_spill] sm:$0xff] %v14469_v46 }
 0x712   : > { %v6515_v50 = vadd.f32 %v14330_v2, %v6356_v3  ;;  %v6543_v2 = vrot.slane %v13916_v5, 1  ;;  %v16756_v3 = vld [vmem:[#allocation84_spill] sm:$0xff] }
 0x714   : > { %v6609_v38 = vpop.f32.mrf.mxu1  ;;  %8749 = vmatmul.msk.f32.gmra.mxu2 %vm4916_vm8, %v6711_v30  ;;  %v6546_v5 = vsel %vm454_vm2, %v6543_v2, %v6545_v29 }
 0x715   : > { %v6683_v59 = vadd.f32 %v6609_v38, %v6514_v18  ;;  %v14502_v48 = vpop.f32.mrf.mxu0 }
 0x716   : > { %16752 = vst [vmem:[#allocation29_spill] sm:$0xff] %v14502_v48  ;;  %v14509_v14 = vpop.f32.mrf.mxu3  ;;  %v16766_v48 = vld [vmem:[#allocation86_spill] sm:$0xff] }
 0x717   : > { %v14483_v20 = vadd.f32 %v6778_v24, %v6683_v59  ;;  %8715 = vmatmul.msk.f32.gmra.mxu1 %vm4916_vm8, %v6540_v32  ;;  %v6781_v10 = vpop.f32.mrf.mxu2  ;;  %v6544_v24 = vsel %vm454_vm2, %v6541_v25, %v6543_v2  ;;  %v16758_v25 = vld [vmem:[#allocation47_spill] sm:$0xff]  ;;  %v16762_v2 = vld [vmem:[#allocation5_spill] sm:$0xff] }
 0x719   : > { %16748 = vst [vmem:[#allocation167_spill] sm:$0xff] %v14483_v20  ;;  %v16768_v20 = vld [vmem:[#allocation10_spill] sm:$0xff] }
 0x71c   : > { %v6612_v19 = vpop.f32.mrf.mxu1  ;;  %8750 = vmatmul.msk.f32.gmra.mxu2 %vm4916_vm8, %v6713_v6 }
 0x71d   : > { %v6684_v28 = vadd.f32 %v6612_v19, %v6515_v50  ;;  %v14516_v31 = vpop.f32.mrf.mxu0  ;;  %v16759_v50 = vld [vmem:[#allocation134_spill] sm:$0xff]  ;;  %v16760_v19 = vld [vmem:[#allocation91_spill] sm:$0xff] }
 0x71e   : > { %16754 = vst [vmem:[#allocation142_spill] sm:$0xff] %v14516_v31  ;;  %v14525_v38 = vpop.f32.mrf.mxu3  ;;  %v5224_v6 = vadd.f32 %v16759_v50, %v16758_v25  ;;  %v16771_v25 = vld [vmem:[#allocation94_spill] sm:$0xff] }
 0x71f   : > { %v14496_v60 = vadd.f32 %v6781_v10, %v6684_v28  ;;  %8716 = vmatmul.msk.f32.gmra.mxu1 %vm4916_vm8, %v6542_v63  ;;  %v14499_v43 = vpop.f32.mrf.mxu2  ;;  %v16757_v10 = vld [vmem:[#allocation53_spill] sm:$0xff]  ;;  %v16761_v28 = vld [vmem:[#allocation88_spill] sm:$0xff] }
 0x720   : > { %16751 = vst [vmem:[#allocation40_spill] sm:$0xff] %v14499_v43  ;;  %v5221_v9 = vadd.f32 %v16757_v10, %v16756_v3  ;;  %v5227_v63 = vadd.f32 %v16761_v28, %v16760_v19  ;;  %v16769_v3 = vld [vmem:[#allocation41_spill] sm:$0xff] }
 0x721   : > { %16750 = vst [vmem:[#allocation25_spill] sm:$0xff] %v14496_v60  ;;  %v5215_v60 = vadd.f32 %v16767_v40, %v16766_v48  ;;  %v16770_v10 = vld [vmem:[#allocation89_spill] sm:$0xff]  ;;  %v16776_v40 = vld [vmem:[#allocation178_spill] sm:$0xff] }
 0x722   : > { %v5530_v46 = vadd.f32 %v16768_v20, %v5227_v63  ;;  %v5218_v35 = vadd.f32 %v16770_v10, %v16769_v3  ;;  %v5236_v48 = vadd.f32 %v16776_v40, %v16775_v23  ;;  %v16778_v3 = vld [vmem:[#allocation124_spill] sm:$0xff]  ;;  %v16779_v10 = vld [vmem:[#allocation130_spill] sm:$0xff]  ;;  %v16784_v40 = vld [vmem:[#allocation179_spill] sm:$0xff] }
 0x724   : > { %v14506_v47 = vpop.f32.mrf.mxu1  ;;  %8751 = vmatmul.msk.f32.gmra.mxu2 %vm4916_vm8, %v6715_v15  ;;  %v5528_v15 = vadd.f32 %v16762_v2, %v5221_v9  ;;  %v5809_v63 = vadd.f32 %v14178_v22, %v5530_v46  ;;  %v16785_v22 = vld [vmem:[#allocation168_spill] sm:$0xff] }
 0x725   : > { %v14527_v59 = vpop.f32.mrf.mxu0 }
 0x726   : > { %16755 = vst [vmem:[#allocation131_spill] sm:$0xff] %v14527_v59  ;;  %v14532_v32 = vpop.f32.mrf.mxu3  ;;  %v16764_v59 = vld [vmem:[#allocation125_spill] sm:$0xff]  ;;  %v5807_v19 = vadd.f32 %v14156_v56, %v5528_v15  ;;  %v16780_v56 = vld [vmem:[#allocation87_spill] sm:$0xff] }
 0x727   : > { %8717 = vmatmul.msk.f32.gmra.mxu1 %vm4916_vm8, %v6544_v24  ;;  %v14513_v52 = vpop.f32.mrf.mxu2  ;;  %v16763_v24 = vld [vmem:[#allocation12_spill] sm:$0xff]  ;;  %v5239_v15 = vadd.f32 %v16780_v56, %v16779_v10  ;;  %v16788_v56 = vld [vmem:[#allocation155_spill] sm:$0xff] }
 0x728   : > { %16753 = vst [vmem:[#allocation132_spill] sm:$0xff] %v14513_v52  ;;  %v16798_v52 = vld [vmem:[#allocation23_spill] sm:$0xff] }
 0x72c   : > { %v14518_v18 = vpop.f32.mrf.mxu1  ;;  %8752 = vmatmul.msk.f32.gmra.mxu2 %vm4916_vm8, %v6714_v57 }
 0x72d   : > { %v14559_v20 = vpop.f32.mrf.mxu0 }
 0x72e   : > { %16777 = vst [vmem:[#allocation64_spill] sm:$0xff] %v14559_v20  ;;  %v6083_v20 = vadd.f32 %v16784_v40, %v5807_v19  ;;  %v16794_v40 = vld [vmem:[#allocation180_spill] sm:$0xff] }
 0x72f   : > { %8718 = vmatmul.msk.f32.gmra.mxu1 %vm4916_vm8, %v6546_v5  ;;  %v14523_v30 = vpop.f32.mrf.mxu2  ;;  %v5529_v5 = vadd.f32 %v16763_v24, %v5224_v6  ;;  %v16772_v6 = vld [vmem:[#allocation92_spill] sm:$0xff]  ;;  %v16773_v24 = vld [vmem:[#allocation79_spill] sm:$0xff] }
 0x730   : > { %v5526_v2 = vadd.f32 %v16772_v6, %v5215_v60  ;;  %v16782_v60 = vld [vmem:[#allocation52_spill] sm:$0xff] }
 0x731   : > { %v5808_v28 = vadd.f32 %v14168_v11, %v5529_v5  ;;  %v16781_v5 = vld [vmem:[#allocation13_spill] sm:$0xff]  ;;  %v5533_v6 = vadd.f32 %v16782_v60, %v5236_v48  ;;  %v16790_v60 = vld [vmem:[#allocation174_spill] sm:$0xff] }
 0x733   : > { %v6084_v46 = vadd.f32 %v16785_v22, %v5808_v28  ;;  %v16795_v22 = vld [vmem:[#allocation60_spill] sm:$0xff] }
 0x734   : > { %v6621_v42 = vpop.f32.mrf.mxu1 }
 0x737   : > { %8719 = vmatmul.msk.f32.gmra.mxu1 %vm4916_vm8, %v6545_v29  ;;  %v14530_v17 = vpop.f32.mrf.mxu2  ;;  %v16765_v29 = vld [vmem:[#allocation58_spill] sm:$0xff] }
 0x738   : > { %v5230_v31 = vadd.f32 %v16765_v29, %v16764_v59  ;;  %v16774_v59 = vld [vmem:[#allocation11_spill] sm:$0xff] }
 0x739   : > { %v5233_v29 = vadd.f32 %v16774_v59, %v16773_v24  ;;  %v5805_v24 = vadd.f32 %v14128_v16, %v5526_v2  ;;  %v16783_v59 = vld [vmem:[#allocation150_spill] sm:$0xff]  ;;  %v6360_v16 = vadd.f32 %v16790_v60, %v6084_v46 }
 0x73a   : > { %v5531_v50 = vadd.f32 %v16771_v25, %v5230_v31  ;;  %v5527_v31 = vadd.f32 %v16778_v3, %v5218_v35  ;;  %v5534_v62 = vadd.f32 %v16783_v59, %v5239_v15  ;;  %v16786_v35 = vld [vmem:[#allocation100_spill] sm:$0xff]  ;;  %v16791_v2 = vld [vmem:[#allocation90_spill] sm:$0xff] }
 0x73b   : > { %v5532_v25 = vadd.f32 %v16781_v5, %v5233_v29  ;;  %v6085_v3 = vadd.f32 %v16786_v35, %v5809_v63  ;;  %v16789_v5 = vld [vmem:[#allocation51_spill] sm:$0xff]  ;;  %v16792_v59 = vld [vmem:[#allocation106_spill] sm:$0xff] }
 0x73c   : > { %v6624_v57 = vpop.f32.mrf.mxu1  ;;  %v5810_v11 = vadd.f32 %v14188_v12, %v5531_v50  ;;  %v5806_v23 = vadd.f32 %v14143_v13, %v5527_v31  ;;  %v5812_v12 = vadd.f32 %v16788_v56, %v5533_v6  ;;  %v6338_v50 = vpop.f32.mrf.mxu3  ;;  %v6359_v48 = vadd.f32 %v16789_v5, %v6083_v20  ;;  %v16793_v31 = vld [vmem:[#allocation160_spill] sm:$0xff]  ;;  %v16796_v35 = vld [vmem:[#allocation163_spill] sm:$0xff]  ;;  %v16799_v20 = vld [vmem:[#allocation113_spill] sm:$0xff] }
 0x73d   : > { %v5811_v10 = vadd.f32 %v16787_v45, %v5532_v25  ;;  %v5813_v13 = vadd.f32 %v16792_v59, %v5534_v62  ;;  %v6081_v19 = vadd.f32 %v16793_v31, %v5805_v24  ;;  %v6361_v28 = vadd.f32 %v16794_v40, %v6085_v3  ;;  %v16797_v6 = vld [vmem:[#allocation171_spill] sm:$0xff]  ;;  %v16800_v46 = vld [vmem:[#allocation14_spill] sm:$0xff]  ;;  %v14591_v3 = vpop.f32.mrf.mxu0 }
 0x73e   : > { %v6086_v15 = vadd.f32 %v16791_v2, %v5810_v11  ;;  %v6082_v63 = vadd.f32 %v16795_v22, %v5806_v23  ;;  %v6088_v5 = vadd.f32 %v16799_v20, %v5812_v12  ;;  %v16801_v11 = vld [vmem:[#allocation97_spill] sm:$0xff]  ;;  %v6518_v62 = vadd.f32 %v14385_v53, %v6359_v48  ;;  %v16815_v20 = vld [vmem:[#allocation176_spill] sm:$0xff] }
 0x73f   : > { %v14552_v9 = vpop.f32.mrf.mxu2  ;;  %v6357_v56 = vadd.f32 %v16797_v6, %v6081_v19  ;;  %v6087_v43 = vadd.f32 %v16798_v52, %v5811_v10  ;;  %v6089_v2 = vadd.f32 %v16801_v11, %v5813_v13  ;;  %v6519_v24 = vadd.f32 %v14402_v44, %v6360_v16  ;;  %v16802_v23 = vld [vmem:[#allocation57_spill] sm:$0xff] }
 0x740   : > { %v6362_v45 = vadd.f32 %v16796_v35, %v6086_v15  ;;  %v6358_v60 = vadd.f32 %v16800_v46, %v6082_v63  ;;  %v16803_v15 = vld [vmem:[#allocation111_spill] sm:$0xff]  ;;  %v6520_v19 = vadd.f32 %v14419_v1, %v6361_v28  ;;  %v16804_v52 = vld [vmem:[#allocation121_spill] sm:$0xff]  ;;  %v6687_v12 = vadd.f32 %v6621_v42, %v6518_v62  ;;  %v16813_v63 = vld [vmem:[#allocation132_spill] sm:$0xff] }
 0x741   : > { %v6363_v59 = vadd.f32 %v16802_v23, %v6087_v43  ;;  %v14595_v31 = vadd.f32 %v16803_v15, %v6088_v5  ;;  %v14599_v10 = vadd.f32 %v16804_v52, %v6089_v2  ;;  %v6688_v40 = vadd.f32 %v6624_v57, %v6519_v24  ;;  %v16816_v46 = vld [vmem:[#allocation123_spill] sm:$0xff]  ;;  %v16817_v2 = vld [vmem:[#allocation138_spill] sm:$0xff]  ;;  %v16818_v24 = vld [vmem:[#allocation108_spill] sm:$0xff] }
 0x742   : > { %v6521_v13 = vadd.f32 %v14440_v51, %v6362_v45  ;;  %v14604_v53 = vadd.f32 %v14427_v26, %v14242_v54  ;;  %v14608_v44 = vadd.f32 %v14453_v41, %v14251_v49  ;;  %v6516_v43 = vadd.f32 %v14361_v58, %v6357_v56  ;;  %v16819_v15 = vld [vmem:[#allocation167_spill] sm:$0xff] }
 0x743   : > { %v6879_v1 = vadd.f32 %v14321_v27, %v14355_v4  ;;  %v6880_v42 = vadd.f32 %v14321_v27, %v14367_v55  ;;  %v6517_v51 = vadd.f32 %v14373_v33, %v6358_v60  ;;  %v14618_v54 = vadd.f32 %v14474_v21, %v14260_v34 }
 0x744   : > { %v6627_v29 = vpop.f32.mrf.mxu1  ;;  %v14622_v49 = vadd.f32 %v14492_v37, %v14267_v36  ;;  %v6341_v58 = vpop.f32.mrf.mxu3  ;;  %v6881_v26 = vadd.f32 %v14321_v27, %v14377_v8  ;;  %v6685_v4 = vadd.f32 %v14506_v47, %v6516_v43  ;;  %v14629_v55 = vadd.f32 %v14509_v14, %v14274_v39  ;;  %v16806_v37 = vld [vmem:[#allocation66_spill] sm:$0xff]  ;;  %v16808_v39 = vld [vmem:[#allocation56_spill] sm:$0xff] }
 0x745   : > { %v6689_v48 = vadd.f32 %v6627_v29, %v6520_v19  ;;  %v6686_v33 = vadd.f32 %v14518_v18, %v6517_v51  ;;  %v6856_v41 = vadd.f32 %v14523_v30, %v6687_v12  ;;  %v6857_v34 = vadd.f32 %v14530_v17, %v6688_v40  ;;  %v16810_v18 = vld [vmem:[#allocation115_spill] sm:$0xff]  ;;  %v6485_v56 = vpop.f32.mrf.mxu0  ;;  %v16820_v40 = vld [vmem:[#allocation25_spill] sm:$0xff] }
 0x746   : > { %v14636_v36 = vadd.f32 %v14525_v38, %v14281_v0  ;;  %v14640_v8 = vadd.f32 %v14532_v32, %v16806_v37  ;;  %v14644_v14 = vadd.f32 %v6338_v50, %v16808_v39  ;;  %v14647_v28 = vadd.f32 %v6341_v58, %v16810_v18  ;;  %v16812_v32 = vld [vmem:[#allocation40_spill] sm:$0xff]  ;;  %v16823_v18 = vld [vmem:[#allocation29_spill] sm:$0xff] }
 0x747   : > { %v6799_v25 = vpop.f32.mrf.mxu2  ;;  %v6858_v47 = vadd.f32 %v14552_v9, %v6689_v48  ;;  %v14649_v30 = vmax.f32 %v6879_v1, 0.0  ;;  %v14651_v17 = vmax.f32 %v6880_v42, 0.0  ;;  %v14653_v22 = vmax.f32 %v6881_v26, 0.0 }
 0x748   : > { %16805 = vst [vmem:[#allocation143_spill] sm:$0xff] %v14636_v36  ;;  %v6882_v0 = vadd.f32 %v14321_v27, %v14387_v61  ;;  %v6883_v38 = vadd.f32 %v14321_v27, %v14398_v7  ;;  %v6854_v9 = vadd.f32 %v16812_v32, %v6685_v4  ;;  %v6855_v50 = vadd.f32 %v16813_v63, %v6686_v33  ;;  %v16824_v32 = vld [vmem:[#allocation93_spill] sm:$0xff] }
 0x749   : > { %16807 = vst [vmem:[#allocation122_spill] sm:$0xff] %v14640_v8  ;;  %v6892_v35 = vadd.f32 %v14321_v27, %v6856_v41  ;;  %v6893_v45 = vadd.f32 %v14321_v27, %v6857_v34  ;;  %v6884_v5 = vadd.f32 %v14321_v27, %v16815_v20  ;;  %v6885_v61 = vadd.f32 %v14321_v27, %v16816_v46  ;;  %v16827_v46 = vld [vmem:[#allocation131_spill] sm:$0xff] }
 0x74a   : > { %16809 = vst [vmem:[#allocation140_spill] sm:$0xff] %v14644_v14  ;;  %v6894_v60 = vadd.f32 %v14321_v27, %v6858_v47  ;;  %v6886_v62 = vadd.f32 %v14321_v27, %v16817_v2  ;;  %v6887_v23 = vadd.f32 %v14321_v27, %v16818_v24  ;;  %v14676_v52 = vmax.f32 %v6882_v0, 0.0 }
 0x74b   : > { %16811 = vst [vmem:[#allocation76_spill] sm:$0xff] %v14647_v28  ;;  %v14678_v12 = vmax.f32 %v6883_v38, 0.0  ;;  %v6890_v43 = vadd.f32 %v14321_v27, %v6854_v9  ;;  %v6891_v48 = vadd.f32 %v14321_v27, %v6855_v50  ;;  %v14686_v1 = vmax.f32 %v6893_v45, 0.0  ;;  %v16825_v9 = vld [vmem:[#allocation142_spill] sm:$0xff] }
 0x74c   : > { %v6630_v16 = vpop.f32.mrf.mxu1  ;;  %v14690_v58 = vmax.f32 %v6885_v61, 0.0  ;;  %v14692_v26 = vmax.f32 %v6894_v60, 0.0  ;;  %v14696_v33 = vmax.f32 %v6886_v62, 0.0  ;;  %v14698_v41 = vmax.f32 %v6887_v23, 0.0 }
 0x74d   : > { %v6690_v57 = vadd.f32 %v6630_v16, %v6521_v13  ;;  %v6889_v13 = vadd.f32 %v14321_v27, %v16820_v40  ;;  %v14684_v16 = vmax.f32 %v6892_v35, 0.0  ;;  %v6524_v0 = vadd.f32 %v16823_v18, %v14599_v10 }
 0x74e   : > { %v14711_v38 = vmax.f32 %v6891_v48, 0.0  ;;  %v14715_v63 = vadd.f32 %v16825_v9, %v16824_v32  ;;  %v15779_v35 = vrot.slane %v14686_v1, 1  ;;  %v14727_v61 = vadd.f32 %v16827_v46, %v14604_v53  ;;  %v16828_v53 = vld [vmem:[#allocation64_spill] sm:$0xff] }
 0x74f   : > { %v6802_v21 = vpop.f32.mrf.mxu2  ;;  %v6859_v29 = vadd.f32 %v6799_v25, %v6690_v57  ;;  %v16814_v25 = vld [vmem:[#allocation85_spill] sm:$0xff]  ;;  %v14688_v57 = vmax.f32 %v6884_v5, 0.0  ;;  %v14703_v47 = vmax.f32 %v6889_v13, 0.0  ;;  %v6997_v50 = vrot.slane %v14684_v16, 1 }
 0x750   : > { %v6522_v6 = vadd.f32 %v16814_v25, %v6363_v59  ;;  %v6888_v59 = vadd.f32 %v14321_v27, %v16819_v15  ;;  %v7104_v25 = vrot.slane %v14684_v16, 2  ;;  %v14746_v24 = vadd.f32 %v16828_v53, %v14608_v44 }
 0x751   : > { %v6895_v7 = vadd.f32 %v14321_v27, %v6859_v29  ;;  %v16822_v29 = vld [vmem:[#allocation30_spill] sm:$0xff]  ;;  %v14732_v60 = vsel %vm454_vm2, %v6997_v50, %v15779_v35  ;;  %v14750_v15 = vadd.f32 %v14591_v3, %v14618_v54  ;;  %v7320_v13 = vrot.slane %v14692_v26, 5 }
 0x752   : > { %v14700_v34 = vmax.f32 %v6888_v59, 0.0  ;;  %v6523_v39 = vadd.f32 %v16822_v29, %v14595_v31  ;;  %v7213_v31 = vrot.slane %v14692_v26, 4  ;;  %v14753_v59 = vadd.f32 %v6485_v56, %v14622_v49 }
 0x753   : > { %v14694_v4 = vmax.f32 %v6895_v7, 0.0  ;;  %v6488_v7 = vpop.f32.mrf.mxu0  ;;  %v7428_v44 = vrot.slane %v14692_v26, 6  ;;  %v6995_v54 = vrot.slane %v14711_v38, 1  ;;  %v7211_v32 = vrot.slane %v14686_v1, 4 }
 0x754   : > { %v6633_v11 = vpop.f32.mrf.mxu1 }
 0x755   : > { %v6691_v19 = vadd.f32 %v6633_v11, %v6522_v6  ;;  %16821 = vst [vmem:[#allocation152_spill] sm:$0xff] %v14694_v4  ;;  %v15778_v6 = vrot.slane %v14686_v1, 2  ;;  %v15777_v20 = vrot.slane %v14694_v4, 4  ;;  %v7063_v11 = vmax.f32 %v14684_v16, %v14732_v60 }
 0x756   : > { %v15775_v3 = vrot.slane %v14694_v4, 6  ;;  %v14777_v18 = vsel %vm454_vm2, %v6995_v54, %v6997_v50  ;;  %v7214_v50 = vsel %vm1422_vm3, %v7211_v32, %v7213_v31 }
 0x757   : > { %v6860_v42 = vadd.f32 %v6802_v21, %v6691_v19  ;;  %v6805_v51 = vpop.f32.mrf.mxu2  ;;  %v14705_v21 = vmax.f32 %v6890_v43, 0.0  ;;  %v14739_v2 = vsel %vm635_vm0, %v7104_v25, %v15778_v6  ;;  %v7216_v62 = vsel %vm1422_vm3, %v7213_v31, %v15777_v20 }
 0x758   : > { %v14756_v19 = vadd.f32 %v6488_v7, %v14629_v55  ;;  %v7170_v40 = vmax.f32 %v7063_v11, %v14739_v2  ;;  %v15776_v43 = vrot.slane %v14694_v4, 5  ;;  %v7318_v7 = vrot.slane %v14686_v1, 5 }
 0x759   : > { %v6896_v37 = vadd.f32 %v14321_v27, %v6860_v42 }
 0x75a   : > { %v7279_v56 = vmax.f32 %v7170_v40, %v7216_v62  ;;  %v7323_v55 = vsel %vm1806_vm5, %v7320_v13, %v15776_v43 }
 0x75b   : > { %v14723_v10 = vmax.f32 %v6896_v37, 0.0 }
 0x75c   : > { %v6636_v45 = vpop.f32.mrf.mxu1 }
 0x75d   : > { %16826 = vst [vmem:[#allocation135_spill] sm:$0xff] %v14723_v10  ;;  %v6692_v5 = vadd.f32 %v6636_v45, %v6523_v39  ;;  %v7005_v49 = vrot.slane %v14723_v10, 1  ;;  %v7112_v37 = vrot.slane %v14723_v10, 2  ;;  %v7431_v39 = vsel %vm2190_vm4, %v7428_v44, %v15775_v3 }
 0x75e   : > { %v7386_v45 = vmax.f32 %v7279_v56, %v7323_v55  ;;  %v15782_v56 = vrot.slane %v14686_v1, 6 }
 0x75f   : > { %v6861_v23 = vadd.f32 %v6805_v51, %v6692_v5  ;;  %v6808_v42 = vpop.f32.mrf.mxu2  ;;  %v7102_v51 = vrot.slane %v14711_v38, 2  ;;  %v7062_v5 = vmax.f32 %v14711_v38, %v14777_v18 }
 0x760   : > { %v7429_v31 = vsel %vm2190_vm4, %v15782_v56, %v7428_v44 }
 0x761   : > { %v6897_v48 = vadd.f32 %v14321_v27, %v6861_v23  ;;  %v14783_v46 = vsel %vm635_vm0, %v7102_v51, %v7104_v25  ;;  %v7496_v23 = vmax.f32 %v7386_v45, %v7431_v39  ;;  %v7003_v39 = vrot.slane %v14694_v4, 1 }
 0x762   : > { %v7169_v40 = vmax.f32 %v7062_v5, %v14783_v46  ;;  %v15781_v45 = vrot.slane %v14705_v21, 2 }
 0x763   : > { %v14771_v29 = vmax.f32 %v6897_v48, 0.0  ;;  %v7321_v48 = vsel %vm1806_vm5, %v7318_v7, %v7320_v13 }
 0x764   : > { %v6639_v9 = vpop.f32.mrf.mxu1  ;;  %v7278_v20 = vmax.f32 %v7169_v40, %v7214_v50 }
 0x765   : > { %16829 = vst [vmem:[#allocation148_spill] sm:$0xff] %v14771_v29  ;;  %v6693_v11 = vadd.f32 %v6639_v9, %v6524_v0  ;;  %v7007_v62 = vrot.slane %v14771_v29, 1  ;;  %v7114_v53 = vrot.slane %v14771_v29, 2  ;;  %v15780_v0 = vrot.slane %v14705_v21, 1 }
 0x766   : > { %v7523_v9 = vmax.f32 %v7496_v23, %v14771_v29  ;;  %v15783_v23 = vrot.slane %v14694_v4, 2 }
 0x767   : > { %v6862_v55 = vadd.f32 %v6808_v42, %v6693_v11  ;;  %v7008_v25 = vsel %vm454_vm2, %v7005_v49, %v7007_v62  ;;  %v7115_v3 = vsel %vm635_vm0, %v7112_v37, %v7114_v53  ;;  %v14804_v42 = vsel %vm454_vm2, %v15780_v0, %v6995_v54  ;;  %v6811_v40 = vpop.f32.mrf.mxu2 }
 0x768   : > { %v7067_v43 = vmax.f32 %v14723_v10, %v7008_v25  ;;  %v7385_v11 = vmax.f32 %v7278_v20, %v7321_v48  ;;  %v7061_v50 = vmax.f32 %v14705_v21, %v14804_v42  ;;  %v14821_v54 = vsel %vm635_vm0, %v15781_v45, %v7102_v51 }
 0x769   : > { %v6898_v13 = vadd.f32 %v14321_v27, %v6862_v55  ;;  %v14816_v55 = vsel %vm454_vm2, %v7003_v39, %v7005_v49 }
 0x76a   : > { %v14808_v5 = vmax.f32 %v7067_v43, %v7115_v3  ;;  %v15785_v43 = vrot.slane %v14684_v16, 4  ;;  %v7495_v20 = vmax.f32 %v7385_v11, %v7429_v31  ;;  %v7066_v48 = vmax.f32 %v14694_v4, %v14816_v55 }
 0x76b   : > { %v14813_v44 = vmax.f32 %v6898_v13, 0.0  ;;  %v14829_v13 = vsel %vm635_vm0, %v15783_v23, %v7112_v37  ;;  %v7168_v49 = vmax.f32 %v7061_v50, %v14821_v54  ;;  %v7219_v50 = vrot.slane %v14771_v29, 4 }
 0x76c   : > { %v6642_v6 = vpop.f32.mrf.mxu1  ;;  %v7522_v11 = vmax.f32 %v7495_v20, %v14723_v10  ;;  %v7173_v56 = vmax.f32 %v7066_v48, %v14829_v13  ;;  %v7212_v37 = vsel %vm1422_vm3, %v15785_v43, %v7211_v32 }
 0x76d   : > { %16830 = vst [vmem:[#allocation49_spill] sm:$0xff] %v14813_v44  ;;  %v6694_v35 = vadd.f32 %v6642_v6, %v14715_v63  ;;  %v15784_v0 = vrot.slane %v14813_v44, 1  ;;  %v15786_v51 = vrot.slane %v14813_v44, 2  ;;  %v7221_v45 = vrot.slane %v14813_v44, 4 }
 0x76e   : > { %v7328_v31 = vrot.slane %v14813_v44, 5  ;;  %v7567_v14 = vmax.f32 %v7522_v11, %v7008_v25  ;;  %v7277_v48 = vmax.f32 %v7168_v49, %v7212_v37  ;;  %v6991_v37 = vrot.slane %v14703_v47, 1 }
 0x76f   : > { %v6863_v23 = vadd.f32 %v6811_v40, %v6694_v35  ;;  %v7010_v63 = vsel %vm454_vm2, %v7007_v62, %v15784_v0  ;;  %v7117_v6 = vsel %vm635_vm0, %v7114_v53, %v15786_v51  ;;  %v7222_v32 = vsel %vm1422_vm3, %v7219_v50, %v7221_v45 }
 0x770   : > { %v7068_v28 = vmax.f32 %v14771_v29, %v7010_v63  ;;  %v7568_v20 = vmax.f32 %v7523_v9, %v7010_v63  ;;  %v7316_v35 = vrot.slane %v14684_v16, 5  ;;  %v7326_v40 = vrot.slane %v14771_v29, 5  ;;  %v6814_v63 = vpop.f32.mrf.mxu2 }
 0x771   : > { %v6899_v8 = vadd.f32 %v14321_v27, %v6863_v23  ;;  %v7610_v43 = vmax.f32 %v7567_v14, %v7115_v3  ;;  %v7282_v53 = vmax.f32 %v7173_v56, %v7222_v32  ;;  %v7424_v9 = vrot.slane %v14684_v16, 6 }
 0x772   : > { %v14854_v62 = vmax.f32 %v7068_v28, %v7117_v6  ;;  %v7611_v0 = vmax.f32 %v7568_v20, %v7117_v6  ;;  %v7319_v44 = vsel %vm1806_vm5, %v7316_v35, %v7318_v7  ;;  %v7329_v25 = vsel %vm1806_vm5, %v7326_v40, %v7328_v31 }
 0x773   : > { %v14856_v51 = vmax.f32 %v6899_v8, 0.0  ;;  %v7384_v49 = vmax.f32 %v7277_v48, %v7319_v44  ;;  %v14861_v11 = vmax.f32 %v7282_v53, %v7329_v25  ;;  %v7001_v28 = vrot.slane %v14692_v26, 1 }
 0x774   : > { %16831 = vst [vmem:[#allocation151_spill] sm:$0xff] %v14854_v62  ;;  %v6645_v23 = vpop.f32.mrf.mxu1  ;;  %7652 = vmatpush.msra.mxu3 %v7611_v0  ;;  %v16834_v7 = vrot.slane %v14686_v1, 6  ;;  %v16835_v44 = vrot.slane %v14705_v21, 1 }
 0x775   : > { %16832 = vst [vmem:[#allocation161_spill] sm:$0xff] %v14856_v51  ;;  %v6695_v14 = vadd.f32 %v6645_v23, %v14727_v61  ;;  %v7223_v8 = vrot.slane %v14856_v51, 4  ;;  %v15789_v3 = vrot.slane %v14856_v51, 5  ;;  %v14877_v20 = vsel %vm454_vm2, %v7001_v28, %v7003_v39 }
 0x776   : > { %16833 = vst [vmem:[#allocation165_spill] sm:$0xff] %v14861_v11  ;;  %v7427_v56 = vsel %vm2190_vm4, %v7424_v9, %v16834_v7  ;;  %7653 = vmatpush.msra.mxu3 %v7610_v43  ;;  %v14874_v6 = vsel %vm454_vm2, %v6991_v37, %v16835_v44  ;;  %v7098_v61 = vrot.slane %v14703_v47, 2  ;;  %v7065_v39 = vmax.f32 %v14692_v26, %v14877_v20 }
 0x777   : > { %v7494_v0 = vmax.f32 %v7384_v49, %v7427_v56  ;;  %v6864_v48 = vadd.f32 %v6814_v63, %v6695_v14  ;;  %v7224_v32 = vsel %vm1422_vm3, %v7221_v45, %v7223_v8  ;;  %v7331_v53 = vsel %vm1806_vm5, %v7328_v31, %v15789_v3 }
 0x778   : > { %v7060_v43 = vmax.f32 %v14703_v47, %v14874_v6  ;;  %v7283_v25 = vmax.f32 %v14808_v5, %v7224_v32  ;;  %v16836_v49 = vrot.slane %v14705_v21, 2  ;;  %v7108_v14 = vrot.slane %v14692_v26, 2 }
 0x779   : > { %v7521_v23 = vmax.f32 %v7494_v0, %v14694_v4  ;;  %v6900_v45 = vadd.f32 %v14321_v27, %v6864_v48  ;;  %v7207_v7 = vrot.slane %v14711_v38, 4  ;;  %v7217_v0 = vrot.slane %v14723_v10, 4 }
 0x77a   : > { %v14893_v63 = vsel %vm635_vm0, %v7098_v61, %v16836_v49  ;;  %v14899_v56 = vmax.f32 %v7283_v25, %v7331_v53  ;;  %v7314_v44 = vrot.slane %v14711_v38, 5  ;;  %v16838_v49 = vrot.slane %v14694_v4, 2 }
 0x77b   : > { %v7167_v31 = vmax.f32 %v7060_v43, %v14893_v63  ;;  %v7566_v5 = vmax.f32 %v7521_v23, %v14816_v55  ;;  %v14904_v32 = vmax.f32 %v6900_v45, 0.0  ;;  %v16839_v3 = vrot.slane %v14684_v16, 4 }
 0x77c   : > { %16837 = vst [vmem:[#allocation22_spill] sm:$0xff] %v14899_v56  ;;  %v7111_v48 = vsel %vm635_vm0, %v7108_v14, %v16838_v49  ;;  %v7324_v11 = vrot.slane %v14723_v10, 5  ;;  %v7220_v55 = vsel %vm1422_vm3, %v7217_v0, %v7219_v50  ;;  %v6648_v56 = vpop.f32.mrf.mxu1  ;;  %v7317_v29 = vsel %vm1806_vm5, %v7314_v44, %v7316_v35 }
 0x77d   : > { %v7210_v43 = vsel %vm1422_vm3, %v7207_v7, %v16839_v3  ;;  %v7609_v53 = vmax.f32 %v7566_v5, %v14829_v13  ;;  %v7172_v25 = vmax.f32 %v7065_v39, %v7111_v48  ;;  %v15794_v45 = vrot.slane %v14904_v32, 4  ;;  %v6817_v39 = vpop.f32.mrf.mxu2 }
 0x77e   : > { %v7276_v23 = vmax.f32 %v7167_v31, %v7210_v43  ;;  %v7327_v51 = vsel %vm1806_vm5, %v7324_v11, %v7326_v40  ;;  %v7422_v49 = vrot.slane %v14711_v38, 6  ;;  %v6696_v10 = vadd.f32 %v6648_v56, %v14746_v24 }
 0x77f   : > { %7654 = vmatpush.msra.mxu3 %v7609_v53  ;;  %v7281_v36 = vmax.f32 %v7172_v25, %v7220_v55  ;;  %v6989_v13 = vrot.slane %v14700_v34, 1  ;;  %v14924_v50 = vsel %vm1422_vm3, %v7223_v8, %v15794_v45  ;;  %v16841_v35 = vrot.slane %v14686_v1, 1 }
 0x780   : > { %v7383_v3 = vmax.f32 %v7276_v23, %v7317_v29  ;;  %16840 = vst [vmem:[#allocation169_spill] sm:$0xff] %v14924_v50  ;;  %v7425_v31 = vsel %vm2190_vm4, %v7422_v49, %v7424_v9  ;;  %v7096_v5 = vrot.slane %v14700_v34, 2  ;;  %v6865_v43 = vadd.f32 %v6817_v39, %v6696_v10 }
 0x781   : > { %v14930_v40 = vsel %vm454_vm2, %v16841_v35, %v7001_v28  ;;  %v14935_v29 = vmax.f32 %v7281_v36, %v7327_v51  ;;  %v14938_v8 = vsel %vm454_vm2, %v6989_v13, %v6991_v37  ;;  %v16843_v28 = vrot.slane %v14686_v1, 2 }
 0x782   : > { %v7493_v56 = vmax.f32 %v7383_v3, %v7425_v31  ;;  %v7064_v9 = vmax.f32 %v14686_v1, %v14930_v40  ;;  %v14943_v53 = vsel %vm635_vm0, %v7096_v5, %v7098_v61  ;;  %v6901_v36 = vadd.f32 %v14321_v27, %v6865_v43 }
 0x783   : > { %16842 = vst [vmem:[#allocation162_spill] sm:$0xff] %v14935_v29  ;;  %v7109_v25 = vsel %vm635_vm0, %v16843_v28, %v7108_v14  ;;  %v7059_v10 = vmax.f32 %v14700_v34, %v14938_v8  ;;  %v7205_v51 = vrot.slane %v14705_v21, 4  ;;  %v16844_v23 = vrot.slane %v14694_v4, 4 }
 0x784   : > { %v7520_v55 = vmax.f32 %v7493_v56, %v14692_v26  ;;  %v7171_v37 = vmax.f32 %v7064_v9, %v7109_v25  ;;  %v7312_v61 = vrot.slane %v14705_v21, 5  ;;  %v16845_v39 = vrot.slane %v14694_v4, 5 }
 0x785   : > { %v7218_v3 = vsel %vm1422_vm3, %v16844_v23, %v7217_v0  ;;  %v14961_v31 = vmax.f32 %v6901_v36, 0.0  ;;  %v7166_v27 = vmax.f32 %v7059_v10, %v14943_v53  ;;  %v7208_v35 = vsel %vm1422_vm3, %v7205_v51, %v7207_v7 }
 0x786   : > { %v7325_v14 = vsel %vm1806_vm5, %v16845_v39, %v7324_v11  ;;  %v7565_v26 = vmax.f32 %v7520_v55, %v14877_v20  ;;  %v7280_v56 = vmax.f32 %v7171_v37, %v7218_v3  ;;  %v7315_v43 = vsel %vm1806_vm5, %v7312_v61, %v7314_v44 }
 0x787   : > { %v7420_v9 = vrot.slane %v14705_v21, 6  ;;  %v6987_v0 = vrot.slane %v14698_v41, 1  ;;  %v7275_v23 = vmax.f32 %v7166_v27, %v7208_v35  ;;  %v7094_v24 = vrot.slane %v14698_v41, 2 }
 0x788   : > { %v7608_v28 = vmax.f32 %v7565_v26, %v7111_v48  ;;  %v7203_v11 = vrot.slane %v14703_v47, 4  ;;  %v14970_v20 = vmax.f32 %v7280_v56, %v7325_v14  ;;  %v7310_v7 = vrot.slane %v14703_v47, 5 }
 0x789   : > { %v7423_v55 = vsel %vm2190_vm4, %v7420_v9, %v7422_v49  ;;  %v14974_v36 = vsel %vm454_vm2, %v6987_v0, %v6989_v13  ;;  %v7382_v44 = vmax.f32 %v7275_v23, %v7315_v43  ;;  %v14980_v48 = vsel %vm635_vm0, %v7094_v24, %v7096_v5  ;;  %v6820_v49 = vpop.f32.mrf.mxu2 }
 0x78a   : > { %16846 = vst [vmem:[#allocation24_spill] sm:$0xff] %v14970_v20  ;;  %7655 = vmatpush.msra.mxu3 %v7608_v28  ;;  %v7058_v10 = vmax.f32 %v14698_v41, %v14974_v36  ;;  %v7206_v37 = vsel %vm1422_vm3, %v7203_v11, %v7205_v51  ;;  %v7313_v3 = vsel %vm1806_vm5, %v7310_v7, %v7312_v61  ;;  %v7418_v39 = vrot.slane %v14703_v47, 6 }
 0x78b   : > { %v6985_v13 = vrot.slane %v14696_v33, 1  ;;  %v7092_v14 = vrot.slane %v14696_v33, 2  ;;  %v7492_v26 = vmax.f32 %v7382_v44, %v7423_v55  ;;  %v7201_v35 = vrot.slane %v14700_v34, 4 }
 0x78c   : > { %v7165_v27 = vmax.f32 %v7058_v10, %v14980_v48  ;;  %v7308_v56 = vrot.slane %v14700_v34, 5  ;;  %v7421_v5 = vsel %vm2190_vm4, %v7418_v39, %v7420_v9  ;;  %v7416_v43 = vrot.slane %v14700_v34, 6 }
 0x78d   : > { %v14992_v51 = vsel %vm454_vm2, %v6985_v13, %v6987_v0  ;;  %v14995_v61 = vsel %vm635_vm0, %v7092_v14, %v7094_v24  ;;  %v7519_v28 = vmax.f32 %v7492_v26, %v14686_v1  ;;  %v7204_v44 = vsel %vm1422_vm3, %v7201_v35, %v7203_v11 }
 0x78e   : > { %v7274_v23 = vmax.f32 %v7165_v27, %v7206_v37  ;;  %v7057_v55 = vmax.f32 %v14696_v33, %v14992_v51  ;;  %v7311_v10 = vsel %vm1806_vm5, %v7308_v56, %v7310_v7  ;;  %v7419_v9 = vsel %vm2190_vm4, %v7416_v43, %v7418_v39  ;;  %v6651_v37 = vpop.f32.mrf.mxu1 }
 0x78f   : > { %v6983_v0 = vrot.slane %v14690_v58, 1  ;;  %v7090_v45 = vrot.slane %v14690_v58, 2  ;;  %v7564_v24 = vmax.f32 %v7519_v28, %v14930_v40  ;;  %v7199_v1 = vrot.slane %v14698_v41, 4 }
 0x790   : > { %v7381_v20 = vmax.f32 %v7274_v23, %v7313_v3  ;;  %v7164_v29 = vmax.f32 %v7057_v55, %v14995_v61  ;;  %v7306_v7 = vrot.slane %v14698_v41, 5  ;;  %v7414_v39 = vrot.slane %v14698_v41, 6 }
 0x791   : > { %v15010_v26 = vsel %vm454_vm2, %v6983_v0, %v6985_v13  ;;  %v15013_v11 = vsel %vm635_vm0, %v7090_v45, %v7092_v14  ;;  %v7607_v27 = vmax.f32 %v7564_v24, %v7109_v25  ;;  %v7202_v3 = vsel %vm1422_vm3, %v7199_v1, %v7201_v35 }
 0x792   : > { %v7491_v4 = vmax.f32 %v7381_v20, %v7421_v5  ;;  %v7273_v50 = vmax.f32 %v7164_v29, %v7204_v44  ;;  %v7056_v40 = vmax.f32 %v14690_v58, %v15010_v26  ;;  %v7309_v28 = vsel %vm1806_vm5, %v7306_v7, %v7308_v56  ;;  %v15029_v56 = vpop.f32.mrf.mxu2 }
 0x793   : > { %v7417_v13 = vsel %vm2190_vm4, %v7414_v39, %v7416_v43  ;;  %v6697_v23 = vadd.f32 %v6651_v37, %v14750_v15  ;;  %7656 = vmatpush.msra.mxu3 %v7607_v27  ;;  %v6981_v25 = vrot.slane %v14688_v57, 1  ;;  %v7088_v20 = vrot.slane %v14688_v57, 2 }
 0x794   : > { %v7518_v14 = vmax.f32 %v7491_v4, %v14684_v16  ;;  %v7380_v55 = vmax.f32 %v7273_v50, %v7311_v10  ;;  %v7163_v62 = vmax.f32 %v7056_v40, %v15013_v11  ;;  %v7197_v5 = vrot.slane %v14696_v33, 4  ;;  %v15038_v4 = vld [vmem:[%s15552_s4] ss:$0 sm:$0xff] }
 0x795   : > { %v6866_v29 = vadd.f32 %v6820_v49, %v6697_v23  ;;  %v7304_v35 = vrot.slane %v14696_v33, 5  ;;  %v15033_v16 = vsel %vm454_vm2, %v6981_v25, %v6983_v0  ;;  %v15044_v10 = vsel %vm635_vm0, %v7088_v20, %v7090_v45 }
 0x796   : > { %v7563_v43 = vmax.f32 %v7518_v14, %v14732_v60  ;;  %v7490_v15 = vmax.f32 %v7380_v55, %v7419_v9  ;;  %v7272_v44 = vmax.f32 %v7163_v62, %v7202_v3  ;;  %v7055_v49 = vmax.f32 %v14688_v57, %v15033_v16 }
 0x797   : > { %v6902_v50 = vadd.f32 %v15038_v4, %v6866_v29  ;;  %v7200_v60 = vsel %vm1422_vm3, %v7197_v5, %v7199_v1  ;;  %v7307_v24 = vsel %vm1806_vm5, %v7304_v35, %v7306_v7  ;;  %v7412_v40 = vrot.slane %v14696_v33, 6 }
 0x798   : > { %v7606_v62 = vmax.f32 %v7563_v43, %v14739_v2  ;;  %v7517_v9 = vmax.f32 %v7490_v15, %v14711_v38  ;;  %v7379_v0 = vmax.f32 %v7272_v44, %v7309_v28  ;;  %v7162_v27 = vmax.f32 %v7055_v49, %v15044_v10  ;;  %v6654_v38 = vpop.f32.mrf.mxu1  ;;  %v15058_v28 = vpop.f32.mrf.mxu0 }
 0x799   : > { %v15050_v37 = vmax.f32 %v6902_v50, 0.0  ;;  %v6979_v3 = vrot.slane %v14678_v12, 1  ;;  %v7086_v1 = vrot.slane %v14678_v12, 2  ;;  %v7195_v2 = vrot.slane %v14690_v58, 4 }
 0x79a   : > { %7657 = vmatpush.msra.mxu3 %v7606_v62  ;;  %v7562_v45 = vmax.f32 %v7517_v9, %v14777_v18  ;;  %v7489_v23 = vmax.f32 %v7379_v0, %v7417_v13  ;;  %v7271_v7 = vmax.f32 %v7162_v27, %v7200_v60  ;;  %v7415_v14 = vsel %vm2190_vm4, %v7412_v40, %v7414_v39  ;;  %v15082_v0 = vpop.f32.mrf.mxu2 }
 0x79b   : > { %v15062_v55 = vsel %vm454_vm2, %v6979_v3, %v6981_v25  ;;  %v7302_v29 = vrot.slane %v14690_v58, 5  ;;  %v15070_v15 = vsel %vm635_vm0, %v7086_v1, %v7088_v20  ;;  %v7198_v50 = vsel %vm1422_vm3, %v7195_v2, %v7197_v5 }
 0x79c   : > { %v7605_v43 = vmax.f32 %v7562_v45, %v14783_v46  ;;  %v7516_v18 = vmax.f32 %v7489_v23, %v14705_v21  ;;  %v7054_v13 = vmax.f32 %v14678_v12, %v15062_v55  ;;  %v7378_v44 = vmax.f32 %v7271_v7, %v7307_v24 }
 0x79d   : > { %v7305_v39 = vsel %vm1806_vm5, %v7302_v29, %v7304_v35  ;;  %v7410_v25 = vrot.slane %v14690_v58, 6  ;;  %v6977_v21 = vrot.slane %v14676_v52, 1  ;;  %v7084_v60 = vrot.slane %v14676_v52, 2 }
 0x79e   : > { %7658 = vmatpush.msra.mxu3 %v7605_v43  ;;  %v7561_v49 = vmax.f32 %v7516_v18, %v14804_v42  ;;  %v7161_v46 = vmax.f32 %v7054_v13, %v15070_v15  ;;  %v7488_v62 = vmax.f32 %v7378_v44, %v7415_v14  ;;  %v7193_v9 = vrot.slane %v14688_v57, 4 }
 0x79f   : > { %v7413_v20 = vsel %vm2190_vm4, %v7410_v25, %v7412_v40  ;;  %v7300_v5 = vrot.slane %v14688_v57, 5  ;;  %v15086_v42 = vsel %vm454_vm2, %v6977_v21, %v6979_v3  ;;  %v15089_v27 = vsel %vm635_vm0, %v7084_v60, %v7086_v1 }
 0x7a0   : > { %v7604_v35 = vmax.f32 %v7561_v49, %v14821_v54  ;;  %v7270_v24 = vmax.f32 %v7161_v46, %v7198_v50  ;;  %v7515_v45 = vmax.f32 %v7488_v62, %v14703_v47  ;;  %v7053_v40 = vmax.f32 %v14676_v52, %v15086_v42  ;;  %v15108_v49 = vpop.f32.mrf.mxu0 }
 0x7a1   : > { %v7196_v23 = vsel %vm1422_vm3, %v7193_v9, %v7195_v2  ;;  %v7303_v7 = vsel %vm1806_vm5, %v7300_v5, %v7302_v29  ;;  %v7408_v54 = vrot.slane %v14688_v57, 6  ;;  %v6975_v43 = vrot.slane %v14653_v22, 1 }
 0x7a2   : > { %7659 = vmatpush.msra.mxu3 %v7604_v35  ;;  %v7377_v14 = vmax.f32 %v7270_v24, %v7305_v39  ;;  %v7082_v3 = vrot.slane %v14653_v22, 2  ;;  %v7560_v1 = vmax.f32 %v7515_v45, %v14874_v6  ;;  %v7160_v18 = vmax.f32 %v7053_v40, %v15089_v27  ;;  %v15106_v39 = vpop.f32.mrf.mxu1 }
 0x7a3   : > { %v7191_v47 = vrot.slane %v14678_v12, 4  ;;  %v7298_v13 = vrot.slane %v14678_v12, 5  ;;  %v7411_v2 = vsel %vm2190_vm4, %v7408_v54, %v7410_v25  ;;  %v6978_v29 = vsel %vm454_vm2, %v6975_v43, %v6977_v21 }
 0x7a4   : > { %v7487_v44 = vmax.f32 %v7377_v14, %v7413_v20  ;;  %v7085_v50 = vsel %vm635_vm0, %v7082_v3, %v7084_v60  ;;  %v7603_v46 = vmax.f32 %v7560_v1, %v14893_v63  ;;  %v7269_v6 = vmax.f32 %v7160_v18, %v7196_v23 }
 0x7a5   : > { %v7052_v62 = vmax.f32 %v14653_v22, %v6978_v29  ;;  %v7194_v35 = vsel %vm1422_vm3, %v7191_v47, %v7193_v9  ;;  %v7301_v20 = vsel %vm1806_vm5, %v7298_v13, %v7300_v5  ;;  %v7406_v25 = vrot.slane %v14678_v12, 6  ;;  %v15123_v5 = vpop.f32.mrf.mxu2 }
 0x7a6   : > { %v7514_v24 = vmax.f32 %v7487_v44, %v14700_v34  ;;  %v6698_v21 = vadd.f32 %v6654_v38, %v14753_v59  ;;  %7660 = vmatpush.msra.mxu3 %v7603_v46  ;;  %v7376_v60 = vmax.f32 %v7269_v6, %v7303_v7  ;;  %v6973_v40 = vrot.slane %v14651_v17, 1 }
 0x7a7   : > { %v7159_v45 = vmax.f32 %v7052_v62, %v7085_v50  ;;  %v7080_v63 = vrot.slane %v14651_v17, 2  ;;  %v7409_v14 = vsel %vm2190_vm4, %v7406_v25, %v7408_v54  ;;  %v7189_v34 = vrot.slane %v14676_v52, 4 }
 0x7a8   : > { %v7559_v23 = vmax.f32 %v7514_v24, %v14938_v8  ;;  %v6867_v9 = vadd.f32 %v15029_v56, %v6698_v21  ;;  %v7486_v1 = vmax.f32 %v7376_v60, %v7411_v2  ;;  %v6976_v59 = vsel %vm454_vm2, %v6973_v40, %v6975_v43 }
 0x7a9   : > { %v7268_v18 = vmax.f32 %v7159_v45, %v7194_v35  ;;  %v7083_v38 = vsel %vm635_vm0, %v7080_v63, %v7082_v3  ;;  %v7051_v8 = vmax.f32 %v14651_v17, %v6976_v59  ;;  %v7192_v54 = vsel %vm1422_vm3, %v7189_v34, %v7191_v47  ;;  %v6497_v45 = vpop.f32.mrf.mxu0 }
 0x7aa   : > { %v7602_v7 = vmax.f32 %v7559_v23, %v14943_v53  ;;  %v6903_v44 = vadd.f32 %v15038_v4, %v6867_v9  ;;  %v7513_v56 = vmax.f32 %v7486_v1, %v14698_v41  ;;  %v7296_v50 = vrot.slane %v14676_v52, 5  ;;  %v15138_v6 = vpop.f32.mrf.mxu1 }
 0x7ab   : > { %v7375_v29 = vmax.f32 %v7268_v18, %v7301_v20  ;;  %v7404_v2 = vrot.slane %v14676_v52, 6  ;;  %v7158_v43 = vmax.f32 %v7051_v8, %v7083_v38  ;;  %v6971_v3 = vrot.slane %v14649_v30, 1  ;;  %v16847_v18 = vld [vmem:[#allocation173_spill] sm:$0xff] }
 0x7ac   : > { %7661 = vmatpush.msra.mxu3 %v7602_v7  ;;  %v15134_v46 = vmax.f32 %v6903_v44, 0.0  ;;  %v7078_v53 = vrot.slane %v14649_v30, 2  ;;  %v7558_v62 = vmax.f32 %v7513_v56, %v14974_v36  ;;  %v7299_v41 = vsel %vm1806_vm5, %v7296_v50, %v7298_v13 }
 0x7ad   : > { %v7485_v47 = vmax.f32 %v7375_v29, %v7409_v14  ;;  %v7407_v35 = vsel %vm2190_vm4, %v7404_v2, %v7406_v25  ;;  %v7267_v24 = vmax.f32 %v7158_v43, %v7192_v54  ;;  %v6974_v20 = vsel %vm454_vm2, %v6971_v3, %v6973_v40  ;;  %v6832_v54 = vpop.f32.mrf.mxu2 }
 0x7ae   : > { %v7081_v21 = vsel %vm635_vm0, %v7078_v53, %v7080_v63  ;;  %v7187_v60 = vrot.slane %v14653_v22, 4  ;;  %v7601_v23 = vmax.f32 %v7558_v62, %v14980_v48  ;;  %v7050_v1 = vmax.f32 %v14649_v30, %v6974_v20 }
 0x7af   : > { %v7512_v9 = vmax.f32 %v7485_v47, %v14696_v33  ;;  %v7294_v36 = vrot.slane %v14653_v22, 5  ;;  %v7374_v14 = vmax.f32 %v7267_v24, %v7299_v41  ;;  %v7402_v25 = vrot.slane %v14653_v22, 6  ;;  %v16851_v47 = vld [vmem:[#allocation166_spill] sm:$0xff]  ;;  %v16852_v41 = vld [vmem:[#allocation109_spill] sm:$0xff] }
 0x7b0   : > { %v7190_v13 = vsel %vm1422_vm3, %v7187_v60, %v7189_v34  ;;  %v16848_v40 = vrot.slane %v16847_v18, 1  ;;  %7662 = vmatpush.msra.mxu3 %v7601_v23  ;;  %v7157_v38 = vmax.f32 %v7050_v1, %v7081_v21  ;;  %v16849_v8 = vrot.slane %v16847_v18, 2 }
 0x7b1   : > { %v7557_v59 = vmax.f32 %v7512_v9, %v14992_v51  ;;  %v7297_v48 = vsel %vm1806_vm5, %v7294_v36, %v7296_v50  ;;  %v7484_v7 = vmax.f32 %v7374_v14, %v7407_v35  ;;  %v7405_v44 = vsel %vm2190_vm4, %v7402_v25, %v7404_v2  ;;  %v16850_v2 = vld [vmem:[#allocation128_spill] sm:$0xff] }
 0x7b2   : > { %v6972_v63 = vsel %vm454_vm2, %v16848_v40, %v6971_v3  ;;  %v7079_v34 = vsel %vm635_vm0, %v16849_v8, %v7078_v53  ;;  %v7185_v22 = vrot.slane %v14651_v17, 4  ;;  %v7266_v29 = vmax.f32 %v7157_v38, %v7190_v13  ;;  %v6663_v24 = vpop.f32.mrf.mxu1  ;;  %v16857_v8 = vld [vmem:[#allocation76_spill] sm:$0xff] }
 0x7b3   : > { %v7049_v33 = vmax.f32 %v16847_v18, %v6972_v63  ;;  %v7600_v56 = vmax.f32 %v7557_v59, %v14995_v61  ;;  %v7292_v51 = vrot.slane %v14651_v17, 5  ;;  %v7511_v50 = vmax.f32 %v7484_v7, %v14690_v58  ;;  %v6500_v59 = vpop.f32.mrf.mxu0 }
 0x7b4   : > { %v7188_v3 = vsel %vm1422_vm3, %v7185_v22, %v7187_v60  ;;  %v7400_v62 = vrot.slane %v14651_v17, 6  ;;  %v16853_v35 = vmax.f32 %v16851_v47, %v16852_v41  ;;  %v7373_v20 = vmax.f32 %v7266_v29, %v7297_v48  ;;  %v16854_v48 = vld [vmem:[#allocation143_spill] sm:$0xff] }
 0x7b5   : > { %v7156_v43 = vmax.f32 %v7049_v33, %v7079_v34  ;;  %7663 = vmatpush.msra.mxu3 %v7600_v56  ;;  %v7295_v61 = vsel %vm1806_vm5, %v7292_v51, %v7294_v36  ;;  %v7184_v23 = vrot.slane %v14649_v30, 4  ;;  %v7556_v9 = vmax.f32 %v7511_v50, %v15010_v26 }
 0x7b6   : > { %v7155_v53 = vmax.f32 %v16853_v35, %v16850_v2  ;;  %v7403_v58 = vsel %vm2190_vm4, %v7400_v62, %v7402_v25  ;;  %v7291_v60 = vrot.slane %v14649_v30, 5  ;;  %v7399_v17 = vrot.slane %v14649_v30, 6 }
 0x7b7   : > { %v7265_v21 = vmax.f32 %v7156_v43, %v7188_v3  ;;  %v7483_v1 = vmax.f32 %v7373_v20, %v7405_v44  ;;  %v7186_v13 = vsel %vm1422_vm3, %v7184_v23, %v7185_v22  ;;  %v6699_v18 = vadd.f32 %v15106_v39, %v14756_v19  ;;  %v16855_v44 = vld [vmem:[#allocation122_spill] sm:$0xff] }
 0x7b8   : > { %v7599_v40 = vmax.f32 %v7556_v9, %v15013_v11  ;;  %v7264_v36 = vmax.f32 %v7155_v53, %v7186_v13  ;;  %v7293_v63 = vsel %vm1806_vm5, %v7291_v60, %v7292_v51  ;;  %v7401_v26 = vsel %vm2190_vm4, %v7399_v17, %v7400_v62  ;;  %v16856_v11 = vld [vmem:[#allocation140_spill] sm:$0xff] }
 0x7b9   : > { %v7372_v14 = vmax.f32 %v7265_v21, %v7295_v61  ;;  %v7510_v25 = vmax.f32 %v7483_v1, %v14688_v57  ;;  %v6868_v30 = vadd.f32 %v15082_v0, %v6699_v18  ;;  %v6531_v33 = vadd.f32 %v15058_v28, %v16854_v48  ;;  %v6835_v28 = vpop.f32.mrf.mxu2 }
 0x7ba   : > { %7664 = vmatpush.msra.mxu3 %v7599_v40  ;;  %v7371_v7 = vmax.f32 %v7264_v36, %v7293_v63  ;;  %v6532_v19 = vadd.f32 %v15108_v49, %v16855_v44  ;;  %v6533_v39 = vadd.f32 %v6497_v45, %v16856_v11  ;;  %v6534_v34 = vadd.f32 %v6500_v59, %v16857_v8  ;;  %v6666_v51 = vpop.f32.mrf.mxu1 }
 0x7bb   : > { %v7482_v38 = vmax.f32 %v7372_v14, %v7403_v58  ;;  %v7555_v22 = vmax.f32 %v7510_v25, %v15033_v16  ;;  %v6904_v57 = vadd.f32 %v15038_v4, %v6868_v30  ;;  %v6700_v0 = vadd.f32 %v15138_v6, %v6531_v33 }
 0x7bc   : > { %v7481_v29 = vmax.f32 %v7371_v7, %v7401_v26  ;;  %v6701_v43 = vadd.f32 %v6663_v24, %v6532_v19  ;;  %v15197_v50 = vrot.slane %v15134_v46, 1  ;;  %v15200_v49 = vrot.slane %v15134_v46, 2 }
 0x7bd   : > { %v7509_v56 = vmax.f32 %v7482_v38, %v14678_v12  ;;  %v7598_v45 = vmax.f32 %v7555_v22, %v15044_v10  ;;  %v15204_v3 = vmax.f32 %v6904_v57, 0.0  ;;  %v6869_v12 = vadd.f32 %v15123_v5, %v6700_v0 }
 0x7be   : > { %v7508_v6 = vmax.f32 %v7481_v29, %v14676_v52  ;;  %v6870_v62 = vadd.f32 %v6832_v54, %v6701_v43  ;;  %v6702_v2 = vadd.f32 %v6666_v51, %v6533_v39  ;;  %v7074_v47 = vmax.f32 %v15134_v46, %v15197_v50 }
 0x7bf   : > { %v7554_v16 = vmax.f32 %v7509_v56, %v15062_v55  ;;  %7665 = vmatpush.msra.mxu3 %v7598_v45  ;;  %v6905_v35 = vadd.f32 %v15038_v4, %v6869_v12  ;;  %v7017_v10 = vrot.slane %v15050_v37, 1  ;;  %v7124_v55 = vrot.slane %v15050_v37, 2 }
 0x7c0   : > { %v7553_v53 = vmax.f32 %v7508_v6, %v15086_v42  ;;  %v6906_v5 = vadd.f32 %v15038_v4, %v6870_v62  ;;  %v6871_v24 = vadd.f32 %v6835_v28, %v6702_v2  ;;  %v7181_v52 = vmax.f32 %v7074_v47, %v15200_v49 }
 0x7c1   : > { %v7597_v41 = vmax.f32 %v7554_v16, %v15070_v15  ;;  %v15217_v54 = vmax.f32 %v6905_v35, 0.0  ;;  %v15221_v20 = vsel %vm454_vm2, %v7017_v10, %v15197_v50  ;;  %v15225_v15 = vsel %vm635_vm0, %v7124_v55, %v15200_v49  ;;  %v6838_v38 = vpop.f32.mrf.mxu2 }
 0x7c2   : > { %v7233_v21 = vrot.slane %v15204_v3, 4  ;;  %v7596_v42 = vmax.f32 %v7553_v53, %v15089_v27  ;;  %v15229_v61 = vmax.f32 %v6906_v5, 0.0  ;;  %v6907_v23 = vadd.f32 %v15038_v4, %v6871_v24  ;;  %v6669_v27 = vpop.f32.mrf.mxu1 }
 0x7c3   : > { %7666 = vmatpush.msra.mxu3 %v7597_v41  ;;  %v7073_v9 = vmax.f32 %v15050_v37, %v15221_v20  ;;  %v7235_v58 = vrot.slane %v15217_v54, 4  ;;  %v7342_v60 = vrot.slane %v15217_v54, 5  ;;  %v7450_v17 = vrot.slane %v15217_v54, 6 }
 0x7c4   : > { %v7340_v1 = vrot.slane %v15204_v3, 5  ;;  %v7452_v14 = vrot.slane %v15229_v61, 6  ;;  %v6939_v13 = vmax.f32 %v6907_v23, 0.0  ;;  %v7448_v40 = vrot.slane %v15204_v3, 6 }
 0x7c5   : > { %7667 = vmatpush.msra.mxu3 %v7596_v42  ;;  %v7180_v18 = vmax.f32 %v7073_v9, %v15225_v15  ;;  %v6703_v36 = vadd.f32 %v6669_v27, %v6534_v34  ;;  %v7290_v63 = vmax.f32 %v7181_v52, %v7235_v58  ;;  %v7236_v26 = vsel %vm1422_vm3, %v7233_v21, %v7235_v58 }
 0x7c6   : > { %v7343_v59 = vsel %vm1806_vm5, %v7340_v1, %v7342_v60  ;;  %v7543_v25 = vrot.slane %v6939_v13, 1  ;;  %v7453_v30 = vsel %vm2190_vm4, %v7450_v17, %v7452_v14  ;;  %v7451_v33 = vsel %vm2190_vm4, %v7448_v40, %v7450_v17 }
 0x7c7   : > { %v7289_v48 = vmax.f32 %v7180_v18, %v7236_v26  ;;  %v6872_v7 = vadd.f32 %v6838_v38, %v6703_v36  ;;  %v7397_v44 = vmax.f32 %v7290_v63, %v7342_v60  ;;  %v7586_v19 = vrot.slane %v6939_v13, 2 }
 0x7c8   : > { %v7015_v11 = vrot.slane %v14961_v31, 1  ;;  %v7122_v8 = vrot.slane %v14961_v31, 2  ;;  %v7231_v34 = vrot.slane %v15134_v46, 4  ;;  %v7338_v22 = vrot.slane %v15134_v46, 5 }
 0x7c9   : > { %v7396_v39 = vmax.f32 %v7289_v48, %v7343_v59  ;;  %v6908_v56 = vadd.f32 %v15038_v4, %v6872_v7  ;;  %v7507_v57 = vmax.f32 %v7397_v44, %v7453_v30  ;;  %v7446_v29 = vrot.slane %v15134_v46, 6  ;;  %v16858_v44 = vld [vmem:[#allocation161_spill] sm:$0xff] }
 0x7ca   : > { %v15251_v0 = vsel %vm454_vm2, %v7015_v11, %v7017_v10  ;;  %v15257_v51 = vsel %vm635_vm0, %v7122_v8, %v7124_v55  ;;  %v7234_v45 = vsel %vm1422_vm3, %v7231_v34, %v7233_v21  ;;  %v7341_v12 = vsel %vm1806_vm5, %v7338_v22, %v7340_v1 }
 0x7cb   : > { %v7506_v43 = vmax.f32 %v7396_v39, %v7451_v33  ;;  %v7072_v28 = vmax.f32 %v14961_v31, %v15251_v0  ;;  %v6940_v16 = vmax.f32 %v6908_v56, 0.0  ;;  %v7449_v4 = vsel %vm2190_vm4, %v7446_v29, %v7448_v40  ;;  %v7623_v39 = vld [vmem:[%s15553_s5] sm:$0xff] }
 0x7cc   : > { %v7541_v6 = vrot.slane %v15229_v61, 1  ;;  %v7584_v47 = vrot.slane %v15229_v61, 2  ;;  %v7013_v41 = vrot.slane %v14904_v32, 1  ;;  %v7120_v21 = vrot.slane %v14904_v32, 2  ;;  %7668 = vmatmul.f32.vlgmr.msra.gmra.mxu3 %v7623_v39  ;;  %v16867_v39 = vld [vmem:[#allocation148_spill] sm:$0xff] }
 0x7cd   : > { %v7533_v62 = vmax.f32 %v7506_v43, %v6939_v13  ;;  %v7179_v2 = vmax.f32 %v7072_v28, %v15257_v51  ;;  %v7534_v35 = vmax.f32 %v7507_v57, %v6940_v16  ;;  %v7545_v10 = vrot.slane %v6940_v16, 1 }
 0x7ce   : > { %v7588_v55 = vrot.slane %v6940_v16, 2  ;;  %v7544_v53 = vsel %vm454_vm2, %v7541_v6, %v7543_v25  ;;  %v7587_v24 = vsel %vm635_vm0, %v7584_v47, %v7586_v19  ;;  %v15269_v52 = vsel %vm454_vm2, %v7013_v41, %v7015_v11 }
 0x7cf   : > { %v7288_v5 = vmax.f32 %v7179_v2, %v7234_v45  ;;  %v7579_v42 = vmax.f32 %v7534_v35, %v7545_v10  ;;  %v7546_v23 = vsel %vm454_vm2, %v7543_v25, %v7545_v10  ;;  %v7071_v58 = vmax.f32 %v14904_v32, %v15269_v52  ;;  %v16859_v35 = vld [vmem:[#allocation49_spill] sm:$0xff] }
 0x7d0   : > { %v7589_v9 = vsel %vm635_vm0, %v7586_v19, %v7588_v55  ;;  %v7578_v60 = vmax.f32 %v7533_v62, %v7546_v23  ;;  %v15277_v1 = vsel %vm635_vm0, %v7120_v21, %v7122_v8  ;;  %v7229_v14 = vrot.slane %v15050_v37, 4 }
 0x7d1   : > { %v7395_v17 = vmax.f32 %v7288_v5, %v7341_v12  ;;  %v7622_v13 = vmax.f32 %v7579_v42, %v7588_v55  ;;  %v7178_v27 = vmax.f32 %v7071_v58, %v15277_v1  ;;  %v7336_v18 = vrot.slane %v15050_v37, 5 }
 0x7d2   : > { %v7444_v40 = vrot.slane %v15050_v37, 6  ;;  %v7621_v36 = vmax.f32 %v7578_v60, %v7589_v9  ;;  %v7232_v26 = vsel %vm1422_vm3, %v7229_v14, %v7231_v34  ;;  %v7539_v59 = vrot.slane %v15217_v54, 1 }
 0x7d3   : > { %v7505_v63 = vmax.f32 %v7395_v17, %v7449_v4  ;;  %8753 = vmatpush.msk.msrb.mxu3 %vm1806_vm5, %v7622_v13  ;;  %v7287_v25 = vmax.f32 %v7178_v27, %v7232_v26  ;;  %v7339_v38 = vsel %vm1806_vm5, %v7336_v18, %v7338_v22  ;;  %v7582_v48 = vrot.slane %v15217_v54, 2 }
 0x7d4   : > { %v7447_v30 = vsel %vm2190_vm4, %v7444_v40, %v7446_v29  ;;  %v7542_v7 = vsel %vm454_vm2, %v7539_v59, %v7541_v6  ;;  %v7011_v19 = vrot.slane %v16858_v44, 1  ;;  %v7118_v11 = vrot.slane %v16858_v44, 2 }
 0x7d5   : > { %v7532_v33 = vmax.f32 %v7505_v63, %v15229_v61  ;;  %7690 = vmatpush.msrb.mxu3 %v7621_v36  ;;  %v7394_v8 = vmax.f32 %v7287_v25, %v7339_v38  ;;  %v7585_v34 = vsel %vm635_vm0, %v7582_v48, %v7584_v47  ;;  %v7227_v22 = vrot.slane %v14961_v31, 4 }
 0x7d6   : > { %v7334_v56 = vrot.slane %v14961_v31, 5  ;;  %v15300_v61 = vsel %vm454_vm2, %v7011_v19, %v7013_v41  ;;  %v15303_v29 = vsel %vm635_vm0, %v7118_v11, %v7120_v21  ;;  %v7442_v43 = vrot.slane %v14961_v31, 6 }
 0x7d7   : > { %v7577_v57 = vmax.f32 %v7532_v33, %v7544_v53  ;;  %v7504_v28 = vmax.f32 %v7394_v8, %v7447_v30  ;;  %v7070_v45 = vmax.f32 %v16858_v44, %v15300_v61  ;;  %v7230_v16 = vsel %vm1422_vm3, %v7227_v22, %v7229_v14  ;;  %v7625_v14 = vld [vmem:[%s15553_s5 + $0x10] sm:$0xff]  ;;  %v16864_v33 = vld [vmem:[#allocation151_spill] sm:$0xff] }
 0x7d8   : > { %v7337_v12 = vsel %vm1806_vm5, %v7334_v56, %v7336_v18  ;;  %v7445_v6 = vsel %vm2190_vm4, %v7442_v43, %v7444_v40  ;;  %v7537_v62 = vrot.slane %v15204_v3, 1  ;;  %v7580_v2 = vrot.slane %v15204_v3, 2  ;;  %7671 = vmatmul.f32.gmra.mxu3 %v7625_v14 }
 0x7d9   : > { %v7620_v4 = vmax.f32 %v7577_v57, %v7587_v24  ;;  %v7531_v47 = vmax.f32 %v7504_v28, %v15217_v54  ;;  %v7177_v41 = vmax.f32 %v7070_v45, %v15303_v29  ;;  %v16860_v10 = vrot.slane %v16859_v35, 1  ;;  %v16869_v45 = vld [vmem:[#allocation22_spill] sm:$0xff] }
 0x7da   : > { %v16861_v53 = vrot.slane %v16859_v35, 2  ;;  %v7540_v24 = vsel %vm454_vm2, %v7537_v62, %v7539_v59  ;;  %v7583_v21 = vsel %vm635_vm0, %v7580_v2, %v7582_v48  ;;  %v16862_v42 = vrot.slane %v14904_v32, 4 }
 0x7db   : > { %v15318_v55 = vsel %vm454_vm2, %v16860_v10, %v7011_v19  ;;  %7691 = vmatpush.msrb.mxu3 %v7620_v4  ;;  %v7576_v9 = vmax.f32 %v7531_v47, %v7542_v7  ;;  %v7286_v58 = vmax.f32 %v7177_v41, %v7230_v16  ;;  %v7332_v60 = vrot.slane %v14904_v32, 5  ;;  %v16865_v7 = vld [vmem:[#allocation169_spill] sm:$0xff]  ;;  %v16871_v47 = vld [vmem:[#allocation152_spill] sm:$0xff] }
 0x7dc   : > { %v15323_v5 = vsel %vm635_vm0, %v16861_v53, %v7118_v11  ;;  %v7069_v54 = vmax.f32 %v16859_v35, %v15318_v55  ;;  %v7228_v23 = vsel %vm1422_vm3, %v16862_v42, %v7227_v22  ;;  %v7440_v17 = vrot.slane %v14904_v32, 6 }
 0x7dd   : > { %v7538_v27 = vsel %vm454_vm2, %v15197_v50, %v7537_v62  ;;  %v7581_v18 = vsel %vm635_vm0, %v15200_v49, %v7580_v2  ;;  %v7438_v40 = vrot.slane %v16858_v44, 6  ;;  %v7619_v36 = vmax.f32 %v7576_v9, %v7585_v34  ;;  %v16868_v34 = vld [vmem:[#allocation135_spill] sm:$0xff]  ;;  %v7627_v9 = vld [vmem:[%s15553_s5 + $0x20] sm:$0xff] }
 0x7de   : > { %v7176_v13 = vmax.f32 %v7069_v54, %v15323_v5  ;;  %v7393_v63 = vmax.f32 %v7286_v58, %v7337_v12  ;;  %v7335_v26 = vsel %vm1806_vm5, %v7332_v60, %v7334_v56  ;;  %v7443_v59 = vsel %vm2190_vm4, %v7440_v17, %v7442_v43 }
 0x7df   : > { %v16863_v38 = vrot.slane %v16858_v44, 5  ;;  %v7441_v48 = vsel %vm2190_vm4, %v7438_v40, %v7440_v17  ;;  %v7436_v50 = vrot.slane %v16859_v35, 6  ;;  %7692 = vmatpush.msrb.mxu3 %v7619_v36  ;;  %v16866_v19 = vmax.f32 %v16864_v33, %v16865_v7  ;;  %v16874_v17 = vld [vmem:[#allocation24_spill] sm:$0xff] }
 0x7e0   : > { %v7285_v25 = vmax.f32 %v7176_v13, %v7228_v23  ;;  %v7503_v49 = vmax.f32 %v7393_v63, %v7445_v6  ;;  %v7434_v8 = vrot.slane %v16867_v39, 6  ;;  %v7432_v22 = vrot.slane %v16868_v34, 6  ;;  %v16870_v6 = vld [vmem:[#allocation165_spill] sm:$0xff]  ;;  %7674 = vmatmul.f32.gmra.mxu3 %v7627_v9 }
 0x7e1   : > { %v7333_v30 = vsel %vm1806_vm5, %v16863_v38, %v7332_v60  ;;  %v7439_v57 = vsel %vm2190_vm4, %v7436_v50, %v7438_v40  ;;  %v16872_v41 = vrot.slane %v16871_v47, 6  ;;  %v8918_v39 = vmov 3   ;;  %v7716_v47 = vld [vmem:[%s15554_s6] sm:$0xff] }
 0x7e2   : > { %v7391_v11 = vmax.f32 %v16866_v19, %v7333_v30  ;;  %v7392_v56 = vmax.f32 %v7285_v25, %v7335_v26  ;;  %v7530_v43 = vmax.f32 %v7503_v49, %v15204_v3  ;;  %v7500_v16 = vmax.f32 %v16869_v45, %v7439_v57  ;;  %v16873_v3 = vld [vmem:[#allocation162_spill] sm:$0xff] }
 0x7e3   : > { %v7437_v12 = vsel %vm2190_vm4, %v7434_v8, %v7436_v50  ;;  %v7435_v2 = vsel %vm2190_vm4, %v7432_v22, %v7434_v8  ;;  %v7433_v10 = vsel %vm2190_vm4, %v16872_v41, %v7432_v22  ;;  %v8916_v19 = vmov 2  }
 0x7e4   : > { %v7501_v28 = vmax.f32 %v7391_v11, %v7441_v48  ;;  %v7502_v4 = vmax.f32 %v7392_v56, %v7443_v59  ;;  %v7499_v62 = vmax.f32 %v16870_v6, %v7437_v12  ;;  %v7575_v53 = vmax.f32 %v7530_v43, %v7540_v24 }
 0x7e5   : > { %v7527_v42 = vmax.f32 %v7500_v16, %v14961_v31  ;;  %v7498_v23 = vmax.f32 %v16873_v3, %v7435_v2  ;;  %v7497_v14 = vmax.f32 %v16874_v17, %v7433_v10  ;;  %v8914_v59 = vmov 4   ;;  %v8759_v2 = vld [vmem:[%s15554_s6 + $0x28] sm:$0xff]  ;;  %v8764_v10 = vld [vmem:[%s15554_s6 + $0x50] sm:$0xff]  ;;  %v8769_v3 = vld [vmem:[%s15554_s6 + $0x78] sm:$0xff] }
 0x7e6   : > { %v7528_v54 = vmax.f32 %v7501_v28, %v15050_v37  ;;  %v7529_v58 = vmax.f32 %v7502_v4, %v15134_v46  ;;  %v7526_v60 = vmax.f32 %v7499_v62, %v14904_v32  ;;  %v7618_v13 = vmax.f32 %v7575_v53, %v7583_v21  ;;  %8816 = vset.pattern.permute.xlu2 %v8914_v59 }
 0x7e7   : > { %v7572_v24 = vmax.f32 %v7527_v42, %v15251_v0  ;;  %v7525_v37 = vmax.f32 %v7498_v23, %v16858_v44  ;;  %v7524_v63 = vmax.f32 %v7497_v14, %v16859_v35  ;;  %v7629_v35 = vld [vmem:[%s15553_s5 + $0x30] sm:$0xff]  ;;  %v8915_v48 = vmov 0  }
 0x7e8   : > { %v7573_v40 = vmax.f32 %v7528_v54, %v15221_v20  ;;  %v7574_v31 = vmax.f32 %v7529_v58, %v7538_v27  ;;  %v7571_v36 = vmax.f32 %v7526_v60, %v15269_v52  ;;  %7693 = vmatpush.msrb.mxu3 %v7618_v13  ;;  %8806 = vset.pattern.permute.xlu0 %v8915_v48  ;;  %v8917_v11 = vmov 5   ;;  %v8774_v58 = vld [vmem:[%s15554_s6 + $0xa0] sm:$0xff] }
 0x7e9   : > { %v7615_v32 = vmax.f32 %v7572_v24, %v15257_v51  ;;  %v7570_v26 = vmax.f32 %v7525_v37, %v15300_v61  ;;  %v7569_v0 = vmax.f32 %v7524_v63, %v15318_v55  ;;  %7677 = vmatmul.f32.gmra.mxu3 %v7629_v35  ;;  %v7624_v51 = vld [vmem:[%s15553_s5 + $0x8] sm:$0xff]  ;;  %v8770_v35 = vld [vmem:[%s15554_s6 + $0x80] sm:$0xff] }
 0x7ea   : > { %v7616_v46 = vmax.f32 %v7573_v40, %v15225_v15  ;;  %v7617_v21 = vmax.f32 %v7574_v31, %v7581_v18  ;;  %v7614_v20 = vmax.f32 %v7571_v36, %v15277_v1  ;;  %v7631_v15 = vld [vmem:[%s15553_s5 + $0x40] sm:$0xf]  ;;  %v7626_v1 = vld [vmem:[%s15553_s5 + $0x18] sm:$0xff]  ;;  %v7628_v61 = vld [vmem:[%s15553_s5 + $0x28] sm:$0xff]  ;;  %v8913_v18 = vmov 1  }
 0x7eb   : > { %v7613_v44 = vmax.f32 %v7570_v26, %v15303_v29  ;;  %v7612_v52 = vmax.f32 %v7569_v0, %v15323_v5  ;;  %v7630_v29 = vld [vmem:[%s15553_s5 + $0x38] sm:$0xff]  ;;  %v7632_v55 = vld [vmem:[%s15553_s5 + $0x48] sm:$0xf]  ;;  %8807 = vset.pattern.permute.xlu1 %v8913_v18 }
 0x7ec   : > { %7694 = vmatpush.msrb.mxu3 %v7617_v21  ;;  %v8765_v21 = vld [vmem:[%s15554_s6 + $0x58] sm:$0xff] }
 0x7ee   : > { %7695 = vmatpush.msrb.mxu3 %v7616_v46  ;;  %v8760_v46 = vld [vmem:[%s15554_s6 + $0x30] sm:$0xff] }
 0x7f0   : > { %7696 = vmatpush.msrb.mxu3 %v7615_v32  ;;  %v7717_v32 = vld [vmem:[%s15554_s6 + $0x8] sm:$0xff] }
 0x7f1   : > { %7680 = vmatmul.f32.gmra.mxu3 %v7631_v15 }
 0x7f2   : > { %7697 = vmatpush.msrb.mxu3 %v7614_v20 }
 0x7f4   : > { %7698 = vmatpush.msrb.mxu3 %v7613_v44 }
 0x7f6   : > { %7699 = vmatpush.msrb.mxu3 %v7612_v52 }
 0x7f9   : > { %8754 = vmatmul.msk.f32.vlgmr.msrb.gmra.mxu3 %vm7633_vm9, %v7624_v51  ;;  %v8775_v51 = vld [vmem:[%s15554_s6 + $0xa8] sm:$0xff] }
 0x801   : > { %8755 = vmatmul.msk.f32.gmra.mxu3 %vm7633_vm9, %v7626_v1 }
 0x809   : > { %8756 = vmatmul.msk.f32.gmra.mxu3 %vm7633_vm9, %v7628_v61 }
 0x811   : > { %8757 = vmatmul.msk.f32.gmra.mxu3 %vm7633_vm9, %v7630_v29 }
 0x819   : > { %8758 = vmatmul.msk.f32.gmra.mxu3 %vm7633_vm9, %v7632_v55  ;;  %v8780_v55 = vld [vmem:[%s15554_s6 + $0xd0] sm:$0xff] }
 0x84f   : > { %v7669_v5 = vpop.f32.mrf.mxu3 }
 0x85b   : > { %v7672_v27 = vpop.f32.mrf.mxu3 }
 0x863   : > { %v7675_v25 = vpop.f32.mrf.mxu3 }
 0x86c   : > { %v7678_v38 = vpop.f32.mrf.mxu3 }
 0x874   : > { %v7681_v30 = vpop.f32.mrf.mxu3 }
 0x87c   : > { %v7701_v50 = vpop.f32.mrf.mxu3 }
 0x87d   : > { %v7702_v49 = vadd.f32 %v7701_v50, %v7669_v5  ;;  %v8779_v5 = vld [vmem:[%s15554_s6 + $0xc8] sm:$0xff] }
 0x87f   : > { %7758 = vperm.xlu1 %8807, %v7702_v49   ;;  %7723 = vperm.xlu0 %8806, %v7702_v49  }
 0x884   : > { %v7704_v33 = vpop.f32.mrf.mxu3 }
 0x885   : > { %v7705_v7 = vadd.f32 %v7704_v33, %v7672_v27 }
 0x887   : > { %8810 = vset.pattern.permute.xlu1 %v8914_v59  ;;  %7870 = vperm.xlu2 %8816, %v7705_v7  }
 0x888   : > { %7866 = vperm.xlu1 %8810, %v7702_v49   ;;  %8808 = vset.pattern.permute.xlu0 %v8916_v19 }
 0x889   : > { %7794 = vperm.xlu0 %8808, %v7702_v49  }
 0x88c   : > { %v7707_v8 = vpop.f32.mrf.mxu3 }
 0x88d   : > { %v7708_v34 = vadd.f32 %v7707_v8, %v7675_v25 }
 0x88f   : > { %8817 = vset.pattern.permute.xlu2 %v8917_v11 }
 0x890   : > { %8811 = vset.pattern.permute.xlu1 %v8917_v11  ;;  %7906 = vperm.xlu2 %8817, %v7705_v7  }
 0x891   : > { %7902 = vperm.xlu1 %8811, %v7702_v49   ;;  %8809 = vset.pattern.permute.xlu0 %v8918_v39 }
 0x892   : > { %7830 = vperm.xlu0 %8809, %v7702_v49  }
 0x894   : > { %v7710_v22 = vpop.f32.mrf.mxu3 }
 0x895   : > { %v7711_v43 = vadd.f32 %v7710_v22, %v7678_v38  ;;  %v8762_v22 = vld [vmem:[%s15554_s6 + $0x40] sm:$0xff] }
 0x898   : > { %8818 = vset.pattern.permute.xlu2 %v8915_v48 }
 0x899   : > { %8813 = vset.pattern.permute.xlu1 %v8913_v18  ;;  %7733 = vperm.xlu2 %8818, %v7708_v34  }
 0x89a   : > { %7762 = vperm.xlu1 %8813, %v7705_v7   ;;  %8812 = vset.pattern.permute.xlu0 %v8915_v48 }
 0x89b   : > { %7728 = vperm.xlu0 %8812, %v7705_v7  }
 0x89c   : > { %v7713_v56 = vpop.f32.mrf.mxu3 }
 0x89d   : > { %v7714_v57 = vadd.f32 %v7713_v56, %v7681_v30 }
 0x8a1   : > { %8819 = vset.pattern.permute.xlu2 %v8913_v18 }
 0x8a2   : > { %8814 = vset.pattern.permute.xlu1 %v8916_v19  ;;  %7766 = vperm.xlu2 %8819, %v7708_v34  }
 0x8a3   : > { %7798 = vperm.xlu1 %8814, %v7705_v7   ;;  %8821 = vset.pattern.permute.xlu0 %v8918_v39 }
 0x8a4   : > { %7838 = vperm.xlu0 %8821, %v7708_v34  }
 0x8aa   : > { %8820 = vset.pattern.permute.xlu2 %v8916_v19 }
 0x8ab   : > { %8815 = vset.pattern.permute.xlu1 %v8918_v39  ;;  %7802 = vperm.xlu2 %8820, %v7708_v34  }
 0x8ac   : > { %7834 = vperm.xlu1 %8815, %v7705_v7   ;;  %8831 = vset.pattern.permute.xlu0 %v8916_v19 }
 0x8ad   : > { %7810 = vperm.xlu0 %8831, %v7714_v57  }
 0x8b3   : > { %8822 = vset.pattern.permute.xlu2 %v8914_v59 }
 0x8b4   : > { %8825 = vset.pattern.permute.xlu1 %v8913_v18  ;;  %7874 = vperm.xlu2 %8822, %v7708_v34  }
 0x8b5   : > { %7770 = vperm.xlu1 %8825, %v7711_v43   ;;  %8832 = vset.pattern.permute.xlu0 %v8918_v39 }
 0x8b6   : > { %7846 = vperm.xlu0 %8832, %v7714_v57  }
 0x8bc   : > { %8823 = vset.pattern.permute.xlu2 %v8917_v11 }
 0x8bd   : > { %8827 = vset.pattern.permute.xlu1 %v8918_v39  ;;  %7910 = vperm.xlu2 %8823, %v7708_v34   ;;  %v8761_v34 = vld [vmem:[%s15554_s6 + $0x38] sm:$0xff] }
 0x8be   : > { %7842 = vperm.xlu1 %8827, %v7711_v43   ;;  %8835 = vset.pattern.permute.xlu0 %v8917_v11 }
 0x8bf   : > { %7918 = vperm.xlu0 %8835, %v7714_v57  }
 0x8c5   : > { %8824 = vset.pattern.permute.xlu2 %v8915_v48 }
 0x8c6   : > { %8828 = vset.pattern.permute.xlu1 %v8914_v59  ;;  %7738 = vperm.xlu2 %8824, %v7711_v43  }
 0x8c7   : > { %7878 = vperm.xlu1 %8828, %v7711_v43  }
 0x8ce   : > { %8826 = vset.pattern.permute.xlu2 %v8916_v19 }
 0x8cf   : > { %8830 = vset.pattern.permute.xlu1 %v8913_v18  ;;  %7806 = vperm.xlu2 %8826, %v7711_v43  }
 0x8d0   : > { %7774 = vperm.xlu1 %8830, %v7714_v57  }
 0x8d7   : > { %8829 = vset.pattern.permute.xlu2 %v8915_v48 }
 0x8d8   : > { %8833 = vset.pattern.permute.xlu1 %v8914_v59  ;;  %7743 = vperm.xlu2 %8829, %v7714_v57  }
 0x8d9   : > { %7882 = vperm.xlu1 %8833, %v7714_v57   ;;  %v7718_v57 = vld [vmem:[%s15554_s6 + $0x10] sm:$0xff] }
 0x8e0   : > { %8834 = vset.pattern.permute.xlu2 %v8917_v11 }
 0x8e1   : > { %7914 = vperm.xlu2 %8834, %v7711_v43   ;;  %v7871_v28 = vpop.permute.xlu2 %7870  ;;  %v8766_v43 = vld [vmem:[%s15554_s6 + $0x60] sm:$0xff] }
 0x8e2   : > { %v7886_v27 = vmul.f32 %v8775_v51, %v7871_v28  ;;  %v7719_v28 = vld [vmem:[%s15554_s6 + $0x18] sm:$0xff] }
 0x8ea   : > { %v7907_v45 = vpop.permute.xlu2 %7906 }
 0x8eb   : > { %v7922_v59 = vmul.f32 %v8780_v55, %v7907_v45 }
 0x8f1   : > { %v7759_v16 = vpop.permute.xlu1 %7758  ;;  %v7724_v12 = vpop.permute.xlu0 %7723 }
 0x8f2   : > { %v7777_v53 = vmul.f32 %v8759_v2, %v7759_v16  ;;  %v7746_v54 = vmul.f32 %v7724_v12, %v7716_v47  ;;  %v8767_v2 = vld [vmem:[%s15554_s6 + $0x68] sm:$0xff] }
 0x8f3   : > { %v15421_v4 = vpop.permute.xlu2 %7733 }
 0x8f4   : > { %v7782_v9 = vadd.f32 %v7777_v53, %v7746_v54  ;;  %v7748_v47 = vmul.f32 %v15421_v4, %v7718_v57  ;;  %v8772_v54 = vld [vmem:[%s15554_s6 + $0x90] sm:$0xff]  ;;  %v7720_v4 = vld [vmem:[%s15554_s6 + $0x20] sm:$0xf] }
 0x8fa   : > { %v7867_v6 = vpop.permute.xlu1 %7866 }
 0x8fb   : > { %v7795_v62 = vpop.permute.xlu0 %7794  ;;  %v7885_v13 = vmul.f32 %v8774_v58, %v7867_v6 }
 0x8fc   : > { %v7767_v41 = vpop.permute.xlu2 %7766  ;;  %v7813_v42 = vmul.f32 %v8764_v10, %v7795_v62  ;;  %v8771_v62 = vld [vmem:[%s15554_s6 + $0x88] sm:$0xff] }
 0x8fd   : > { %v7779_v12 = vmul.f32 %v8761_v34, %v7767_v41 }
 0x8fe   : > { %v7818_v17 = vadd.f32 %v7813_v42, %v7782_v9  ;;  %v8777_v9 = vld [vmem:[%s15554_s6 + $0xb8] sm:$0xff] }
 0x8ff   : > { %v7784_v42 = vadd.f32 %v7779_v12, %v7748_v47 }
 0x903   : > { %v7903_v23 = vpop.permute.xlu1 %7902 }
 0x904   : > { %v7831_v60 = vpop.permute.xlu0 %7830  ;;  %v7921_v25 = vmul.f32 %v8779_v5, %v7903_v23  ;;  %v8773_v5 = vld [vmem:[%s15554_s6 + $0x98] sm:$0xf] }
 0x905   : > { %v7849_v14 = vmul.f32 %v8769_v3, %v7831_v60  ;;  %v7803_v40 = vpop.permute.xlu2 %7802 }
 0x906   : > { %v7815_v10 = vmul.f32 %v8766_v43, %v7803_v40 }
 0x907   : > { %v7854_v24 = vadd.f32 %v7849_v14, %v7818_v17  ;;  %v8763_v17 = vld [vmem:[%s15554_s6 + $0x48] sm:$0xf]  ;;  %v8776_v14 = vld [vmem:[%s15554_s6 + $0xb0] sm:$0xff] }
 0x908   : > { %v7820_v58 = vadd.f32 %v7815_v10, %v7784_v42 }
 0x909   : > { %v7890_v37 = vadd.f32 %v7885_v13, %v7854_v24 }
 0x90b   : > { %v7926_v30 = vadd.f32 %v7921_v25, %v7890_v37 }
 0x90c   : > { %v7763_v31 = vpop.permute.xlu1 %7762 }
 0x90d   : > { %v7729_v26 = vpop.permute.xlu0 %7728  ;;  %v7778_v20 = vmul.f32 %v8760_v46, %v7763_v31  ;;  %v7932_v33 = vsel %vm7931_vm10, %v7926_v30, 0.0  ;;  %v8768_v31 = vld [vmem:[%s15554_s6 + $0x70] sm:$0xf] }
 0x90e   : > { %v15438_v36 = vpop.permute.xlu2 %7874  ;;  %v7747_v0 = vmul.f32 %v7729_v26, %v7717_v32  ;;  %v8782_v26 = vld [vmem:[%s15554_s6 + $0xe0] sm:$0xff] }
 0x910   : > { %v7783_v15 = vadd.f32 %v7778_v20, %v7747_v0  ;;  %v7952_v20 = vld [vmem:[%s15556_s8 + $0x8] sm:$0x3]  ;;  %v7951_v0 = vld [vmem:[%s15556_s8] sm:$0xff] }
 0x911   : > { %8784 = vmatpush.msk.msra.mxu3 %vm2190_vm4, %v7952_v20 }
 0x913   : > { %7975 = vmatpush.msra.mxu3 %v7951_v0 }
 0x915   : > { %v7799_v63 = vpop.permute.xlu1 %7798 }
 0x916   : > { %v7814_v44 = vmul.f32 %v8765_v21, %v7799_v63  ;;  %v7839_v11 = vpop.permute.xlu0 %7838 }
 0x917   : > { %v15449_v52 = vpop.permute.xlu2 %7910  ;;  %v7851_v41 = vmul.f32 %v8771_v62, %v7839_v11 }
 0x918   : > { %v7819_v29 = vadd.f32 %v7814_v44, %v7783_v15  ;;  %v7887_v44 = vmul.f32 %v8776_v14, %v15438_v36  ;;  %v8781_v15 = vld [vmem:[%s15554_s6 + $0xd8] sm:$0xff] }
 0x919   : > { %v7856_v40 = vadd.f32 %v7851_v41, %v7820_v58 }
 0x91e   : > { %v7835_v1 = vpop.permute.xlu1 %7834 }
 0x91f   : > { %v7850_v61 = vmul.f32 %v8770_v35, %v7835_v1  ;;  %v7811_v56 = vpop.permute.xlu0 %7810  ;;  %v7892_v1 = vadd.f32 %v7887_v44, %v7856_v40 }
 0x920   : > { %v7739_v50 = vpop.permute.xlu2 %7738 }
 0x921   : > { %v7855_v18 = vadd.f32 %v7850_v61, %v7819_v29  ;;  %v7749_v53 = vmul.f32 %v7739_v50, %v7719_v28  ;;  %v7817_v29 = vmul.f32 %v8768_v31, %v7811_v56 }
 0x923   : > { %v7891_v38 = vadd.f32 %v7886_v27, %v7855_v18  ;;  %v7923_v27 = vmul.f32 %v8781_v15, %v15449_v52  ;;  %v8778_v18 = vld [vmem:[%s15554_s6 + $0xc0] sm:$0xf] }
 0x925   : > { %v7927_v48 = vadd.f32 %v7922_v59, %v7891_v38  ;;  %v7928_v59 = vadd.f32 %v7923_v27, %v7892_v1 }
 0x927   : > { %v7771_v49 = vpop.permute.xlu1 %7770  ;;  %v7933_v7 = vsel %vm7931_vm10, %v7927_v48, 0.0  ;;  %v8783_v48 = vld [vmem:[%s15554_s6 + $0xe8] sm:$0xf] }
 0x928   : > { %v15465_v19 = vadd.f32 %v7933_v7, %v7932_v33  ;;  %v7780_v6 = vmul.f32 %v8762_v22, %v7771_v49  ;;  %v7847_v13 = vpop.permute.xlu0 %7846  ;;  %v7935_v7 = vsel %vm7931_vm10, %v7928_v59, 0.0 }
 0x929   : > { %v7807_v39 = vpop.permute.xlu2 %7806  ;;  %v7853_v25 = vmul.f32 %v8773_v5, %v7847_v13 }
 0x92a   : > { %v7785_v3 = vadd.f32 %v7780_v6, %v7749_v53  ;;  %v7816_v23 = vmul.f32 %v8767_v2, %v7807_v39  ;;  %v7948_v6 = vld [vmem:[%s15555_s7] sm:$0x1] }
 0x92c   : > { %v7821_v24 = vadd.f32 %v7816_v23, %v7785_v3 }
 0x930   : > { %v7843_v8 = vpop.permute.xlu1 %7842 }
 0x931   : > { %v7852_v60 = vmul.f32 %v8772_v54, %v7843_v8  ;;  %v7919_v50 = vpop.permute.xlu0 %7918  ;;  %v7936_v8 = vadd.f32 %v7935_v7, %v15465_v19  ;;  %v7953_v19 = vld [vmem:[%s15557_s9] sm:$0x1] }
 0x932   : > { %v7744_v16 = vpop.permute.xlu2 %7743  ;;  %v7925_v39 = vmul.f32 %v8783_v48, %v7919_v50 }
 0x933   : > { %v7750_v46 = vmul.f32 %v7744_v16, %v7720_v4  ;;  %v7857_v35 = vadd.f32 %v7852_v60, %v7821_v24 }
 0x939   : > { %v7879_v45 = vpop.permute.xlu1 %7878 }
 0x93a   : > { %v7888_v37 = vmul.f32 %v8777_v9, %v7879_v45 }
 0x93b   : > { %v7915_v21 = vpop.permute.xlu2 %7914 }
 0x93c   : > { %v7893_v61 = vadd.f32 %v7888_v37, %v7857_v35  ;;  %v7924_v55 = vmul.f32 %v8782_v26, %v7915_v21 }
 0x93e   : > { %v7929_v38 = vadd.f32 %v7924_v55, %v7893_v61 }
 0x940   : > { %v7937_v52 = vsel %vm7931_vm10, %v7929_v38, 0.0 }
 0x941   : > { %v7938_v22 = vadd.f32 %v7937_v52, %v7936_v8 }
 0x942   : > { %v7775_v63 = vpop.permute.xlu1 %7774 }
 0x943   : > { %v7781_v32 = vmul.f32 %v8763_v17, %v7775_v63 }
 0x945   : > { %v7786_v51 = vadd.f32 %v7781_v32, %v7750_v46 }
 0x947   : > { %v7822_v36 = vadd.f32 %v7817_v29, %v7786_v51 }
 0x949   : > { %v7858_v49 = vadd.f32 %v7853_v25, %v7822_v36 }
 0x94b   : > { %v7883_v30 = vpop.permute.xlu1 %7882 }
 0x94c   : > { %v7889_v33 = vmul.f32 %v8778_v18, %v7883_v30 }
 0x94e   : > { %v7894_v11 = vadd.f32 %v7889_v33, %v7858_v49 }
 0x950   : > { %v7930_v34 = vadd.f32 %v7925_v39, %v7894_v11 }
 0x952   : > { %v7940_v56 = vsel %vm7939_vm11, %v7930_v34, 0.0 }
 0x953   : > { %v7941_v57 = vadd.f32 %v7940_v56, %v7938_v22 }
 0x955   : > { %v7942_v43 = vrot.slane %v7941_v57, 4 }
 0x957   : > { %v7943_v28 = vadd.f32 %v7942_v43, %v7941_v57 }
 0x959   : > { %v7944_v45 = vrot.slane %v7943_v28, 2 }
 0x95b   : > { %v7945_v16 = vadd.f32 %v7944_v45, %v7943_v28 }
 0x95d   : > { %v7946_v12 = vrot.slane %v7945_v16, 1 }
 0x95f   : > { %v7947_v62 = vadd.f32 %v7946_v12, %v7945_v16 }
 0x961   : > { %v7949_v2 = vadd.f32 %v7948_v6, %v7947_v62 }
 0x963   : > { %8838 = vtanh.f32 %v7949_v2 }
 0x969   : > { %v8839_v47 = vpop.eup %8838 }
 0x96a   : > { %8785 = vmatmul.msk.f32.vlgmr.msra.gmra.mxu3 %vm7931_vm10, %v8839_v47 }
 0x9ed   : > { %v7977_v10 = vpop.f32.mrf.mxu3 }
 0x9ee   : > { %v7978_v53 = vadd.f32 %v7977_v10, %v7953_v19 }
 0x9f0   : > { %7981 = vst.msk [vmem:[%s355_s11] sm:$0x1] %vm7980_vm12, %v7978_v53 }
 0x9f1 PF: > { %s20_s13 = sadd.s32 1, %s8911_s13  }
 0x9f2   : > { %p17_p4 = scmp.ge.s32.totalorder %s20_s13, 6  }
 0x9f4   :  { %19 = sbr.rel (!%p17_p4) target bundleno = 1 (0x1), region = 111 }

</bundles_post_ra>
